<compile_context>
chip_gen: v7x
topology: tpu7x:2x2x1
jax: 0.10.0
libtpu: 0.0.40
codegen_flags: <defaults>
</compile_context>

<pallas_src>
import functools

import jax
import jax.numpy as jnp
from jax.experimental import pallas as pl
from jax.experimental.pallas import tpu as pltpu

SIZE = 512      # small, TPU-tile-friendly stand-in for the module's SIZE=4000
BATCH = 256     # one 256-row tile on single-TC chips, two 128-row tiles on v7x


def mlp_kernel(x_ref, w1_ref, b1_ref, w2_hbm, b2_ref, w3_hbm, b3_ref, o_ref,
               w2_vmem, w3_vmem, dma_sems, *, bf16_relu):
    """Fused net3(relu(net2(relu(net1(x))))) for one (tile_m, SIZE) batch tile."""
    # Kick off w2/w3 HBM->VMEM streams now; they complete under the layer-1/2
    # matmuls instead of being exposed before the first grid step runs.
    cp2 = pltpu.make_async_copy(w2_hbm, w2_vmem, dma_sems.at[0])
    cp3 = pltpu.make_async_copy(w3_hbm, w3_vmem, dma_sems.at[1])
    cp2.start()
    cp3.start()

    x = x_ref[...].astype(jnp.bfloat16)      # cast in-kernel, not in the wrapper

    def relu_to_bf16(h_f32):
        if bf16_relu:                         # v6e/v7x: bf16 VPU -> max in bf16
            return jnp.maximum(h_f32.astype(jnp.bfloat16), 0)
        return jnp.maximum(h_f32, 0.0).astype(jnp.bfloat16)   # v5e: f32 VPU only

    h1 = relu_to_bf16(
        jnp.dot(x, w1_ref[...], preferred_element_type=jnp.float32) + b1_ref[...])
    cp2.wait()
    h2 = relu_to_bf16(
        jnp.dot(h1, w2_vmem[...], preferred_element_type=jnp.float32) + b2_ref[...])
    cp3.wait()
    y = jnp.dot(h2, w3_vmem[...], preferred_element_type=jnp.float32) + b3_ref[...]
    o_ref[...] = y.astype(o_ref.dtype)


@functools.partial(
    jax.jit,
    static_argnames=("tile_m", "core_parallel", "bf16_relu",
                     "single_buffer_weights", "out_dtype"))
def toy_model_forward(x, w1_t, b1, w2_t, b2, w3_t, b3, *, tile_m,
                      core_parallel=False, bf16_relu=True,
                      single_buffer_weights=True, out_dtype=jnp.float32):
    m, d = x.shape
    assert m % tile_m == 0 and tile_m % 8 == 0 and d % 128 == 0

    res_kwargs = dict(pipeline_mode=pl.Buffered(1)) if single_buffer_weights else {}
    # Grid-invariant, VMEM-resident operands (never re-fetched across steps).
    w1_spec = pl.BlockSpec((d, d), lambda i: (0, 0), **res_kwargs)
    bias_spec = pl.BlockSpec((1, d), lambda i: (0, 0), **res_kwargs)
    # w2/w3 stay in HBM; the kernel streams them into VMEM scratch itself so
    # their DMA overlaps layer-1/2 compute instead of stalling grid step 0.
    hbm_spec = pl.BlockSpec(memory_space=pl.ANY)

    if core_parallel:
        semantics = (pltpu.CORE_PARALLEL,)   # v7x: shard batch tiles across 2 TCs
    else:
        semantics = ("arbitrary",)           # grid is 1 step here anyway

    return pl.pallas_call(
        functools.partial(mlp_kernel, bf16_relu=bf16_relu),
        out_shape=jax.ShapeDtypeStruct((m, d), out_dtype),
        grid_spec=pltpu.PrefetchScalarGridSpec(
            num_scalar_prefetch=0,
            grid=(m // tile_m,),
            in_specs=[
                pl.BlockSpec((tile_m, d), lambda i: (i, 0)),   # x batch tile (f32)
                w1_spec, bias_spec,                            # net1
                hbm_spec, bias_spec,                           # net2 (manual DMA)
                hbm_spec, bias_spec,                           # net3 (manual DMA)
            ],
            out_specs=pl.BlockSpec((tile_m, d), lambda i: (i, 0)),
            scratch_shapes=[
                pltpu.VMEM((d, d), jnp.bfloat16),              # w2 landing buffer
                pltpu.VMEM((d, d), jnp.bfloat16),              # w3 landing buffer
                pltpu.SemaphoreType.DMA((2,)),
            ]),
        compiler_params=pltpu.CompilerParams(
            dimension_semantics=semantics,
            vmem_limit_bytes=32 * 1024 * 1024,
        ),
    )(x, w1_t, b1, w2_t, b2, w3_t, b3)


def init_linear_params(key, in_features, out_features):
    """Deterministic init mimicking nn.Linear default U(-1/sqrt(in), 1/sqrt(in))."""
    kw, kb = jax.random.split(key)
    bound = 1.0 / jnp.sqrt(jnp.float32(in_features))
    # PyTorch stores W as (out, in); keep that convention, transpose for the kernel.
    w = jax.random.uniform(kw, (out_features, in_features), jnp.float32, -bound, bound)
    b = jax.random.uniform(kb, (out_features,), jnp.float32, -bound, bound)
    return w, b


def prepare_layer(w, b):
    """PyTorch (out, in) f32 -> kernel-ready: bf16 (in, out) weight, f32 (1, out) bias."""
    return w.T.astype(jnp.bfloat16), b.reshape(1, -1).astype(jnp.float32)


def pick_config(batch):
    """Per-generation (tile_m, core_parallel, bf16_relu)."""
    kind = jax.devices()[0].device_kind.lower()
    if "v7" in kind:
        # Two 128-row tiles, one per TensorCore.  A/B'd against the single-core
        # variant in __main__ (the 2-core split re-DMAs the weights per core).
        return 128, True, True
    if "v5" in kind:
        return batch, False, False     # single tile; no bf16 VPU on v5e
    return batch, False, True          # v6e and default: single 256-row tile


if __name__ == "__main__":
    key = jax.random.PRNGKey(0)
    kx, k1, k2, k3 = jax.random.split(key, 4)

    x = jax.random.normal(kx, (BATCH, SIZE), jnp.float32)
    w1, b1 = init_linear_params(k1, SIZE, SIZE)
    w2, b2 = init_linear_params(k2, SIZE, SIZE)
    w3, b3 = init_linear_params(k3, SIZE, SIZE)

    w1_t, b1_r = prepare_layer(w1, b1)
    w2_t, b2_r = prepare_layer(w2, b2)
    w3_t, b3_r = prepare_layer(w3, b3)

    tile_m, core_parallel, bf16_relu = pick_config(BATCH)
    args = (x, w1_t, b1_r, w2_t, b2_r, w3_t, b3_r)
    try:
        out = jax.block_until_ready(
            toy_model_forward(*args, tile_m=tile_m, core_parallel=core_parallel,
                              bf16_relu=bf16_relu))
    except Exception:
        # Conservative fallback (single-core, one 256-row tile, default
        # buffering) in case the generation-specific knobs are unsupported on
        # this chip/runtime.  Numerics are identical.
        out = jax.block_until_ready(
            toy_model_forward(*args, tile_m=BATCH, core_parallel=False,
                              bf16_relu=bf16_relu, single_buffer_weights=False))

    assert out.shape == (BATCH, SIZE) and out.dtype == jnp.float32

    # Reference 1: mirrors the kernel's numerics (bf16 operands, f32 accumulation).
    def linear_bf16(a, w, b):
        a16 = a.astype(jnp.bfloat16).astype(jnp.float32)
        w16 = w.T.astype(jnp.bfloat16).astype(jnp.float32)
        return jnp.dot(a16, w16, preferred_element_type=jnp.float32) + b

    h = jnp.maximum(linear_bf16(x, w1, b1), 0.0)
    h = jnp.maximum(linear_bf16(h, w2, b2), 0.0)
    ref_bf16 = linear_bf16(h, w3, b3)
    assert jnp.allclose(out, ref_bf16, atol=1e-2, rtol=1e-2)

    # Reference 2: full-f32 PyTorch semantics; bf16 kernel must stay close.
    hp = jax.lax.Precision.HIGHEST
    h = jnp.maximum(jnp.dot(x, w1.T, precision=hp) + b1, 0.0)
    h = jnp.maximum(jnp.dot(h, w2.T, precision=hp) + b2, 0.0)
    ref_f32 = jnp.dot(h, w3.T, precision=hp) + b3
    assert jnp.allclose(out, ref_f32, atol=2e-2, rtol=2e-2)

    print("KERNEL_OK")
</pallas_src>

<mosaic_0001>
module attributes {stable_mosaic.version = 11 : i64} {
  func.func @mlp_kernel(%arg0: i32, %arg1: memref<256x512xf32, #tpu.memory_space<vmem>>, %arg2: memref<512x512xbf16, #tpu.memory_space<vmem>>, %arg3: memref<1x512xf32, #tpu.memory_space<vmem>>, %arg4: memref<512x512xbf16, #tpu.memory_space<any>>, %arg5: memref<1x512xf32, #tpu.memory_space<vmem>>, %arg6: memref<512x512xbf16, #tpu.memory_space<any>>, %arg7: memref<1x512xf32, #tpu.memory_space<vmem>>, %arg8: memref<256x512xf32, #tpu.memory_space<vmem>>, %arg9: memref<512x512xbf16, #tpu.memory_space<vmem>>, %arg10: memref<512x512xbf16, #tpu.memory_space<vmem>>, %arg11: memref<2x!tpu.dma_semaphore, #tpu.memory_space<semaphore_mem>>) attributes {dimension_semantics = [#tpu.dimension_semantics<arbitrary>], iteration_bounds = array<i64: 1>, scalar_prefetch = 0 : i64, scratch_operands = 3 : i64, tpu.core_type = #tpu.core_type<tc>, window_params = [{transform_indices = @transform_0, window_bounds = array<i64: 256, 512>}, {pipeline_mode = #tpu.pipeline_mode<synchronous>, transform_indices = @transform_1, window_bounds = array<i64: 512, 512>}, {pipeline_mode = #tpu.pipeline_mode<synchronous>, transform_indices = @transform_2, window_bounds = array<i64: 1, 512>}, {}, {pipeline_mode = #tpu.pipeline_mode<synchronous>, transform_indices = @transform_4, window_bounds = array<i64: 1, 512>}, {}, {pipeline_mode = #tpu.pipeline_mode<synchronous>, transform_indices = @transform_6, window_bounds = array<i64: 1, 512>}, {transform_indices = @transform_7, window_bounds = array<i64: 256, 512>}]} {
    %c0_i32 = arith.constant 0 : i32
    %0 = tpu.memref_slice %arg11[%c0_i32] : memref<2x!tpu.dma_semaphore, #tpu.memory_space<semaphore_mem>> -> memref<1x!tpu.dma_semaphore, #tpu.memory_space<semaphore_mem>>
    %1 = tpu.memref_squeeze %0 : memref<1x!tpu.dma_semaphore, #tpu.memory_space<semaphore_mem>> -> memref<!tpu.dma_semaphore, #tpu.memory_space<semaphore_mem>>
    tpu.enqueue_dma source(%arg4 : memref<512x512xbf16, #tpu.memory_space<any>>) target(%arg9 : memref<512x512xbf16, #tpu.memory_space<vmem>>) target_semaphore(%1 : memref<!tpu.dma_semaphore, #tpu.memory_space<semaphore_mem>>)
    %c1_i32 = arith.constant 1 : i32
    %2 = tpu.memref_slice %arg11[%c1_i32] : memref<2x!tpu.dma_semaphore, #tpu.memory_space<semaphore_mem>> -> memref<1x!tpu.dma_semaphore, #tpu.memory_space<semaphore_mem>>
    %3 = tpu.memref_squeeze %2 : memref<1x!tpu.dma_semaphore, #tpu.memory_space<semaphore_mem>> -> memref<!tpu.dma_semaphore, #tpu.memory_space<semaphore_mem>>
    tpu.enqueue_dma source(%arg6 : memref<512x512xbf16, #tpu.memory_space<any>>) target(%arg10 : memref<512x512xbf16, #tpu.memory_space<vmem>>) target_semaphore(%3 : memref<!tpu.dma_semaphore, #tpu.memory_space<semaphore_mem>>)
    %c0 = arith.constant 0 : index
    %c0_0 = arith.constant 0 : index
    %4 = vector.load %arg1[%c0, %c0_0] : memref<256x512xf32, #tpu.memory_space<vmem>>, vector<256x512xf32>
    %5 = arith.truncf %4 : vector<256x512xf32> to vector<256x512xbf16>
    %c0_1 = arith.constant 0 : index
    %c0_2 = arith.constant 0 : index
    %6 = vector.load %arg2[%c0_1, %c0_2] : memref<512x512xbf16, #tpu.memory_space<vmem>>, vector<512x512xbf16>
    %cst = arith.constant dense<0.000000e+00> : vector<256x512xf32>
    %7 = tpu.matmul %5, %6, %cst {dimension_numbers = #tpu.dot_dimension_numbers<[1], [0], [0], [1], [0, 0, 1, 1], [], []>} : vector<256x512xbf16>, vector<512x512xbf16>, vector<256x512xf32> -> vector<256x512xf32>
    %c0_3 = arith.constant 0 : index
    %c0_4 = arith.constant 0 : index
    %8 = vector.load %arg3[%c0_3, %c0_4] : memref<1x512xf32, #tpu.memory_space<vmem>>, vector<1x512xf32>
    %9 = vector.broadcast %8 : vector<1x512xf32> to vector<256x512xf32>
    %10 = arith.addf %7, %9 : vector<256x512xf32>
    %11 = arith.truncf %10 : vector<256x512xf32> to vector<256x512xbf16>
    %cst_5 = arith.constant 0.000000e+00 : bf16
    %12 = vector.broadcast %cst_5 : bf16 to vector<256x512xbf16>
    %13 = arith.maximumf %11, %12 : vector<256x512xbf16>
    %c0_i32_6 = arith.constant 0 : i32
    %14 = tpu.memref_slice %arg11[%c0_i32_6] : memref<2x!tpu.dma_semaphore, #tpu.memory_space<semaphore_mem>> -> memref<1x!tpu.dma_semaphore, #tpu.memory_space<semaphore_mem>>
    %15 = tpu.memref_squeeze %14 : memref<1x!tpu.dma_semaphore, #tpu.memory_space<semaphore_mem>> -> memref<!tpu.dma_semaphore, #tpu.memory_space<semaphore_mem>>
    tpu.wait_dma2 semaphore(%15 : memref<!tpu.dma_semaphore, #tpu.memory_space<semaphore_mem>>) src(%arg4 : memref<512x512xbf16, #tpu.memory_space<any>>) dst(%arg9 : memref<512x512xbf16, #tpu.memory_space<vmem>>)
    %c0_7 = arith.constant 0 : index
    %c0_8 = arith.constant 0 : index
    %16 = vector.load %arg9[%c0_7, %c0_8] : memref<512x512xbf16, #tpu.memory_space<vmem>>, vector<512x512xbf16>
    %cst_9 = arith.constant dense<0.000000e+00> : vector<256x512xf32>
    %17 = tpu.matmul %13, %16, %cst_9 {dimension_numbers = #tpu.dot_dimension_numbers<[1], [0], [0], [1], [0, 0, 1, 1], [], []>} : vector<256x512xbf16>, vector<512x512xbf16>, vector<256x512xf32> -> vector<256x512xf32>
    %c0_10 = arith.constant 0 : index
    %c0_11 = arith.constant 0 : index
    %18 = vector.load %arg5[%c0_10, %c0_11] : memref<1x512xf32, #tpu.memory_space<vmem>>, vector<1x512xf32>
    %19 = vector.broadcast %18 : vector<1x512xf32> to vector<256x512xf32>
    %20 = arith.addf %17, %19 : vector<256x512xf32>
    %21 = arith.truncf %20 : vector<256x512xf32> to vector<256x512xbf16>
    %cst_12 = arith.constant 0.000000e+00 : bf16
    %22 = vector.broadcast %cst_12 : bf16 to vector<256x512xbf16>
    %23 = arith.maximumf %21, %22 : vector<256x512xbf16>
    %c1_i32_13 = arith.constant 1 : i32
    %24 = tpu.memref_slice %arg11[%c1_i32_13] : memref<2x!tpu.dma_semaphore, #tpu.memory_space<semaphore_mem>> -> memref<1x!tpu.dma_semaphore, #tpu.memory_space<semaphore_mem>>
    %25 = tpu.memref_squeeze %24 : memref<1x!tpu.dma_semaphore, #tpu.memory_space<semaphore_mem>> -> memref<!tpu.dma_semaphore, #tpu.memory_space<semaphore_mem>>
    tpu.wait_dma2 semaphore(%25 : memref<!tpu.dma_semaphore, #tpu.memory_space<semaphore_mem>>) src(%arg6 : memref<512x512xbf16, #tpu.memory_space<any>>) dst(%arg10 : memref<512x512xbf16, #tpu.memory_space<vmem>>)
    %c0_14 = arith.constant 0 : index
    %c0_15 = arith.constant 0 : index
    %26 = vector.load %arg10[%c0_14, %c0_15] : memref<512x512xbf16, #tpu.memory_space<vmem>>, vector<512x512xbf16>
    %cst_16 = arith.constant dense<0.000000e+00> : vector<256x512xf32>
    %27 = tpu.matmul %23, %26, %cst_16 {dimension_numbers = #tpu.dot_dimension_numbers<[1], [0], [0], [1], [0, 0, 1, 1], [], []>} : vector<256x512xbf16>, vector<512x512xbf16>, vector<256x512xf32> -> vector<256x512xf32>
    %c0_17 = arith.constant 0 : index
    %c0_18 = arith.constant 0 : index
    %28 = vector.load %arg7[%c0_17, %c0_18] : memref<1x512xf32, #tpu.memory_space<vmem>>, vector<1x512xf32>
    %29 = vector.broadcast %28 : vector<1x512xf32> to vector<256x512xf32>
    %30 = arith.addf %27, %29 : vector<256x512xf32>
    %c0_19 = arith.constant 0 : index
    %c0_20 = arith.constant 0 : index
    %31 = vector.load %arg8[%c0_19, %c0_20] : memref<256x512xf32, #tpu.memory_space<vmem>>, vector<256x512xf32>
    tpu.vector_store %arg8[%c0_19, %c0_20], %30 {strides = array<i32>} : memref<256x512xf32, #tpu.memory_space<vmem>>, vector<256x512xf32>,
    return
  }
  func.func @transform_0(%arg0: i32) -> (i32, i32) {
    %c0_i32 = arith.constant 0 : i32
    %c0_i32_0 = arith.constant 0 : i32
    return %arg0, %c0_i32 : i32, i32
  }
  func.func @transform_1(%arg0: i32) -> (i32, i32) {
    %c0_i32 = arith.constant 0 : i32
    %c0_i32_0 = arith.constant 0 : i32
    %c0_i32_1 = arith.constant 0 : i32
    return %c0_i32, %c0_i32_0 : i32, i32
  }
  func.func @transform_2(%arg0: i32) -> (i32, i32) {
    %c0_i32 = arith.constant 0 : i32
    %c0_i32_0 = arith.constant 0 : i32
    %c0_i32_1 = arith.constant 0 : i32
    return %c0_i32, %c0_i32_0 : i32, i32
  }
  func.func @transform_4(%arg0: i32) -> (i32, i32) {
    %c0_i32 = arith.constant 0 : i32
    %c0_i32_0 = arith.constant 0 : i32
    %c0_i32_1 = arith.constant 0 : i32
    return %c0_i32, %c0_i32_0 : i32, i32
  }
  func.func @transform_6(%arg0: i32) -> (i32, i32) {
    %c0_i32 = arith.constant 0 : i32
    %c0_i32_0 = arith.constant 0 : i32
    %c0_i32_1 = arith.constant 0 : i32
    return %c0_i32, %c0_i32_0 : i32, i32
  }
  func.func @transform_7(%arg0: i32) -> (i32, i32) {
    %c0_i32 = arith.constant 0 : i32
    %c0_i32_0 = arith.constant 0 : i32
    return %arg0, %c0_i32 : i32, i32
  }
}

module attributes {stable_mosaic.version = 11 : i64} {
  func.func @mlp_kernel(%arg0: i32, %arg1: memref<256x512xf32, #tpu.memory_space<vmem>>, %arg2: memref<512x512xbf16, #tpu.memory_space<vmem>>, %arg3: memref<1x512xf32, #tpu.memory_space<vmem>>, %arg4: memref<512x512xbf16, #tpu.memory_space<any>>, %arg5: memref<1x512xf32, #tpu.memory_space<vmem>>, %arg6: memref<512x512xbf16, #tpu.memory_space<any>>, %arg7: memref<1x512xf32, #tpu.memory_space<vmem>>, %arg8: memref<256x512xf32, #tpu.memory_space<vmem>>, %arg9: memref<512x512xbf16, #tpu.memory_space<vmem>>, %arg10: memref<512x512xbf16, #tpu.memory_space<vmem>>, %arg11: memref<2x!tpu.dma_semaphore, #tpu.memory_space<semaphore_mem>>) attributes {dimension_semantics = [#tpu.dimension_semantics<arbitrary>], iteration_bounds = array<i64: 1>, scalar_prefetch = 0 : i64, scratch_operands = 3 : i64, tpu.core_type = #tpu.core_type<tc>, window_params = [{transform_indices = @transform_0, window_bounds = array<i64: 256, 512>}, {pipeline_mode = #tpu.pipeline_mode<synchronous>, transform_indices = @transform_1, window_bounds = array<i64: 512, 512>}, {pipeline_mode = #tpu.pipeline_mode<synchronous>, transform_indices = @transform_2, window_bounds = array<i64: 1, 512>}, {}, {pipeline_mode = #tpu.pipeline_mode<synchronous>, transform_indices = @transform_4, window_bounds = array<i64: 1, 512>}, {}, {pipeline_mode = #tpu.pipeline_mode<synchronous>, transform_indices = @transform_6, window_bounds = array<i64: 1, 512>}, {transform_indices = @transform_7, window_bounds = array<i64: 256, 512>}]} {
    %c0_i32 = arith.constant 0 : i32
    %0 = tpu.memref_slice %arg11[%c0_i32] : memref<2x!tpu.dma_semaphore, #tpu.memory_space<semaphore_mem>> -> memref<1x!tpu.dma_semaphore, #tpu.memory_space<semaphore_mem>>
    %1 = tpu.memref_squeeze %0 : memref<1x!tpu.dma_semaphore, #tpu.memory_space<semaphore_mem>> -> memref<!tpu.dma_semaphore, #tpu.memory_space<semaphore_mem>>
    tpu.enqueue_dma source(%arg4 : memref<512x512xbf16, #tpu.memory_space<any>>) target(%arg9 : memref<512x512xbf16, #tpu.memory_space<vmem>>) target_semaphore(%1 : memref<!tpu.dma_semaphore, #tpu.memory_space<semaphore_mem>>)
    %c1_i32 = arith.constant 1 : i32
    %2 = tpu.memref_slice %arg11[%c1_i32] : memref<2x!tpu.dma_semaphore, #tpu.memory_space<semaphore_mem>> -> memref<1x!tpu.dma_semaphore, #tpu.memory_space<semaphore_mem>>
    %3 = tpu.memref_squeeze %2 : memref<1x!tpu.dma_semaphore, #tpu.memory_space<semaphore_mem>> -> memref<!tpu.dma_semaphore, #tpu.memory_space<semaphore_mem>>
    tpu.enqueue_dma source(%arg6 : memref<512x512xbf16, #tpu.memory_space<any>>) target(%arg10 : memref<512x512xbf16, #tpu.memory_space<vmem>>) target_semaphore(%3 : memref<!tpu.dma_semaphore, #tpu.memory_space<semaphore_mem>>)
    %c0 = arith.constant 0 : index
    %c0_0 = arith.constant 0 : index
    %4 = vector.load %arg1[%c0, %c0_0] : memref<256x512xf32, #tpu.memory_space<vmem>>, vector<256x512xf32>
    %5 = arith.truncf %4 : vector<256x512xf32> to vector<256x512xbf16>
    %c0_1 = arith.constant 0 : index
    %c0_2 = arith.constant 0 : index
    %6 = vector.load %arg2[%c0_1, %c0_2] : memref<512x512xbf16, #tpu.memory_space<vmem>>, vector<512x512xbf16>
    %cst = arith.constant dense<0.000000e+00> : vector<256x512xf32>
    %7 = tpu.matmul %5, %6, %cst {dimension_numbers = #tpu.dot_dimension_numbers<[1], [0], [0], [1], [0, 0, 1, 1], [], []>} : vector<256x512xbf16>, vector<512x512xbf16>, vector<256x512xf32> -> vector<256x512xf32>
    %c0_3 = arith.constant 0 : index
    %c0_4 = arith.constant 0 : index
    %8 = vector.load %arg3[%c0_3, %c0_4] : memref<1x512xf32, #tpu.memory_space<vmem>>, vector<1x512xf32>
    %9 = vector.broadcast %8 : vector<1x512xf32> to vector<256x512xf32>
    %10 = arith.addf %7, %9 : vector<256x512xf32>
    %11 = arith.truncf %10 : vector<256x512xf32> to vector<256x512xbf16>
    %cst_5 = arith.constant 0.000000e+00 : bf16
    %12 = vector.broadcast %cst_5 : bf16 to vector<256x512xbf16>
    %13 = arith.maximumf %11, %12 : vector<256x512xbf16>
    %c0_i32_6 = arith.constant 0 : i32
    %14 = tpu.memref_slice %arg11[%c0_i32_6] : memref<2x!tpu.dma_semaphore, #tpu.memory_space<semaphore_mem>> -> memref<1x!tpu.dma_semaphore, #tpu.memory_space<semaphore_mem>>
    %15 = tpu.memref_squeeze %14 : memref<1x!tpu.dma_semaphore, #tpu.memory_space<semaphore_mem>> -> memref<!tpu.dma_semaphore, #tpu.memory_space<semaphore_mem>>
    tpu.wait_dma2 semaphore(%15 : memref<!tpu.dma_semaphore, #tpu.memory_space<semaphore_mem>>) src(%arg4 : memref<512x512xbf16, #tpu.memory_space<any>>) dst(%arg9 : memref<512x512xbf16, #tpu.memory_space<vmem>>)
    %c0_7 = arith.constant 0 : index
    %c0_8 = arith.constant 0 : index
    %16 = vector.load %arg9[%c0_7, %c0_8] : memref<512x512xbf16, #tpu.memory_space<vmem>>, vector<512x512xbf16>
    %cst_9 = arith.constant dense<0.000000e+00> : vector<256x512xf32>
    %17 = tpu.matmul %13, %16, %cst_9 {dimension_numbers = #tpu.dot_dimension_numbers<[1], [0], [0], [1], [0, 0, 1, 1], [], []>} : vector<256x512xbf16>, vector<512x512xbf16>, vector<256x512xf32> -> vector<256x512xf32>
    %c0_10 = arith.constant 0 : index
    %c0_11 = arith.constant 0 : index
    %18 = vector.load %arg5[%c0_10, %c0_11] : memref<1x512xf32, #tpu.memory_space<vmem>>, vector<1x512xf32>
    %19 = vector.broadcast %18 : vector<1x512xf32> to vector<256x512xf32>
    %20 = arith.addf %17, %19 : vector<256x512xf32>
    %21 = arith.truncf %20 : vector<256x512xf32> to vector<256x512xbf16>
    %cst_12 = arith.constant 0.000000e+00 : bf16
    %22 = vector.broadcast %cst_12 : bf16 to vector<256x512xbf16>
    %23 = arith.maximumf %21, %22 : vector<256x512xbf16>
    %c1_i32_13 = arith.constant 1 : i32
    %24 = tpu.memref_slice %arg11[%c1_i32_13] : memref<2x!tpu.dma_semaphore, #tpu.memory_space<semaphore_mem>> -> memref<1x!tpu.dma_semaphore, #tpu.memory_space<semaphore_mem>>
    %25 = tpu.memref_squeeze %24 : memref<1x!tpu.dma_semaphore, #tpu.memory_space<semaphore_mem>> -> memref<!tpu.dma_semaphore, #tpu.memory_space<semaphore_mem>>
    tpu.wait_dma2 semaphore(%25 : memref<!tpu.dma_semaphore, #tpu.memory_space<semaphore_mem>>) src(%arg6 : memref<512x512xbf16, #tpu.memory_space<any>>) dst(%arg10 : memref<512x512xbf16, #tpu.memory_space<vmem>>)
    %c0_14 = arith.constant 0 : index
    %c0_15 = arith.constant 0 : index
    %26 = vector.load %arg10[%c0_14, %c0_15] : memref<512x512xbf16, #tpu.memory_space<vmem>>, vector<512x512xbf16>
    %cst_16 = arith.constant dense<0.000000e+00> : vector<256x512xf32>
    %27 = tpu.matmul %23, %26, %cst_16 {dimension_numbers = #tpu.dot_dimension_numbers<[1], [0], [0], [1], [0, 0, 1, 1], [], []>} : vector<256x512xbf16>, vector<512x512xbf16>, vector<256x512xf32> -> vector<256x512xf32>
    %c0_17 = arith.constant 0 : index
    %c0_18 = arith.constant 0 : index
    %28 = vector.load %arg7[%c0_17, %c0_18] : memref<1x512xf32, #tpu.memory_space<vmem>>, vector<1x512xf32>
    %29 = vector.broadcast %28 : vector<1x512xf32> to vector<256x512xf32>
    %30 = arith.addf %27, %29 : vector<256x512xf32>
    %c0_19 = arith.constant 0 : index
    %c0_20 = arith.constant 0 : index
    %31 = vector.load %arg8[%c0_19, %c0_20] : memref<256x512xf32, #tpu.memory_space<vmem>>, vector<256x512xf32>
    tpu.vector_store %arg8[%c0_19, %c0_20], %30 {strides = array<i32>} : memref<256x512xf32, #tpu.memory_space<vmem>>, vector<256x512xf32>,
    return
  }
  func.func @transform_0(%arg0: i32) -> (i32, i32) {
    %c0_i32 = arith.constant 0 : i32
    %c0_i32_0 = arith.constant 0 : i32
    return %arg0, %c0_i32 : i32, i32
  }
  func.func @transform_1(%arg0: i32) -> (i32, i32) {
    %c0_i32 = arith.constant 0 : i32
    %c0_i32_0 = arith.constant 0 : i32
    %c0_i32_1 = arith.constant 0 : i32
    return %c0_i32, %c0_i32_0 : i32, i32
  }
  func.func @transform_2(%arg0: i32) -> (i32, i32) {
    %c0_i32 = arith.constant 0 : i32
    %c0_i32_0 = arith.constant 0 : i32
    %c0_i32_1 = arith.constant 0 : i32
    return %c0_i32, %c0_i32_0 : i32, i32
  }
  func.func @transform_4(%arg0: i32) -> (i32, i32) {
    %c0_i32 = arith.constant 0 : i32
    %c0_i32_0 = arith.constant 0 : i32
    %c0_i32_1 = arith.constant 0 : i32
    return %c0_i32, %c0_i32_0 : i32, i32
  }
  func.func @transform_6(%arg0: i32) -> (i32, i32) {
    %c0_i32 = arith.constant 0 : i32
    %c0_i32_0 = arith.constant 0 : i32
    %c0_i32_1 = arith.constant 0 : i32
    return %c0_i32, %c0_i32_0 : i32, i32
  }
  func.func @transform_7(%arg0: i32) -> (i32, i32) {
    %c0_i32 = arith.constant 0 : i32
    %c0_i32_0 = arith.constant 0 : i32
    return %arg0, %c0_i32 : i32, i32
  }
}

</mosaic_0001>

<bundles_post_ra>
// kernel: toy_model_forward.1
= control target key start
LH: loop header
LB: loop body
LE: loop exit
PB: predicated region body
PF: predicated region fallthrough
CT: control target
= control target key end

     0   :  { %12 = vsyncpa [#allocation6], 0  ;;  %s6520_s0 = inlined_call_operand.hbm [shape: f32[256,512], index: 0, kind: input, shape index: {}]   ;;  %s6521_s1 = inlined_call_operand.hbm [shape: bf16[512,512], index: 1, kind: input, shape index: {}]   ;;  %s6522_s2 = inlined_call_operand.vmem [shape: f32[1,512], index: 2, kind: input, shape index: {}]   ;;  %s6523_s3 = inlined_call_operand.hbm [shape: bf16[512,512], index: 3, kind: input, shape index: {}]   ;;  %s6524_s4 = inlined_call_operand.vmem [shape: f32[1,512], index: 4, kind: input, shape index: {}]   ;;  %s6525_s5 = inlined_call_operand.hbm [shape: bf16[512,512], index: 5, kind: input, shape index: {}]   ;;  %s6526_s6 = inlined_call_operand.vmem [shape: f32[1,512], index: 6, kind: input, shape index: {}]   ;;  %s6527_s7 = inlined_call_operand.hbm [shape: f32[256,512], index: 7, kind: output, shape index: {}]  }
   0x1   :  { %13 = vsyncpa [#allocation9], 0 }
   0x2   :  { %14 = vsyncpa [#allocation7], 0  ;;  %s5329_s24 = smov [#allocation5]   ;;  %s5253_s28 = scalar_lea.hbm %s6520_s0, 16384 }
   0x3   :  { %s20_s25 = sshll.u32 %s5329_s24, 4  ;;  %p5254_p0 = scmp.ne.s32.totalorder %s6520_s0, %s5253_s28  ;;  %s21_s25 = int_to_ptr.vmem [resolvable:$true] %s20_s25 }
   0x4   :  { %p5257_p1 = scmp.lt.u32.totalorder %s5253_s28, %s6520_s0 }
   0x6   :  { %p5259_p2 = pnand %p5257_p1, %p5254_p0 }
   0x8   :  { %5262 = shalt.err (!%p5259_p2)
}
   0x9   :  { %s5263_s10 = scalar_lea.vmem %s21_s25, 16384  ;;  %p5268_p4 = scmp.lt.s32.totalorder %s21_s25, %s21_s25 }
   0xa   :  { %p5264_p3 = scmp.ne.s32.totalorder %s21_s25, %s5263_s10  ;;  %p5269_p5 = scmp.lt.s32.totalorder %s5263_s10, %s5263_s10 }
   0xc   :  { %p5270_p6 = por %p5269_p5, %p5268_p4 }
   0xe   :  { %p5271_p7 = pnand %p5270_p6, %p5264_p3 }
  0x10   :  { %5274 = shalt.err (!%p5271_p7)
}
  0x11   :  { %s5330_s11 = smov 512   ;;  %s5331_s12 = smov 32  }
  0x12   :  { %26 = dma.hbm_to_vmem [thread:$0]  %s6520_s0, 16384, %s21_s25, [#allocation6], %s5330_s11, %s5330_s11, %s5331_s12  }
  0x13   :  { %s5332_s15 = smov [#allocation8]   ;;  %s5275_s19 = scalar_lea.hbm %s6521_s1, 16384 }
  0x14   :  { %s32_s16 = sshll.u32 %s5332_s15, 4  ;;  %p5276_p8 = scmp.ne.s32.totalorder %s6521_s1, %s5275_s19  ;;  %s33_s16 = int_to_ptr.vmem [resolvable:$true] %s32_s16 }
  0x15   :  { %p5279_p9 = scmp.lt.u32.totalorder %s5275_s19, %s6521_s1 }
  0x17   :  { %p5281_p10 = pnand %p5279_p9, %p5276_p8 }
  0x19   :  { %5284 = shalt.err (!%p5281_p10)
}
  0x1a   :  { %s5285_s24 = scalar_lea.vmem %s33_s16, 16384  ;;  %p5290_p12 = scmp.lt.s32.totalorder %s33_s16, %s33_s16 }
  0x1b   :  { %p5286_p11 = scmp.ne.s32.totalorder %s33_s16, %s5285_s24  ;;  %p5291_p13 = scmp.lt.s32.totalorder %s5285_s24, %s5285_s24 }
  0x1d   :  { %p5292_p0 = por %p5291_p13, %p5290_p12 }
  0x1f   :  { %p5293_p1 = pnand %p5292_p0, %p5286_p11 }
  0x21   :  { %5296 = shalt.err (!%p5293_p1)
}
  0x22   :  { %s5333_s0 = smov 256   ;;  %s5334_s25 = smov 16  }
  0x23   :  { %38 = dma.hbm_to_vmem [thread:$0]  %s6521_s1, 16384, %s33_s16, [#allocation9], %s5333_s0, %s5333_s0, %s5334_s25  }
  0x24   :  { %5319 = dma.done.wait [#allocation6], 16384  }
  0x25   :  { %5320 = vsyncadd [#allocation6], 4294950912 }
  0x26   :  { %5321 = dma.done.wait [#allocation9], 16384  }
  0x27   :  { %5322 = vsyncadd [#allocation9], 4294950912  ;;  %s56_s28 = sld [smem:[#allocation0]]   ;;  %68 = sst [smem:[#allocation12]] %s5330_s11 }
  0x28   :  { %70 = sst [smem:[#allocation12 + $0x1]] %s5330_s11  ;;  %s5335_s29 = smov [#allocation2]  }
  0x29   :  { %s64_s30 = sshll.u32 %s5335_s29, 4  ;;  %80 = sst [smem:[#allocation12 + $0x6]] %s5333_s0  ;;  %s65_s30 = int_to_ptr.vmem [resolvable:$true] %s64_s30 }
  0x2a   :  { %s5336_s8 = smov 4   ;;  %s5337_s9 = smov 64  }
  0x2b   :  { %72 = sst [smem:[#allocation12 + $0x2]] %s5336_s8  ;;  %s5338_s10 = smov 128  }
  0x2c   :  { %74 = sst [smem:[#allocation12 + $0x3]] %s5337_s9  ;;  %s5339_s13 = smov 2  }
  0x2d   :  { %76 = sst [smem:[#allocation12 + $0x4]] %s5338_s10  ;;  %s4141_s1 = sshll.u32 %s56_s28, 26 }
  0x2e   :  { %78 = sst [smem:[#allocation12 + $0x5]] %s5339_s13  ;;  %s4142_s14 = sadd.s32 134217728, %s4141_s1 }
  0x2f   :  { %82 = sst [smem:[#allocation12 + $0x7]] %s5337_s9  ;;  %s5340_s15 = smov [#allocation4]  }
  0x30   :  { %84 = sst [smem:[#allocation12 + $0x8]] %s5336_s8  ;;  %s5341_s16 = smov [#allocation11]  }
  0x31   :  { %86 = dma.general %s6523_s3, 16384, %s65_s30, %s5340_s15, %s5341_s16, [#allocation12], %s4142_s14, 0  }
  0x32   :  { %103 = sst [smem:[#allocation14]] %s5330_s11  ;;  %s5342_s19 = smov [#allocation3]  }
  0x33   :  { %105 = sst [smem:[#allocation14 + $0x1]] %s5330_s11  ;;  %s99_s20 = sshll.u32 %s5342_s19, 4  ;;  %s100_s20 = int_to_ptr.vmem [resolvable:$true] %s99_s20 }
  0x34   :  { %107 = sst [smem:[#allocation14 + $0x2]] %s5336_s8  ;;  %s5343_s21 = smov [#allocation4 + $0x1]  }
  0x35   :  { %109 = sst [smem:[#allocation14 + $0x3]] %s5337_s9  ;;  %s5344_s22 = smov [#allocation13]  }
  0x36   :  { %111 = sst [smem:[#allocation14 + $0x4]] %s5338_s10 }
  0x37   :  { %113 = sst [smem:[#allocation14 + $0x5]] %s5339_s13 }
  0x38   :  { %115 = sst [smem:[#allocation14 + $0x6]] %s5333_s0 }
  0x39   :  { %117 = sst [smem:[#allocation14 + $0x7]] %s5337_s9 }
  0x3a   :  { %119 = sst [smem:[#allocation14 + $0x8]] %s5336_s8 }
  0x3b   :  { %121 = dma.general %s6525_s5, 16384, %s100_s20, %s5343_s21, %s5344_s22, [#allocation14], %s4142_s14, 0  }
  0x3c   :  { %v5061_v0 = vld [vmem:[#allocation8 + $0x4] ss:$16 sps:$4 sm:$0xff]   ;;  %v5063_v1 = vld [vmem:[#allocation8 + $0xc] ss:$16 sps:$4 sm:$0xff]   ;;  %v5065_v2 = vld [vmem:[#allocation8] ss:$16 sps:$4 sm:$0xff]  }
  0x3d   :  { %1104 = vmatprep.subr.bf16.mxu0 %v5061_v0  ;;  %v5066_v3 = vld [vmem:[#allocation8 + $0x8] ss:$16 sps:$4 sm:$0xff]   ;;  %1490 = vmatprep.subr.bf16.mxu1 %v5063_v1  ;;  %v5067_v4 = vld [vmem:[#allocation8 + $0x24] ss:$16 sps:$4 sm:$0xff]   ;;  %v5069_v5 = vld [vmem:[#allocation8 + $0x2c] ss:$16 sps:$4 sm:$0xff]  }
  0x3e   :  { %1105 = vmatpush1.bf16.msra.mxu0 %v5065_v2  ;;  %1491 = vmatpush1.bf16.msra.mxu1 %v5066_v3  ;;  %v5071_v6 = vld [vmem:[#allocation8 + $0x20] ss:$16 sps:$4 sm:$0xff]   ;;  %v5072_v7 = vld [vmem:[#allocation8 + $0x28] ss:$16 sps:$4 sm:$0xff]   ;;  %v5073_v8 = vld [vmem:[#allocation8 + $0x44] ss:$16 sps:$4 sm:$0xff]  }
  0x3f   :  { %1106 = vmatprep.subr.bf16.mxu0 %v5067_v4  ;;  %1492 = vmatprep.subr.bf16.mxu1 %v5069_v5  ;;  %v5075_v9 = vld [vmem:[#allocation8 + $0x4c] ss:$16 sps:$4 sm:$0xff]   ;;  %v5077_v10 = vld [vmem:[#allocation8 + $0x40] ss:$16 sps:$4 sm:$0xff]   ;;  %v5078_v11 = vld [vmem:[#allocation8 + $0x48] ss:$16 sps:$4 sm:$0xff]  }
  0x40   :  { %v5079_v12 = vld [vmem:[#allocation8 + $0x64] ss:$16 sps:$4 sm:$0xff]   ;;  %v5081_v13 = vld [vmem:[#allocation8 + $0x6c] ss:$16 sps:$4 sm:$0xff]   ;;  %v5083_v14 = vld [vmem:[#allocation8 + $0x60] ss:$16 sps:$4 sm:$0xff]  }
  0x41   :  { %v5084_v15 = vld [vmem:[#allocation8 + $0x68] ss:$16 sps:$4 sm:$0xff]   ;;  %v5085_v16 = vld [vmem:[#allocation8 + $0x84] ss:$16 sps:$4 sm:$0xff]   ;;  %v5087_v17 = vld [vmem:[#allocation8 + $0x8c] ss:$16 sps:$4 sm:$0xff]  }
  0x42   :  { %1107 = vmatpush1.bf16.msra.mxu0 %v5071_v6  ;;  %1493 = vmatpush1.bf16.msra.mxu1 %v5072_v7  ;;  %v5089_v18 = vld [vmem:[#allocation8 + $0x80] ss:$16 sps:$4 sm:$0xff]   ;;  %v5090_v19 = vld [vmem:[#allocation8 + $0x88] ss:$16 sps:$4 sm:$0xff]   ;;  %v5091_v20 = vld [vmem:[#allocation8 + $0xa4] ss:$16 sps:$4 sm:$0xff]  }
  0x43   :  { %1108 = vmatprep.subr.bf16.mxu0 %v5073_v8  ;;  %1494 = vmatprep.subr.bf16.mxu1 %v5075_v9  ;;  %v5093_v21 = vld [vmem:[#allocation8 + $0xac] ss:$16 sps:$4 sm:$0xff]   ;;  %v5095_v22 = vld [vmem:[#allocation8 + $0xa0] ss:$16 sps:$4 sm:$0xff]   ;;  %v5096_v23 = vld [vmem:[#allocation8 + $0xa8] ss:$16 sps:$4 sm:$0xff]  }
  0x44   :  { %v5097_v24 = vld [vmem:[#allocation8 + $0xc4] ss:$16 sps:$4 sm:$0xff]   ;;  %v5099_v25 = vld [vmem:[#allocation8 + $0xcc] ss:$16 sps:$4 sm:$0xff]   ;;  %v5101_v26 = vld [vmem:[#allocation8 + $0xc0] ss:$16 sps:$4 sm:$0xff]  }
  0x45   :  { %v5102_v27 = vld [vmem:[#allocation8 + $0xc8] ss:$16 sps:$4 sm:$0xff]   ;;  %v5103_v28 = vld [vmem:[#allocation8 + $0xe4] ss:$16 sps:$4 sm:$0xff]   ;;  %v5105_v29 = vld [vmem:[#allocation8 + $0xec] ss:$16 sps:$4 sm:$0xff]  }
  0x46   :  { %1109 = vmatpush1.bf16.msra.mxu0 %v5077_v10  ;;  %1495 = vmatpush1.bf16.msra.mxu1 %v5078_v11  ;;  %v5107_v30 = vld [vmem:[#allocation8 + $0xe0] ss:$16 sps:$4 sm:$0xff]   ;;  %v5108_v31 = vld [vmem:[#allocation8 + $0xe8] ss:$16 sps:$4 sm:$0xff]   ;;  %v5109_v32 = vld [vmem:[#allocation8 + $0x104] ss:$16 sps:$4 sm:$0xff]  }
  0x47   :  { %1110 = vmatprep.subr.bf16.mxu0 %v5079_v12  ;;  %1496 = vmatprep.subr.bf16.mxu1 %v5081_v13  ;;  %v5111_v33 = vld [vmem:[#allocation8 + $0x10c] ss:$16 sps:$4 sm:$0xff]   ;;  %v5113_v34 = vld [vmem:[#allocation8 + $0x100] ss:$16 sps:$4 sm:$0xff]   ;;  %v5114_v35 = vld [vmem:[#allocation8 + $0x108] ss:$16 sps:$4 sm:$0xff]  }
  0x48   :  { %v5115_v36 = vld [vmem:[#allocation8 + $0x124] ss:$16 sps:$4 sm:$0xff]   ;;  %v5117_v37 = vld [vmem:[#allocation8 + $0x12c] ss:$16 sps:$4 sm:$0xff]   ;;  %v5119_v38 = vld [vmem:[#allocation8 + $0x120] ss:$16 sps:$4 sm:$0xff]  }
  0x49   :  { %v5120_v39 = vld [vmem:[#allocation8 + $0x128] ss:$16 sps:$4 sm:$0xff]   ;;  %v5121_v40 = vld [vmem:[#allocation8 + $0x144] ss:$16 sps:$4 sm:$0xff]   ;;  %v5123_v41 = vld [vmem:[#allocation8 + $0x14c] ss:$16 sps:$4 sm:$0xff]  }
  0x4a   :  { %1111 = vmatpush1.bf16.msra.mxu0 %v5083_v14  ;;  %1497 = vmatpush1.bf16.msra.mxu1 %v5084_v15  ;;  %v5125_v42 = vld [vmem:[#allocation8 + $0x140] ss:$16 sps:$4 sm:$0xff]   ;;  %v5126_v43 = vld [vmem:[#allocation8 + $0x148] ss:$16 sps:$4 sm:$0xff]   ;;  %v5127_v44 = vld [vmem:[#allocation8 + $0x164] ss:$16 sps:$4 sm:$0xff]  }
  0x4b   :  { %1112 = vmatprep.subr.bf16.mxu0 %v5085_v16  ;;  %1498 = vmatprep.subr.bf16.mxu1 %v5087_v17  ;;  %v5129_v45 = vld [vmem:[#allocation8 + $0x16c] ss:$16 sps:$4 sm:$0xff]   ;;  %v5131_v47 = vld [vmem:[#allocation8 + $0x160] ss:$16 sps:$4 sm:$0xff]   ;;  %v5132_v48 = vld [vmem:[#allocation8 + $0x168] ss:$16 sps:$4 sm:$0xff]  }
  0x4c   :  { %v123_v46 = vld [vmem:[#allocation5 + $0x8] sm:$0xff]  ;;  %v5133_v50 = vld [vmem:[#allocation8 + $0x184] ss:$16 sps:$4 sm:$0xff]   ;;  %v5137_v53 = vld [vmem:[#allocation8 + $0x180] ss:$16 sps:$4 sm:$0xff]  }
  0x4d   :  { %v127_v49 = vld [vmem:[#allocation5 + $0x28] sm:$0xff]  ;;  %v5139_v55 = vld [vmem:[#allocation8 + $0x1a4] ss:$16 sps:$4 sm:$0xff]   ;;  %v5143_v57 = vld [vmem:[#allocation8 + $0x1a0] ss:$16 sps:$4 sm:$0xff]  }
  0x4e   :  { %1113 = vmatpush1.bf16.msra.mxu0 %v5089_v18  ;;  %1499 = vmatpush1.bf16.msra.mxu1 %v5090_v19  ;;  %v251_v51 = vpack.c.bf16 %v127_v49, %v123_v46  ;;  %v5135_v52 = vld [vmem:[#allocation8 + $0x18c] ss:$16 sps:$4 sm:$0xff]   ;;  %v5138_v54 = vld [vmem:[#allocation8 + $0x188] ss:$16 sps:$4 sm:$0xff]   ;;  %v5145_v59 = vld [vmem:[#allocation8 + $0x1c4] ss:$16 sps:$4 sm:$0xff]  }
  0x4f   :  { %1114 = vmatprep.subr.bf16.mxu0 %v5091_v20  ;;  %1500 = vmatprep.subr.bf16.mxu1 %v5093_v21  ;;  %v5141_v56 = vld [vmem:[#allocation8 + $0x1ac] ss:$16 sps:$4 sm:$0xff]   ;;  %v5144_v58 = vld [vmem:[#allocation8 + $0x1a8] ss:$16 sps:$4 sm:$0xff]   ;;  %v5149_v61 = vld [vmem:[#allocation8 + $0x1c0] ss:$16 sps:$4 sm:$0xff]  }
  0x50   :  { %1136 = vmatprep.mubr.bf16.mxu0 %v251_v51  ;;  %1522 = vmatprep.mubr.bf16.mxu1 %v251_v51  ;;  %v5147_v60 = vld [vmem:[#allocation8 + $0x1cc] ss:$16 sps:$4 sm:$0xff]   ;;  %v5150_v62 = vld [vmem:[#allocation8 + $0x1c8] ss:$16 sps:$4 sm:$0xff]   ;;  %v5151_v63 = vld [vmem:[#allocation8 + $0x1e4] ss:$16 sps:$4 sm:$0xff]  }
  0x51   :  { %v5153_v0 = vld [vmem:[#allocation8 + $0x1ec] ss:$16 sps:$4 sm:$0xff]   ;;  %v5155_v1 = vld [vmem:[#allocation8 + $0x1e0] ss:$16 sps:$4 sm:$0xff]   ;;  %v5156_v2 = vld [vmem:[#allocation8 + $0x1e8] ss:$16 sps:$4 sm:$0xff]  }
  0x52   :  { %1115 = vmatpush1.bf16.msra.mxu0 %v5095_v22  ;;  %1501 = vmatpush1.bf16.msra.mxu1 %v5096_v23  ;;  %v122_v3 = vld [vmem:[#allocation5] sm:$0xff]  ;;  %v5162_v6 = vld [vmem:[#allocation8 + $0x20c] ss:$16 sps:$4 sm:$0xff]   ;;  %v5160_v11 = vld [vmem:[#allocation8 + $0x208] ss:$16 sps:$4 sm:$0xff]  }
  0x53   :  { %1116 = vmatprep.subr.bf16.mxu0 %v5097_v24  ;;  %1502 = vmatprep.subr.bf16.mxu1 %v5099_v25  ;;  %v126_v4 = vld [vmem:[#allocation5 + $0x20] sm:$0xff]  ;;  %v131_v7 = vld [vmem:[#allocation5 + $0x48] sm:$0xff] }
  0x54   :  { %v5159_v5 = vld [vmem:[#allocation8 + $0x204] ss:$16 sps:$4 sm:$0xff]   ;;  %v135_v8 = vld [vmem:[#allocation5 + $0x68] sm:$0xff]  ;;  %v250_v9 = vpack.c.bf16 %v126_v4, %v122_v3  ;;  %v5157_v10 = vld [vmem:[#allocation8 + $0x200] ss:$16 sps:$4 sm:$0xff]  }
  0x55   :  { %v255_v12 = vpack.c.bf16 %v135_v8, %v131_v7  ;;  %v130_v13 = vld [vmem:[#allocation5 + $0x40] sm:$0xff]  ;;  %v5168_v17 = vld [vmem:[#allocation8 + $0x22c] ss:$16 sps:$4 sm:$0xff]   ;;  %v5166_v18 = vld [vmem:[#allocation8 + $0x228] ss:$16 sps:$4 sm:$0xff]  }
  0x56   :  { %1117 = vmatpush1.bf16.msra.mxu0 %v5101_v26  ;;  %1503 = vmatpush1.bf16.msra.mxu1 %v5102_v27  ;;  %v134_v14 = vld [vmem:[#allocation5 + $0x60] sm:$0xff]  ;;  %v139_v19 = vld [vmem:[#allocation5 + $0x88] sm:$0xff] }
  0x57   :  { %1118 = vmatprep.subr.bf16.mxu0 %v5103_v28  ;;  %1504 = vmatprep.subr.bf16.mxu1 %v5105_v29  ;;  %v5163_v15 = vld [vmem:[#allocation8 + $0x220] ss:$16 sps:$4 sm:$0xff]   ;;  %v5165_v16 = vld [vmem:[#allocation8 + $0x224] ss:$16 sps:$4 sm:$0xff]   ;;  %v143_v20 = vld [vmem:[#allocation5 + $0xa8] sm:$0xff]  ;;  %v254_v23 = vpack.c.bf16 %v134_v14, %v130_v13 }
  0x58   :  { %v5171_v21 = vld [vmem:[#allocation8 + $0x244] ss:$16 sps:$4 sm:$0xff]   ;;  %v5174_v22 = vld [vmem:[#allocation8 + $0x24c] ss:$16 sps:$4 sm:$0xff]   ;;  %v259_v24 = vpack.c.bf16 %v143_v20, %v139_v19  ;;  %v5169_v25 = vld [vmem:[#allocation8 + $0x240] ss:$16 sps:$4 sm:$0xff]  }
  0x59   :  { %v5172_v26 = vld [vmem:[#allocation8 + $0x248] ss:$16 sps:$4 sm:$0xff]   ;;  %v138_v27 = vld [vmem:[#allocation5 + $0x80] sm:$0xff]  ;;  %v5180_v29 = vld [vmem:[#allocation8 + $0x26c] ss:$16 sps:$4 sm:$0xff]  }
  0x5a   :  { %1119 = vmatpush1.bf16.msra.mxu0 %v5107_v30  ;;  %1505 = vmatpush1.bf16.msra.mxu1 %v5108_v31  ;;  %v5177_v28 = vld [vmem:[#allocation8 + $0x264] ss:$16 sps:$4 sm:$0xff]   ;;  %v147_v31 = vld [vmem:[#allocation5 + $0xc8] sm:$0xff]  ;;  %v5205_v3 = vld [vmem:[#allocation8 + $0x300] ss:$16 sps:$4 sm:$0xff]  }
  0x5b   :  { %1120 = vmatprep.subr.bf16.mxu0 %v5109_v32  ;;  %1506 = vmatprep.subr.bf16.mxu1 %v5111_v33  ;;  %v142_v30 = vld [vmem:[#allocation5 + $0xa0] sm:$0xff]  ;;  %v151_v32 = vld [vmem:[#allocation5 + $0xe8] sm:$0xff] }
  0x5c   :  { %v5175_v33 = vld [vmem:[#allocation8 + $0x260] ss:$16 sps:$4 sm:$0xff]   ;;  %v159_v46 = vld [vmem:[#allocation5 + $0x128] sm:$0xff]  ;;  %v5195_v49 = vld [vmem:[#allocation8 + $0x2c4] ss:$16 sps:$4 sm:$0xff]  }
  0x5d   :  { %v5208_v4 = vld [vmem:[#allocation8 + $0x308] ss:$16 sps:$4 sm:$0xff]   ;;  %v5216_v7 = vld [vmem:[#allocation8 + $0x32c] ss:$16 sps:$4 sm:$0xff]   ;;  %v166_v8 = vld [vmem:[#allocation5 + $0x160] sm:$0xff] }
  0x5e   :  { %1121 = vmatpush1.bf16.msra.mxu0 %v5113_v34  ;;  %1507 = vmatpush1.bf16.msra.mxu1 %v5114_v35  ;;  %v5178_v34 = vld [vmem:[#allocation8 + $0x268] ss:$16 sps:$4 sm:$0xff]   ;;  %v5183_v35 = vld [vmem:[#allocation8 + $0x284] ss:$16 sps:$4 sm:$0xff]   ;;  %v5222_v14 = vld [vmem:[#allocation8 + $0x34c] ss:$16 sps:$4 sm:$0xff]  }
  0x5f   :  { %1122 = vmatprep.subr.bf16.mxu0 %v5115_v36  ;;  %1508 = vmatprep.subr.bf16.mxu1 %v5117_v37  ;;  %v5186_v36 = vld [vmem:[#allocation8 + $0x28c] ss:$16 sps:$4 sm:$0xff]   ;;  %v258_v37 = vpack.c.bf16 %v142_v30, %v138_v27  ;;  %v5219_v13 = vld [vmem:[#allocation8 + $0x344] ss:$16 sps:$4 sm:$0xff]  }
  0x60   :  { %v5225_v19 = vld [vmem:[#allocation8 + $0x364] ss:$16 sps:$4 sm:$0xff]   ;;  %v5228_v20 = vld [vmem:[#allocation8 + $0x36c] ss:$16 sps:$4 sm:$0xff]  }
  0x61   :  { %v5231_v27 = vld [vmem:[#allocation8 + $0x384] ss:$16 sps:$4 sm:$0xff]  }
  0x62   :  { %1123 = vmatpush1.bf16.msra.mxu0 %v5119_v38  ;;  %1509 = vmatpush1.bf16.msra.mxu1 %v5120_v39  ;;  %v263_v38 = vpack.c.bf16 %v151_v32, %v147_v31  ;;  %v5181_v39 = vld [vmem:[#allocation8 + $0x280] ss:$16 sps:$4 sm:$0xff]   ;;  %v5232_v32 = vld [vmem:[#allocation8 + $0x388] ss:$16 sps:$4 sm:$0xff]  }
  0x63   :  { %1124 = vmatprep.subr.bf16.mxu0 %v5121_v40  ;;  %1510 = vmatprep.subr.bf16.mxu1 %v5123_v41  ;;  %v5184_v40 = vld [vmem:[#allocation8 + $0x288] ss:$16 sps:$4 sm:$0xff]   ;;  %v146_v41 = vld [vmem:[#allocation5 + $0xc0] sm:$0xff] }
  0x64   :  { %v5229_v31 = vld [vmem:[#allocation8 + $0x380] ss:$16 sps:$4 sm:$0xff]  }
  0x66   :  { %1125 = vmatpush1.bf16.msra.mxu0 %v5125_v42  ;;  %1511 = vmatpush1.bf16.msra.mxu1 %v5126_v43  ;;  %v5189_v42 = vld [vmem:[#allocation8 + $0x2a4] ss:$16 sps:$4 sm:$0xff]   ;;  %v5192_v43 = vld [vmem:[#allocation8 + $0x2ac] ss:$16 sps:$4 sm:$0xff]  }
  0x67   :  { %1126 = vmatprep.subr.bf16.mxu0 %v5127_v44  ;;  %1512 = vmatprep.subr.bf16.mxu1 %v5129_v45  ;;  %v150_v44 = vld [vmem:[#allocation5 + $0xe0] sm:$0xff]  ;;  %v155_v45 = vld [vmem:[#allocation5 + $0x108] sm:$0xff] }
  0x68   :  { %v262_v51 = vpack.c.bf16 %v150_v44, %v146_v41  ;;  %v5243_v41 = vld [vmem:[#allocation8 + $0x3c4] ss:$16 sps:$4 sm:$0xff]  }
  0x6a   :  { %1127 = vmatpush1.bf16.msra.mxu0 %v5131_v47  ;;  %1513 = vmatpush1.bf16.msra.mxu1 %v5132_v48  ;;  %v5187_v47 = vld [vmem:[#allocation8 + $0x2a0] ss:$16 sps:$4 sm:$0xff]   ;;  %v5190_v48 = vld [vmem:[#allocation8 + $0x2a8] ss:$16 sps:$4 sm:$0xff]  }
  0x6b   :  { %1128 = vmatprep.subr.bf16.mxu0 %v5133_v50  ;;  %1514 = vmatprep.subr.bf16.mxu1 %v5135_v52  ;;  %v5198_v50 = vld [vmem:[#allocation8 + $0x2cc] ss:$16 sps:$4 sm:$0xff]   ;;  %v267_v52 = vpack.c.bf16 %v159_v46, %v155_v45  ;;  %v5241_v45 = vld [vmem:[#allocation8 + $0x3c0] ss:$16 sps:$4 sm:$0xff]   ;;  %v5244_v46 = vld [vmem:[#allocation8 + $0x3c8] ss:$16 sps:$4 sm:$0xff]  }
  0x6e   :  { %1129 = vmatpush1.bf16.msra.mxu0 %v5137_v53  ;;  %1515 = vmatpush1.bf16.msra.mxu1 %v5138_v54  ;;  %v5193_v53 = vld [vmem:[#allocation8 + $0x2c0] ss:$16 sps:$4 sm:$0xff]   ;;  %v5196_v54 = vld [vmem:[#allocation8 + $0x2c8] ss:$16 sps:$4 sm:$0xff]  }
  0x6f   :  { %1130 = vmatprep.subr.bf16.mxu0 %v5139_v55  ;;  %1516 = vmatprep.subr.bf16.mxu1 %v5141_v56  ;;  %v154_v55 = vld [vmem:[#allocation5 + $0x100] sm:$0xff] }
  0x70   :  { %v5201_v56 = vld [vmem:[#allocation8 + $0x2e4] ss:$16 sps:$4 sm:$0xff]  }
  0x72   :  { %1131 = vmatpush1.bf16.msra.mxu0 %v5143_v57  ;;  %1517 = vmatpush1.bf16.msra.mxu1 %v5144_v58  ;;  %v5204_v57 = vld [vmem:[#allocation8 + $0x2ec] ss:$16 sps:$4 sm:$0xff]   ;;  %v158_v58 = vld [vmem:[#allocation5 + $0x120] sm:$0xff] }
  0x73   :  { %1132 = vmatprep.subr.bf16.mxu0 %v5145_v59  ;;  %1518 = vmatprep.subr.bf16.mxu1 %v5147_v60  ;;  %v163_v59 = vld [vmem:[#allocation5 + $0x148] sm:$0xff] }
  0x74   :  { %v167_v60 = vld [vmem:[#allocation5 + $0x168] sm:$0xff] }
  0x76   :  { %1133 = vmatpush1.bf16.msra.mxu0 %v5149_v61  ;;  %1519 = vmatpush1.bf16.msra.mxu1 %v5150_v62  ;;  %v5199_v61 = vld [vmem:[#allocation8 + $0x2e0] ss:$16 sps:$4 sm:$0xff]   ;;  %v5202_v62 = vld [vmem:[#allocation8 + $0x2e8] ss:$16 sps:$4 sm:$0xff]  }
  0x77   :  { %1134 = vmatprep.subr.bf16.mxu0 %v5151_v63  ;;  %1520 = vmatprep.subr.bf16.mxu1 %v5153_v0  ;;  %v5207_v63 = vld [vmem:[#allocation8 + $0x304] ss:$16 sps:$4 sm:$0xff]   ;;  %v5210_v0 = vld [vmem:[#allocation8 + $0x30c] ss:$16 sps:$4 sm:$0xff]  }
  0x7a   :  { %1135 = vmatpush1.bf16.msra.mxu0 %v5155_v1  ;;  %1521 = vmatpush1.bf16.msra.mxu1 %v5156_v2  ;;  %v266_v1 = vpack.c.bf16 %v158_v58, %v154_v55  ;;  %v271_v2 = vpack.c.bf16 %v167_v60, %v163_v59  ;;  %v198_v58 = vld [vmem:[#allocation5 + $0x260] sm:$0xff]  ;;  %v203_v59 = vld [vmem:[#allocation5 + $0x288] sm:$0xff] }
  0x7b   :  { %1297 = vmatprep.subr.bf16.mxu0 %v5159_v5  ;;  %1683 = vmatprep.subr.bf16.mxu1 %v5162_v6  ;;  %v162_v5 = vld [vmem:[#allocation5 + $0x140] sm:$0xff]  ;;  %v207_v60 = vld [vmem:[#allocation5 + $0x2a8] sm:$0xff] }
  0x7c   :  { %v5213_v6 = vld [vmem:[#allocation8 + $0x324] ss:$16 sps:$4 sm:$0xff]  }
  0x7d   :  { %1137 = vmatmul.mubr.bf16.vlgmr.msra.gmra.mrb[0].mxu0 %v250_v9  ;;  %1523 = vmatmul.mubr.bf16.vlgmr.msra.gmra.mrb[0].mxu1 %v250_v9  ;;  %v171_v9 = vld [vmem:[#allocation5 + $0x188] sm:$0xff] }
  0x7e   :  { %1298 = vmatpush1.bf16.msra.mxu0 %v5157_v10  ;;  %1684 = vmatpush1.bf16.msra.mxu1 %v5160_v11  ;;  %v175_v10 = vld [vmem:[#allocation5 + $0x1a8] sm:$0xff]  ;;  %v5211_v11 = vld [vmem:[#allocation8 + $0x320] ss:$16 sps:$4 sm:$0xff]  }
  0x7f   :  { %1146 = vmatprep.mubr.bf16.mxu0 %v255_v12  ;;  %1532 = vmatprep.mubr.bf16.mxu1 %v255_v12  ;;  %v5214_v12 = vld [vmem:[#allocation8 + $0x328] ss:$16 sps:$4 sm:$0xff]  }
  0x80   :  { %1299 = vmatprep.subr.bf16.mxu0 %v5165_v16  ;;  %1685 = vmatprep.subr.bf16.mxu1 %v5168_v17  ;;  %v275_v16 = vpack.c.bf16 %v175_v10, %v171_v9  ;;  %v5217_v17 = vld [vmem:[#allocation8 + $0x340] ss:$16 sps:$4 sm:$0xff]  }
  0x82   :  { %1300 = vmatpush1.bf16.msra.mxu0 %v5163_v15  ;;  %1686 = vmatpush1.bf16.msra.mxu1 %v5166_v18  ;;  %v270_v15 = vpack.c.bf16 %v166_v8, %v162_v5  ;;  %v5220_v18 = vld [vmem:[#allocation8 + $0x348] ss:$16 sps:$4 sm:$0xff]   ;;  %v210_v5 = vld [vmem:[#allocation5 + $0x2c0] sm:$0xff] }
  0x83   :  { %1301 = vmatprep.subr.bf16.mxu0 %v5171_v21  ;;  %1687 = vmatprep.subr.bf16.mxu1 %v5174_v22  ;;  %v170_v21 = vld [vmem:[#allocation5 + $0x180] sm:$0xff]  ;;  %v223_v8 = vld [vmem:[#allocation5 + $0x328] sm:$0xff] }
  0x84   :  { %v174_v22 = vld [vmem:[#allocation5 + $0x1a0] sm:$0xff] }
  0x85   :  { %1147 = vmatmul.mubr.bf16.gmra.mrb[4].mxu0 %v254_v23  ;;  %1533 = vmatmul.mubr.bf16.gmra.mrb[4].mxu1 %v254_v23  ;;  %v179_v23 = vld [vmem:[#allocation5 + $0x1c8] sm:$0xff] }
  0x86   :  { %1156 = vmatprep.mubr.bf16.mxu0 %v259_v24  ;;  %1542 = vmatprep.mubr.bf16.mxu1 %v259_v24  ;;  %v183_v24 = vld [vmem:[#allocation5 + $0x1e8] sm:$0xff] }
  0x87   :  { %1302 = vmatpush1.bf16.msra.mxu0 %v5169_v25  ;;  %1688 = vmatpush1.bf16.msra.mxu1 %v5172_v26  ;;  %v5223_v25 = vld [vmem:[#allocation8 + $0x360] ss:$16 sps:$4 sm:$0xff]   ;;  %v5226_v26 = vld [vmem:[#allocation8 + $0x368] ss:$16 sps:$4 sm:$0xff]   ;;  %v279_v30 = vpack.c.bf16 %v183_v24, %v179_v23 }
  0x88   :  { %1303 = vmatprep.subr.bf16.mxu0 %v5177_v28  ;;  %1689 = vmatprep.subr.bf16.mxu1 %v5180_v29  ;;  %v5234_v28 = vld [vmem:[#allocation8 + $0x38c] ss:$16 sps:$4 sm:$0xff]   ;;  %v274_v29 = vpack.c.bf16 %v174_v22, %v170_v21  ;;  %v234_v23 = vld [vmem:[#allocation5 + $0x380] sm:$0xff] }
  0x89   :  { %v238_v24 = vld [vmem:[#allocation5 + $0x3a0] sm:$0xff] }
  0x8b   :  { %1304 = vmatpush1.bf16.msra.mxu0 %v5175_v33  ;;  %1690 = vmatpush1.bf16.msra.mxu1 %v5178_v34  ;;  %v5237_v33 = vld [vmem:[#allocation8 + $0x3a4] ss:$16 sps:$4 sm:$0xff]   ;;  %v5240_v34 = vld [vmem:[#allocation8 + $0x3ac] ss:$16 sps:$4 sm:$0xff]  }
  0x8c   :  { %1305 = vmatprep.subr.bf16.mxu0 %v5183_v35  ;;  %1691 = vmatprep.subr.bf16.mxu1 %v5186_v36  ;;  %v178_v35 = vld [vmem:[#allocation5 + $0x1c0] sm:$0xff] }
  0x8d   :  { %1157 = vmatmul.mubr.bf16.gmra.mrb[8].mxu0 %v258_v37  ;;  %1543 = vmatmul.mubr.bf16.gmra.mrb[8].mxu1 %v258_v37  ;;  %v182_v36 = vld [vmem:[#allocation5 + $0x1e0] sm:$0xff]  ;;  %v187_v37 = vld [vmem:[#allocation5 + $0x208] sm:$0xff] }
  0x8e   :  { %1166 = vmatprep.mubr.bf16.mxu0 %v263_v38  ;;  %1552 = vmatprep.mubr.bf16.mxu1 %v263_v38  ;;  %v191_v38 = vld [vmem:[#allocation5 + $0x228] sm:$0xff] }
  0x8f   :  { %1306 = vmatpush1.bf16.msra.mxu0 %v5181_v39  ;;  %1692 = vmatpush1.bf16.msra.mxu1 %v5184_v40  ;;  %v5235_v39 = vld [vmem:[#allocation8 + $0x3a0] ss:$16 sps:$4 sm:$0xff]   ;;  %v5238_v40 = vld [vmem:[#allocation8 + $0x3a8] ss:$16 sps:$4 sm:$0xff]   ;;  %v283_v44 = vpack.c.bf16 %v191_v38, %v187_v37 }
  0x90   :  { %1307 = vmatprep.subr.bf16.mxu0 %v5189_v42  ;;  %1693 = vmatprep.subr.bf16.mxu1 %v5192_v43  ;;  %v5246_v42 = vld [vmem:[#allocation8 + $0x3cc] ss:$16 sps:$4 sm:$0xff]   ;;  %v278_v43 = vpack.c.bf16 %v182_v36, %v178_v35  ;;  %v124_v35 = vld [vmem:[#allocation5 + $0x10] sm:$0xff] }
  0x91   :  { %v128_v36 = vld [vmem:[#allocation5 + $0x30] sm:$0xff]  ;;  %v133_v37 = vld [vmem:[#allocation5 + $0x58] sm:$0xff] }
  0x92   :  { %v137_v38 = vld [vmem:[#allocation5 + $0x78] sm:$0xff] }
  0x93   :  { %1308 = vmatpush1.bf16.msra.mxu0 %v5187_v47  ;;  %1694 = vmatpush1.bf16.msra.mxu1 %v5190_v48  ;;  %v5249_v47 = vld [vmem:[#allocation8 + $0x3e4] ss:$16 sps:$4 sm:$0xff]   ;;  %v5252_v48 = vld [vmem:[#allocation8 + $0x3ec] ss:$16 sps:$4 sm:$0xff]  }
  0x94   :  { %1309 = vmatprep.subr.bf16.mxu0 %v5195_v49  ;;  %1695 = vmatprep.subr.bf16.mxu1 %v5198_v50  ;;  %v186_v49 = vld [vmem:[#allocation5 + $0x200] sm:$0xff] }
  0x95   :  { %1167 = vmatmul.mubr.bf16.gmra.mrb[12].mxu0 %v262_v51  ;;  %1553 = vmatmul.mubr.bf16.gmra.mrb[12].mxu1 %v262_v51  ;;  %v190_v50 = vld [vmem:[#allocation5 + $0x220] sm:$0xff]  ;;  %v195_v51 = vld [vmem:[#allocation5 + $0x248] sm:$0xff] }
  0x96   :  { %1176 = vmatprep.mubr.bf16.mxu0 %v267_v52  ;;  %1562 = vmatprep.mubr.bf16.mxu1 %v267_v52  ;;  %v199_v52 = vld [vmem:[#allocation5 + $0x268] sm:$0xff]  ;;  %v282_v55 = vpack.c.bf16 %v190_v50, %v186_v49  ;;  %v149_v49 = vld [vmem:[#allocation5 + $0xd8] sm:$0xff] }
  0x97   :  { %1310 = vmatpush1.bf16.msra.mxu0 %v5193_v53  ;;  %1696 = vmatpush1.bf16.msra.mxu1 %v5196_v54  ;;  %v5247_v53 = vld [vmem:[#allocation8 + $0x3e0] ss:$16 sps:$4 sm:$0xff]   ;;  %v5250_v54 = vld [vmem:[#allocation8 + $0x3e8] ss:$16 sps:$4 sm:$0xff]  }
  0x98   :  { %1311 = vmatprep.subr.bf16.mxu0 %v5201_v56  ;;  %1697 = vmatprep.subr.bf16.mxu1 %v5204_v57  ;;  %v287_v56 = vpack.c.bf16 %v199_v52, %v195_v51  ;;  %v194_v57 = vld [vmem:[#allocation5 + $0x240] sm:$0xff]  ;;  %v153_v50 = vld [vmem:[#allocation5 + $0xf8] sm:$0xff] }
  0x99   :  { %v265_v52 = vpack.c.bf16 %v153_v50, %v149_v49  ;;  %v228_v49 = vld [vmem:[#allocation5 + $0x350] sm:$0xff] }
  0x9a   :  { %v232_v50 = vld [vmem:[#allocation5 + $0x370] sm:$0xff] }
  0x9b   :  { %1312 = vmatpush1.bf16.msra.mxu0 %v5199_v61  ;;  %1698 = vmatpush1.bf16.msra.mxu1 %v5202_v62  ;;  %v286_v61 = vpack.c.bf16 %v198_v58, %v194_v57  ;;  %v291_v62 = vpack.c.bf16 %v207_v60, %v203_v59  ;;  %v156_v59 = vld [vmem:[#allocation5 + $0x110] sm:$0xff] }
  0x9c   :  { %1313 = vmatprep.subr.bf16.mxu0 %v5207_v63  ;;  %1699 = vmatprep.subr.bf16.mxu1 %v5210_v0  ;;  %v202_v63 = vld [vmem:[#allocation5 + $0x280] sm:$0xff]  ;;  %v160_v60 = vld [vmem:[#allocation5 + $0x130] sm:$0xff] }
  0x9d   :  { %1177 = vmatmul.mubr.bf16.gmra.mrb[16].mxu0 %v266_v1  ;;  %1563 = vmatmul.mubr.bf16.gmra.mrb[16].mxu1 %v266_v1  ;;  %v206_v0 = vld [vmem:[#allocation5 + $0x2a0] sm:$0xff]  ;;  %v211_v1 = vld [vmem:[#allocation5 + $0x2c8] sm:$0xff] }
  0x9e   :  { %1186 = vmatprep.mubr.bf16.mxu0 %v271_v2  ;;  %1572 = vmatprep.mubr.bf16.mxu1 %v271_v2  ;;  %v215_v2 = vld [vmem:[#allocation5 + $0x2e8] sm:$0xff] }
  0x9f   :  { %1314 = vmatpush1.bf16.msra.mxu0 %v5205_v3  ;;  %1700 = vmatpush1.bf16.msra.mxu1 %v5208_v4  ;;  %v290_v3 = vpack.c.bf16 %v206_v0, %v202_v63  ;;  %v295_v4 = vpack.c.bf16 %v215_v2, %v211_v1  ;;  %v268_v63 = vpack.c.bf16 %v160_v60, %v156_v59  ;;  %v164_v1 = vld [vmem:[#allocation5 + $0x150] sm:$0xff] }
  0xa0   :  { %1315 = vmatprep.subr.bf16.mxu0 %v5213_v6  ;;  %1701 = vmatprep.subr.bf16.mxu1 %v5216_v7  ;;  %v214_v6 = vld [vmem:[#allocation5 + $0x2e0] sm:$0xff]  ;;  %v219_v7 = vld [vmem:[#allocation5 + $0x308] sm:$0xff]  ;;  %v168_v2 = vld [vmem:[#allocation5 + $0x170] sm:$0xff] }
  0xa1   :  { %v294_v9 = vpack.c.bf16 %v214_v6, %v210_v5  ;;  %v299_v10 = vpack.c.bf16 %v223_v8, %v219_v7  ;;  %v272_v5 = vpack.c.bf16 %v168_v2, %v164_v1  ;;  %v172_v7 = vld [vmem:[#allocation5 + $0x190] sm:$0xff] }
  0xa2   :  { %v176_v8 = vld [vmem:[#allocation5 + $0x1b0] sm:$0xff] }
  0xa3   :  { %1316 = vmatpush1.bf16.msra.mxu0 %v5211_v11  ;;  %1702 = vmatpush1.bf16.msra.mxu1 %v5214_v12  ;;  %v218_v11 = vld [vmem:[#allocation5 + $0x300] sm:$0xff] }
  0xa4   :  { %1317 = vmatprep.subr.bf16.mxu0 %v5219_v13  ;;  %1703 = vmatprep.subr.bf16.mxu1 %v5222_v14  ;;  %v222_v12 = vld [vmem:[#allocation5 + $0x320] sm:$0xff]  ;;  %v227_v13 = vld [vmem:[#allocation5 + $0x348] sm:$0xff] }
  0xa5   :  { %1187 = vmatmul.mubr.bf16.gmra.mrb[20].mxu0 %v270_v15  ;;  %1573 = vmatmul.mubr.bf16.gmra.mrb[20].mxu1 %v270_v15  ;;  %v231_v14 = vld [vmem:[#allocation5 + $0x368] sm:$0xff]  ;;  %v298_v15 = vpack.c.bf16 %v222_v12, %v218_v11  ;;  %v276_v11 = vpack.c.bf16 %v176_v8, %v172_v7 }
  0xa6   :  { %1196 = vmatprep.mubr.bf16.mxu0 %v275_v16  ;;  %1582 = vmatprep.mubr.bf16.mxu1 %v275_v16  ;;  %v303_v16 = vpack.c.bf16 %v231_v14, %v227_v13  ;;  %v180_v13 = vld [vmem:[#allocation5 + $0x1d0] sm:$0xff] }
  0xa7   :  { %1318 = vmatpush1.bf16.msra.mxu0 %v5217_v17  ;;  %1704 = vmatpush1.bf16.msra.mxu1 %v5220_v18  ;;  %v226_v17 = vld [vmem:[#allocation5 + $0x340] sm:$0xff]  ;;  %v184_v14 = vld [vmem:[#allocation5 + $0x1f0] sm:$0xff] }
  0xa8   :  { %1319 = vmatprep.subr.bf16.mxu0 %v5225_v19  ;;  %1705 = vmatprep.subr.bf16.mxu1 %v5228_v20  ;;  %v230_v18 = vld [vmem:[#allocation5 + $0x360] sm:$0xff]  ;;  %v235_v19 = vld [vmem:[#allocation5 + $0x388] sm:$0xff] }
  0xa9   :  { %v239_v20 = vld [vmem:[#allocation5 + $0x3a8] sm:$0xff]  ;;  %v302_v21 = vpack.c.bf16 %v230_v18, %v226_v17  ;;  %v280_v17 = vpack.c.bf16 %v184_v14, %v180_v13 }
  0xaa   :  { %v307_v22 = vpack.c.bf16 %v239_v20, %v235_v19  ;;  %v188_v19 = vld [vmem:[#allocation5 + $0x210] sm:$0xff] }
  0xab   :  { %1320 = vmatpush1.bf16.msra.mxu0 %v5223_v25  ;;  %1706 = vmatpush1.bf16.msra.mxu1 %v5226_v26  ;;  %v243_v25 = vld [vmem:[#allocation5 + $0x3c8] sm:$0xff]  ;;  %v192_v20 = vld [vmem:[#allocation5 + $0x230] sm:$0xff] }
  0xac   :  { %1321 = vmatprep.subr.bf16.mxu0 %v5231_v27  ;;  %1707 = vmatprep.subr.bf16.mxu1 %v5234_v28  ;;  %v247_v26 = vld [vmem:[#allocation5 + $0x3e8] sm:$0xff]  ;;  %v306_v27 = vpack.c.bf16 %v238_v24, %v234_v23  ;;  %v284_v23 = vpack.c.bf16 %v192_v20, %v188_v19 }
  0xad   :  { %1197 = vmatmul.mubr.bf16.gmra.mrb[24].mxu0 %v274_v29  ;;  %1583 = vmatmul.mubr.bf16.gmra.mrb[24].mxu1 %v274_v29  ;;  %v311_v28 = vpack.c.bf16 %v247_v26, %v243_v25  ;;  %v242_v29 = vld [vmem:[#allocation5 + $0x3c0] sm:$0xff]  ;;  %v196_v25 = vld [vmem:[#allocation5 + $0x250] sm:$0xff] }
  0xae   :  { %1206 = vmatprep.mubr.bf16.mxu0 %v279_v30  ;;  %1592 = vmatprep.mubr.bf16.mxu1 %v279_v30  ;;  %v246_v30 = vld [vmem:[#allocation5 + $0x3e0] sm:$0xff]  ;;  %v200_v26 = vld [vmem:[#allocation5 + $0x270] sm:$0xff] }
  0xaf   :  { %1322 = vmatpush1.bf16.msra.mxu0 %v5229_v31  ;;  %1708 = vmatpush1.bf16.msra.mxu1 %v5232_v32  ;;  %v125_v31 = vld [vmem:[#allocation5 + $0x18] sm:$0xff] }
  0xb0   :  { %1323 = vmatprep.subr.bf16.mxu0 %v5237_v33  ;;  %1709 = vmatprep.subr.bf16.mxu1 %v5240_v34  ;;  %v129_v32 = vld [vmem:[#allocation5 + $0x38] sm:$0xff]  ;;  %v310_v33 = vpack.c.bf16 %v246_v30, %v242_v29  ;;  %v288_v29 = vpack.c.bf16 %v200_v26, %v196_v25 }
  0xb1   :  { %v253_v34 = vpack.c.bf16 %v129_v32, %v125_v31  ;;  %v204_v31 = vld [vmem:[#allocation5 + $0x290] sm:$0xff] }
  0xb2   :  { %v208_v32 = vld [vmem:[#allocation5 + $0x2b0] sm:$0xff] }
  0xb3   :  { %1324 = vmatpush1.bf16.msra.mxu0 %v5235_v39  ;;  %1710 = vmatpush1.bf16.msra.mxu1 %v5238_v40  ;;  %v252_v39 = vpack.c.bf16 %v128_v36, %v124_v35  ;;  %v257_v40 = vpack.c.bf16 %v137_v38, %v133_v37  ;;  %v292_v35 = vpack.c.bf16 %v208_v32, %v204_v31  ;;  %v212_v37 = vld [vmem:[#allocation5 + $0x2d0] sm:$0xff]  ;;  %v6530_v31 = vmov 0  }
  0xb4   :  { %1325 = vmatprep.subr.bf16.mxu0 %v5243_v41  ;;  %1711 = vmatprep.subr.bf16.mxu1 %v5246_v42  ;;  %v132_v41 = vld [vmem:[#allocation5 + $0x50] sm:$0xff] }
  0xb5   :  { %1207 = vmatmul.mubr.bf16.gmra.mrb[28].mxu0 %v278_v43  ;;  %1593 = vmatmul.mubr.bf16.gmra.mrb[28].mxu1 %v278_v43  ;;  %v136_v42 = vld [vmem:[#allocation5 + $0x70] sm:$0xff]  ;;  %v141_v43 = vld [vmem:[#allocation5 + $0x98] sm:$0xff] }
  0xb6   :  { %1216 = vmatprep.mubr.bf16.mxu0 %v283_v44  ;;  %1602 = vmatprep.mubr.bf16.mxu1 %v283_v44  ;;  %v145_v44 = vld [vmem:[#allocation5 + $0xb8] sm:$0xff]  ;;  %v216_v38 = vld [vmem:[#allocation5 + $0x2f0] sm:$0xff] }
  0xb7   :  { %1326 = vmatpush1.bf16.msra.mxu0 %v5241_v45  ;;  %1712 = vmatpush1.bf16.msra.mxu1 %v5244_v46  ;;  %v256_v45 = vpack.c.bf16 %v136_v42, %v132_v41  ;;  %v261_v46 = vpack.c.bf16 %v145_v44, %v141_v43  ;;  %v296_v41 = vpack.c.bf16 %v216_v38, %v212_v37  ;;  %v220_v43 = vld [vmem:[#allocation5 + $0x310] sm:$0xff] }
  0xb8   :  { %1327 = vmatprep.subr.bf16.mxu0 %v5249_v47  ;;  %1713 = vmatprep.subr.bf16.mxu1 %v5252_v48  ;;  %v140_v47 = vld [vmem:[#allocation5 + $0x90] sm:$0xff] }
  0xb9   :  { %v144_v48 = vld [vmem:[#allocation5 + $0xb0] sm:$0xff] }
  0xba   :  { %v260_v51 = vpack.c.bf16 %v144_v48, %v140_v47  ;;  %v224_v44 = vld [vmem:[#allocation5 + $0x330] sm:$0xff] }
  0xbb   :  { %1328 = vmatpush1.bf16.msra.mxu0 %v5247_v53  ;;  %1714 = vmatpush1.bf16.msra.mxu1 %v5250_v54  ;;  %v148_v53 = vld [vmem:[#allocation5 + $0xd0] sm:$0xff]  ;;  %v300_v47 = vpack.c.bf16 %v224_v44, %v220_v43 }
  0xbc   :  { %v152_v54 = vld [vmem:[#allocation5 + $0xf0] sm:$0xff] }
  0xbd   :  { %1217 = vmatmul.mubr.bf16.gmra.mrb[32].mxu0 %v282_v55  ;;  %1603 = vmatmul.mubr.bf16.gmra.mrb[32].mxu1 %v282_v55  ;;  %v157_v55 = vld [vmem:[#allocation5 + $0x118] sm:$0xff]  ;;  %v264_v57 = vpack.c.bf16 %v152_v54, %v148_v53  ;;  %v304_v53 = vpack.c.bf16 %v232_v50, %v228_v49 }
  0xbe   :  { %1226 = vmatprep.mubr.bf16.mxu0 %v287_v56  ;;  %1612 = vmatprep.mubr.bf16.mxu1 %v287_v56  ;;  %v161_v56 = vld [vmem:[#allocation5 + $0x138] sm:$0xff] }
  0xbf   :  { %v269_v58 = vpack.c.bf16 %v161_v56, %v157_v55  ;;  %v236_v55 = vld [vmem:[#allocation5 + $0x390] sm:$0xff] }
  0xc0   :  { %v240_v56 = vld [vmem:[#allocation5 + $0x3b0] sm:$0xff] }
  0xc1   :  { %v308_v59 = vpack.c.bf16 %v240_v56, %v236_v55 }
  0xc5   :  { %1227 = vmatmul.mubr.bf16.gmra.mrb[36].mxu0 %v286_v61  ;;  %1613 = vmatmul.mubr.bf16.gmra.mrb[36].mxu1 %v286_v61  ;;  %v165_v61 = vld [vmem:[#allocation5 + $0x158] sm:$0xff] }
  0xc6   :  { %1236 = vmatprep.mubr.bf16.mxu0 %v291_v62  ;;  %1622 = vmatprep.mubr.bf16.mxu1 %v291_v62  ;;  %v169_v62 = vld [vmem:[#allocation5 + $0x178] sm:$0xff] }
  0xc7   :  { %v273_v0 = vpack.c.bf16 %v169_v62, %v165_v61  ;;  %v244_v61 = vld [vmem:[#allocation5 + $0x3d0] sm:$0xff] }
  0xc8   :  { %v248_v62 = vld [vmem:[#allocation5 + $0x3f0] sm:$0xff] }
  0xcd   :  { %1237 = vmatmul.mubr.bf16.gmra.mrb[40].mxu0 %v290_v3  ;;  %1623 = vmatmul.mubr.bf16.gmra.mrb[40].mxu1 %v290_v3  ;;  %v173_v3 = vld [vmem:[#allocation5 + $0x198] sm:$0xff] }
  0xce   :  { %1246 = vmatprep.mubr.bf16.mxu0 %v295_v4  ;;  %1632 = vmatprep.mubr.bf16.mxu1 %v295_v4  ;;  %v177_v4 = vld [vmem:[#allocation5 + $0x1b8] sm:$0xff] }
  0xcf   :  { %v277_v6 = vpack.c.bf16 %v177_v4, %v173_v3  ;;  %v442_v4 = vld [vmem:[%s6522_s2] sm:$0xf] }
  0xd5   :  { %1247 = vmatmul.mubr.bf16.gmra.mrb[44].mxu0 %v294_v9  ;;  %1633 = vmatmul.mubr.bf16.gmra.mrb[44].mxu1 %v294_v9  ;;  %v181_v9 = vld [vmem:[#allocation5 + $0x1d8] sm:$0xff] }
  0xd6   :  { %1256 = vmatprep.mubr.bf16.mxu0 %v299_v10  ;;  %1642 = vmatprep.mubr.bf16.mxu1 %v299_v10  ;;  %v185_v10 = vld [vmem:[#allocation5 + $0x1f8] sm:$0xff] }
  0xd7   :  { %v281_v12 = vpack.c.bf16 %v185_v10, %v181_v9 }
  0xdd   :  { %1257 = vmatmul.mubr.bf16.gmra.mrb[48].mxu0 %v298_v15  ;;  %1643 = vmatmul.mubr.bf16.gmra.mrb[48].mxu1 %v298_v15  ;;  %v189_v15 = vld [vmem:[#allocation5 + $0x218] sm:$0xff] }
  0xde   :  { %1266 = vmatprep.mubr.bf16.mxu0 %v303_v16  ;;  %1652 = vmatprep.mubr.bf16.mxu1 %v303_v16  ;;  %v193_v16 = vld [vmem:[#allocation5 + $0x238] sm:$0xff] }
  0xdf   :  { %v285_v18 = vpack.c.bf16 %v193_v16, %v189_v15 }
  0xe5   :  { %1267 = vmatmul.mubr.bf16.gmra.mrb[52].mxu0 %v302_v21  ;;  %1653 = vmatmul.mubr.bf16.gmra.mrb[52].mxu1 %v302_v21  ;;  %v197_v21 = vld [vmem:[#allocation5 + $0x258] sm:$0xff] }
  0xe6   :  { %1276 = vmatprep.mubr.bf16.mxu0 %v307_v22  ;;  %1662 = vmatprep.mubr.bf16.mxu1 %v307_v22  ;;  %v201_v22 = vld [vmem:[#allocation5 + $0x278] sm:$0xff] }
  0xe7   :  { %v289_v24 = vpack.c.bf16 %v201_v22, %v197_v21 }
  0xed   :  { %1277 = vmatmul.mubr.bf16.gmra.mrb[56].mxu0 %v306_v27  ;;  %1663 = vmatmul.mubr.bf16.gmra.mrb[56].mxu1 %v306_v27  ;;  %v205_v27 = vld [vmem:[#allocation5 + $0x298] sm:$0xff] }
  0xee   :  { %1286 = vmatprep.mubr.bf16.mxu0 %v311_v28  ;;  %1672 = vmatprep.mubr.bf16.mxu1 %v311_v28  ;;  %v209_v28 = vld [vmem:[#allocation5 + $0x2b8] sm:$0xff] }
  0xef   :  { %v293_v30 = vpack.c.bf16 %v209_v28, %v205_v27 }
  0xf5   :  { %1287 = vmatmul.mubr.bf16.gmra.mrb[60].mxu0 %v310_v33  ;;  %1673 = vmatmul.mubr.bf16.gmra.mrb[60].mxu1 %v310_v33  ;;  %v213_v33 = vld [vmem:[#allocation5 + $0x2d8] sm:$0xff] }
  0xf6   :  { %1329 = vmatprep.mubr.bf16.mxu0 %v253_v34  ;;  %1715 = vmatprep.mubr.bf16.mxu1 %v253_v34  ;;  %v217_v34 = vld [vmem:[#allocation5 + $0x2f8] sm:$0xff] }
  0xf7   :  { %v297_v36 = vpack.c.bf16 %v217_v34, %v213_v33 }
  0xfd   :  { %1330 = vmatmul.mubr.bf16.vlgmr.msra.gmra.mrb[0].mxu0 %v252_v39  ;;  %1716 = vmatmul.mubr.bf16.vlgmr.msra.gmra.mrb[0].mxu1 %v252_v39  ;;  %v221_v39 = vld [vmem:[#allocation5 + $0x318] sm:$0xff] }
  0xfe   :  { %1339 = vmatprep.mubr.bf16.mxu0 %v257_v40  ;;  %1725 = vmatprep.mubr.bf16.mxu1 %v257_v40  ;;  %v225_v40 = vld [vmem:[#allocation5 + $0x338] sm:$0xff] }
  0xff   :  { %v301_v42 = vpack.c.bf16 %v225_v40, %v221_v39 }
 0x105   :  { %1340 = vmatmul.mubr.bf16.gmra.mrb[4].mxu0 %v256_v45  ;;  %1726 = vmatmul.mubr.bf16.gmra.mrb[4].mxu1 %v256_v45  ;;  %v229_v45 = vld [vmem:[#allocation5 + $0x358] sm:$0xff] }
 0x106   :  { %1349 = vmatprep.mubr.bf16.mxu0 %v261_v46  ;;  %1735 = vmatprep.mubr.bf16.mxu1 %v261_v46  ;;  %v233_v46 = vld [vmem:[#allocation5 + $0x378] sm:$0xff] }
 0x107   :  { %v305_v48 = vpack.c.bf16 %v233_v46, %v229_v45 }
 0x10d   :  { %1350 = vmatmul.mubr.bf16.gmra.mrb[8].mxu0 %v260_v51  ;;  %1736 = vmatmul.mubr.bf16.gmra.mrb[8].mxu1 %v260_v51  ;;  %v237_v51 = vld [vmem:[#allocation5 + $0x398] sm:$0xff] }
 0x10e   :  { %1359 = vmatprep.mubr.bf16.mxu0 %v265_v52  ;;  %1745 = vmatprep.mubr.bf16.mxu1 %v265_v52  ;;  %v241_v52 = vld [vmem:[#allocation5 + $0x3b8] sm:$0xff] }
 0x10f   :  { %v309_v54 = vpack.c.bf16 %v241_v52, %v237_v51 }
 0x115   :  { %1360 = vmatmul.mubr.bf16.gmra.mrb[12].mxu0 %v264_v57  ;;  %1746 = vmatmul.mubr.bf16.gmra.mrb[12].mxu1 %v264_v57  ;;  %v245_v57 = vld [vmem:[#allocation5 + $0x3d8] sm:$0xff] }
 0x116   :  { %1369 = vmatprep.mubr.bf16.mxu0 %v269_v58  ;;  %1755 = vmatprep.mubr.bf16.mxu1 %v269_v58  ;;  %v249_v58 = vld [vmem:[#allocation5 + $0x3f8] sm:$0xff] }
 0x117   :  { %v313_v60 = vpack.c.bf16 %v249_v58, %v245_v57 }
 0x11d   :  { %1370 = vmatmul.mubr.bf16.gmra.mrb[16].mxu0 %v268_v63  ;;  %1756 = vmatmul.mubr.bf16.gmra.mrb[16].mxu1 %v268_v63  ;;  %v312_v63 = vpack.c.bf16 %v248_v62, %v244_v61 }
 0x11e   :  { %1379 = vmatprep.mubr.bf16.mxu0 %v273_v0  ;;  %1765 = vmatprep.mubr.bf16.mxu1 %v273_v0  ;;  %v444_v0 = vlaneseq }
 0x120   :  { %v445_v1 = vshrl.u32 %v444_v0, 7 }
 0x122   :  { %v5428_v2 = vsub.s32 0, %v445_v1  ;;  %v5430_v3 = vsub.s32 2, %v445_v1 }
 0x124   :  { %6578 = vst [vmem:[#allocation20_spill] sm:$0xff] %v5428_v2  ;;  %6579 = vst [vmem:[#allocation21_spill] sm:$0xff] %v5430_v3  ;;  %v5440_v7 = vrot.slane %v442_v4, %v5428_v2  ;;  %v5443_v8 = vrot.slane %v442_v4, %v5430_v3  ;;  %v6592_v2 = vmov 0  }
 0x125   :  { %1380 = vmatmul.mubr.bf16.gmra.mrb[20].mxu0 %v272_v5  ;;  %1766 = vmatmul.mubr.bf16.gmra.mrb[20].mxu1 %v272_v5  ;;  %v5435_v5 = vsub.s32 1, %v445_v1 }
 0x126   :  { %1389 = vmatprep.mubr.bf16.mxu0 %v277_v6  ;;  %1775 = vmatprep.mubr.bf16.mxu1 %v277_v6  ;;  %v5437_v6 = vsub.s32 3, %v445_v1 }
 0x127   :  { %6580 = vst [vmem:[#allocation22_spill] sm:$0xff] %v5435_v5 }
 0x128   :  { %6581 = vst [vmem:[#allocation23_spill] sm:$0xff] %v5437_v6 }
 0x12d   :  { %1390 = vmatmul.mubr.bf16.gmra.mrb[24].mxu0 %v276_v11  ;;  %1776 = vmatmul.mubr.bf16.gmra.mrb[24].mxu1 %v276_v11  ;;  %v5446_v11 = vrot.slane %v442_v4, %v5435_v5 }
 0x12e   :  { %1399 = vmatprep.mubr.bf16.mxu0 %v281_v12  ;;  %1785 = vmatprep.mubr.bf16.mxu1 %v281_v12  ;;  %v5449_v12 = vrot.slane %v442_v4, %v5437_v6 }
 0x135   :  { %1400 = vmatmul.mubr.bf16.gmra.mrb[28].mxu0 %v280_v17  ;;  %1786 = vmatmul.mubr.bf16.gmra.mrb[28].mxu1 %v280_v17 }
 0x136   :  { %1409 = vmatprep.mubr.bf16.mxu0 %v285_v18  ;;  %1795 = vmatprep.mubr.bf16.mxu1 %v285_v18 }
 0x13d   :  { %1410 = vmatmul.mubr.bf16.gmra.mrb[32].mxu0 %v284_v23  ;;  %1796 = vmatmul.mubr.bf16.gmra.mrb[32].mxu1 %v284_v23 }
 0x13e   :  { %1419 = vmatprep.mubr.bf16.mxu0 %v289_v24  ;;  %1805 = vmatprep.mubr.bf16.mxu1 %v289_v24 }
 0x145   :  { %1420 = vmatmul.mubr.bf16.gmra.mrb[36].mxu0 %v288_v29  ;;  %1806 = vmatmul.mubr.bf16.gmra.mrb[36].mxu1 %v288_v29 }
 0x146   :  { %1429 = vmatprep.mubr.bf16.mxu0 %v293_v30  ;;  %1815 = vmatprep.mubr.bf16.mxu1 %v293_v30 }
 0x14d   :  { %1430 = vmatmul.mubr.bf16.gmra.mrb[40].mxu0 %v292_v35  ;;  %1816 = vmatmul.mubr.bf16.gmra.mrb[40].mxu1 %v292_v35 }
 0x14e   :  { %1439 = vmatprep.mubr.bf16.mxu0 %v297_v36  ;;  %1825 = vmatprep.mubr.bf16.mxu1 %v297_v36 }
 0x155   :  { %1440 = vmatmul.mubr.bf16.gmra.mrb[44].mxu0 %v296_v41  ;;  %1826 = vmatmul.mubr.bf16.gmra.mrb[44].mxu1 %v296_v41 }
 0x156   :  { %1449 = vmatprep.mubr.bf16.mxu0 %v301_v42  ;;  %1835 = vmatprep.mubr.bf16.mxu1 %v301_v42 }
 0x15d   :  { %1450 = vmatmul.mubr.bf16.gmra.mrb[48].mxu0 %v300_v47  ;;  %1836 = vmatmul.mubr.bf16.gmra.mrb[48].mxu1 %v300_v47 }
 0x15e   :  { %1459 = vmatprep.mubr.bf16.mxu0 %v305_v48  ;;  %1845 = vmatprep.mubr.bf16.mxu1 %v305_v48 }
 0x165   :  { %1460 = vmatmul.mubr.bf16.gmra.mrb[52].mxu0 %v304_v53  ;;  %1846 = vmatmul.mubr.bf16.gmra.mrb[52].mxu1 %v304_v53 }
 0x166   :  { %1469 = vmatprep.mubr.bf16.mxu0 %v309_v54  ;;  %1855 = vmatprep.mubr.bf16.mxu1 %v309_v54 }
 0x16d   :  { %1470 = vmatmul.mubr.bf16.gmra.mrb[56].mxu0 %v308_v59  ;;  %1856 = vmatmul.mubr.bf16.gmra.mrb[56].mxu1 %v308_v59 }
 0x16e   :  { %1479 = vmatprep.mubr.bf16.mxu0 %v313_v60  ;;  %1865 = vmatprep.mubr.bf16.mxu1 %v313_v60 }
 0x175   :  { %1480 = vmatmul.mubr.bf16.gmra.mrb[60].mxu0 %v312_v63  ;;  %1866 = vmatmul.mubr.bf16.gmra.mrb[60].mxu1 %v312_v63 }
 0x1d0   :  { %v1331_v9 = vpop.f32.mrb[0].mxu0  ;;  %v1717_v10 = vpop.f32.mrb[0].mxu1 }
 0x1d1   :  { %v1333_v13 = vpop.f32.mrb[1].mxu0  ;;  %v1719_v14 = vpop.f32.mrb[1].mxu1  ;;  %v4275_v17 = vadd.f32 %v1331_v9, %v5440_v7  ;;  %v4339_v18 = vadd.f32 %v1717_v10, %v5443_v8 }
 0x1d2   :  { %v1335_v15 = vpop.f32.mrb[2].mxu0  ;;  %v1721_v16 = vpop.f32.mrb[2].mxu1  ;;  %v4276_v23 = vadd.f32 %v1333_v13, %v5446_v11  ;;  %v4340_v24 = vadd.f32 %v1719_v14, %v5449_v12 }
 0x1d3   :  { %v4277_v19 = vadd.f32 %v1335_v15, %v5440_v7  ;;  %v4341_v20 = vadd.f32 %v1721_v16, %v5443_v8  ;;  %v1337_v21 = vpop.f32.mrb[3].mxu0  ;;  %v1723_v22 = vpop.f32.mrb[3].mxu1 }
 0x1d4   :  { %v4278_v25 = vadd.f32 %v1337_v21, %v5446_v11  ;;  %v4342_v26 = vadd.f32 %v1723_v22, %v5449_v12 }
 0x1d5   :  { %v1876_v27 = vpack.c.bf16 %v4277_v19, %v4275_v17  ;;  %v1878_v28 = vpack.c.bf16 %v4341_v20, %v4339_v18 }
 0x1d6   :  { %v1877_v29 = vpack.c.bf16 %v4278_v25, %v4276_v23  ;;  %v1879_v30 = vpack.c.bf16 %v4342_v26, %v4340_v24 }
 0x1d7   :  { %v5460_v32 = vmax.bf16 %v6530_v31, %v1876_v27  ;;  %v5463_v33 = vmax.bf16 %v6530_v31, %v1878_v28 }
 0x1d8   :  { %v5466_v34 = vmax.bf16 %v6530_v31, %v1877_v29  ;;  %v5469_v35 = vmax.bf16 %v6530_v31, %v1879_v30  ;;  %v1341_v36 = vpop.f32.mrb[4].mxu0  ;;  %v1727_v37 = vpop.f32.mrb[4].mxu1 }
 0x1d9   :  { %v1343_v38 = vpop.f32.mrb[5].mxu0  ;;  %v1729_v39 = vpop.f32.mrb[5].mxu1  ;;  %v4279_v42 = vadd.f32 %v1341_v36, %v5440_v7  ;;  %v4343_v43 = vadd.f32 %v1727_v37, %v5443_v8 }
 0x1da   :  { %v1345_v40 = vpop.f32.mrb[6].mxu0  ;;  %v1731_v41 = vpop.f32.mrb[6].mxu1  ;;  %v4280_v48 = vadd.f32 %v1343_v38, %v5446_v11  ;;  %v4344_v49 = vadd.f32 %v1729_v39, %v5449_v12 }
 0x1db   :  { %v4281_v44 = vadd.f32 %v1345_v40, %v5440_v7  ;;  %v4345_v45 = vadd.f32 %v1731_v41, %v5443_v8  ;;  %v1347_v46 = vpop.f32.mrb[7].mxu0  ;;  %v1733_v47 = vpop.f32.mrb[7].mxu1 }
 0x1dc   :  { %v4282_v50 = vadd.f32 %v1347_v46, %v5446_v11  ;;  %v4346_v51 = vadd.f32 %v1733_v47, %v5449_v12 }
 0x1dd   :  { %v1880_v52 = vpack.c.bf16 %v4281_v44, %v4279_v42  ;;  %v1882_v53 = vpack.c.bf16 %v4345_v45, %v4343_v43 }
 0x1de   :  { %v1881_v54 = vpack.c.bf16 %v4282_v50, %v4280_v48  ;;  %v1883_v55 = vpack.c.bf16 %v4346_v51, %v4344_v49 }
 0x1df   :  { %v5480_v56 = vmax.bf16 %v6530_v31, %v1880_v52  ;;  %v5483_v57 = vmax.bf16 %v6530_v31, %v1882_v53 }
 0x1e0   :  { %v5486_v58 = vmax.bf16 %v6530_v31, %v1881_v54  ;;  %v5489_v59 = vmax.bf16 %v6530_v31, %v1883_v55  ;;  %v1351_v60 = vpop.f32.mrb[8].mxu0  ;;  %v1737_v61 = vpop.f32.mrb[8].mxu1 }
 0x1e1   :  { %v1353_v62 = vpop.f32.mrb[9].mxu0  ;;  %v1739_v63 = vpop.f32.mrb[9].mxu1  ;;  %v4283_v4 = vadd.f32 %v1351_v60, %v5440_v7  ;;  %v4347_v9 = vadd.f32 %v1737_v61, %v5443_v8 }
 0x1e2   :  { %v1355_v0 = vpop.f32.mrb[10].mxu0  ;;  %v1741_v1 = vpop.f32.mrb[10].mxu1  ;;  %v4284_v16 = vadd.f32 %v1353_v62, %v5446_v11  ;;  %v4348_v17 = vadd.f32 %v1739_v63, %v5449_v12 }
 0x1e3   :  { %v4285_v10 = vadd.f32 %v1355_v0, %v5440_v7  ;;  %v4349_v13 = vadd.f32 %v1741_v1, %v5443_v8  ;;  %v1357_v14 = vpop.f32.mrb[11].mxu0  ;;  %v1743_v15 = vpop.f32.mrb[11].mxu1 }
 0x1e4   :  { %v4286_v18 = vadd.f32 %v1357_v14, %v5446_v11  ;;  %v4350_v19 = vadd.f32 %v1743_v15, %v5449_v12 }
 0x1e5   :  { %v1884_v20 = vpack.c.bf16 %v4285_v10, %v4283_v4  ;;  %v1886_v21 = vpack.c.bf16 %v4349_v13, %v4347_v9 }
 0x1e6   :  { %v1885_v22 = vpack.c.bf16 %v4286_v18, %v4284_v16  ;;  %v1887_v23 = vpack.c.bf16 %v4350_v19, %v4348_v17 }
 0x1e7   :  { %v5500_v24 = vmax.bf16 %v6530_v31, %v1884_v20  ;;  %v5503_v25 = vmax.bf16 %v6530_v31, %v1886_v21 }
 0x1e8   :  { %v5506_v26 = vmax.bf16 %v6530_v31, %v1885_v22  ;;  %v5509_v27 = vmax.bf16 %v6530_v31, %v1887_v23  ;;  %v1361_v28 = vpop.f32.mrb[12].mxu0  ;;  %v1747_v29 = vpop.f32.mrb[12].mxu1 }
 0x1e9   :  { %v1363_v30 = vpop.f32.mrb[13].mxu0  ;;  %v1749_v36 = vpop.f32.mrb[13].mxu1  ;;  %v4287_v39 = vadd.f32 %v1361_v28, %v5440_v7  ;;  %v4351_v40 = vadd.f32 %v1747_v29, %v5443_v8 }
 0x1ea   :  { %v1365_v37 = vpop.f32.mrb[14].mxu0  ;;  %v1751_v38 = vpop.f32.mrb[14].mxu1  ;;  %v4288_v45 = vadd.f32 %v1363_v30, %v5446_v11  ;;  %v4352_v46 = vadd.f32 %v1749_v36, %v5449_v12 }
 0x1eb   :  { %v4289_v41 = vadd.f32 %v1365_v37, %v5440_v7  ;;  %v4353_v42 = vadd.f32 %v1751_v38, %v5443_v8  ;;  %v1367_v43 = vpop.f32.mrb[15].mxu0  ;;  %v1753_v44 = vpop.f32.mrb[15].mxu1 }
 0x1ec   :  { %v4290_v47 = vadd.f32 %v1367_v43, %v5446_v11  ;;  %v4354_v48 = vadd.f32 %v1753_v44, %v5449_v12 }
 0x1ed   :  { %v1888_v49 = vpack.c.bf16 %v4289_v41, %v4287_v39  ;;  %v1890_v50 = vpack.c.bf16 %v4353_v42, %v4351_v40 }
 0x1ee   :  { %v1889_v51 = vpack.c.bf16 %v4290_v47, %v4288_v45  ;;  %v1891_v52 = vpack.c.bf16 %v4354_v48, %v4352_v46 }
 0x1ef   :  { %v5520_v53 = vmax.bf16 %v6530_v31, %v1888_v49  ;;  %v5523_v54 = vmax.bf16 %v6530_v31, %v1890_v50 }
 0x1f0   :  { %v5526_v55 = vmax.bf16 %v6530_v31, %v1889_v51  ;;  %v5529_v60 = vmax.bf16 %v6530_v31, %v1891_v52  ;;  %v1371_v61 = vpop.f32.mrb[16].mxu0  ;;  %v1757_v62 = vpop.f32.mrb[16].mxu1 }
 0x1f1   :  { %v1373_v63 = vpop.f32.mrb[17].mxu0  ;;  %v1759_v0 = vpop.f32.mrb[17].mxu1  ;;  %v4291_v9 = vadd.f32 %v1371_v61, %v5440_v7  ;;  %v4355_v10 = vadd.f32 %v1757_v62, %v5443_v8 }
 0x1f2   :  { %v1375_v1 = vpop.f32.mrb[18].mxu0  ;;  %v1761_v4 = vpop.f32.mrb[18].mxu1  ;;  %v4292_v17 = vadd.f32 %v1373_v63, %v5446_v11  ;;  %v4356_v18 = vadd.f32 %v1759_v0, %v5449_v12 }
 0x1f3   :  { %v4293_v13 = vadd.f32 %v1375_v1, %v5440_v7  ;;  %v4357_v14 = vadd.f32 %v1761_v4, %v5443_v8  ;;  %v1377_v15 = vpop.f32.mrb[19].mxu0  ;;  %v1763_v16 = vpop.f32.mrb[19].mxu1 }
 0x1f4   :  { %v4294_v19 = vadd.f32 %v1377_v15, %v5446_v11  ;;  %v4358_v20 = vadd.f32 %v1763_v16, %v5449_v12 }
 0x1f5   :  { %v1892_v21 = vpack.c.bf16 %v4293_v13, %v4291_v9  ;;  %v1894_v22 = vpack.c.bf16 %v4357_v14, %v4355_v10 }
 0x1f6   :  { %v1893_v23 = vpack.c.bf16 %v4294_v19, %v4292_v17  ;;  %v1895_v28 = vpack.c.bf16 %v4358_v20, %v4356_v18 }
 0x1f7   :  { %v5540_v29 = vmax.bf16 %v6530_v31, %v1892_v21  ;;  %v5543_v30 = vmax.bf16 %v6530_v31, %v1894_v22 }
 0x1f8   :  { %v5546_v36 = vmax.bf16 %v6530_v31, %v1893_v23  ;;  %v5549_v37 = vmax.bf16 %v6530_v31, %v1895_v28  ;;  %v1381_v38 = vpop.f32.mrb[20].mxu0  ;;  %v1767_v39 = vpop.f32.mrb[20].mxu1 }
 0x1f9   :  { %v1383_v40 = vpop.f32.mrb[21].mxu0  ;;  %v1769_v41 = vpop.f32.mrb[21].mxu1  ;;  %v4295_v44 = vadd.f32 %v1381_v38, %v5440_v7  ;;  %v4359_v45 = vadd.f32 %v1767_v39, %v5443_v8 }
 0x1fa   :  { %v1385_v42 = vpop.f32.mrb[22].mxu0  ;;  %v1771_v43 = vpop.f32.mrb[22].mxu1  ;;  %v4296_v50 = vadd.f32 %v1383_v40, %v5446_v11  ;;  %v4360_v51 = vadd.f32 %v1769_v41, %v5449_v12 }
 0x1fb   :  { %v4297_v46 = vadd.f32 %v1385_v42, %v5440_v7  ;;  %v4361_v47 = vadd.f32 %v1771_v43, %v5443_v8  ;;  %v1387_v48 = vpop.f32.mrb[23].mxu0  ;;  %v1773_v49 = vpop.f32.mrb[23].mxu1 }
 0x1fc   :  { %v4298_v52 = vadd.f32 %v1387_v48, %v5446_v11  ;;  %v4362_v61 = vadd.f32 %v1773_v49, %v5449_v12 }
 0x1fd   :  { %v1896_v62 = vpack.c.bf16 %v4297_v46, %v4295_v44  ;;  %v1898_v63 = vpack.c.bf16 %v4361_v47, %v4359_v45 }
 0x1fe   :  { %v1897_v0 = vpack.c.bf16 %v4298_v52, %v4296_v50  ;;  %v1899_v1 = vpack.c.bf16 %v4362_v61, %v4360_v51 }
 0x1ff   :  { %v5560_v4 = vmax.bf16 %v6530_v31, %v1896_v62  ;;  %v5563_v9 = vmax.bf16 %v6530_v31, %v1898_v63 }
 0x200   :  { %v5566_v10 = vmax.bf16 %v6530_v31, %v1897_v0  ;;  %v5569_v13 = vmax.bf16 %v6530_v31, %v1899_v1  ;;  %v1391_v14 = vpop.f32.mrb[24].mxu0  ;;  %v1777_v15 = vpop.f32.mrb[24].mxu1 }
 0x201   :  { %6582 = vst [vmem:[#allocation24_spill] sm:$0xff] %v5563_v9  ;;  %v1393_v16 = vpop.f32.mrb[25].mxu0  ;;  %v1779_v17 = vpop.f32.mrb[25].mxu1  ;;  %v4299_v20 = vadd.f32 %v1391_v14, %v5440_v7  ;;  %v4363_v21 = vadd.f32 %v1777_v15, %v5443_v8 }
 0x202   :  { %6583 = vst [vmem:[#allocation25_spill] sm:$0xff] %v5569_v13  ;;  %v1395_v18 = vpop.f32.mrb[26].mxu0  ;;  %v1781_v19 = vpop.f32.mrb[26].mxu1  ;;  %v4300_v39 = vadd.f32 %v1393_v16, %v5446_v11  ;;  %v4364_v40 = vadd.f32 %v1779_v17, %v5449_v12 }
 0x203   :  { %v4301_v22 = vadd.f32 %v1395_v18, %v5440_v7  ;;  %v4365_v23 = vadd.f32 %v1781_v19, %v5443_v8  ;;  %v1397_v28 = vpop.f32.mrb[27].mxu0  ;;  %v1783_v38 = vpop.f32.mrb[27].mxu1 }
 0x204   :  { %v4302_v41 = vadd.f32 %v1397_v28, %v5446_v11  ;;  %v4366_v42 = vadd.f32 %v1783_v38, %v5449_v12 }
 0x205   :  { %v1900_v43 = vpack.c.bf16 %v4301_v22, %v4299_v20  ;;  %v1902_v44 = vpack.c.bf16 %v4365_v23, %v4363_v21 }
 0x206   :  { %v1901_v45 = vpack.c.bf16 %v4302_v41, %v4300_v39  ;;  %v1903_v46 = vpack.c.bf16 %v4366_v42, %v4364_v40 }
 0x207   :  { %v5580_v47 = vmax.bf16 %v6530_v31, %v1900_v43  ;;  %v5583_v48 = vmax.bf16 %v6530_v31, %v1902_v44 }
 0x208   :  { %v5586_v49 = vmax.bf16 %v6530_v31, %v1901_v45  ;;  %v5589_v50 = vmax.bf16 %v6530_v31, %v1903_v46  ;;  %v1401_v51 = vpop.f32.mrb[28].mxu0  ;;  %v1787_v52 = vpop.f32.mrb[28].mxu1 }
 0x209   :  { %6584 = vst [vmem:[#allocation26_spill] sm:$0xff] %v5583_v48  ;;  %v1403_v61 = vpop.f32.mrb[29].mxu0  ;;  %v1789_v62 = vpop.f32.mrb[29].mxu1  ;;  %v4303_v1 = vadd.f32 %v1401_v51, %v5440_v7  ;;  %v4367_v14 = vadd.f32 %v1787_v52, %v5443_v8 }
 0x20a   :  { %6585 = vst [vmem:[#allocation27_spill] sm:$0xff] %v5589_v50  ;;  %v1405_v63 = vpop.f32.mrb[30].mxu0  ;;  %v1791_v0 = vpop.f32.mrb[30].mxu1  ;;  %v4304_v19 = vadd.f32 %v1403_v61, %v5446_v11  ;;  %v4368_v20 = vadd.f32 %v1789_v62, %v5449_v12 }
 0x20b   :  { %v4305_v15 = vadd.f32 %v1405_v63, %v5440_v7  ;;  %v4369_v16 = vadd.f32 %v1791_v0, %v5443_v8  ;;  %v1407_v17 = vpop.f32.mrb[31].mxu0  ;;  %v1793_v18 = vpop.f32.mrb[31].mxu1 }
 0x20c   :  { %v4306_v21 = vadd.f32 %v1407_v17, %v5446_v11  ;;  %v4370_v22 = vadd.f32 %v1793_v18, %v5449_v12 }
 0x20d   :  { %v1904_v23 = vpack.c.bf16 %v4305_v15, %v4303_v1  ;;  %v1906_v28 = vpack.c.bf16 %v4369_v16, %v4367_v14 }
 0x20e   :  { %v1905_v38 = vpack.c.bf16 %v4306_v21, %v4304_v19  ;;  %v1907_v39 = vpack.c.bf16 %v4370_v22, %v4368_v20 }
 0x20f   :  { %v5600_v40 = vmax.bf16 %v6530_v31, %v1904_v23  ;;  %v5603_v41 = vmax.bf16 %v6530_v31, %v1906_v28 }
 0x210   :  { %v5606_v42 = vmax.bf16 %v6530_v31, %v1905_v38  ;;  %v5609_v43 = vmax.bf16 %v6530_v31, %v1907_v39  ;;  %v1411_v44 = vpop.f32.mrb[32].mxu0  ;;  %v1797_v45 = vpop.f32.mrb[32].mxu1 }
 0x211   :  { %6586 = vst [vmem:[#allocation28_spill] sm:$0xff] %v5603_v41  ;;  %v1413_v46 = vpop.f32.mrb[33].mxu0  ;;  %v1799_v51 = vpop.f32.mrb[33].mxu1  ;;  %v4307_v62 = vadd.f32 %v1411_v44, %v5440_v7  ;;  %v4371_v63 = vadd.f32 %v1797_v45, %v5443_v8 }
 0x212   :  { %6587 = vst [vmem:[#allocation29_spill] sm:$0xff] %v5609_v43  ;;  %v1415_v52 = vpop.f32.mrb[34].mxu0  ;;  %v1801_v61 = vpop.f32.mrb[34].mxu1  ;;  %v4308_v16 = vadd.f32 %v1413_v46, %v5446_v11  ;;  %v4372_v17 = vadd.f32 %v1799_v51, %v5449_v12 }
 0x213   :  { %v4309_v0 = vadd.f32 %v1415_v52, %v5440_v7  ;;  %v4373_v1 = vadd.f32 %v1801_v61, %v5443_v8  ;;  %v1417_v14 = vpop.f32.mrb[35].mxu0  ;;  %v1803_v15 = vpop.f32.mrb[35].mxu1 }
 0x214   :  { %v4310_v18 = vadd.f32 %v1417_v14, %v5446_v11  ;;  %v4374_v19 = vadd.f32 %v1803_v15, %v5449_v12 }
 0x215   :  { %v1908_v20 = vpack.c.bf16 %v4309_v0, %v4307_v62  ;;  %v1910_v21 = vpack.c.bf16 %v4373_v1, %v4371_v63 }
 0x216   :  { %v1909_v22 = vpack.c.bf16 %v4310_v18, %v4308_v16  ;;  %v1911_v23 = vpack.c.bf16 %v4374_v19, %v4372_v17 }
 0x217   :  { %v5620_v28 = vmax.bf16 %v6530_v31, %v1908_v20  ;;  %v5623_v38 = vmax.bf16 %v6530_v31, %v1910_v21 }
 0x218   :  { %v5626_v39 = vmax.bf16 %v6530_v31, %v1909_v22  ;;  %v5629_v44 = vmax.bf16 %v6530_v31, %v1911_v23  ;;  %v1421_v45 = vpop.f32.mrb[36].mxu0  ;;  %v1807_v46 = vpop.f32.mrb[36].mxu1 }
 0x219   :  { %6588 = vst [vmem:[#allocation30_spill] sm:$0xff] %v5623_v38  ;;  %v1423_v51 = vpop.f32.mrb[37].mxu0  ;;  %v1809_v52 = vpop.f32.mrb[37].mxu1  ;;  %v4311_v63 = vadd.f32 %v1421_v45, %v5440_v7  ;;  %v4375_v0 = vadd.f32 %v1807_v46, %v5443_v8 }
 0x21a   :  { %6589 = vst [vmem:[#allocation31_spill] sm:$0xff] %v5629_v44  ;;  %v1425_v61 = vpop.f32.mrb[38].mxu0  ;;  %v1811_v62 = vpop.f32.mrb[38].mxu1  ;;  %v4312_v17 = vadd.f32 %v1423_v51, %v5446_v11  ;;  %v4376_v18 = vadd.f32 %v1809_v52, %v5449_v12 }
 0x21b   :  { %v4313_v1 = vadd.f32 %v1425_v61, %v5440_v7  ;;  %v4377_v14 = vadd.f32 %v1811_v62, %v5443_v8  ;;  %v1427_v15 = vpop.f32.mrb[39].mxu0  ;;  %v1813_v16 = vpop.f32.mrb[39].mxu1 }
 0x21c   :  { %v4314_v19 = vadd.f32 %v1427_v15, %v5446_v11  ;;  %v4378_v20 = vadd.f32 %v1813_v16, %v5449_v12 }
 0x21d   :  { %v1912_v21 = vpack.c.bf16 %v4313_v1, %v4311_v63  ;;  %v1914_v22 = vpack.c.bf16 %v4377_v14, %v4375_v0 }
 0x21e   :  { %v1913_v23 = vpack.c.bf16 %v4314_v19, %v4312_v17  ;;  %v1915_v45 = vpack.c.bf16 %v4378_v20, %v4376_v18 }
 0x21f   :  { %v5640_v46 = vmax.bf16 %v6530_v31, %v1912_v21  ;;  %v5643_v61 = vmax.bf16 %v6530_v31, %v1914_v22 }
 0x220   :  { %v5646_v62 = vmax.bf16 %v6530_v31, %v1913_v23  ;;  %v5649_v51 = vmax.bf16 %v6530_v31, %v1915_v45  ;;  %v1431_v52 = vpop.f32.mrb[40].mxu0  ;;  %v1817_v15 = vpop.f32.mrb[40].mxu1 }
 0x221   :  { %6590 = vst [vmem:[#allocation32_spill] sm:$0xff] %v5643_v61  ;;  %v1433_v6 = vpop.f32.mrb[41].mxu0  ;;  %v1819_v16 = vpop.f32.mrb[41].mxu1  ;;  %v4315_v1 = vadd.f32 %v1431_v52, %v5440_v7  ;;  %v4379_v14 = vadd.f32 %v1817_v15, %v5443_v8 }
 0x222   :  { %6591 = vst [vmem:[#allocation33_spill] sm:$0xff] %v5649_v51  ;;  %v1435_v63 = vpop.f32.mrb[42].mxu0  ;;  %v1821_v0 = vpop.f32.mrb[42].mxu1  ;;  %v4316_v21 = vadd.f32 %v1433_v6, %v5446_v11  ;;  %v4380_v22 = vadd.f32 %v1819_v16, %v5449_v12 }
 0x223   :  { %v4317_v17 = vadd.f32 %v1435_v63, %v5440_v7  ;;  %v4381_v18 = vadd.f32 %v1821_v0, %v5443_v8  ;;  %v1437_v19 = vpop.f32.mrb[43].mxu0  ;;  %v1823_v20 = vpop.f32.mrb[43].mxu1 }
 0x224   :  { %v4318_v23 = vadd.f32 %v1437_v19, %v5446_v11  ;;  %v4382_v45 = vadd.f32 %v1823_v20, %v5449_v12 }
 0x225   :  { %v1916_v31 = vpack.c.bf16 %v4317_v17, %v4315_v1  ;;  %v1918_v5 = vpack.c.bf16 %v4381_v18, %v4379_v14 }
 0x226   :  { %v1917_v3 = vpack.c.bf16 %v4318_v23, %v4316_v21  ;;  %v1919_v52 = vpack.c.bf16 %v4382_v45, %v4380_v22 }
 0x227   :  { %v5660_v15 = vmax.bf16 %v6592_v2, %v1916_v31  ;;  %v5663_v63 = vmax.bf16 %v6592_v2, %v1918_v5 }
 0x228   :  { %v5666_v0 = vmax.bf16 %v6592_v2, %v1917_v3  ;;  %v5669_v6 = vmax.bf16 %v6592_v2, %v1919_v52  ;;  %v1441_v16 = vpop.f32.mrb[44].mxu0  ;;  %v1827_v19 = vpop.f32.mrb[44].mxu1 }
 0x229   :  { %6593 = vst [vmem:[#allocation34_spill] sm:$0xff] %v5663_v63  ;;  %v1443_v61 = vpop.f32.mrb[45].mxu0  ;;  %v1829_v20 = vpop.f32.mrb[45].mxu1  ;;  %v4319_v17 = vadd.f32 %v1441_v16, %v5440_v7  ;;  %v4383_v31 = vadd.f32 %v1827_v19, %v5443_v8 }
 0x22a   :  { %6594 = vst [vmem:[#allocation35_spill] sm:$0xff] %v5669_v6  ;;  %v1445_v1 = vpop.f32.mrb[46].mxu0  ;;  %v1831_v14 = vpop.f32.mrb[46].mxu1  ;;  %v4320_v22 = vadd.f32 %v1443_v61, %v5446_v11  ;;  %v4384_v23 = vadd.f32 %v1829_v20, %v5449_v12 }
 0x22b   :  { %v4321_v18 = vadd.f32 %v1445_v1, %v5440_v7  ;;  %v4385_v5 = vadd.f32 %v1831_v14, %v5443_v8  ;;  %v1447_v21 = vpop.f32.mrb[47].mxu0  ;;  %v1833_v3 = vpop.f32.mrb[47].mxu1 }
 0x22c   :  { %v4322_v45 = vadd.f32 %v1447_v21, %v5446_v11  ;;  %v4386_v52 = vadd.f32 %v1833_v3, %v5449_v12 }
 0x22d   :  { %v1920_v63 = vpack.c.bf16 %v4321_v18, %v4319_v17  ;;  %v1922_v6 = vpack.c.bf16 %v4385_v5, %v4383_v31 }
 0x22e   :  { %v1921_v51 = vpack.c.bf16 %v4322_v45, %v4320_v22  ;;  %v1923_v16 = vpack.c.bf16 %v4386_v52, %v4384_v23 }
 0x22f   :  { %v5680_v19 = vmax.bf16 %v6592_v2, %v1920_v63  ;;  %v5683_v1 = vmax.bf16 %v6592_v2, %v1922_v6 }
 0x230   :  { %v5686_v14 = vmax.bf16 %v6592_v2, %v1921_v51  ;;  %v5689_v61 = vmax.bf16 %v6592_v2, %v1923_v16  ;;  %v1451_v20 = vpop.f32.mrb[48].mxu0  ;;  %v1837_v21 = vpop.f32.mrb[48].mxu1 }
 0x231   :  { %6595 = vst [vmem:[#allocation36_spill] sm:$0xff] %v5683_v1  ;;  %v1453_v38 = vpop.f32.mrb[49].mxu0  ;;  %v1839_v3 = vpop.f32.mrb[49].mxu1  ;;  %v4323_v18 = vadd.f32 %v1451_v20, %v5440_v7  ;;  %v4387_v63 = vadd.f32 %v1837_v21, %v5443_v8 }
 0x232   :  { %6596 = vst [vmem:[#allocation37_spill] sm:$0xff] %v5689_v61  ;;  %v1455_v17 = vpop.f32.mrb[50].mxu0  ;;  %v1841_v31 = vpop.f32.mrb[50].mxu1  ;;  %v4324_v23 = vadd.f32 %v1453_v38, %v5446_v11  ;;  %v4388_v45 = vadd.f32 %v1839_v3, %v5449_v12 }
 0x233   :  { %v4325_v5 = vadd.f32 %v1455_v17, %v5440_v7  ;;  %v4389_v6 = vadd.f32 %v1841_v31, %v5443_v8  ;;  %v1457_v22 = vpop.f32.mrb[51].mxu0  ;;  %v1843_v51 = vpop.f32.mrb[51].mxu1 }
 0x234   :  { %v4326_v52 = vadd.f32 %v1457_v22, %v5446_v11  ;;  %v4390_v16 = vadd.f32 %v1843_v51, %v5449_v12 }
 0x235   :  { %v1924_v1 = vpack.c.bf16 %v4325_v5, %v4323_v18  ;;  %v1926_v61 = vpack.c.bf16 %v4389_v6, %v4387_v63 }
 0x236   :  { %v1925_v44 = vpack.c.bf16 %v4326_v52, %v4324_v23  ;;  %v1927_v20 = vpack.c.bf16 %v4390_v16, %v4388_v45 }
 0x237   :  { %v5700_v21 = vmax.bf16 %v6592_v2, %v1924_v1  ;;  %v5703_v17 = vmax.bf16 %v6592_v2, %v1926_v61 }
 0x238   :  { %v5706_v31 = vmax.bf16 %v6592_v2, %v1925_v44  ;;  %v5709_v38 = vmax.bf16 %v6592_v2, %v1927_v20  ;;  %v1461_v3 = vpop.f32.mrb[52].mxu0  ;;  %v1847_v22 = vpop.f32.mrb[52].mxu1 }
 0x239   :  { %6597 = vst [vmem:[#allocation38_spill] sm:$0xff] %v5703_v17  ;;  %v1463_v41 = vpop.f32.mrb[53].mxu0  ;;  %v1849_v51 = vpop.f32.mrb[53].mxu1  ;;  %v4327_v5 = vadd.f32 %v1461_v3, %v5440_v7  ;;  %v4391_v1 = vadd.f32 %v1847_v22, %v5443_v8 }
 0x23a   :  { %6598 = vst [vmem:[#allocation39_spill] sm:$0xff] %v5709_v38  ;;  %v1465_v18 = vpop.f32.mrb[54].mxu0  ;;  %v1851_v63 = vpop.f32.mrb[54].mxu1  ;;  %v4328_v45 = vadd.f32 %v1463_v41, %v5446_v11  ;;  %v4392_v52 = vadd.f32 %v1849_v51, %v5449_v12 }
 0x23b   :  { %v4329_v6 = vadd.f32 %v1465_v18, %v5440_v7  ;;  %v4393_v61 = vadd.f32 %v1851_v63, %v5443_v8  ;;  %v1467_v23 = vpop.f32.mrb[55].mxu0  ;;  %v1853_v44 = vpop.f32.mrb[55].mxu1 }
 0x23c   :  { %v4330_v16 = vadd.f32 %v1467_v23, %v5446_v11  ;;  %v4394_v20 = vadd.f32 %v1853_v44, %v5449_v12 }
 0x23d   :  { %v1928_v17 = vpack.c.bf16 %v4329_v6, %v4327_v5  ;;  %v1930_v38 = vpack.c.bf16 %v4393_v61, %v4391_v1 }
 0x23e   :  { %v1929_v43 = vpack.c.bf16 %v4330_v16, %v4328_v45  ;;  %v1931_v3 = vpack.c.bf16 %v4394_v20, %v4392_v52 }
 0x23f   :  { %v5720_v22 = vmax.bf16 %v6592_v2, %v1928_v17  ;;  %v5723_v18 = vmax.bf16 %v6592_v2, %v1930_v38 }
 0x240   :  { %v5726_v63 = vmax.bf16 %v6592_v2, %v1929_v43  ;;  %v5729_v41 = vmax.bf16 %v6592_v2, %v1931_v3  ;;  %v1471_v51 = vpop.f32.mrb[56].mxu0  ;;  %v1857_v23 = vpop.f32.mrb[56].mxu1 }
 0x241   :  { %6599 = vst [vmem:[#allocation40_spill] sm:$0xff] %v5723_v18  ;;  %v1473_v48 = vpop.f32.mrb[57].mxu0  ;;  %v1859_v44 = vpop.f32.mrb[57].mxu1  ;;  %v4331_v6 = vadd.f32 %v1471_v51, %v5440_v7  ;;  %v4395_v17 = vadd.f32 %v1857_v23, %v5443_v8 }
 0x242   :  { %6600 = vst [vmem:[#allocation41_spill] sm:$0xff] %v5729_v41  ;;  %v1475_v5 = vpop.f32.mrb[58].mxu0  ;;  %v1861_v1 = vpop.f32.mrb[58].mxu1  ;;  %v4332_v52 = vadd.f32 %v1473_v48, %v5446_v11  ;;  %v4396_v16 = vadd.f32 %v1859_v44, %v5449_v12 }
 0x243   :  { %v4333_v61 = vadd.f32 %v1475_v5, %v5440_v7  ;;  %v4397_v38 = vadd.f32 %v1861_v1, %v5443_v8  ;;  %v1477_v45 = vpop.f32.mrb[59].mxu0  ;;  %v1863_v43 = vpop.f32.mrb[59].mxu1 }
 0x244   :  { %v4334_v20 = vadd.f32 %v1477_v45, %v5446_v11  ;;  %v4398_v3 = vadd.f32 %v1863_v43, %v5449_v12 }
 0x245   :  { %v1932_v18 = vpack.c.bf16 %v4333_v61, %v4331_v6  ;;  %v1934_v41 = vpack.c.bf16 %v4397_v38, %v4395_v17 }
 0x246   :  { %v1933_v50 = vpack.c.bf16 %v4334_v20, %v4332_v52  ;;  %v1935_v51 = vpack.c.bf16 %v4398_v3, %v4396_v16 }
 0x247   :  { %v5740_v23 = vmax.bf16 %v6592_v2, %v1932_v18  ;;  %v5743_v5 = vmax.bf16 %v6592_v2, %v1934_v41 }
 0x248   :  { %v5746_v1 = vmax.bf16 %v6592_v2, %v1933_v50  ;;  %v5749_v48 = vmax.bf16 %v6592_v2, %v1935_v51  ;;  %v1481_v44 = vpop.f32.mrb[60].mxu0  ;;  %v1867_v45 = vpop.f32.mrb[60].mxu1 }
 0x249   :  { %6601 = vst [vmem:[#allocation42_spill] sm:$0xff] %v5743_v5  ;;  %v1483_v9 = vpop.f32.mrb[61].mxu0  ;;  %v1869_v43 = vpop.f32.mrb[61].mxu1  ;;  %v4335_v61 = vadd.f32 %v1481_v44, %v5440_v7  ;;  %v4399_v18 = vadd.f32 %v1867_v45, %v5443_v8 }
 0x24a   :  { %6602 = vst [vmem:[#allocation43_spill] sm:$0xff] %v5749_v48  ;;  %v1485_v6 = vpop.f32.mrb[62].mxu0  ;;  %v1871_v17 = vpop.f32.mrb[62].mxu1  ;;  %v4336_v16 = vadd.f32 %v1483_v9, %v5446_v11  ;;  %v4400_v20 = vadd.f32 %v1869_v43, %v5449_v12 }
 0x24b   :  { %v4337_v38 = vadd.f32 %v1485_v6, %v5440_v7  ;;  %v4401_v41 = vadd.f32 %v1871_v17, %v5443_v8  ;;  %v1487_v52 = vpop.f32.mrb[63].mxu0  ;;  %v1873_v50 = vpop.f32.mrb[63].mxu1 }
 0x24c   :  { %v4338_v3 = vadd.f32 %v1487_v52, %v5446_v11  ;;  %v4402_v51 = vadd.f32 %v1873_v50, %v5449_v12 }
 0x24d   :  { %v1936_v5 = vpack.c.bf16 %v4337_v38, %v4335_v61  ;;  %v1938_v48 = vpack.c.bf16 %v4401_v41, %v4399_v18 }
 0x24e   :  { %v1937_v13 = vpack.c.bf16 %v4338_v3, %v4336_v16  ;;  %v1939_v44 = vpack.c.bf16 %v4402_v51, %v4400_v20 }
 0x24f   :  { %v5760_v45 = vmax.bf16 %v6592_v2, %v1936_v5  ;;  %v5763_v7 = vmax.bf16 %v6592_v2, %v1938_v48 }
 0x250   :  { %v5766_v8 = vmax.bf16 %v6592_v2, %v1937_v13  ;;  %v5769_v9 = vmax.bf16 %v6592_v2, %v1939_v44 }
 0x251   :  { %5323 = dma.done.wait [#allocation4], 16384 }
 0x252   :  { %5324 = vsyncadd [#allocation4], 4294950912  ;;  %2190 = vmatprep.mubr.bf16.mxu0 %v5466_v34  ;;  %2576 = vmatprep.mubr.bf16.mxu1 %v5466_v34  ;;  %v2009_v11 = vld [vmem:[#allocation2 + $0x8] sm:$0xff]  ;;  %v2011_v12 = vld [vmem:[#allocation2 + $0x18] sm:$0xff] }
 0x253   :  { %v2008_v43 = vld [vmem:[#allocation2] sm:$0xff]  ;;  %2158 = vmatprep.subr.bf16.mxu0 %v2009_v11  ;;  %2544 = vmatprep.subr.bf16.mxu1 %v2011_v12  ;;  %v2010_v5 = vld [vmem:[#allocation2 + $0x10] sm:$0xff]  ;;  %v2013_v48 = vld [vmem:[#allocation2 + $0x28] sm:$0xff] }
 0x254   :  { %v2015_v6 = vld [vmem:[#allocation2 + $0x38] sm:$0xff]  ;;  %2159 = vmatpush1.bf16.msra.mxu0 %v2008_v43  ;;  %2545 = vmatpush1.bf16.msra.mxu1 %v2010_v5  ;;  %v2012_v13 = vld [vmem:[#allocation2 + $0x20] sm:$0xff]  ;;  %v2014_v17 = vld [vmem:[#allocation2 + $0x30] sm:$0xff] }
 0x255   :  { %2160 = vmatprep.subr.bf16.mxu0 %v2013_v48  ;;  %2546 = vmatprep.subr.bf16.mxu1 %v2015_v6  ;;  %v2017_v61 = vld [vmem:[#allocation2 + $0x48] sm:$0xff]  ;;  %v2019_v18 = vld [vmem:[#allocation2 + $0x58] sm:$0xff]  ;;  %v2016_v34 = vld [vmem:[#allocation2 + $0x40] sm:$0xff] }
 0x256   :  { %v2018_v38 = vld [vmem:[#allocation2 + $0x50] sm:$0xff]  ;;  %v2021_v41 = vld [vmem:[#allocation2 + $0x68] sm:$0xff]  ;;  %v2023_v52 = vld [vmem:[#allocation2 + $0x78] sm:$0xff] }
 0x257   :  { %v2020_v50 = vld [vmem:[#allocation2 + $0x60] sm:$0xff]  ;;  %v2022_v16 = vld [vmem:[#allocation2 + $0x70] sm:$0xff]  ;;  %v2025_v20 = vld [vmem:[#allocation2 + $0x88] sm:$0xff] }
 0x258   :  { %2161 = vmatpush1.bf16.msra.mxu0 %v2012_v13  ;;  %2547 = vmatpush1.bf16.msra.mxu1 %v2014_v17  ;;  %v2027_v3 = vld [vmem:[#allocation2 + $0x98] sm:$0xff]  ;;  %v2024_v51 = vld [vmem:[#allocation2 + $0x80] sm:$0xff]  ;;  %v2026_v44 = vld [vmem:[#allocation2 + $0x90] sm:$0xff] }
 0x259   :  { %2162 = vmatprep.subr.bf16.mxu0 %v2017_v61  ;;  %2548 = vmatprep.subr.bf16.mxu1 %v2019_v18  ;;  %v2029_v11 = vld [vmem:[#allocation2 + $0xa8] sm:$0xff]  ;;  %v2031_v12 = vld [vmem:[#allocation2 + $0xb8] sm:$0xff]  ;;  %v2028_v43 = vld [vmem:[#allocation2 + $0xa0] sm:$0xff] }
 0x25a   :  { %v2030_v5 = vld [vmem:[#allocation2 + $0xb0] sm:$0xff]  ;;  %v2033_v48 = vld [vmem:[#allocation2 + $0xc8] sm:$0xff]  ;;  %v2035_v6 = vld [vmem:[#allocation2 + $0xd8] sm:$0xff] }
 0x25b   :  { %v2032_v13 = vld [vmem:[#allocation2 + $0xc0] sm:$0xff]  ;;  %v2034_v17 = vld [vmem:[#allocation2 + $0xd0] sm:$0xff]  ;;  %v2037_v61 = vld [vmem:[#allocation2 + $0xe8] sm:$0xff] }
 0x25c   :  { %2163 = vmatpush1.bf16.msra.mxu0 %v2016_v34  ;;  %2549 = vmatpush1.bf16.msra.mxu1 %v2018_v38  ;;  %v2039_v18 = vld [vmem:[#allocation2 + $0xf8] sm:$0xff]  ;;  %v2036_v34 = vld [vmem:[#allocation2 + $0xe0] sm:$0xff]  ;;  %v2038_v38 = vld [vmem:[#allocation2 + $0xf0] sm:$0xff] }
 0x25d   :  { %2164 = vmatprep.subr.bf16.mxu0 %v2021_v41  ;;  %2550 = vmatprep.subr.bf16.mxu1 %v2023_v52  ;;  %v2041_v41 = vld [vmem:[#allocation2 + $0x108] sm:$0xff]  ;;  %v2043_v52 = vld [vmem:[#allocation2 + $0x118] sm:$0xff] }
 0x260   :  { %2165 = vmatpush1.bf16.msra.mxu0 %v2020_v50  ;;  %2551 = vmatpush1.bf16.msra.mxu1 %v2022_v16  ;;  %v2040_v50 = vld [vmem:[#allocation2 + $0x100] sm:$0xff]  ;;  %v2042_v16 = vld [vmem:[#allocation2 + $0x110] sm:$0xff] }
 0x261   :  { %2166 = vmatprep.subr.bf16.mxu0 %v2025_v20  ;;  %2552 = vmatprep.subr.bf16.mxu1 %v2027_v3  ;;  %v2045_v20 = vld [vmem:[#allocation2 + $0x128] sm:$0xff]  ;;  %v2047_v3 = vld [vmem:[#allocation2 + $0x138] sm:$0xff] }
 0x264   :  { %2167 = vmatpush1.bf16.msra.mxu0 %v2024_v51  ;;  %2553 = vmatpush1.bf16.msra.mxu1 %v2026_v44  ;;  %v2044_v51 = vld [vmem:[#allocation2 + $0x120] sm:$0xff]  ;;  %v2046_v44 = vld [vmem:[#allocation2 + $0x130] sm:$0xff] }
 0x265   :  { %2168 = vmatprep.subr.bf16.mxu0 %v2029_v11  ;;  %2554 = vmatprep.subr.bf16.mxu1 %v2031_v12  ;;  %v2049_v11 = vld [vmem:[#allocation2 + $0x148] sm:$0xff]  ;;  %v2051_v12 = vld [vmem:[#allocation2 + $0x158] sm:$0xff] }
 0x268   :  { %2169 = vmatpush1.bf16.msra.mxu0 %v2028_v43  ;;  %2555 = vmatpush1.bf16.msra.mxu1 %v2030_v5  ;;  %v2048_v43 = vld [vmem:[#allocation2 + $0x140] sm:$0xff]  ;;  %v2050_v5 = vld [vmem:[#allocation2 + $0x150] sm:$0xff] }
 0x269   :  { %2170 = vmatprep.subr.bf16.mxu0 %v2033_v48  ;;  %2556 = vmatprep.subr.bf16.mxu1 %v2035_v6  ;;  %v2053_v48 = vld [vmem:[#allocation2 + $0x168] sm:$0xff]  ;;  %v2055_v6 = vld [vmem:[#allocation2 + $0x178] sm:$0xff] }
 0x26c   :  { %2171 = vmatpush1.bf16.msra.mxu0 %v2032_v13  ;;  %2557 = vmatpush1.bf16.msra.mxu1 %v2034_v17  ;;  %v2052_v13 = vld [vmem:[#allocation2 + $0x160] sm:$0xff]  ;;  %v2054_v17 = vld [vmem:[#allocation2 + $0x170] sm:$0xff] }
 0x26d   :  { %2172 = vmatprep.subr.bf16.mxu0 %v2037_v61  ;;  %2558 = vmatprep.subr.bf16.mxu1 %v2039_v18  ;;  %v2057_v61 = vld [vmem:[#allocation2 + $0x188] sm:$0xff]  ;;  %v2059_v18 = vld [vmem:[#allocation2 + $0x198] sm:$0xff] }
 0x270   :  { %2173 = vmatpush1.bf16.msra.mxu0 %v2036_v34  ;;  %2559 = vmatpush1.bf16.msra.mxu1 %v2038_v38  ;;  %v2056_v34 = vld [vmem:[#allocation2 + $0x180] sm:$0xff]  ;;  %v2058_v38 = vld [vmem:[#allocation2 + $0x190] sm:$0xff] }
 0x271   :  { %2174 = vmatprep.subr.bf16.mxu0 %v2041_v41  ;;  %2560 = vmatprep.subr.bf16.mxu1 %v2043_v52  ;;  %v2061_v41 = vld [vmem:[#allocation2 + $0x1a8] sm:$0xff]  ;;  %v2063_v52 = vld [vmem:[#allocation2 + $0x1b8] sm:$0xff] }
 0x274   :  { %2175 = vmatpush1.bf16.msra.mxu0 %v2040_v50  ;;  %2561 = vmatpush1.bf16.msra.mxu1 %v2042_v16  ;;  %v2060_v50 = vld [vmem:[#allocation2 + $0x1a0] sm:$0xff]  ;;  %v2062_v16 = vld [vmem:[#allocation2 + $0x1b0] sm:$0xff] }
 0x275   :  { %2176 = vmatprep.subr.bf16.mxu0 %v2045_v20  ;;  %2562 = vmatprep.subr.bf16.mxu1 %v2047_v3  ;;  %v2065_v20 = vld [vmem:[#allocation2 + $0x1c8] sm:$0xff]  ;;  %v2067_v3 = vld [vmem:[#allocation2 + $0x1d8] sm:$0xff] }
 0x278   :  { %2177 = vmatpush1.bf16.msra.mxu0 %v2044_v51  ;;  %2563 = vmatpush1.bf16.msra.mxu1 %v2046_v44  ;;  %v2064_v51 = vld [vmem:[#allocation2 + $0x1c0] sm:$0xff]  ;;  %v2066_v44 = vld [vmem:[#allocation2 + $0x1d0] sm:$0xff] }
 0x279   :  { %2178 = vmatprep.subr.bf16.mxu0 %v2049_v11  ;;  %2564 = vmatprep.subr.bf16.mxu1 %v2051_v12  ;;  %v2069_v11 = vld [vmem:[#allocation2 + $0x1e8] sm:$0xff]  ;;  %v2071_v12 = vld [vmem:[#allocation2 + $0x1f8] sm:$0xff] }
 0x27c   :  { %2179 = vmatpush1.bf16.msra.mxu0 %v2048_v43  ;;  %2565 = vmatpush1.bf16.msra.mxu1 %v2050_v5  ;;  %v2068_v43 = vld [vmem:[#allocation2 + $0x1e0] sm:$0xff]  ;;  %v2070_v5 = vld [vmem:[#allocation2 + $0x1f0] sm:$0xff] }
 0x27d   :  { %2180 = vmatprep.subr.bf16.mxu0 %v2053_v48  ;;  %2566 = vmatprep.subr.bf16.mxu1 %v2055_v6  ;;  %v2073_v48 = vld [vmem:[#allocation2 + $0x208] sm:$0xff]  ;;  %v2075_v6 = vld [vmem:[#allocation2 + $0x218] sm:$0xff] }
 0x280   :  { %2181 = vmatpush1.bf16.msra.mxu0 %v2052_v13  ;;  %2567 = vmatpush1.bf16.msra.mxu1 %v2054_v17  ;;  %v2072_v13 = vld [vmem:[#allocation2 + $0x200] sm:$0xff]  ;;  %v2074_v17 = vld [vmem:[#allocation2 + $0x210] sm:$0xff] }
 0x281   :  { %2182 = vmatprep.subr.bf16.mxu0 %v2057_v61  ;;  %2568 = vmatprep.subr.bf16.mxu1 %v2059_v18  ;;  %v2077_v61 = vld [vmem:[#allocation2 + $0x228] sm:$0xff]  ;;  %v2079_v18 = vld [vmem:[#allocation2 + $0x238] sm:$0xff] }
 0x284   :  { %2183 = vmatpush1.bf16.msra.mxu0 %v2056_v34  ;;  %2569 = vmatpush1.bf16.msra.mxu1 %v2058_v38  ;;  %v2076_v34 = vld [vmem:[#allocation2 + $0x220] sm:$0xff]  ;;  %v2078_v38 = vld [vmem:[#allocation2 + $0x230] sm:$0xff] }
 0x285   :  { %2184 = vmatprep.subr.bf16.mxu0 %v2061_v41  ;;  %2570 = vmatprep.subr.bf16.mxu1 %v2063_v52  ;;  %v2081_v41 = vld [vmem:[#allocation2 + $0x248] sm:$0xff]  ;;  %v2083_v52 = vld [vmem:[#allocation2 + $0x258] sm:$0xff] }
 0x288   :  { %2185 = vmatpush1.bf16.msra.mxu0 %v2060_v50  ;;  %2571 = vmatpush1.bf16.msra.mxu1 %v2062_v16  ;;  %v2080_v50 = vld [vmem:[#allocation2 + $0x240] sm:$0xff]  ;;  %v2085_v16 = vld [vmem:[#allocation2 + $0x268] sm:$0xff] }
 0x289   :  { %2186 = vmatprep.subr.bf16.mxu0 %v2065_v20  ;;  %2572 = vmatprep.subr.bf16.mxu1 %v2067_v3  ;;  %v2087_v20 = vld [vmem:[#allocation2 + $0x278] sm:$0xff]  ;;  %v2086_v3 = vld [vmem:[#allocation2 + $0x270] sm:$0xff] }
 0x28c   :  { %2187 = vmatpush1.bf16.msra.mxu0 %v2064_v51  ;;  %2573 = vmatpush1.bf16.msra.mxu1 %v2066_v44  ;;  %v2089_v51 = vld [vmem:[#allocation2 + $0x288] sm:$0xff]  ;;  %v2091_v44 = vld [vmem:[#allocation2 + $0x298] sm:$0xff] }
 0x28d   :  { %2188 = vmatprep.subr.bf16.mxu0 %v2069_v11  ;;  %2574 = vmatprep.subr.bf16.mxu1 %v2071_v12  ;;  %v2088_v11 = vld [vmem:[#allocation2 + $0x280] sm:$0xff]  ;;  %v2093_v12 = vld [vmem:[#allocation2 + $0x2a8] sm:$0xff] }
 0x290   :  { %2189 = vmatpush1.bf16.msra.mxu0 %v2068_v43  ;;  %2575 = vmatpush1.bf16.msra.mxu1 %v2070_v5  ;;  %v2092_v43 = vld [vmem:[#allocation2 + $0x2a0] sm:$0xff]  ;;  %v2094_v5 = vld [vmem:[#allocation2 + $0x2b0] sm:$0xff] }
 0x291   :  { %2351 = vmatprep.subr.bf16.mxu0 %v2073_v48  ;;  %2737 = vmatprep.subr.bf16.mxu1 %v2075_v6  ;;  %v2097_v48 = vld [vmem:[#allocation2 + $0x2c8] sm:$0xff]  ;;  %v2099_v6 = vld [vmem:[#allocation2 + $0x2d8] sm:$0xff] }
 0x293   :  { %2191 = vmatmul.mubr.bf16.vlgmr.msra.gmra.mrb[64].mxu0 %v5460_v32  ;;  %2577 = vmatmul.mubr.bf16.vlgmr.msra.gmra.mrb[64].mxu1 %v5460_v32  ;;  %v2082_v32 = vld [vmem:[#allocation2 + $0x250] sm:$0xff] }
 0x294   :  { %2352 = vmatpush1.bf16.msra.mxu0 %v2072_v13  ;;  %2738 = vmatpush1.bf16.msra.mxu1 %v2074_v17  ;;  %v2096_v13 = vld [vmem:[#allocation2 + $0x2c0] sm:$0xff]  ;;  %v2101_v17 = vld [vmem:[#allocation2 + $0x2e8] sm:$0xff] }
 0x295   :  { %2200 = vmatprep.mubr.bf16.mxu0 %v5486_v58  ;;  %2586 = vmatprep.mubr.bf16.mxu1 %v5486_v58  ;;  %v2084_v58 = vld [vmem:[#allocation2 + $0x260] sm:$0xff] }
 0x296   :  { %2353 = vmatprep.subr.bf16.mxu0 %v2077_v61  ;;  %2739 = vmatprep.subr.bf16.mxu1 %v2079_v18  ;;  %v2100_v61 = vld [vmem:[#allocation2 + $0x2e0] sm:$0xff]  ;;  %v2102_v18 = vld [vmem:[#allocation2 + $0x2f0] sm:$0xff] }
 0x298   :  { %2354 = vmatpush1.bf16.msra.mxu0 %v2076_v34  ;;  %2740 = vmatpush1.bf16.msra.mxu1 %v2078_v38  ;;  %v2105_v34 = vld [vmem:[#allocation2 + $0x308] sm:$0xff]  ;;  %v2107_v38 = vld [vmem:[#allocation2 + $0x318] sm:$0xff] }
 0x299   :  { %2355 = vmatprep.subr.bf16.mxu0 %v2081_v41  ;;  %2741 = vmatprep.subr.bf16.mxu1 %v2083_v52  ;;  %v2104_v41 = vld [vmem:[#allocation2 + $0x300] sm:$0xff]  ;;  %v2109_v52 = vld [vmem:[#allocation2 + $0x328] sm:$0xff] }
 0x29b   :  { %2201 = vmatmul.mubr.bf16.gmra.mrb[68].mxu0 %v5480_v56  ;;  %2587 = vmatmul.mubr.bf16.gmra.mrb[68].mxu1 %v5480_v56  ;;  %v2090_v56 = vld [vmem:[#allocation2 + $0x290] sm:$0xff] }
 0x29c   :  { %2210 = vmatprep.mubr.bf16.mxu0 %v5506_v26  ;;  %2596 = vmatprep.mubr.bf16.mxu1 %v5506_v26  ;;  %v2095_v26 = vld [vmem:[#allocation2 + $0x2b8] sm:$0xff] }
 0x29d   :  { %2356 = vmatpush1.bf16.msra.mxu0 %v2080_v50  ;;  %2742 = vmatpush1.bf16.msra.mxu1 %v2082_v32  ;;  %v2108_v50 = vld [vmem:[#allocation2 + $0x320] sm:$0xff]  ;;  %v2110_v32 = vld [vmem:[#allocation2 + $0x330] sm:$0xff] }
 0x29e   :  { %2357 = vmatprep.subr.bf16.mxu0 %v2085_v16  ;;  %2743 = vmatprep.subr.bf16.mxu1 %v2087_v20  ;;  %v2113_v16 = vld [vmem:[#allocation2 + $0x348] sm:$0xff]  ;;  %v2115_v20 = vld [vmem:[#allocation2 + $0x358] sm:$0xff] }
 0x2a1   :  { %2358 = vmatpush1.bf16.msra.mxu0 %v2084_v58  ;;  %2744 = vmatpush1.bf16.msra.mxu1 %v2086_v3  ;;  %v2112_v58 = vld [vmem:[#allocation2 + $0x340] sm:$0xff]  ;;  %v2117_v3 = vld [vmem:[#allocation2 + $0x368] sm:$0xff] }
 0x2a2   :  { %2359 = vmatprep.subr.bf16.mxu0 %v2089_v51  ;;  %2745 = vmatprep.subr.bf16.mxu1 %v2091_v44  ;;  %v2116_v51 = vld [vmem:[#allocation2 + $0x360] sm:$0xff]  ;;  %v2118_v44 = vld [vmem:[#allocation2 + $0x370] sm:$0xff] }
 0x2a3   :  { %2211 = vmatmul.mubr.bf16.gmra.mrb[72].mxu0 %v5500_v24  ;;  %2597 = vmatmul.mubr.bf16.gmra.mrb[72].mxu1 %v5500_v24  ;;  %v2098_v24 = vld [vmem:[#allocation2 + $0x2d0] sm:$0xff] }
 0x2a4   :  { %2220 = vmatprep.mubr.bf16.mxu0 %v5526_v55  ;;  %2606 = vmatprep.mubr.bf16.mxu1 %v5526_v55  ;;  %v2103_v55 = vld [vmem:[#allocation2 + $0x2f8] sm:$0xff] }
 0x2a5   :  { %2360 = vmatpush1.bf16.msra.mxu0 %v2088_v11  ;;  %2746 = vmatpush1.bf16.msra.mxu1 %v2090_v56  ;;  %v2121_v11 = vld [vmem:[#allocation2 + $0x388] sm:$0xff]  ;;  %v2123_v56 = vld [vmem:[#allocation2 + $0x398] sm:$0xff] }
 0x2a6   :  { %2361 = vmatprep.subr.bf16.mxu0 %v2093_v12  ;;  %2747 = vmatprep.subr.bf16.mxu1 %v2095_v26  ;;  %v2120_v12 = vld [vmem:[#allocation2 + $0x380] sm:$0xff]  ;;  %v2125_v26 = vld [vmem:[#allocation2 + $0x3a8] sm:$0xff] }
 0x2a9   :  { %2362 = vmatpush1.bf16.msra.mxu0 %v2092_v43  ;;  %2748 = vmatpush1.bf16.msra.mxu1 %v2094_v5  ;;  %v2124_v43 = vld [vmem:[#allocation2 + $0x3a0] sm:$0xff]  ;;  %v2126_v5 = vld [vmem:[#allocation2 + $0x3b0] sm:$0xff] }
 0x2aa   :  { %2363 = vmatprep.subr.bf16.mxu0 %v2097_v48  ;;  %2749 = vmatprep.subr.bf16.mxu1 %v2099_v6  ;;  %v2129_v48 = vld [vmem:[#allocation2 + $0x3c8] sm:$0xff]  ;;  %v2131_v6 = vld [vmem:[#allocation2 + $0x3d8] sm:$0xff] }
 0x2ab   :  { %2221 = vmatmul.mubr.bf16.gmra.mrb[76].mxu0 %v5520_v53  ;;  %2607 = vmatmul.mubr.bf16.gmra.mrb[76].mxu1 %v5520_v53  ;;  %v2106_v53 = vld [vmem:[#allocation2 + $0x310] sm:$0xff] }
 0x2ac   :  { %2230 = vmatprep.mubr.bf16.mxu0 %v5546_v36  ;;  %2616 = vmatprep.mubr.bf16.mxu1 %v5546_v36  ;;  %v2111_v36 = vld [vmem:[#allocation2 + $0x338] sm:$0xff] }
 0x2ad   :  { %2364 = vmatpush1.bf16.msra.mxu0 %v2096_v13  ;;  %2750 = vmatpush1.bf16.msra.mxu1 %v2098_v24  ;;  %v2128_v13 = vld [vmem:[#allocation2 + $0x3c0] sm:$0xff]  ;;  %v2133_v24 = vld [vmem:[#allocation2 + $0x3e8] sm:$0xff] }
 0x2ae   :  { %2365 = vmatprep.subr.bf16.mxu0 %v2101_v17  ;;  %2751 = vmatprep.subr.bf16.mxu1 %v2103_v55  ;;  %v2132_v17 = vld [vmem:[#allocation2 + $0x3e0] sm:$0xff]  ;;  %v2134_v55 = vld [vmem:[#allocation2 + $0x3f0] sm:$0xff] }
 0x2b1   :  { %2366 = vmatpush1.bf16.msra.mxu0 %v2100_v61  ;;  %2752 = vmatpush1.bf16.msra.mxu1 %v2102_v18  ;;  %v6625_v61 = vld [vmem:[#allocation22_spill] sm:$0xff] }
 0x2b2   :  { %2367 = vmatprep.subr.bf16.mxu0 %v2105_v34  ;;  %2753 = vmatprep.subr.bf16.mxu1 %v2107_v38 }
 0x2b3   :  { %2231 = vmatmul.mubr.bf16.gmra.mrb[80].mxu0 %v5540_v29  ;;  %2617 = vmatmul.mubr.bf16.gmra.mrb[80].mxu1 %v5540_v29  ;;  %v2114_v29 = vld [vmem:[#allocation2 + $0x350] sm:$0xff] }
 0x2b4   :  { %2240 = vmatprep.mubr.bf16.mxu0 %v5566_v10  ;;  %2626 = vmatprep.mubr.bf16.mxu1 %v5566_v10  ;;  %v2119_v10 = vld [vmem:[#allocation2 + $0x378] sm:$0xff] }
 0x2b5   :  { %2368 = vmatpush1.bf16.msra.mxu0 %v2104_v41  ;;  %2754 = vmatpush1.bf16.msra.mxu1 %v2106_v53 }
 0x2b6   :  { %2369 = vmatprep.subr.bf16.mxu0 %v2109_v52  ;;  %2755 = vmatprep.subr.bf16.mxu1 %v2111_v36 }
 0x2b9   :  { %2370 = vmatpush1.bf16.msra.mxu0 %v2108_v50  ;;  %2756 = vmatpush1.bf16.msra.mxu1 %v2110_v32 }
 0x2ba   :  { %2371 = vmatprep.subr.bf16.mxu0 %v2113_v16  ;;  %2757 = vmatprep.subr.bf16.mxu1 %v2115_v20 }
 0x2bb   :  { %2241 = vmatmul.mubr.bf16.gmra.mrb[84].mxu0 %v5560_v4  ;;  %2627 = vmatmul.mubr.bf16.gmra.mrb[84].mxu1 %v5560_v4  ;;  %v2122_v4 = vld [vmem:[#allocation2 + $0x390] sm:$0xff] }
 0x2bc   :  { %2250 = vmatprep.mubr.bf16.mxu0 %v5586_v49  ;;  %2636 = vmatprep.mubr.bf16.mxu1 %v5586_v49  ;;  %v2127_v49 = vld [vmem:[#allocation2 + $0x3b8] sm:$0xff] }
 0x2bd   :  { %2372 = vmatpush1.bf16.msra.mxu0 %v2112_v58  ;;  %2758 = vmatpush1.bf16.msra.mxu1 %v2114_v29 }
 0x2be   :  { %2373 = vmatprep.subr.bf16.mxu0 %v2117_v3  ;;  %2759 = vmatprep.subr.bf16.mxu1 %v2119_v10 }
 0x2c1   :  { %2374 = vmatpush1.bf16.msra.mxu0 %v2116_v51  ;;  %2760 = vmatpush1.bf16.msra.mxu1 %v2118_v44 }
 0x2c2   :  { %2375 = vmatprep.subr.bf16.mxu0 %v2121_v11  ;;  %2761 = vmatprep.subr.bf16.mxu1 %v2123_v56 }
 0x2c3   :  { %2251 = vmatmul.mubr.bf16.gmra.mrb[88].mxu0 %v5580_v47  ;;  %2637 = vmatmul.mubr.bf16.gmra.mrb[88].mxu1 %v5580_v47  ;;  %v2130_v47 = vld [vmem:[#allocation2 + $0x3d0] sm:$0xff] }
 0x2c4   :  { %2260 = vmatprep.mubr.bf16.mxu0 %v5606_v42  ;;  %2646 = vmatprep.mubr.bf16.mxu1 %v5606_v42  ;;  %v2135_v42 = vld [vmem:[#allocation2 + $0x3f8] sm:$0xff] }
 0x2c5   :  { %2376 = vmatpush1.bf16.msra.mxu0 %v2120_v12  ;;  %2762 = vmatpush1.bf16.msra.mxu1 %v2122_v4 }
 0x2c6   :  { %2377 = vmatprep.subr.bf16.mxu0 %v2125_v26  ;;  %2763 = vmatprep.subr.bf16.mxu1 %v2127_v49 }
 0x2c9   :  { %2378 = vmatpush1.bf16.msra.mxu0 %v2124_v43  ;;  %2764 = vmatpush1.bf16.msra.mxu1 %v2126_v5 }
 0x2ca   :  { %2379 = vmatprep.subr.bf16.mxu0 %v2129_v48  ;;  %2765 = vmatprep.subr.bf16.mxu1 %v2131_v6 }
 0x2cb   :  { %2261 = vmatmul.mubr.bf16.gmra.mrb[92].mxu0 %v5600_v40  ;;  %2647 = vmatmul.mubr.bf16.gmra.mrb[92].mxu1 %v5600_v40  ;;  %v6613_v40 = vld [vmem:[#allocation35_spill] sm:$0xff] }
 0x2cc   :  { %2270 = vmatprep.mubr.bf16.mxu0 %v5626_v39  ;;  %2656 = vmatprep.mubr.bf16.mxu1 %v5626_v39  ;;  %v6615_v39 = vld [vmem:[#allocation37_spill] sm:$0xff] }
 0x2cd   :  { %2380 = vmatpush1.bf16.msra.mxu0 %v2128_v13  ;;  %2766 = vmatpush1.bf16.msra.mxu1 %v2130_v47 }
 0x2ce   :  { %2381 = vmatprep.subr.bf16.mxu0 %v2133_v24  ;;  %2767 = vmatprep.subr.bf16.mxu1 %v2135_v42 }
 0x2d1   :  { %2382 = vmatpush1.bf16.msra.mxu0 %v2132_v17  ;;  %2768 = vmatpush1.bf16.msra.mxu1 %v2134_v55 }
 0x2d3   :  { %2271 = vmatmul.mubr.bf16.gmra.mrb[96].mxu0 %v5620_v28  ;;  %2657 = vmatmul.mubr.bf16.gmra.mrb[96].mxu1 %v5620_v28  ;;  %v6614_v28 = vld [vmem:[#allocation34_spill] sm:$0xff] }
 0x2d4   :  { %2280 = vmatprep.mubr.bf16.mxu0 %v5646_v62  ;;  %2666 = vmatprep.mubr.bf16.mxu1 %v5646_v62  ;;  %v6617_v62 = vld [vmem:[#allocation39_spill] sm:$0xff] }
 0x2db   :  { %2281 = vmatmul.mubr.bf16.gmra.mrb[100].mxu0 %v5640_v46  ;;  %2667 = vmatmul.mubr.bf16.gmra.mrb[100].mxu1 %v5640_v46  ;;  %v6616_v46 = vld [vmem:[#allocation36_spill] sm:$0xff] }
 0x2dc   :  { %2290 = vmatprep.mubr.bf16.mxu0 %v5666_v0  ;;  %2676 = vmatprep.mubr.bf16.mxu1 %v5666_v0  ;;  %v6619_v0 = vld [vmem:[#allocation41_spill] sm:$0xff] }
 0x2e3   :  { %2291 = vmatmul.mubr.bf16.gmra.mrb[104].mxu0 %v5660_v15  ;;  %2677 = vmatmul.mubr.bf16.gmra.mrb[104].mxu1 %v5660_v15  ;;  %v6618_v15 = vld [vmem:[#allocation38_spill] sm:$0xff] }
 0x2e4   :  { %2300 = vmatprep.mubr.bf16.mxu0 %v5686_v14  ;;  %2686 = vmatprep.mubr.bf16.mxu1 %v5686_v14  ;;  %v6621_v14 = vld [vmem:[#allocation43_spill] sm:$0xff] }
 0x2eb   :  { %2301 = vmatmul.mubr.bf16.gmra.mrb[108].mxu0 %v5680_v19  ;;  %2687 = vmatmul.mubr.bf16.gmra.mrb[108].mxu1 %v5680_v19  ;;  %v6620_v19 = vld [vmem:[#allocation40_spill] sm:$0xff] }
 0x2ec   :  { %2310 = vmatprep.mubr.bf16.mxu0 %v5706_v31  ;;  %2696 = vmatprep.mubr.bf16.mxu1 %v5706_v31  ;;  %v2136_v31 = vld [vmem:[%s6524_s4] sm:$0xf] }
 0x2ed   :  { %v5909_v18 = vrot.slane %v2136_v31, %v6625_v61 }
 0x2f3   :  { %2311 = vmatmul.mubr.bf16.gmra.mrb[112].mxu0 %v5700_v21  ;;  %2697 = vmatmul.mubr.bf16.gmra.mrb[112].mxu1 %v5700_v21  ;;  %v6622_v21 = vld [vmem:[#allocation42_spill] sm:$0xff] }
 0x2f4   :  { %2320 = vmatprep.mubr.bf16.mxu0 %v5726_v63  ;;  %2706 = vmatprep.mubr.bf16.mxu1 %v5726_v63 }
 0x2fb   :  { %2321 = vmatmul.mubr.bf16.gmra.mrb[116].mxu0 %v5720_v22  ;;  %2707 = vmatmul.mubr.bf16.gmra.mrb[116].mxu1 %v5720_v22  ;;  %v6623_v22 = vld [vmem:[#allocation20_spill] sm:$0xff] }
 0x2fc   :  { %2330 = vmatprep.mubr.bf16.mxu0 %v5746_v1  ;;  %2716 = vmatprep.mubr.bf16.mxu1 %v5746_v1  ;;  %v5903_v63 = vrot.slane %v2136_v31, %v6623_v22 }
 0x303   :  { %2331 = vmatmul.mubr.bf16.gmra.mrb[120].mxu0 %v5740_v23  ;;  %2717 = vmatmul.mubr.bf16.gmra.mrb[120].mxu1 %v5740_v23  ;;  %v6624_v23 = vld [vmem:[#allocation21_spill] sm:$0xff] }
 0x304   :  { %2340 = vmatprep.mubr.bf16.mxu0 %v5766_v8  ;;  %2726 = vmatprep.mubr.bf16.mxu1 %v5766_v8  ;;  %v5906_v1 = vrot.slane %v2136_v31, %v6624_v23 }
 0x30b   :  { %2341 = vmatmul.mubr.bf16.gmra.mrb[124].mxu0 %v5760_v45  ;;  %2727 = vmatmul.mubr.bf16.gmra.mrb[124].mxu1 %v5760_v45 }
 0x30c   :  { %2383 = vmatprep.mubr.bf16.mxu0 %v5469_v35  ;;  %2769 = vmatprep.mubr.bf16.mxu1 %v5469_v35  ;;  %v6604_v35 = vld [vmem:[#allocation24_spill] sm:$0xff] }
 0x313   :  { %2384 = vmatmul.mubr.bf16.vlgmr.msra.gmra.mrb[64].mxu0 %v5463_v33  ;;  %2770 = vmatmul.mubr.bf16.vlgmr.msra.gmra.mrb[64].mxu1 %v5463_v33  ;;  %v6603_v33 = vld [vmem:[#allocation25_spill] sm:$0xff] }
 0x314   :  { %2393 = vmatprep.mubr.bf16.mxu0 %v5489_v59  ;;  %2779 = vmatprep.mubr.bf16.mxu1 %v5489_v59  ;;  %v6606_v59 = vld [vmem:[#allocation26_spill] sm:$0xff] }
 0x31b   :  { %2394 = vmatmul.mubr.bf16.gmra.mrb[68].mxu0 %v5483_v57  ;;  %2780 = vmatmul.mubr.bf16.gmra.mrb[68].mxu1 %v5483_v57  ;;  %v6605_v57 = vld [vmem:[#allocation27_spill] sm:$0xff] }
 0x31c   :  { %2403 = vmatprep.mubr.bf16.mxu0 %v5509_v27  ;;  %2789 = vmatprep.mubr.bf16.mxu1 %v5509_v27  ;;  %v6608_v27 = vld [vmem:[#allocation28_spill] sm:$0xff] }
 0x323   :  { %2404 = vmatmul.mubr.bf16.gmra.mrb[72].mxu0 %v5503_v25  ;;  %2790 = vmatmul.mubr.bf16.gmra.mrb[72].mxu1 %v5503_v25  ;;  %v6607_v25 = vld [vmem:[#allocation29_spill] sm:$0xff] }
 0x324   :  { %2413 = vmatprep.mubr.bf16.mxu0 %v5529_v60  ;;  %2799 = vmatprep.mubr.bf16.mxu1 %v5529_v60  ;;  %v6610_v60 = vld [vmem:[#allocation30_spill] sm:$0xff] }
 0x32b   :  { %2414 = vmatmul.mubr.bf16.gmra.mrb[76].mxu0 %v5523_v54  ;;  %2800 = vmatmul.mubr.bf16.gmra.mrb[76].mxu1 %v5523_v54  ;;  %v6609_v54 = vld [vmem:[#allocation31_spill] sm:$0xff] }
 0x32c   :  { %2423 = vmatprep.mubr.bf16.mxu0 %v5549_v37  ;;  %2809 = vmatprep.mubr.bf16.mxu1 %v5549_v37  ;;  %v6612_v37 = vld [vmem:[#allocation32_spill] sm:$0xff] }
 0x333   :  { %2424 = vmatmul.mubr.bf16.gmra.mrb[80].mxu0 %v5543_v30  ;;  %2810 = vmatmul.mubr.bf16.gmra.mrb[80].mxu1 %v5543_v30  ;;  %v6611_v30 = vld [vmem:[#allocation33_spill] sm:$0xff] }
 0x334   :  { %2433 = vmatprep.mubr.bf16.mxu0 %v6603_v33  ;;  %2819 = vmatprep.mubr.bf16.mxu1 %v6603_v33 }
 0x33b   :  { %2434 = vmatmul.mubr.bf16.gmra.mrb[84].mxu0 %v6604_v35  ;;  %2820 = vmatmul.mubr.bf16.gmra.mrb[84].mxu1 %v6604_v35 }
 0x33c   :  { %2443 = vmatprep.mubr.bf16.mxu0 %v6605_v57  ;;  %2829 = vmatprep.mubr.bf16.mxu1 %v6605_v57 }
 0x343   :  { %2444 = vmatmul.mubr.bf16.gmra.mrb[88].mxu0 %v6606_v59  ;;  %2830 = vmatmul.mubr.bf16.gmra.mrb[88].mxu1 %v6606_v59 }
 0x344   :  { %2453 = vmatprep.mubr.bf16.mxu0 %v6607_v25  ;;  %2839 = vmatprep.mubr.bf16.mxu1 %v6607_v25 }
 0x34b   :  { %2454 = vmatmul.mubr.bf16.gmra.mrb[92].mxu0 %v6608_v27  ;;  %2840 = vmatmul.mubr.bf16.gmra.mrb[92].mxu1 %v6608_v27 }
 0x34c   :  { %2463 = vmatprep.mubr.bf16.mxu0 %v6609_v54  ;;  %2849 = vmatprep.mubr.bf16.mxu1 %v6609_v54 }
 0x353   :  { %2464 = vmatmul.mubr.bf16.gmra.mrb[96].mxu0 %v6610_v60  ;;  %2850 = vmatmul.mubr.bf16.gmra.mrb[96].mxu1 %v6610_v60 }
 0x354   :  { %2473 = vmatprep.mubr.bf16.mxu0 %v6611_v30  ;;  %2859 = vmatprep.mubr.bf16.mxu1 %v6611_v30 }
 0x35b   :  { %2474 = vmatmul.mubr.bf16.gmra.mrb[100].mxu0 %v6612_v37  ;;  %2860 = vmatmul.mubr.bf16.gmra.mrb[100].mxu1 %v6612_v37 }
 0x35c   :  { %2483 = vmatprep.mubr.bf16.mxu0 %v6613_v40  ;;  %2869 = vmatprep.mubr.bf16.mxu1 %v6613_v40 }
 0x363   :  { %2484 = vmatmul.mubr.bf16.gmra.mrb[104].mxu0 %v6614_v28  ;;  %2870 = vmatmul.mubr.bf16.gmra.mrb[104].mxu1 %v6614_v28 }
 0x364   :  { %2493 = vmatprep.mubr.bf16.mxu0 %v6615_v39  ;;  %2879 = vmatprep.mubr.bf16.mxu1 %v6615_v39 }
 0x36b   :  { %2494 = vmatmul.mubr.bf16.gmra.mrb[108].mxu0 %v6616_v46  ;;  %2880 = vmatmul.mubr.bf16.gmra.mrb[108].mxu1 %v6616_v46 }
 0x36c   :  { %2503 = vmatprep.mubr.bf16.mxu0 %v6617_v62  ;;  %2889 = vmatprep.mubr.bf16.mxu1 %v6617_v62 }
 0x373   :  { %2504 = vmatmul.mubr.bf16.gmra.mrb[112].mxu0 %v6618_v15  ;;  %2890 = vmatmul.mubr.bf16.gmra.mrb[112].mxu1 %v6618_v15 }
 0x374   :  { %2513 = vmatprep.mubr.bf16.mxu0 %v6619_v0  ;;  %2899 = vmatprep.mubr.bf16.mxu1 %v6619_v0 }
 0x37b   :  { %2514 = vmatmul.mubr.bf16.gmra.mrb[116].mxu0 %v6620_v19  ;;  %2900 = vmatmul.mubr.bf16.gmra.mrb[116].mxu1 %v6620_v19 }
 0x37c   :  { %2523 = vmatprep.mubr.bf16.mxu0 %v6621_v14  ;;  %2909 = vmatprep.mubr.bf16.mxu1 %v6621_v14 }
 0x383   :  { %2524 = vmatmul.mubr.bf16.gmra.mrb[120].mxu0 %v6622_v21  ;;  %2910 = vmatmul.mubr.bf16.gmra.mrb[120].mxu1 %v6622_v21 }
 0x384   :  { %2533 = vmatprep.mubr.bf16.mxu0 %v5769_v9  ;;  %2919 = vmatprep.mubr.bf16.mxu1 %v5769_v9  ;;  %v6626_v9 = vld [vmem:[#allocation23_spill] sm:$0xff] }
 0x385   :  { %v5912_v34 = vrot.slane %v2136_v31, %v6626_v9 }
 0x38b   :  { %2534 = vmatmul.mubr.bf16.gmra.mrb[124].mxu0 %v5763_v7  ;;  %2920 = vmatmul.mubr.bf16.gmra.mrb[124].mxu1 %v5763_v7 }
 0x3e6   :  { %v2385_v45 = vpop.f32.mrb[64].mxu0  ;;  %v2771_v8 = vpop.f32.mrb[64].mxu1 }
 0x3e7   :  { %v2387_v38 = vpop.f32.mrb[65].mxu0  ;;  %v2773_v7 = vpop.f32.mrb[65].mxu1  ;;  %v4403_v52 = vadd.f32 %v2385_v45, %v5903_v63  ;;  %v4467_v36 = vadd.f32 %v2771_v8, %v5906_v1 }
 0x3e8   :  { %v2389_v41 = vpop.f32.mrb[66].mxu0  ;;  %v2775_v53 = vpop.f32.mrb[66].mxu1  ;;  %v4404_v58 = vadd.f32 %v2387_v38, %v5909_v18  ;;  %v4468_v29 = vadd.f32 %v2773_v7, %v5912_v34 }
 0x3e9   :  { %v4405_v50 = vadd.f32 %v2389_v41, %v5903_v63  ;;  %v4469_v32 = vadd.f32 %v2775_v53, %v5906_v1  ;;  %v2391_v16 = vpop.f32.mrb[67].mxu0  ;;  %v2777_v20 = vpop.f32.mrb[67].mxu1 }
 0x3ea   :  { %v4406_v3 = vadd.f32 %v2391_v16, %v5909_v18  ;;  %v4470_v10 = vadd.f32 %v2777_v20, %v5912_v34 }
 0x3eb   :  { %v2930_v51 = vpack.c.bf16 %v4405_v50, %v4403_v52  ;;  %v2932_v44 = vpack.c.bf16 %v4469_v32, %v4467_v36 }
 0x3ec   :  { %v2931_v11 = vpack.c.bf16 %v4406_v3, %v4404_v58  ;;  %v2933_v56 = vpack.c.bf16 %v4470_v10, %v4468_v29 }
 0x3ed   :  { %v5923_v12 = vmax.bf16 %v6592_v2, %v2930_v51  ;;  %v5926_v4 = vmax.bf16 %v6592_v2, %v2932_v44 }
 0x3ee   :  { %v5929_v26 = vmax.bf16 %v6592_v2, %v2931_v11  ;;  %v5932_v49 = vmax.bf16 %v6592_v2, %v2933_v56  ;;  %v2395_v43 = vpop.f32.mrb[68].mxu0  ;;  %v2781_v5 = vpop.f32.mrb[68].mxu1 }
 0x3ef   :  { %v2397_v48 = vpop.f32.mrb[69].mxu0  ;;  %v2783_v6 = vpop.f32.mrb[69].mxu1  ;;  %v4407_v24 = vadd.f32 %v2395_v43, %v5903_v63  ;;  %v4471_v42 = vadd.f32 %v2781_v5, %v5906_v1 }
 0x3f0   :  { %v2399_v13 = vpop.f32.mrb[70].mxu0  ;;  %v2785_v47 = vpop.f32.mrb[70].mxu1  ;;  %v4408_v57 = vadd.f32 %v2397_v48, %v5909_v18  ;;  %v4472_v59 = vadd.f32 %v2783_v6, %v5912_v34 }
 0x3f1   :  { %v4409_v17 = vadd.f32 %v2399_v13, %v5903_v63  ;;  %v4473_v55 = vadd.f32 %v2785_v47, %v5906_v1  ;;  %v2401_v33 = vpop.f32.mrb[71].mxu0  ;;  %v2787_v35 = vpop.f32.mrb[71].mxu1 }
 0x3f2   :  { %v4410_v25 = vadd.f32 %v2401_v33, %v5909_v18  ;;  %v4474_v27 = vadd.f32 %v2787_v35, %v5912_v34 }
 0x3f3   :  { %v2934_v54 = vpack.c.bf16 %v4409_v17, %v4407_v24  ;;  %v2936_v60 = vpack.c.bf16 %v4473_v55, %v4471_v42 }
 0x3f4   :  { %v2935_v30 = vpack.c.bf16 %v4410_v25, %v4408_v57  ;;  %v2937_v37 = vpack.c.bf16 %v4474_v27, %v4472_v59 }
 0x3f5   :  { %v5943_v40 = vmax.bf16 %v6592_v2, %v2934_v54  ;;  %v5946_v28 = vmax.bf16 %v6592_v2, %v2936_v60 }
 0x3f6   :  { %v5949_v39 = vmax.bf16 %v6592_v2, %v2935_v30  ;;  %v5952_v46 = vmax.bf16 %v6592_v2, %v2937_v37  ;;  %v2405_v62 = vpop.f32.mrb[72].mxu0  ;;  %v2791_v15 = vpop.f32.mrb[72].mxu1 }
 0x3f7   :  { %v2407_v0 = vpop.f32.mrb[73].mxu0  ;;  %v2793_v19 = vpop.f32.mrb[73].mxu1  ;;  %v4411_v31 = vadd.f32 %v2405_v62, %v5903_v63  ;;  %v4475_v45 = vadd.f32 %v2791_v15, %v5906_v1 }
 0x3f8   :  { %v2409_v14 = vpop.f32.mrb[74].mxu0  ;;  %v2795_v21 = vpop.f32.mrb[74].mxu1  ;;  %v4412_v53 = vadd.f32 %v2407_v0, %v5909_v18  ;;  %v4476_v52 = vadd.f32 %v2793_v19, %v5912_v34 }
 0x3f9   :  { %v4413_v8 = vadd.f32 %v2409_v14, %v5903_v63  ;;  %v4477_v38 = vadd.f32 %v2795_v21, %v5906_v1  ;;  %v2411_v7 = vpop.f32.mrb[75].mxu0  ;;  %v2797_v41 = vpop.f32.mrb[75].mxu1 }
 0x3fa   :  { %v4414_v36 = vadd.f32 %v2411_v7, %v5909_v18  ;;  %v4478_v50 = vadd.f32 %v2797_v41, %v5912_v34 }
 0x3fb   :  { %v2938_v32 = vpack.c.bf16 %v4413_v8, %v4411_v31  ;;  %v2940_v16 = vpack.c.bf16 %v4477_v38, %v4475_v45 }
 0x3fc   :  { %v2939_v20 = vpack.c.bf16 %v4414_v36, %v4412_v53  ;;  %v2941_v58 = vpack.c.bf16 %v4478_v50, %v4476_v52 }
 0x3fd   :  { %v5963_v29 = vmax.bf16 %v6592_v2, %v2938_v32  ;;  %v5966_v3 = vmax.bf16 %v6592_v2, %v2940_v16 }
 0x3fe   :  { %v5969_v10 = vmax.bf16 %v6592_v2, %v2939_v20  ;;  %v5972_v51 = vmax.bf16 %v6592_v2, %v2941_v58  ;;  %v2415_v44 = vpop.f32.mrb[76].mxu0  ;;  %v2801_v11 = vpop.f32.mrb[76].mxu1 }
 0x3ff   :  { %v2417_v56 = vpop.f32.mrb[77].mxu0  ;;  %v2803_v43 = vpop.f32.mrb[77].mxu1  ;;  %v4415_v6 = vadd.f32 %v2415_v44, %v5903_v63  ;;  %v4479_v13 = vadd.f32 %v2801_v11, %v5906_v1 }
 0x400   :  { %v2419_v5 = vpop.f32.mrb[78].mxu0  ;;  %v2805_v48 = vpop.f32.mrb[78].mxu1  ;;  %v4416_v55 = vadd.f32 %v2417_v56, %v5909_v18  ;;  %v4480_v33 = vadd.f32 %v2803_v43, %v5912_v34 }
 0x401   :  { %v4417_v47 = vadd.f32 %v2419_v5, %v5903_v63  ;;  %v4481_v24 = vadd.f32 %v2805_v48, %v5906_v1  ;;  %v2421_v42 = vpop.f32.mrb[79].mxu0  ;;  %v2807_v17 = vpop.f32.mrb[79].mxu1 }
 0x402   :  { %v4418_v35 = vadd.f32 %v2421_v42, %v5909_v18  ;;  %v4482_v57 = vadd.f32 %v2807_v17, %v5912_v34 }
 0x403   :  { %v2942_v59 = vpack.c.bf16 %v4417_v47, %v4415_v6  ;;  %v2944_v25 = vpack.c.bf16 %v4481_v24, %v4479_v13 }
 0x404   :  { %v2943_v27 = vpack.c.bf16 %v4418_v35, %v4416_v55  ;;  %v2945_v54 = vpack.c.bf16 %v4482_v57, %v4480_v33 }
 0x405   :  { %v5983_v60 = vmax.bf16 %v6592_v2, %v2942_v59  ;;  %v5986_v30 = vmax.bf16 %v6592_v2, %v2944_v25 }
 0x406   :  { %v5989_v37 = vmax.bf16 %v6592_v2, %v2943_v27  ;;  %v5992_v62 = vmax.bf16 %v6592_v2, %v2945_v54  ;;  %v2425_v15 = vpop.f32.mrb[80].mxu0  ;;  %v2811_v0 = vpop.f32.mrb[80].mxu1 }
 0x407   :  { %v2427_v19 = vpop.f32.mrb[81].mxu0  ;;  %v2813_v14 = vpop.f32.mrb[81].mxu1  ;;  %v4419_v45 = vadd.f32 %v2425_v15, %v5903_v63  ;;  %v4483_v8 = vadd.f32 %v2811_v0, %v5906_v1 }
 0x408   :  { %v2429_v21 = vpop.f32.mrb[82].mxu0  ;;  %v2815_v31 = vpop.f32.mrb[82].mxu1  ;;  %v4420_v52 = vadd.f32 %v2427_v19, %v5909_v18  ;;  %v4484_v36 = vadd.f32 %v2813_v14, %v5912_v34 }
 0x409   :  { %v4421_v38 = vadd.f32 %v2429_v21, %v5903_v63  ;;  %v4485_v7 = vadd.f32 %v2815_v31, %v5906_v1  ;;  %v2431_v41 = vpop.f32.mrb[83].mxu0  ;;  %v2817_v53 = vpop.f32.mrb[83].mxu1 }
 0x40a   :  { %v4422_v50 = vadd.f32 %v2431_v41, %v5909_v18  ;;  %v4486_v32 = vadd.f32 %v2817_v53, %v5912_v34 }
 0x40b   :  { %v2946_v16 = vpack.c.bf16 %v4421_v38, %v4419_v45  ;;  %v2948_v20 = vpack.c.bf16 %v4485_v7, %v4483_v8 }
 0x40c   :  { %v2947_v58 = vpack.c.bf16 %v4422_v50, %v4420_v52  ;;  %v2949_v44 = vpack.c.bf16 %v4486_v32, %v4484_v36 }
 0x40d   :  { %v6003_v11 = vmax.bf16 %v6592_v2, %v2946_v16  ;;  %v6006_v56 = vmax.bf16 %v6592_v2, %v2948_v20 }
 0x40e   :  { %v6009_v43 = vmax.bf16 %v6592_v2, %v2947_v58  ;;  %v6012_v5 = vmax.bf16 %v6592_v2, %v2949_v44  ;;  %v2435_v48 = vpop.f32.mrb[84].mxu0  ;;  %v2821_v6 = vpop.f32.mrb[84].mxu1 }
 0x40f   :  { %v2437_v13 = vpop.f32.mrb[85].mxu0  ;;  %v2823_v47 = vpop.f32.mrb[85].mxu1  ;;  %v4423_v17 = vadd.f32 %v2435_v48, %v5903_v63  ;;  %v4487_v55 = vadd.f32 %v2821_v6, %v5906_v1 }
 0x410   :  { %v2439_v24 = vpop.f32.mrb[86].mxu0  ;;  %v2825_v42 = vpop.f32.mrb[86].mxu1  ;;  %v4424_v25 = vadd.f32 %v2437_v13, %v5909_v18  ;;  %v4488_v27 = vadd.f32 %v2823_v47, %v5912_v34 }
 0x411   :  { %v4425_v33 = vadd.f32 %v2439_v24, %v5903_v63  ;;  %v4489_v35 = vadd.f32 %v2825_v42, %v5906_v1  ;;  %v2441_v57 = vpop.f32.mrb[87].mxu0  ;;  %v2827_v59 = vpop.f32.mrb[87].mxu1 }
 0x412   :  { %v4426_v54 = vadd.f32 %v2441_v57, %v5909_v18  ;;  %v4490_v15 = vadd.f32 %v2827_v59, %v5912_v34 }
 0x413   :  { %v2950_v0 = vpack.c.bf16 %v4425_v33, %v4423_v17  ;;  %v2952_v19 = vpack.c.bf16 %v4489_v35, %v4487_v55 }
 0x414   :  { %v2951_v14 = vpack.c.bf16 %v4426_v54, %v4424_v25  ;;  %v2953_v21 = vpack.c.bf16 %v4490_v15, %v4488_v27 }
 0x415   :  { %v6023_v31 = vmax.bf16 %v6592_v2, %v2950_v0  ;;  %v6026_v45 = vmax.bf16 %v6592_v2, %v2952_v19 }
 0x416   :  { %v6029_v8 = vmax.bf16 %v6592_v2, %v2951_v14  ;;  %v6032_v38 = vmax.bf16 %v6592_v2, %v2953_v21  ;;  %v2445_v7 = vpop.f32.mrb[88].mxu0  ;;  %v2831_v41 = vpop.f32.mrb[88].mxu1 }
 0x417   :  { %6627 = vst [vmem:[#allocation25_spill] sm:$0xff] %v6026_v45  ;;  %v2447_v53 = vpop.f32.mrb[89].mxu0  ;;  %v2833_v52 = vpop.f32.mrb[89].mxu1  ;;  %v4427_v32 = vadd.f32 %v2445_v7, %v5903_v63  ;;  %v4491_v16 = vadd.f32 %v2831_v41, %v5906_v1 }
 0x418   :  { %6628 = vst [vmem:[#allocation24_spill] sm:$0xff] %v6032_v38  ;;  %v2449_v36 = vpop.f32.mrb[90].mxu0  ;;  %v2835_v50 = vpop.f32.mrb[90].mxu1  ;;  %v4428_v6 = vadd.f32 %v2447_v53, %v5909_v18  ;;  %v4492_v13 = vadd.f32 %v2833_v52, %v5912_v34 }
 0x419   :  { %v4429_v20 = vadd.f32 %v2449_v36, %v5903_v63  ;;  %v4493_v58 = vadd.f32 %v2835_v50, %v5906_v1  ;;  %v2451_v44 = vpop.f32.mrb[91].mxu0  ;;  %v2837_v48 = vpop.f32.mrb[91].mxu1 }
 0x41a   :  { %v4430_v47 = vadd.f32 %v2451_v44, %v5909_v18  ;;  %v4494_v24 = vadd.f32 %v2837_v48, %v5912_v34 }
 0x41b   :  { %v2954_v42 = vpack.c.bf16 %v4429_v20, %v4427_v32  ;;  %v2956_v17 = vpack.c.bf16 %v4493_v58, %v4491_v16 }
 0x41c   :  { %v2955_v55 = vpack.c.bf16 %v4430_v47, %v4428_v6  ;;  %v2957_v33 = vpack.c.bf16 %v4494_v24, %v4492_v13 }
 0x41d   :  { %v6043_v35 = vmax.bf16 %v6592_v2, %v2954_v42  ;;  %v6046_v57 = vmax.bf16 %v6592_v2, %v2956_v17 }
 0x41e   :  { %v6049_v59 = vmax.bf16 %v6592_v2, %v2955_v55  ;;  %v6052_v25 = vmax.bf16 %v6592_v2, %v2957_v33  ;;  %v2455_v27 = vpop.f32.mrb[92].mxu0  ;;  %v2841_v54 = vpop.f32.mrb[92].mxu1 }
 0x41f   :  { %6629 = vst [vmem:[#allocation27_spill] sm:$0xff] %v6046_v57  ;;  %v2457_v15 = vpop.f32.mrb[93].mxu0  ;;  %v2843_v0 = vpop.f32.mrb[93].mxu1  ;;  %v4431_v21 = vadd.f32 %v2455_v27, %v5903_v63  ;;  %v4495_v7 = vadd.f32 %v2841_v54, %v5906_v1 }
 0x420   :  { %6630 = vst [vmem:[#allocation26_spill] sm:$0xff] %v6052_v25  ;;  %v2459_v19 = vpop.f32.mrb[94].mxu0  ;;  %v2845_v14 = vpop.f32.mrb[94].mxu1  ;;  %v4432_v50 = vadd.f32 %v2457_v15, %v5909_v18  ;;  %v4496_v32 = vadd.f32 %v2843_v0, %v5912_v34 }
 0x421   :  { %v4433_v41 = vadd.f32 %v2459_v19, %v5903_v63  ;;  %v4497_v53 = vadd.f32 %v2845_v14, %v5906_v1  ;;  %v2461_v52 = vpop.f32.mrb[95].mxu0  ;;  %v2847_v36 = vpop.f32.mrb[95].mxu1 }
 0x422   :  { %v4434_v16 = vadd.f32 %v2461_v52, %v5909_v18  ;;  %v4498_v20 = vadd.f32 %v2847_v36, %v5912_v34 }
 0x423   :  { %v2958_v58 = vpack.c.bf16 %v4433_v41, %v4431_v21  ;;  %v2960_v44 = vpack.c.bf16 %v4497_v53, %v4495_v7 }
 0x424   :  { %v2959_v48 = vpack.c.bf16 %v4434_v16, %v4432_v50  ;;  %v2961_v6 = vpack.c.bf16 %v4498_v20, %v4496_v32 }
 0x425   :  { %v6063_v13 = vmax.bf16 %v6592_v2, %v2958_v58  ;;  %v6066_v47 = vmax.bf16 %v6592_v2, %v2960_v44 }
 0x426   :  { %v6069_v24 = vmax.bf16 %v6592_v2, %v2959_v48  ;;  %v6072_v42 = vmax.bf16 %v6592_v2, %v2961_v6  ;;  %v2465_v17 = vpop.f32.mrb[96].mxu0  ;;  %v2851_v55 = vpop.f32.mrb[96].mxu1 }
 0x427   :  { %6631 = vst [vmem:[#allocation29_spill] sm:$0xff] %v6066_v47  ;;  %v2467_v33 = vpop.f32.mrb[97].mxu0  ;;  %v2853_v27 = vpop.f32.mrb[97].mxu1  ;;  %v4435_v0 = vadd.f32 %v2465_v17, %v5903_v63  ;;  %v4499_v19 = vadd.f32 %v2851_v55, %v5906_v1 }
 0x428   :  { %6632 = vst [vmem:[#allocation28_spill] sm:$0xff] %v6072_v42  ;;  %v2469_v54 = vpop.f32.mrb[98].mxu0  ;;  %v2855_v15 = vpop.f32.mrb[98].mxu1  ;;  %v4436_v53 = vadd.f32 %v2467_v33, %v5909_v18  ;;  %v4500_v52 = vadd.f32 %v2853_v27, %v5912_v34 }
 0x429   :  { %v4437_v14 = vadd.f32 %v2469_v54, %v5903_v63  ;;  %v4501_v21 = vadd.f32 %v2855_v15, %v5906_v1  ;;  %v2471_v7 = vpop.f32.mrb[99].mxu0  ;;  %v2857_v41 = vpop.f32.mrb[99].mxu1 }
 0x42a   :  { %v4438_v36 = vadd.f32 %v2471_v7, %v5909_v18  ;;  %v4502_v50 = vadd.f32 %v2857_v41, %v5912_v34 }
 0x42b   :  { %v2962_v32 = vpack.c.bf16 %v4437_v14, %v4435_v0  ;;  %v2964_v16 = vpack.c.bf16 %v4501_v21, %v4499_v19 }
 0x42c   :  { %v2963_v20 = vpack.c.bf16 %v4438_v36, %v4436_v53  ;;  %v2965_v58 = vpack.c.bf16 %v4502_v50, %v4500_v52 }
 0x42d   :  { %v6083_v44 = vmax.bf16 %v6592_v2, %v2962_v32  ;;  %v6086_v48 = vmax.bf16 %v6592_v2, %v2964_v16 }
 0x42e   :  { %v6089_v6 = vmax.bf16 %v6592_v2, %v2963_v20  ;;  %v6092_v17 = vmax.bf16 %v6592_v2, %v2965_v58  ;;  %v2475_v55 = vpop.f32.mrb[100].mxu0  ;;  %v2861_v33 = vpop.f32.mrb[100].mxu1 }
 0x42f   :  { %6633 = vst [vmem:[#allocation31_spill] sm:$0xff] %v6086_v48  ;;  %v2477_v27 = vpop.f32.mrb[101].mxu0  ;;  %v2863_v54 = vpop.f32.mrb[101].mxu1  ;;  %v4439_v19 = vadd.f32 %v2475_v55, %v5903_v63  ;;  %v4503_v14 = vadd.f32 %v2861_v33, %v5906_v1 }
 0x430   :  { %6634 = vst [vmem:[#allocation30_spill] sm:$0xff] %v6092_v17  ;;  %v2479_v15 = vpop.f32.mrb[102].mxu0  ;;  %v2865_v0 = vpop.f32.mrb[102].mxu1  ;;  %v4440_v52 = vadd.f32 %v2477_v27, %v5909_v18  ;;  %v4504_v36 = vadd.f32 %v2863_v54, %v5912_v34 }
 0x431   :  { %v4441_v21 = vadd.f32 %v2479_v15, %v5903_v63  ;;  %v4505_v7 = vadd.f32 %v2865_v0, %v5906_v1  ;;  %v2481_v41 = vpop.f32.mrb[103].mxu0  ;;  %v2867_v53 = vpop.f32.mrb[103].mxu1 }
 0x432   :  { %v4442_v50 = vadd.f32 %v2481_v41, %v5909_v18  ;;  %v4506_v32 = vadd.f32 %v2867_v53, %v5912_v34 }
 0x433   :  { %v2966_v16 = vpack.c.bf16 %v4441_v21, %v4439_v19  ;;  %v2968_v20 = vpack.c.bf16 %v4505_v7, %v4503_v14 }
 0x434   :  { %v2967_v58 = vpack.c.bf16 %v4442_v50, %v4440_v52  ;;  %v2969_v55 = vpack.c.bf16 %v4506_v32, %v4504_v36 }
 0x435   :  { %v6103_v33 = vmax.bf16 %v6592_v2, %v2966_v16  ;;  %v6106_v15 = vmax.bf16 %v6592_v2, %v2968_v20 }
 0x436   :  { %v6109_v0 = vmax.bf16 %v6592_v2, %v2967_v58  ;;  %v6112_v27 = vmax.bf16 %v6592_v2, %v2969_v55  ;;  %v2485_v54 = vpop.f32.mrb[104].mxu0  ;;  %v2871_v41 = vpop.f32.mrb[104].mxu1 }
 0x437   :  { %6635 = vst [vmem:[#allocation33_spill] sm:$0xff] %v6106_v15  ;;  %v2487_v9 = vpop.f32.mrb[105].mxu0  ;;  %v2873_v53 = vpop.f32.mrb[105].mxu1  ;;  %v4443_v21 = vadd.f32 %v2485_v54, %v5903_v63  ;;  %v4507_v7 = vadd.f32 %v2871_v41, %v5906_v1 }
 0x438   :  { %6636 = vst [vmem:[#allocation32_spill] sm:$0xff] %v6112_v27  ;;  %v2489_v19 = vpop.f32.mrb[106].mxu0  ;;  %v2875_v14 = vpop.f32.mrb[106].mxu1  ;;  %v4444_v16 = vadd.f32 %v2487_v9, %v5909_v18  ;;  %v4508_v20 = vadd.f32 %v2873_v53, %v5912_v34 }
 0x439   :  { %v4445_v52 = vadd.f32 %v2489_v19, %v5903_v63  ;;  %v4509_v36 = vadd.f32 %v2875_v14, %v5906_v1  ;;  %v2491_v50 = vpop.f32.mrb[107].mxu0  ;;  %v2877_v32 = vpop.f32.mrb[107].mxu1 }
 0x43a   :  { %v4446_v58 = vadd.f32 %v2491_v50, %v5909_v18  ;;  %v4510_v55 = vadd.f32 %v2877_v32, %v5912_v34 }
 0x43b   :  { %v2970_v61 = vpack.c.bf16 %v4445_v52, %v4443_v21  ;;  %v2972_v23 = vpack.c.bf16 %v4509_v36, %v4507_v7 }
 0x43c   :  { %v2971_v22 = vpack.c.bf16 %v4446_v58, %v4444_v16  ;;  %v2973_v54 = vpack.c.bf16 %v4510_v55, %v4508_v20 }
 0x43d   :  { %v6123_v41 = vmax.bf16 %v6592_v2, %v2970_v61  ;;  %v6126_v19 = vmax.bf16 %v6592_v2, %v2972_v23 }
 0x43e   :  { %v6129_v14 = vmax.bf16 %v6592_v2, %v2971_v22  ;;  %v6132_v9 = vmax.bf16 %v6592_v2, %v2973_v54  ;;  %v2495_v53 = vpop.f32.mrb[108].mxu0  ;;  %v2881_v50 = vpop.f32.mrb[108].mxu1 }
 0x43f   :  { %6637 = vst [vmem:[#allocation35_spill] sm:$0xff] %v6126_v19  ;;  %v2497_v15 = vpop.f32.mrb[109].mxu0  ;;  %v2883_v32 = vpop.f32.mrb[109].mxu1  ;;  %v4447_v52 = vadd.f32 %v2495_v53, %v5903_v63  ;;  %v4511_v61 = vadd.f32 %v2881_v50, %v5906_v1 }
 0x440   :  { %6638 = vst [vmem:[#allocation34_spill] sm:$0xff] %v6132_v9  ;;  %v2499_v21 = vpop.f32.mrb[110].mxu0  ;;  %v2885_v7 = vpop.f32.mrb[110].mxu1  ;;  %v4448_v20 = vadd.f32 %v2497_v15, %v5909_v18  ;;  %v4512_v58 = vadd.f32 %v2883_v32, %v5912_v34 }
 0x441   :  { %v4449_v36 = vadd.f32 %v2499_v21, %v5903_v63  ;;  %v4513_v23 = vadd.f32 %v2885_v7, %v5906_v1  ;;  %v2501_v16 = vpop.f32.mrb[111].mxu0  ;;  %v2887_v22 = vpop.f32.mrb[111].mxu1 }
 0x442   :  { %v4450_v55 = vadd.f32 %v2501_v16, %v5909_v18  ;;  %v4514_v54 = vadd.f32 %v2887_v22, %v5912_v34 }
 0x443   :  { %v2974_v19 = vpack.c.bf16 %v4449_v36, %v4447_v52  ;;  %v2976_v9 = vpack.c.bf16 %v4513_v23, %v4511_v61 }
 0x444   :  { %v2975_v27 = vpack.c.bf16 %v4450_v55, %v4448_v20  ;;  %v2977_v53 = vpack.c.bf16 %v4514_v54, %v4512_v58 }
 0x445   :  { %v6143_v50 = vmax.bf16 %v6592_v2, %v2974_v19  ;;  %v6146_v21 = vmax.bf16 %v6592_v2, %v2976_v9 }
 0x446   :  { %v6149_v7 = vmax.bf16 %v6592_v2, %v2975_v27  ;;  %v6152_v15 = vmax.bf16 %v6592_v2, %v2977_v53  ;;  %v2505_v32 = vpop.f32.mrb[112].mxu0  ;;  %v2891_v16 = vpop.f32.mrb[112].mxu1 }
 0x447   :  { %6639 = vst [vmem:[#allocation37_spill] sm:$0xff] %v6146_v21  ;;  %v2507_v48 = vpop.f32.mrb[113].mxu0  ;;  %v2893_v22 = vpop.f32.mrb[113].mxu1  ;;  %v4451_v36 = vadd.f32 %v2505_v32, %v5903_v63  ;;  %v4515_v19 = vadd.f32 %v2891_v16, %v5906_v1 }
 0x448   :  { %6640 = vst [vmem:[#allocation36_spill] sm:$0xff] %v6152_v15  ;;  %v2509_v52 = vpop.f32.mrb[114].mxu0  ;;  %v2895_v61 = vpop.f32.mrb[114].mxu1  ;;  %v4452_v58 = vadd.f32 %v2507_v48, %v5909_v18  ;;  %v4516_v55 = vadd.f32 %v2893_v22, %v5912_v34 }
 0x449   :  { %v4453_v23 = vadd.f32 %v2509_v52, %v5903_v63  ;;  %v4517_v9 = vadd.f32 %v2895_v61, %v5906_v1  ;;  %v2511_v20 = vpop.f32.mrb[115].mxu0  ;;  %v2897_v27 = vpop.f32.mrb[115].mxu1 }
 0x44a   :  { %v4454_v54 = vadd.f32 %v2511_v20, %v5909_v18  ;;  %v4518_v53 = vadd.f32 %v2897_v27, %v5912_v34 }
 0x44b   :  { %v2978_v21 = vpack.c.bf16 %v4453_v23, %v4451_v36  ;;  %v2980_v15 = vpack.c.bf16 %v4517_v9, %v4515_v19 }
 0x44c   :  { %v2979_v17 = vpack.c.bf16 %v4454_v54, %v4452_v58  ;;  %v2981_v32 = vpack.c.bf16 %v4518_v53, %v4516_v55 }
 0x44d   :  { %v6163_v16 = vmax.bf16 %v6592_v2, %v2978_v21  ;;  %v6166_v52 = vmax.bf16 %v6592_v2, %v2980_v15 }
 0x44e   :  { %v6169_v61 = vmax.bf16 %v6592_v2, %v2979_v17  ;;  %v6172_v48 = vmax.bf16 %v6592_v2, %v2981_v32  ;;  %v2515_v22 = vpop.f32.mrb[116].mxu0  ;;  %v2901_v20 = vpop.f32.mrb[116].mxu1 }
 0x44f   :  { %6641 = vst [vmem:[#allocation39_spill] sm:$0xff] %v6166_v52  ;;  %v2517_v47 = vpop.f32.mrb[117].mxu0  ;;  %v2903_v27 = vpop.f32.mrb[117].mxu1  ;;  %v4455_v23 = vadd.f32 %v2515_v22, %v5903_v63  ;;  %v4519_v21 = vadd.f32 %v2901_v20, %v5906_v1 }
 0x450   :  { %6642 = vst [vmem:[#allocation38_spill] sm:$0xff] %v6172_v48  ;;  %v2519_v36 = vpop.f32.mrb[118].mxu0  ;;  %v2905_v19 = vpop.f32.mrb[118].mxu1  ;;  %v4456_v55 = vadd.f32 %v2517_v47, %v5909_v18  ;;  %v4520_v54 = vadd.f32 %v2903_v27, %v5912_v34 }
 0x451   :  { %v4457_v9 = vadd.f32 %v2519_v36, %v5903_v63  ;;  %v4521_v15 = vadd.f32 %v2905_v19, %v5906_v1  ;;  %v2521_v58 = vpop.f32.mrb[119].mxu0  ;;  %v2907_v17 = vpop.f32.mrb[119].mxu1 }
 0x452   :  { %v4458_v53 = vadd.f32 %v2521_v58, %v5909_v18  ;;  %v4522_v32 = vadd.f32 %v2907_v17, %v5912_v34 }
 0x453   :  { %v2982_v52 = vpack.c.bf16 %v4457_v9, %v4455_v23  ;;  %v2984_v48 = vpack.c.bf16 %v4521_v15, %v4519_v21 }
 0x454   :  { %v2983_v42 = vpack.c.bf16 %v4458_v53, %v4456_v55  ;;  %v2985_v22 = vpack.c.bf16 %v4522_v32, %v4520_v54 }
 0x455   :  { %v6183_v20 = vmax.bf16 %v6592_v2, %v2982_v52  ;;  %v6186_v36 = vmax.bf16 %v6592_v2, %v2984_v48 }
 0x456   :  { %v6189_v19 = vmax.bf16 %v6592_v2, %v2983_v42  ;;  %v6192_v47 = vmax.bf16 %v6592_v2, %v2985_v22  ;;  %v2525_v27 = vpop.f32.mrb[120].mxu0  ;;  %v2911_v58 = vpop.f32.mrb[120].mxu1 }
 0x457   :  { %6643 = vst [vmem:[#allocation41_spill] sm:$0xff] %v6186_v36  ;;  %v2527_v57 = vpop.f32.mrb[121].mxu0  ;;  %v2913_v17 = vpop.f32.mrb[121].mxu1  ;;  %v4459_v9 = vadd.f32 %v2525_v27, %v5903_v63  ;;  %v4523_v52 = vadd.f32 %v2911_v58, %v5906_v1 }
 0x458   :  { %6644 = vst [vmem:[#allocation40_spill] sm:$0xff] %v6192_v47  ;;  %v2529_v23 = vpop.f32.mrb[122].mxu0  ;;  %v2915_v21 = vpop.f32.mrb[122].mxu1  ;;  %v4460_v54 = vadd.f32 %v2527_v57, %v5909_v18  ;;  %v4524_v53 = vadd.f32 %v2913_v17, %v5912_v34 }
 0x459   :  { %v4461_v15 = vadd.f32 %v2529_v23, %v5903_v63  ;;  %v4525_v48 = vadd.f32 %v2915_v21, %v5906_v1  ;;  %v2531_v55 = vpop.f32.mrb[123].mxu0  ;;  %v2917_v42 = vpop.f32.mrb[123].mxu1 }
 0x45a   :  { %v4462_v32 = vadd.f32 %v2531_v55, %v5909_v18  ;;  %v4526_v22 = vadd.f32 %v2917_v42, %v5912_v34 }
 0x45b   :  { %v2986_v36 = vpack.c.bf16 %v4461_v15, %v4459_v9  ;;  %v2988_v47 = vpack.c.bf16 %v4525_v48, %v4523_v52 }
 0x45c   :  { %v2987_v25 = vpack.c.bf16 %v4462_v32, %v4460_v54  ;;  %v2989_v27 = vpack.c.bf16 %v4526_v22, %v4524_v53 }
 0x45d   :  { %v6203_v58 = vmax.bf16 %v6592_v2, %v2986_v36  ;;  %v6206_v23 = vmax.bf16 %v6592_v2, %v2988_v47 }
 0x45e   :  { %v6209_v21 = vmax.bf16 %v6592_v2, %v2987_v25  ;;  %v6212_v57 = vmax.bf16 %v6592_v2, %v2989_v27  ;;  %v2535_v17 = vpop.f32.mrb[124].mxu0  ;;  %v2921_v55 = vpop.f32.mrb[124].mxu1 }
 0x45f   :  { %6645 = vst [vmem:[#allocation43_spill] sm:$0xff] %v6206_v23  ;;  %v2537_v45 = vpop.f32.mrb[125].mxu0  ;;  %v2923_v42 = vpop.f32.mrb[125].mxu1  ;;  %v4463_v15 = vadd.f32 %v2535_v17, %v5903_v63  ;;  %v4527_v36 = vadd.f32 %v2921_v55, %v5906_v1 }
 0x460   :  { %6646 = vst [vmem:[#allocation42_spill] sm:$0xff] %v6212_v57  ;;  %v2539_v9 = vpop.f32.mrb[126].mxu0  ;;  %v2925_v52 = vpop.f32.mrb[126].mxu1  ;;  %v4464_v53 = vadd.f32 %v2537_v45, %v5909_v18  ;;  %v4528_v32 = vadd.f32 %v2923_v42, %v5912_v34 }
 0x461   :  { %v4465_v48 = vadd.f32 %v2539_v9, %v5903_v63  ;;  %v4529_v47 = vadd.f32 %v2925_v52, %v5906_v1  ;;  %v2541_v54 = vpop.f32.mrb[127].mxu0  ;;  %v2927_v25 = vpop.f32.mrb[127].mxu1 }
 0x462   :  { %v4466_v22 = vadd.f32 %v2541_v54, %v5909_v18  ;;  %v4530_v27 = vadd.f32 %v2927_v25, %v5912_v34 }
 0x463   :  { %v2990_v23 = vpack.c.bf16 %v4465_v48, %v4463_v15  ;;  %v2992_v57 = vpack.c.bf16 %v4529_v47, %v4527_v36 }
 0x464   :  { %v2991_v38 = vpack.c.bf16 %v4466_v22, %v4464_v53  ;;  %v2993_v17 = vpack.c.bf16 %v4530_v27, %v4528_v32 }
 0x465   :  { %v6223_v55 = vmax.bf16 %v6592_v2, %v2990_v23  ;;  %v6226_v63 = vmax.bf16 %v6592_v2, %v2992_v57 }
 0x466   :  { %v6229_v1 = vmax.bf16 %v6592_v2, %v2991_v38  ;;  %v6232_v45 = vmax.bf16 %v6592_v2, %v2993_v17 }
 0x467   :  { %5325 = dma.done.wait [#allocation4 + $0x1], 16384 }
 0x468   :  { %5326 = vsyncadd [#allocation4 + $0x1], 4294950912  ;;  %3242 = vmatprep.mubr.bf16.mxu0 %v5929_v26  ;;  %3628 = vmatprep.mubr.bf16.mxu1 %v5929_v26  ;;  %v3061_v18 = vld [vmem:[#allocation3 + $0x8] sm:$0xff]  ;;  %v3063_v34 = vld [vmem:[#allocation3 + $0x18] sm:$0xff] }
 0x469   :  { %v3060_v42 = vld [vmem:[#allocation3] sm:$0xff]  ;;  %3210 = vmatprep.subr.bf16.mxu0 %v3061_v18  ;;  %3596 = vmatprep.subr.bf16.mxu1 %v3063_v34  ;;  %v3062_v23 = vld [vmem:[#allocation3 + $0x10] sm:$0xff]  ;;  %v3065_v57 = vld [vmem:[#allocation3 + $0x28] sm:$0xff] }
 0x46a   :  { %v3067_v9 = vld [vmem:[#allocation3 + $0x38] sm:$0xff]  ;;  %3211 = vmatpush1.bf16.msra.mxu0 %v3060_v42  ;;  %3597 = vmatpush1.bf16.msra.mxu1 %v3062_v23  ;;  %v3064_v2 = vld [vmem:[#allocation3 + $0x20] sm:$0xff]  ;;  %v3066_v38 = vld [vmem:[#allocation3 + $0x30] sm:$0xff] }
 0x46b   :  { %3212 = vmatprep.subr.bf16.mxu0 %v3065_v57  ;;  %3598 = vmatprep.subr.bf16.mxu1 %v3067_v9  ;;  %v3069_v52 = vld [vmem:[#allocation3 + $0x48] sm:$0xff]  ;;  %v3071_v15 = vld [vmem:[#allocation3 + $0x58] sm:$0xff]  ;;  %v3068_v26 = vld [vmem:[#allocation3 + $0x40] sm:$0xff] }
 0x46c   :  { %v3070_v36 = vld [vmem:[#allocation3 + $0x50] sm:$0xff]  ;;  %v3073_v48 = vld [vmem:[#allocation3 + $0x68] sm:$0xff]  ;;  %v3075_v47 = vld [vmem:[#allocation3 + $0x78] sm:$0xff] }
 0x46d   :  { %v3072_v54 = vld [vmem:[#allocation3 + $0x60] sm:$0xff]  ;;  %v3074_v25 = vld [vmem:[#allocation3 + $0x70] sm:$0xff]  ;;  %v3077_v53 = vld [vmem:[#allocation3 + $0x88] sm:$0xff] }
 0x46e   :  { %3213 = vmatpush1.bf16.msra.mxu0 %v3064_v2  ;;  %3599 = vmatpush1.bf16.msra.mxu1 %v3066_v38  ;;  %v3079_v32 = vld [vmem:[#allocation3 + $0x98] sm:$0xff]  ;;  %v3076_v22 = vld [vmem:[#allocation3 + $0x80] sm:$0xff]  ;;  %v3078_v27 = vld [vmem:[#allocation3 + $0x90] sm:$0xff] }
 0x46f   :  { %3214 = vmatprep.subr.bf16.mxu0 %v3069_v52  ;;  %3600 = vmatprep.subr.bf16.mxu1 %v3071_v15  ;;  %v3081_v17 = vld [vmem:[#allocation3 + $0xa8] sm:$0xff]  ;;  %v3083_v18 = vld [vmem:[#allocation3 + $0xb8] sm:$0xff]  ;;  %v3080_v34 = vld [vmem:[#allocation3 + $0xa0] sm:$0xff] }
 0x470   :  { %v3082_v42 = vld [vmem:[#allocation3 + $0xb0] sm:$0xff]  ;;  %v3085_v23 = vld [vmem:[#allocation3 + $0xc8] sm:$0xff]  ;;  %v3087_v57 = vld [vmem:[#allocation3 + $0xd8] sm:$0xff] }
 0x471   :  { %v3084_v9 = vld [vmem:[#allocation3 + $0xc0] sm:$0xff]  ;;  %v3086_v2 = vld [vmem:[#allocation3 + $0xd0] sm:$0xff]  ;;  %v3089_v38 = vld [vmem:[#allocation3 + $0xe8] sm:$0xff] }
 0x472   :  { %3215 = vmatpush1.bf16.msra.mxu0 %v3068_v26  ;;  %3601 = vmatpush1.bf16.msra.mxu1 %v3070_v36  ;;  %v3091_v52 = vld [vmem:[#allocation3 + $0xf8] sm:$0xff]  ;;  %v3088_v15 = vld [vmem:[#allocation3 + $0xe0] sm:$0xff]  ;;  %v3090_v26 = vld [vmem:[#allocation3 + $0xf0] sm:$0xff] }
 0x473   :  { %3216 = vmatprep.subr.bf16.mxu0 %v3073_v48  ;;  %3602 = vmatprep.subr.bf16.mxu1 %v3075_v47  ;;  %v3093_v36 = vld [vmem:[#allocation3 + $0x108] sm:$0xff]  ;;  %v3095_v48 = vld [vmem:[#allocation3 + $0x118] sm:$0xff]  ;;  %v3092_v47 = vld [vmem:[#allocation3 + $0x100] sm:$0xff] }
 0x476   :  { %3217 = vmatpush1.bf16.msra.mxu0 %v3072_v54  ;;  %3603 = vmatpush1.bf16.msra.mxu1 %v3074_v25  ;;  %v3094_v54 = vld [vmem:[#allocation3 + $0x110] sm:$0xff]  ;;  %v3097_v25 = vld [vmem:[#allocation3 + $0x128] sm:$0xff] }
 0x477   :  { %3218 = vmatprep.subr.bf16.mxu0 %v3077_v53  ;;  %3604 = vmatprep.subr.bf16.mxu1 %v3079_v32  ;;  %v3099_v53 = vld [vmem:[#allocation3 + $0x138] sm:$0xff]  ;;  %v3096_v32 = vld [vmem:[#allocation3 + $0x120] sm:$0xff] }
 0x47a   :  { %3219 = vmatpush1.bf16.msra.mxu0 %v3076_v22  ;;  %3605 = vmatpush1.bf16.msra.mxu1 %v3078_v27  ;;  %v3098_v22 = vld [vmem:[#allocation3 + $0x130] sm:$0xff]  ;;  %v3101_v27 = vld [vmem:[#allocation3 + $0x148] sm:$0xff] }
 0x47b   :  { %3220 = vmatprep.subr.bf16.mxu0 %v3081_v17  ;;  %3606 = vmatprep.subr.bf16.mxu1 %v3083_v18  ;;  %v3103_v17 = vld [vmem:[#allocation3 + $0x158] sm:$0xff]  ;;  %v3100_v18 = vld [vmem:[#allocation3 + $0x140] sm:$0xff] }
 0x47e   :  { %3221 = vmatpush1.bf16.msra.mxu0 %v3080_v34  ;;  %3607 = vmatpush1.bf16.msra.mxu1 %v3082_v42  ;;  %v3102_v34 = vld [vmem:[#allocation3 + $0x150] sm:$0xff]  ;;  %v3105_v42 = vld [vmem:[#allocation3 + $0x168] sm:$0xff] }
 0x47f   :  { %3222 = vmatprep.subr.bf16.mxu0 %v3085_v23  ;;  %3608 = vmatprep.subr.bf16.mxu1 %v3087_v57  ;;  %v3107_v23 = vld [vmem:[#allocation3 + $0x178] sm:$0xff]  ;;  %v3104_v57 = vld [vmem:[#allocation3 + $0x160] sm:$0xff] }
 0x482   :  { %3223 = vmatpush1.bf16.msra.mxu0 %v3084_v9  ;;  %3609 = vmatpush1.bf16.msra.mxu1 %v3086_v2  ;;  %v3106_v9 = vld [vmem:[#allocation3 + $0x170] sm:$0xff]  ;;  %v3109_v2 = vld [vmem:[#allocation3 + $0x188] sm:$0xff] }
 0x483   :  { %3224 = vmatprep.subr.bf16.mxu0 %v3089_v38  ;;  %3610 = vmatprep.subr.bf16.mxu1 %v3091_v52  ;;  %v3111_v38 = vld [vmem:[#allocation3 + $0x198] sm:$0xff]  ;;  %v3108_v52 = vld [vmem:[#allocation3 + $0x180] sm:$0xff] }
 0x486   :  { %3225 = vmatpush1.bf16.msra.mxu0 %v3088_v15  ;;  %3611 = vmatpush1.bf16.msra.mxu1 %v3090_v26  ;;  %v3110_v15 = vld [vmem:[#allocation3 + $0x190] sm:$0xff]  ;;  %v3113_v26 = vld [vmem:[#allocation3 + $0x1a8] sm:$0xff] }
 0x487   :  { %3226 = vmatprep.subr.bf16.mxu0 %v3093_v36  ;;  %3612 = vmatprep.subr.bf16.mxu1 %v3095_v48  ;;  %v3115_v36 = vld [vmem:[#allocation3 + $0x1b8] sm:$0xff]  ;;  %v3112_v48 = vld [vmem:[#allocation3 + $0x1a0] sm:$0xff] }
 0x48a   :  { %3227 = vmatpush1.bf16.msra.mxu0 %v3092_v47  ;;  %3613 = vmatpush1.bf16.msra.mxu1 %v3094_v54  ;;  %v3114_v47 = vld [vmem:[#allocation3 + $0x1b0] sm:$0xff]  ;;  %v3117_v54 = vld [vmem:[#allocation3 + $0x1c8] sm:$0xff] }
 0x48b   :  { %3228 = vmatprep.subr.bf16.mxu0 %v3097_v25  ;;  %3614 = vmatprep.subr.bf16.mxu1 %v3099_v53  ;;  %v3119_v25 = vld [vmem:[#allocation3 + $0x1d8] sm:$0xff]  ;;  %v3116_v53 = vld [vmem:[#allocation3 + $0x1c0] sm:$0xff] }
 0x48e   :  { %3229 = vmatpush1.bf16.msra.mxu0 %v3096_v32  ;;  %3615 = vmatpush1.bf16.msra.mxu1 %v3098_v22  ;;  %v3118_v32 = vld [vmem:[#allocation3 + $0x1d0] sm:$0xff]  ;;  %v3121_v22 = vld [vmem:[#allocation3 + $0x1e8] sm:$0xff] }
 0x48f   :  { %3230 = vmatprep.subr.bf16.mxu0 %v3101_v27  ;;  %3616 = vmatprep.subr.bf16.mxu1 %v3103_v17  ;;  %v3123_v27 = vld [vmem:[#allocation3 + $0x1f8] sm:$0xff]  ;;  %v3120_v17 = vld [vmem:[#allocation3 + $0x1e0] sm:$0xff] }
 0x492   :  { %3231 = vmatpush1.bf16.msra.mxu0 %v3100_v18  ;;  %3617 = vmatpush1.bf16.msra.mxu1 %v3102_v34  ;;  %v3122_v18 = vld [vmem:[#allocation3 + $0x1f0] sm:$0xff]  ;;  %v3125_v34 = vld [vmem:[#allocation3 + $0x208] sm:$0xff] }
 0x493   :  { %3232 = vmatprep.subr.bf16.mxu0 %v3105_v42  ;;  %3618 = vmatprep.subr.bf16.mxu1 %v3107_v23  ;;  %v3127_v42 = vld [vmem:[#allocation3 + $0x218] sm:$0xff]  ;;  %v3124_v23 = vld [vmem:[#allocation3 + $0x200] sm:$0xff] }
 0x496   :  { %3233 = vmatpush1.bf16.msra.mxu0 %v3104_v57  ;;  %3619 = vmatpush1.bf16.msra.mxu1 %v3106_v9  ;;  %v3126_v57 = vld [vmem:[#allocation3 + $0x210] sm:$0xff]  ;;  %v3129_v9 = vld [vmem:[#allocation3 + $0x228] sm:$0xff] }
 0x497   :  { %3234 = vmatprep.subr.bf16.mxu0 %v3109_v2  ;;  %3620 = vmatprep.subr.bf16.mxu1 %v3111_v38  ;;  %v3131_v2 = vld [vmem:[#allocation3 + $0x238] sm:$0xff]  ;;  %v3128_v38 = vld [vmem:[#allocation3 + $0x220] sm:$0xff] }
 0x49a   :  { %3235 = vmatpush1.bf16.msra.mxu0 %v3108_v52  ;;  %3621 = vmatpush1.bf16.msra.mxu1 %v3110_v15  ;;  %v3130_v52 = vld [vmem:[#allocation3 + $0x230] sm:$0xff]  ;;  %v3133_v15 = vld [vmem:[#allocation3 + $0x248] sm:$0xff] }
 0x49b   :  { %3236 = vmatprep.subr.bf16.mxu0 %v3113_v26  ;;  %3622 = vmatprep.subr.bf16.mxu1 %v3115_v36  ;;  %v3135_v26 = vld [vmem:[#allocation3 + $0x258] sm:$0xff]  ;;  %v3132_v36 = vld [vmem:[#allocation3 + $0x240] sm:$0xff] }
 0x49e   :  { %3237 = vmatpush1.bf16.msra.mxu0 %v3112_v48  ;;  %3623 = vmatpush1.bf16.msra.mxu1 %v3114_v47  ;;  %v3137_v48 = vld [vmem:[#allocation3 + $0x268] sm:$0xff]  ;;  %v3139_v47 = vld [vmem:[#allocation3 + $0x278] sm:$0xff] }
 0x49f   :  { %3238 = vmatprep.subr.bf16.mxu0 %v3117_v54  ;;  %3624 = vmatprep.subr.bf16.mxu1 %v3119_v25  ;;  %v3138_v54 = vld [vmem:[#allocation3 + $0x270] sm:$0xff]  ;;  %v3141_v25 = vld [vmem:[#allocation3 + $0x288] sm:$0xff] }
 0x4a2   :  { %3239 = vmatpush1.bf16.msra.mxu0 %v3116_v53  ;;  %3625 = vmatpush1.bf16.msra.mxu1 %v3118_v32  ;;  %v3143_v53 = vld [vmem:[#allocation3 + $0x298] sm:$0xff]  ;;  %v3140_v32 = vld [vmem:[#allocation3 + $0x280] sm:$0xff] }
 0x4a3   :  { %3240 = vmatprep.subr.bf16.mxu0 %v3121_v22  ;;  %3626 = vmatprep.subr.bf16.mxu1 %v3123_v27  ;;  %v3145_v22 = vld [vmem:[#allocation3 + $0x2a8] sm:$0xff]  ;;  %v3144_v27 = vld [vmem:[#allocation3 + $0x2a0] sm:$0xff] }
 0x4a6   :  { %3241 = vmatpush1.bf16.msra.mxu0 %v3120_v17  ;;  %3627 = vmatpush1.bf16.msra.mxu1 %v3122_v18  ;;  %v3146_v17 = vld [vmem:[#allocation3 + $0x2b0] sm:$0xff]  ;;  %v3149_v18 = vld [vmem:[#allocation3 + $0x2c8] sm:$0xff] }
 0x4a7   :  { %3403 = vmatprep.subr.bf16.mxu0 %v3125_v34  ;;  %3789 = vmatprep.subr.bf16.mxu1 %v3127_v42  ;;  %v3151_v34 = vld [vmem:[#allocation3 + $0x2d8] sm:$0xff]  ;;  %v3148_v42 = vld [vmem:[#allocation3 + $0x2c0] sm:$0xff] }
 0x4a9   :  { %3243 = vmatmul.mubr.bf16.vlgmr.msra.gmra.mrb[128].mxu0 %v5923_v12  ;;  %3629 = vmatmul.mubr.bf16.vlgmr.msra.gmra.mrb[128].mxu1 %v5923_v12  ;;  %v3134_v12 = vld [vmem:[#allocation3 + $0x250] sm:$0xff] }
 0x4aa   :  { %3404 = vmatpush1.bf16.msra.mxu0 %v3124_v23  ;;  %3790 = vmatpush1.bf16.msra.mxu1 %v3126_v57  ;;  %v3153_v23 = vld [vmem:[#allocation3 + $0x2e8] sm:$0xff]  ;;  %v3152_v57 = vld [vmem:[#allocation3 + $0x2e0] sm:$0xff] }
 0x4ab   :  { %3252 = vmatprep.mubr.bf16.mxu0 %v5949_v39  ;;  %3638 = vmatprep.mubr.bf16.mxu1 %v5949_v39  ;;  %v3136_v39 = vld [vmem:[#allocation3 + $0x260] sm:$0xff] }
 0x4ac   :  { %3405 = vmatprep.subr.bf16.mxu0 %v3129_v9  ;;  %3791 = vmatprep.subr.bf16.mxu1 %v3131_v2  ;;  %v3154_v9 = vld [vmem:[#allocation3 + $0x2f0] sm:$0xff]  ;;  %v3157_v2 = vld [vmem:[#allocation3 + $0x308] sm:$0xff] }
 0x4ae   :  { %3406 = vmatpush1.bf16.msra.mxu0 %v3128_v38  ;;  %3792 = vmatpush1.bf16.msra.mxu1 %v3130_v52  ;;  %v3159_v38 = vld [vmem:[#allocation3 + $0x318] sm:$0xff]  ;;  %v3156_v52 = vld [vmem:[#allocation3 + $0x300] sm:$0xff] }
 0x4af   :  { %3407 = vmatprep.subr.bf16.mxu0 %v3133_v15  ;;  %3793 = vmatprep.subr.bf16.mxu1 %v3135_v26  ;;  %v3161_v15 = vld [vmem:[#allocation3 + $0x328] sm:$0xff]  ;;  %v3160_v26 = vld [vmem:[#allocation3 + $0x320] sm:$0xff] }
 0x4b1   :  { %3253 = vmatmul.mubr.bf16.gmra.mrb[132].mxu0 %v5943_v40  ;;  %3639 = vmatmul.mubr.bf16.gmra.mrb[132].mxu1 %v5943_v40  ;;  %v3142_v40 = vld [vmem:[#allocation3 + $0x290] sm:$0xff] }
 0x4b2   :  { %3262 = vmatprep.mubr.bf16.mxu0 %v5969_v10  ;;  %3648 = vmatprep.mubr.bf16.mxu1 %v5969_v10  ;;  %v3147_v10 = vld [vmem:[#allocation3 + $0x2b8] sm:$0xff] }
 0x4b3   :  { %3408 = vmatpush1.bf16.msra.mxu0 %v3132_v36  ;;  %3794 = vmatpush1.bf16.msra.mxu1 %v3134_v12  ;;  %v3162_v36 = vld [vmem:[#allocation3 + $0x330] sm:$0xff]  ;;  %v3165_v12 = vld [vmem:[#allocation3 + $0x348] sm:$0xff] }
 0x4b4   :  { %3409 = vmatprep.subr.bf16.mxu0 %v3137_v48  ;;  %3795 = vmatprep.subr.bf16.mxu1 %v3139_v47  ;;  %v3167_v48 = vld [vmem:[#allocation3 + $0x358] sm:$0xff]  ;;  %v3164_v47 = vld [vmem:[#allocation3 + $0x340] sm:$0xff] }
 0x4b7   :  { %3410 = vmatpush1.bf16.msra.mxu0 %v3136_v39  ;;  %3796 = vmatpush1.bf16.msra.mxu1 %v3138_v54  ;;  %v3169_v39 = vld [vmem:[#allocation3 + $0x368] sm:$0xff]  ;;  %v3168_v54 = vld [vmem:[#allocation3 + $0x360] sm:$0xff] }
 0x4b8   :  { %3411 = vmatprep.subr.bf16.mxu0 %v3141_v25  ;;  %3797 = vmatprep.subr.bf16.mxu1 %v3143_v53  ;;  %v3170_v25 = vld [vmem:[#allocation3 + $0x370] sm:$0xff]  ;;  %v3173_v53 = vld [vmem:[#allocation3 + $0x388] sm:$0xff] }
 0x4b9   :  { %3263 = vmatmul.mubr.bf16.gmra.mrb[136].mxu0 %v5963_v29  ;;  %3649 = vmatmul.mubr.bf16.gmra.mrb[136].mxu1 %v5963_v29  ;;  %v3150_v29 = vld [vmem:[#allocation3 + $0x2d0] sm:$0xff] }
 0x4ba   :  { %3272 = vmatprep.mubr.bf16.mxu0 %v5989_v37  ;;  %3658 = vmatprep.mubr.bf16.mxu1 %v5989_v37  ;;  %v3155_v37 = vld [vmem:[#allocation3 + $0x2f8] sm:$0xff] }
 0x4bb   :  { %3412 = vmatpush1.bf16.msra.mxu0 %v3140_v32  ;;  %3798 = vmatpush1.bf16.msra.mxu1 %v3142_v40  ;;  %v3175_v32 = vld [vmem:[#allocation3 + $0x398] sm:$0xff]  ;;  %v3172_v40 = vld [vmem:[#allocation3 + $0x380] sm:$0xff] }
 0x4bc   :  { %3413 = vmatprep.subr.bf16.mxu0 %v3145_v22  ;;  %3799 = vmatprep.subr.bf16.mxu1 %v3147_v10  ;;  %v3177_v22 = vld [vmem:[#allocation3 + $0x3a8] sm:$0xff]  ;;  %v3176_v10 = vld [vmem:[#allocation3 + $0x3a0] sm:$0xff] }
 0x4bf   :  { %3414 = vmatpush1.bf16.msra.mxu0 %v3144_v27  ;;  %3800 = vmatpush1.bf16.msra.mxu1 %v3146_v17  ;;  %v3178_v27 = vld [vmem:[#allocation3 + $0x3b0] sm:$0xff]  ;;  %v3181_v17 = vld [vmem:[#allocation3 + $0x3c8] sm:$0xff] }
 0x4c0   :  { %3415 = vmatprep.subr.bf16.mxu0 %v3149_v18  ;;  %3801 = vmatprep.subr.bf16.mxu1 %v3151_v34  ;;  %v3183_v18 = vld [vmem:[#allocation3 + $0x3d8] sm:$0xff]  ;;  %v3180_v34 = vld [vmem:[#allocation3 + $0x3c0] sm:$0xff] }
 0x4c1   :  { %3273 = vmatmul.mubr.bf16.gmra.mrb[140].mxu0 %v5983_v60  ;;  %3659 = vmatmul.mubr.bf16.gmra.mrb[140].mxu1 %v5983_v60  ;;  %v3158_v60 = vld [vmem:[#allocation3 + $0x310] sm:$0xff] }
 0x4c2   :  { %3282 = vmatprep.mubr.bf16.mxu0 %v6009_v43  ;;  %3668 = vmatprep.mubr.bf16.mxu1 %v6009_v43  ;;  %v3163_v43 = vld [vmem:[#allocation3 + $0x338] sm:$0xff] }
 0x4c3   :  { %3416 = vmatpush1.bf16.msra.mxu0 %v3148_v42  ;;  %3802 = vmatpush1.bf16.msra.mxu1 %v3150_v29  ;;  %v3185_v42 = vld [vmem:[#allocation3 + $0x3e8] sm:$0xff]  ;;  %v3184_v29 = vld [vmem:[#allocation3 + $0x3e0] sm:$0xff] }
 0x4c4   :  { %3417 = vmatprep.subr.bf16.mxu0 %v3153_v23  ;;  %3803 = vmatprep.subr.bf16.mxu1 %v3155_v37  ;;  %v3186_v23 = vld [vmem:[#allocation3 + $0x3f0] sm:$0xff]  ;;  %v6670_v37 = vld [vmem:[#allocation23_spill] sm:$0xff] }
 0x4c7   :  { %3418 = vmatpush1.bf16.msra.mxu0 %v3152_v57  ;;  %3804 = vmatpush1.bf16.msra.mxu1 %v3154_v9 }
 0x4c8   :  { %3419 = vmatprep.subr.bf16.mxu0 %v3157_v2  ;;  %3805 = vmatprep.subr.bf16.mxu1 %v3159_v38 }
 0x4c9   :  { %3283 = vmatmul.mubr.bf16.gmra.mrb[144].mxu0 %v6003_v11  ;;  %3669 = vmatmul.mubr.bf16.gmra.mrb[144].mxu1 %v6003_v11  ;;  %v3166_v11 = vld [vmem:[#allocation3 + $0x350] sm:$0xff] }
 0x4ca   :  { %3292 = vmatprep.mubr.bf16.mxu0 %v6029_v8  ;;  %3678 = vmatprep.mubr.bf16.mxu1 %v6029_v8  ;;  %v3171_v8 = vld [vmem:[#allocation3 + $0x378] sm:$0xff] }
 0x4cb   :  { %3420 = vmatpush1.bf16.msra.mxu0 %v3156_v52  ;;  %3806 = vmatpush1.bf16.msra.mxu1 %v3158_v60 }
 0x4cc   :  { %3421 = vmatprep.subr.bf16.mxu0 %v3161_v15  ;;  %3807 = vmatprep.subr.bf16.mxu1 %v3163_v43 }
 0x4cf   :  { %3422 = vmatpush1.bf16.msra.mxu0 %v3160_v26  ;;  %3808 = vmatpush1.bf16.msra.mxu1 %v3162_v36 }
 0x4d0   :  { %3423 = vmatprep.subr.bf16.mxu0 %v3165_v12  ;;  %3809 = vmatprep.subr.bf16.mxu1 %v3167_v48 }
 0x4d1   :  { %3293 = vmatmul.mubr.bf16.gmra.mrb[148].mxu0 %v6023_v31  ;;  %3679 = vmatmul.mubr.bf16.gmra.mrb[148].mxu1 %v6023_v31  ;;  %v3174_v31 = vld [vmem:[#allocation3 + $0x390] sm:$0xff] }
 0x4d2   :  { %3302 = vmatprep.mubr.bf16.mxu0 %v6049_v59  ;;  %3688 = vmatprep.mubr.bf16.mxu1 %v6049_v59  ;;  %v3179_v59 = vld [vmem:[#allocation3 + $0x3b8] sm:$0xff] }
 0x4d3   :  { %3424 = vmatpush1.bf16.msra.mxu0 %v3164_v47  ;;  %3810 = vmatpush1.bf16.msra.mxu1 %v3166_v11 }
 0x4d4   :  { %3425 = vmatprep.subr.bf16.mxu0 %v3169_v39  ;;  %3811 = vmatprep.subr.bf16.mxu1 %v3171_v8 }
 0x4d7   :  { %3426 = vmatpush1.bf16.msra.mxu0 %v3168_v54  ;;  %3812 = vmatpush1.bf16.msra.mxu1 %v3170_v25 }
 0x4d8   :  { %3427 = vmatprep.subr.bf16.mxu0 %v3173_v53  ;;  %3813 = vmatprep.subr.bf16.mxu1 %v3175_v32 }
 0x4d9   :  { %3303 = vmatmul.mubr.bf16.gmra.mrb[152].mxu0 %v6043_v35  ;;  %3689 = vmatmul.mubr.bf16.gmra.mrb[152].mxu1 %v6043_v35  ;;  %v3182_v35 = vld [vmem:[#allocation3 + $0x3d0] sm:$0xff] }
 0x4da   :  { %3312 = vmatprep.mubr.bf16.mxu0 %v6069_v24  ;;  %3698 = vmatprep.mubr.bf16.mxu1 %v6069_v24  ;;  %v3187_v24 = vld [vmem:[#allocation3 + $0x3f8] sm:$0xff] }
 0x4db   :  { %3428 = vmatpush1.bf16.msra.mxu0 %v3172_v40  ;;  %3814 = vmatpush1.bf16.msra.mxu1 %v3174_v31 }
 0x4dc   :  { %3429 = vmatprep.subr.bf16.mxu0 %v3177_v22  ;;  %3815 = vmatprep.subr.bf16.mxu1 %v3179_v59 }
 0x4df   :  { %3430 = vmatpush1.bf16.msra.mxu0 %v3176_v10  ;;  %3816 = vmatpush1.bf16.msra.mxu1 %v3178_v27 }
 0x4e0   :  { %3431 = vmatprep.subr.bf16.mxu0 %v3181_v17  ;;  %3817 = vmatprep.subr.bf16.mxu1 %v3183_v18 }
 0x4e1   :  { %3313 = vmatmul.mubr.bf16.gmra.mrb[156].mxu0 %v6063_v13  ;;  %3699 = vmatmul.mubr.bf16.gmra.mrb[156].mxu1 %v6063_v13  ;;  %v6657_v13 = vld [vmem:[#allocation34_spill] sm:$0xff] }
 0x4e2   :  { %3322 = vmatprep.mubr.bf16.mxu0 %v6089_v6  ;;  %3708 = vmatprep.mubr.bf16.mxu1 %v6089_v6  ;;  %v6659_v6 = vld [vmem:[#allocation36_spill] sm:$0xff] }
 0x4e3   :  { %3432 = vmatpush1.bf16.msra.mxu0 %v3180_v34  ;;  %3818 = vmatpush1.bf16.msra.mxu1 %v3182_v35 }
 0x4e4   :  { %3433 = vmatprep.subr.bf16.mxu0 %v3185_v42  ;;  %3819 = vmatprep.subr.bf16.mxu1 %v3187_v24 }
 0x4e7   :  { %3434 = vmatpush1.bf16.msra.mxu0 %v3184_v29  ;;  %3820 = vmatpush1.bf16.msra.mxu1 %v3186_v23 }
 0x4e9   :  { %3323 = vmatmul.mubr.bf16.gmra.mrb[160].mxu0 %v6083_v44  ;;  %3709 = vmatmul.mubr.bf16.gmra.mrb[160].mxu1 %v6083_v44  ;;  %v6658_v44 = vld [vmem:[#allocation35_spill] sm:$0xff] }
 0x4ea   :  { %3332 = vmatprep.mubr.bf16.mxu0 %v6109_v0  ;;  %3718 = vmatprep.mubr.bf16.mxu1 %v6109_v0  ;;  %v6661_v0 = vld [vmem:[#allocation38_spill] sm:$0xff] }
 0x4f1   :  { %3333 = vmatmul.mubr.bf16.gmra.mrb[164].mxu0 %v6103_v33  ;;  %3719 = vmatmul.mubr.bf16.gmra.mrb[164].mxu1 %v6103_v33  ;;  %v6660_v33 = vld [vmem:[#allocation37_spill] sm:$0xff] }
 0x4f2   :  { %3342 = vmatprep.mubr.bf16.mxu0 %v6129_v14  ;;  %3728 = vmatprep.mubr.bf16.mxu1 %v6129_v14  ;;  %v6663_v14 = vld [vmem:[#allocation40_spill] sm:$0xff] }
 0x4f9   :  { %3343 = vmatmul.mubr.bf16.gmra.mrb[168].mxu0 %v6123_v41  ;;  %3729 = vmatmul.mubr.bf16.gmra.mrb[168].mxu1 %v6123_v41  ;;  %v6662_v41 = vld [vmem:[#allocation39_spill] sm:$0xff] }
 0x4fa   :  { %3352 = vmatprep.mubr.bf16.mxu0 %v6149_v7  ;;  %3738 = vmatprep.mubr.bf16.mxu1 %v6149_v7  ;;  %v6665_v7 = vld [vmem:[#allocation42_spill] sm:$0xff] }
 0x501   :  { %3353 = vmatmul.mubr.bf16.gmra.mrb[172].mxu0 %v6143_v50  ;;  %3739 = vmatmul.mubr.bf16.gmra.mrb[172].mxu1 %v6143_v50  ;;  %v6664_v50 = vld [vmem:[#allocation41_spill] sm:$0xff] }
 0x502   :  { %3362 = vmatprep.mubr.bf16.mxu0 %v6169_v61  ;;  %3748 = vmatprep.mubr.bf16.mxu1 %v6169_v61  ;;  %v3188_v61 = vld [vmem:[%s6526_s6] sm:$0xf]  ;;  %s5346_s6 = smov [#allocation10]  }
 0x503   :  { %v6375_v57 = vrot.slane %v3188_v61, %v6670_v37  ;;  %s4115_s26 = sshll.u32 %s5346_s6, 4  ;;  %s4116_s26 = int_to_ptr.vmem [resolvable:$true] %s4115_s26 }
 0x504   :  { %s5297_s27 = scalar_lea.vmem %s4116_s26, 16384  ;;  %p5302_p3 = scmp.lt.s32.totalorder %s4116_s26, %s4116_s26 }
 0x505   :  { %p5298_p2 = scmp.ne.s32.totalorder %s4116_s26, %s5297_s27  ;;  %p5303_p4 = scmp.lt.s32.totalorder %s5297_s27, %s5297_s27 }
 0x507   :  { %p5304_p5 = por %p5303_p4, %p5302_p3 }
 0x509   :  { %3363 = vmatmul.mubr.bf16.gmra.mrb[176].mxu0 %v6163_v16  ;;  %3749 = vmatmul.mubr.bf16.gmra.mrb[176].mxu1 %v6163_v16  ;;  %v6666_v16 = vld [vmem:[#allocation43_spill] sm:$0xff]  ;;  %p5305_p6 = pnand %p5304_p5, %p5298_p2 }
 0x50a   :  { %3372 = vmatprep.mubr.bf16.mxu0 %v6189_v19  ;;  %3758 = vmatprep.mubr.bf16.mxu1 %v6189_v19 }
 0x511   :  { %3373 = vmatmul.mubr.bf16.gmra.mrb[180].mxu0 %v6183_v20  ;;  %3759 = vmatmul.mubr.bf16.gmra.mrb[180].mxu1 %v6183_v20  ;;  %v6667_v20 = vld [vmem:[#allocation20_spill] sm:$0xff] }
 0x512   :  { %3382 = vmatprep.mubr.bf16.mxu0 %v6209_v21  ;;  %3768 = vmatprep.mubr.bf16.mxu1 %v6209_v21  ;;  %v6366_v19 = vrot.slane %v3188_v61, %v6667_v20 }
 0x519   :  { %3383 = vmatmul.mubr.bf16.gmra.mrb[184].mxu0 %v6203_v58  ;;  %3769 = vmatmul.mubr.bf16.gmra.mrb[184].mxu1 %v6203_v58  ;;  %v6668_v58 = vld [vmem:[#allocation21_spill] sm:$0xff] }
 0x51a   :  { %3392 = vmatprep.mubr.bf16.mxu0 %v6229_v1  ;;  %3778 = vmatprep.mubr.bf16.mxu1 %v6229_v1  ;;  %v6369_v21 = vrot.slane %v3188_v61, %v6668_v58 }
 0x521   :  { %3393 = vmatmul.mubr.bf16.gmra.mrb[188].mxu0 %v6223_v55  ;;  %3779 = vmatmul.mubr.bf16.gmra.mrb[188].mxu1 %v6223_v55  ;;  %v6669_v55 = vld [vmem:[#allocation22_spill] sm:$0xff] }
 0x522   :  { %3435 = vmatprep.mubr.bf16.mxu0 %v5932_v49  ;;  %3821 = vmatprep.mubr.bf16.mxu1 %v5932_v49  ;;  %v6648_v49 = vld [vmem:[#allocation25_spill] sm:$0xff]  ;;  %v6372_v1 = vrot.slane %v3188_v61, %v6669_v55 }
 0x529   :  { %3436 = vmatmul.mubr.bf16.vlgmr.msra.gmra.mrb[128].mxu0 %v5926_v4  ;;  %3822 = vmatmul.mubr.bf16.vlgmr.msra.gmra.mrb[128].mxu1 %v5926_v4  ;;  %v6647_v4 = vld [vmem:[#allocation24_spill] sm:$0xff] }
 0x52a   :  { %3445 = vmatprep.mubr.bf16.mxu0 %v5952_v46  ;;  %3831 = vmatprep.mubr.bf16.mxu1 %v5952_v46  ;;  %v6650_v46 = vld [vmem:[#allocation27_spill] sm:$0xff] }
 0x531   :  { %3446 = vmatmul.mubr.bf16.gmra.mrb[132].mxu0 %v5946_v28  ;;  %3832 = vmatmul.mubr.bf16.gmra.mrb[132].mxu1 %v5946_v28  ;;  %v6649_v28 = vld [vmem:[#allocation26_spill] sm:$0xff] }
 0x532   :  { %3455 = vmatprep.mubr.bf16.mxu0 %v5972_v51  ;;  %3841 = vmatprep.mubr.bf16.mxu1 %v5972_v51  ;;  %v6652_v51 = vld [vmem:[#allocation29_spill] sm:$0xff] }
 0x539   :  { %3456 = vmatmul.mubr.bf16.gmra.mrb[136].mxu0 %v5966_v3  ;;  %3842 = vmatmul.mubr.bf16.gmra.mrb[136].mxu1 %v5966_v3  ;;  %v6651_v3 = vld [vmem:[#allocation28_spill] sm:$0xff] }
 0x53a   :  { %3465 = vmatprep.mubr.bf16.mxu0 %v5992_v62  ;;  %3851 = vmatprep.mubr.bf16.mxu1 %v5992_v62  ;;  %v6654_v62 = vld [vmem:[#allocation31_spill] sm:$0xff] }
 0x541   :  { %3466 = vmatmul.mubr.bf16.gmra.mrb[140].mxu0 %v5986_v30  ;;  %3852 = vmatmul.mubr.bf16.gmra.mrb[140].mxu1 %v5986_v30  ;;  %v6653_v30 = vld [vmem:[#allocation30_spill] sm:$0xff] }
 0x542   :  { %3475 = vmatprep.mubr.bf16.mxu0 %v6012_v5  ;;  %3861 = vmatprep.mubr.bf16.mxu1 %v6012_v5  ;;  %v6656_v5 = vld [vmem:[#allocation33_spill] sm:$0xff] }
 0x549   :  { %3476 = vmatmul.mubr.bf16.gmra.mrb[144].mxu0 %v6006_v56  ;;  %3862 = vmatmul.mubr.bf16.gmra.mrb[144].mxu1 %v6006_v56  ;;  %v6655_v56 = vld [vmem:[#allocation32_spill] sm:$0xff] }
 0x54a   :  { %3485 = vmatprep.mubr.bf16.mxu0 %v6647_v4  ;;  %3871 = vmatprep.mubr.bf16.mxu1 %v6647_v4 }
 0x551   :  { %3486 = vmatmul.mubr.bf16.gmra.mrb[148].mxu0 %v6648_v49  ;;  %3872 = vmatmul.mubr.bf16.gmra.mrb[148].mxu1 %v6648_v49 }
 0x552   :  { %3495 = vmatprep.mubr.bf16.mxu0 %v6649_v28  ;;  %3881 = vmatprep.mubr.bf16.mxu1 %v6649_v28 }
 0x559   :  { %3496 = vmatmul.mubr.bf16.gmra.mrb[152].mxu0 %v6650_v46  ;;  %3882 = vmatmul.mubr.bf16.gmra.mrb[152].mxu1 %v6650_v46 }
 0x55a   :  { %3505 = vmatprep.mubr.bf16.mxu0 %v6651_v3  ;;  %3891 = vmatprep.mubr.bf16.mxu1 %v6651_v3 }
 0x561   :  { %3506 = vmatmul.mubr.bf16.gmra.mrb[156].mxu0 %v6652_v51  ;;  %3892 = vmatmul.mubr.bf16.gmra.mrb[156].mxu1 %v6652_v51 }
 0x562   :  { %3515 = vmatprep.mubr.bf16.mxu0 %v6653_v30  ;;  %3901 = vmatprep.mubr.bf16.mxu1 %v6653_v30 }
 0x569   :  { %3516 = vmatmul.mubr.bf16.gmra.mrb[160].mxu0 %v6654_v62  ;;  %3902 = vmatmul.mubr.bf16.gmra.mrb[160].mxu1 %v6654_v62 }
 0x56a   :  { %3525 = vmatprep.mubr.bf16.mxu0 %v6655_v56  ;;  %3911 = vmatprep.mubr.bf16.mxu1 %v6655_v56 }
 0x571   :  { %3526 = vmatmul.mubr.bf16.gmra.mrb[164].mxu0 %v6656_v5  ;;  %3912 = vmatmul.mubr.bf16.gmra.mrb[164].mxu1 %v6656_v5 }
 0x572   :  { %3535 = vmatprep.mubr.bf16.mxu0 %v6657_v13  ;;  %3921 = vmatprep.mubr.bf16.mxu1 %v6657_v13 }
 0x579   :  { %3536 = vmatmul.mubr.bf16.gmra.mrb[168].mxu0 %v6658_v44  ;;  %3922 = vmatmul.mubr.bf16.gmra.mrb[168].mxu1 %v6658_v44 }
 0x57a   :  { %3545 = vmatprep.mubr.bf16.mxu0 %v6659_v6  ;;  %3931 = vmatprep.mubr.bf16.mxu1 %v6659_v6 }
 0x581   :  { %3546 = vmatmul.mubr.bf16.gmra.mrb[172].mxu0 %v6660_v33  ;;  %3932 = vmatmul.mubr.bf16.gmra.mrb[172].mxu1 %v6660_v33 }
 0x582   :  { %3555 = vmatprep.mubr.bf16.mxu0 %v6661_v0  ;;  %3941 = vmatprep.mubr.bf16.mxu1 %v6661_v0 }
 0x589   :  { %3556 = vmatmul.mubr.bf16.gmra.mrb[176].mxu0 %v6662_v41  ;;  %3942 = vmatmul.mubr.bf16.gmra.mrb[176].mxu1 %v6662_v41 }
 0x58a   :  { %3565 = vmatprep.mubr.bf16.mxu0 %v6663_v14  ;;  %3951 = vmatprep.mubr.bf16.mxu1 %v6663_v14 }
 0x591   :  { %3566 = vmatmul.mubr.bf16.gmra.mrb[180].mxu0 %v6664_v50  ;;  %3952 = vmatmul.mubr.bf16.gmra.mrb[180].mxu1 %v6664_v50 }
 0x592   :  { %3575 = vmatprep.mubr.bf16.mxu0 %v6665_v7  ;;  %3961 = vmatprep.mubr.bf16.mxu1 %v6665_v7 }
 0x599   :  { %3576 = vmatmul.mubr.bf16.gmra.mrb[184].mxu0 %v6666_v16  ;;  %3962 = vmatmul.mubr.bf16.gmra.mrb[184].mxu1 %v6666_v16 }
 0x59a   :  { %3585 = vmatprep.mubr.bf16.mxu0 %v6232_v45  ;;  %3971 = vmatprep.mubr.bf16.mxu1 %v6232_v45 }
 0x5a1   :  { %3586 = vmatmul.mubr.bf16.gmra.mrb[188].mxu0 %v6226_v63  ;;  %3972 = vmatmul.mubr.bf16.gmra.mrb[188].mxu1 %v6226_v63 }
 0x5fc   :  { %v3437_v45 = vpop.f32.mrb[128].mxu0  ;;  %v3823_v9 = vpop.f32.mrb[128].mxu1 }
 0x5fd   :  { %v4531_v63 = vadd.f32 %v3437_v45, %v6366_v19  ;;  %v4595_v2 = vadd.f32 %v3823_v9, %v6369_v21  ;;  %v3439_v38 = vpop.f32.mrb[129].mxu0  ;;  %v3825_v52 = vpop.f32.mrb[129].mxu1 }
 0x5fe   :  { %v4532_v60 = vadd.f32 %v3439_v38, %v6372_v1  ;;  %v4596_v15 = vadd.f32 %v3825_v52, %v6375_v57  ;;  %v3441_v43 = vpop.f32.mrb[130].mxu0  ;;  %v3827_v26 = vpop.f32.mrb[130].mxu1 }
 0x5ff   :  { %3982 = vst [vmem:[#allocation10] sm:$0xff] %v4531_v63  ;;  %3984 = vst [vmem:[#allocation10 + $0x10] sm:$0xff] %v4595_v2  ;;  %v4533_v36 = vadd.f32 %v3441_v43, %v6366_v19  ;;  %v4597_v12 = vadd.f32 %v3827_v26, %v6369_v21  ;;  %v3443_v48 = vpop.f32.mrb[131].mxu0  ;;  %v3829_v47 = vpop.f32.mrb[131].mxu1 }
 0x600   :  { %3983 = vst [vmem:[#allocation10 + $0x8] sm:$0xff] %v4532_v60  ;;  %3985 = vst [vmem:[#allocation10 + $0x18] sm:$0xff] %v4596_v15  ;;  %v4534_v11 = vadd.f32 %v3443_v48, %v6372_v1  ;;  %v4598_v39 = vadd.f32 %v3829_v47, %v6375_v57 }
 0x601   :  { %3986 = vst [vmem:[#allocation10 + $0x20] sm:$0xff] %v4533_v36  ;;  %3988 = vst [vmem:[#allocation10 + $0x30] sm:$0xff] %v4597_v12 }
 0x602   :  { %3987 = vst [vmem:[#allocation10 + $0x28] sm:$0xff] %v4534_v11  ;;  %3989 = vst [vmem:[#allocation10 + $0x38] sm:$0xff] %v4598_v39 }
 0x604   :  { %v3447_v8 = vpop.f32.mrb[132].mxu0  ;;  %v3833_v54 = vpop.f32.mrb[132].mxu1 }
 0x605   :  { %v4535_v25 = vadd.f32 %v3447_v8, %v6366_v19  ;;  %v4599_v53 = vadd.f32 %v3833_v54, %v6369_v21  ;;  %v3449_v32 = vpop.f32.mrb[133].mxu0  ;;  %v3835_v40 = vpop.f32.mrb[133].mxu1 }
 0x606   :  { %v4536_v31 = vadd.f32 %v3449_v32, %v6372_v1  ;;  %v4600_v22 = vadd.f32 %v3835_v40, %v6375_v57  ;;  %v3451_v59 = vpop.f32.mrb[134].mxu0  ;;  %v3837_v10 = vpop.f32.mrb[134].mxu1 }
 0x607   :  { %3990 = vst [vmem:[#allocation10 + $0x40] sm:$0xff] %v4535_v25  ;;  %3992 = vst [vmem:[#allocation10 + $0x50] sm:$0xff] %v4599_v53  ;;  %v4537_v27 = vadd.f32 %v3451_v59, %v6366_v19  ;;  %v4601_v17 = vadd.f32 %v3837_v10, %v6369_v21  ;;  %v3453_v18 = vpop.f32.mrb[135].mxu0  ;;  %v3839_v34 = vpop.f32.mrb[135].mxu1 }
 0x608   :  { %3991 = vst [vmem:[#allocation10 + $0x48] sm:$0xff] %v4536_v31  ;;  %3993 = vst [vmem:[#allocation10 + $0x58] sm:$0xff] %v4600_v22  ;;  %v4538_v35 = vadd.f32 %v3453_v18, %v6372_v1  ;;  %v4602_v42 = vadd.f32 %v3839_v34, %v6375_v57 }
 0x609   :  { %3994 = vst [vmem:[#allocation10 + $0x60] sm:$0xff] %v4537_v27  ;;  %3996 = vst [vmem:[#allocation10 + $0x70] sm:$0xff] %v4601_v17 }
 0x60a   :  { %3995 = vst [vmem:[#allocation10 + $0x68] sm:$0xff] %v4538_v35  ;;  %3997 = vst [vmem:[#allocation10 + $0x78] sm:$0xff] %v4602_v42 }
 0x60c   :  { %v3457_v24 = vpop.f32.mrb[136].mxu0  ;;  %v3843_v29 = vpop.f32.mrb[136].mxu1 }
 0x60d   :  { %v4539_v23 = vadd.f32 %v3457_v24, %v6366_v19  ;;  %v4603_v4 = vadd.f32 %v3843_v29, %v6369_v21  ;;  %v3459_v49 = vpop.f32.mrb[137].mxu0  ;;  %v3845_v28 = vpop.f32.mrb[137].mxu1 }
 0x60e   :  { %v4540_v46 = vadd.f32 %v3459_v49, %v6372_v1  ;;  %v4604_v3 = vadd.f32 %v3845_v28, %v6375_v57  ;;  %v3461_v51 = vpop.f32.mrb[138].mxu0  ;;  %v3847_v30 = vpop.f32.mrb[138].mxu1 }
 0x60f   :  { %3998 = vst [vmem:[#allocation10 + $0x80] sm:$0xff] %v4539_v23  ;;  %4000 = vst [vmem:[#allocation10 + $0x90] sm:$0xff] %v4603_v4  ;;  %v4541_v62 = vadd.f32 %v3461_v51, %v6366_v19  ;;  %v4605_v56 = vadd.f32 %v3847_v30, %v6369_v21  ;;  %v3463_v5 = vpop.f32.mrb[139].mxu0  ;;  %v3849_v13 = vpop.f32.mrb[139].mxu1 }
 0x610   :  { %3999 = vst [vmem:[#allocation10 + $0x88] sm:$0xff] %v4540_v46  ;;  %4001 = vst [vmem:[#allocation10 + $0x98] sm:$0xff] %v4604_v3  ;;  %v4542_v44 = vadd.f32 %v3463_v5, %v6372_v1  ;;  %v4606_v6 = vadd.f32 %v3849_v13, %v6375_v57 }
 0x611   :  { %4002 = vst [vmem:[#allocation10 + $0xa0] sm:$0xff] %v4541_v62  ;;  %4004 = vst [vmem:[#allocation10 + $0xb0] sm:$0xff] %v4605_v56 }
 0x612   :  { %4003 = vst [vmem:[#allocation10 + $0xa8] sm:$0xff] %v4542_v44  ;;  %4005 = vst [vmem:[#allocation10 + $0xb8] sm:$0xff] %v4606_v6 }
 0x614   :  { %v3467_v33 = vpop.f32.mrb[140].mxu0  ;;  %v3853_v0 = vpop.f32.mrb[140].mxu1 }
 0x615   :  { %v4543_v41 = vadd.f32 %v3467_v33, %v6366_v19  ;;  %v4607_v14 = vadd.f32 %v3853_v0, %v6369_v21  ;;  %v3469_v50 = vpop.f32.mrb[141].mxu0  ;;  %v3855_v7 = vpop.f32.mrb[141].mxu1 }
 0x616   :  { %v4544_v16 = vadd.f32 %v3469_v50, %v6372_v1  ;;  %v4608_v61 = vadd.f32 %v3855_v7, %v6375_v57  ;;  %v3471_v20 = vpop.f32.mrb[142].mxu0  ;;  %v3857_v58 = vpop.f32.mrb[142].mxu1 }
 0x617   :  { %4006 = vst [vmem:[#allocation10 + $0xc0] sm:$0xff] %v4543_v41  ;;  %4008 = vst [vmem:[#allocation10 + $0xd0] sm:$0xff] %v4607_v14  ;;  %v4545_v55 = vadd.f32 %v3471_v20, %v6366_v19  ;;  %v4609_v37 = vadd.f32 %v3857_v58, %v6369_v21  ;;  %v3473_v45 = vpop.f32.mrb[143].mxu0  ;;  %v3859_v9 = vpop.f32.mrb[143].mxu1 }
 0x618   :  { %4007 = vst [vmem:[#allocation10 + $0xc8] sm:$0xff] %v4544_v16  ;;  %4009 = vst [vmem:[#allocation10 + $0xd8] sm:$0xff] %v4608_v61  ;;  %v4546_v63 = vadd.f32 %v3473_v45, %v6372_v1  ;;  %v4610_v2 = vadd.f32 %v3859_v9, %v6375_v57 }
 0x619   :  { %4010 = vst [vmem:[#allocation10 + $0xe0] sm:$0xff] %v4545_v55  ;;  %4012 = vst [vmem:[#allocation10 + $0xf0] sm:$0xff] %v4609_v37 }
 0x61a   :  { %4011 = vst [vmem:[#allocation10 + $0xe8] sm:$0xff] %v4546_v63  ;;  %4013 = vst [vmem:[#allocation10 + $0xf8] sm:$0xff] %v4610_v2 }
 0x61c   :  { %v3477_v38 = vpop.f32.mrb[144].mxu0  ;;  %v3863_v52 = vpop.f32.mrb[144].mxu1 }
 0x61d   :  { %v4547_v60 = vadd.f32 %v3477_v38, %v6366_v19  ;;  %v4611_v15 = vadd.f32 %v3863_v52, %v6369_v21  ;;  %v3479_v43 = vpop.f32.mrb[145].mxu0  ;;  %v3865_v26 = vpop.f32.mrb[145].mxu1 }
 0x61e   :  { %v4548_v36 = vadd.f32 %v3479_v43, %v6372_v1  ;;  %v4612_v12 = vadd.f32 %v3865_v26, %v6375_v57  ;;  %v3481_v48 = vpop.f32.mrb[146].mxu0  ;;  %v3867_v47 = vpop.f32.mrb[146].mxu1 }
 0x61f   :  { %4014 = vst [vmem:[#allocation10 + $0x100] sm:$0xff] %v4547_v60  ;;  %4016 = vst [vmem:[#allocation10 + $0x110] sm:$0xff] %v4611_v15  ;;  %v4549_v11 = vadd.f32 %v3481_v48, %v6366_v19  ;;  %v4613_v39 = vadd.f32 %v3867_v47, %v6369_v21  ;;  %v3483_v8 = vpop.f32.mrb[147].mxu0  ;;  %v3869_v54 = vpop.f32.mrb[147].mxu1 }
 0x620   :  { %4015 = vst [vmem:[#allocation10 + $0x108] sm:$0xff] %v4548_v36  ;;  %4017 = vst [vmem:[#allocation10 + $0x118] sm:$0xff] %v4612_v12  ;;  %v4550_v25 = vadd.f32 %v3483_v8, %v6372_v1  ;;  %v4614_v53 = vadd.f32 %v3869_v54, %v6375_v57 }
 0x621   :  { %4018 = vst [vmem:[#allocation10 + $0x120] sm:$0xff] %v4549_v11  ;;  %4020 = vst [vmem:[#allocation10 + $0x130] sm:$0xff] %v4613_v39 }
 0x622   :  { %4019 = vst [vmem:[#allocation10 + $0x128] sm:$0xff] %v4550_v25  ;;  %4021 = vst [vmem:[#allocation10 + $0x138] sm:$0xff] %v4614_v53 }
 0x624   :  { %v3487_v32 = vpop.f32.mrb[148].mxu0  ;;  %v3873_v40 = vpop.f32.mrb[148].mxu1 }
 0x625   :  { %v4551_v31 = vadd.f32 %v3487_v32, %v6366_v19  ;;  %v4615_v22 = vadd.f32 %v3873_v40, %v6369_v21  ;;  %v3489_v59 = vpop.f32.mrb[149].mxu0  ;;  %v3875_v10 = vpop.f32.mrb[149].mxu1 }
 0x626   :  { %v4552_v27 = vadd.f32 %v3489_v59, %v6372_v1  ;;  %v4616_v17 = vadd.f32 %v3875_v10, %v6375_v57  ;;  %v3491_v18 = vpop.f32.mrb[150].mxu0  ;;  %v3877_v34 = vpop.f32.mrb[150].mxu1 }
 0x627   :  { %4022 = vst [vmem:[#allocation10 + $0x140] sm:$0xff] %v4551_v31  ;;  %4024 = vst [vmem:[#allocation10 + $0x150] sm:$0xff] %v4615_v22  ;;  %v4553_v35 = vadd.f32 %v3491_v18, %v6366_v19  ;;  %v4617_v42 = vadd.f32 %v3877_v34, %v6369_v21  ;;  %v3493_v24 = vpop.f32.mrb[151].mxu0  ;;  %v3879_v29 = vpop.f32.mrb[151].mxu1 }
 0x628   :  { %4023 = vst [vmem:[#allocation10 + $0x148] sm:$0xff] %v4552_v27  ;;  %4025 = vst [vmem:[#allocation10 + $0x158] sm:$0xff] %v4616_v17  ;;  %v4554_v23 = vadd.f32 %v3493_v24, %v6372_v1  ;;  %v4618_v4 = vadd.f32 %v3879_v29, %v6375_v57 }
 0x629   :  { %4026 = vst [vmem:[#allocation10 + $0x160] sm:$0xff] %v4553_v35  ;;  %4028 = vst [vmem:[#allocation10 + $0x170] sm:$0xff] %v4617_v42 }
 0x62a   :  { %4027 = vst [vmem:[#allocation10 + $0x168] sm:$0xff] %v4554_v23  ;;  %4029 = vst [vmem:[#allocation10 + $0x178] sm:$0xff] %v4618_v4 }
 0x62c   :  { %v3497_v49 = vpop.f32.mrb[152].mxu0  ;;  %v3883_v28 = vpop.f32.mrb[152].mxu1 }
 0x62d   :  { %v4555_v46 = vadd.f32 %v3497_v49, %v6366_v19  ;;  %v4619_v3 = vadd.f32 %v3883_v28, %v6369_v21  ;;  %v3499_v51 = vpop.f32.mrb[153].mxu0  ;;  %v3885_v30 = vpop.f32.mrb[153].mxu1 }
 0x62e   :  { %v4556_v62 = vadd.f32 %v3499_v51, %v6372_v1  ;;  %v4620_v56 = vadd.f32 %v3885_v30, %v6375_v57  ;;  %v3501_v5 = vpop.f32.mrb[154].mxu0  ;;  %v3887_v13 = vpop.f32.mrb[154].mxu1 }
 0x62f   :  { %4030 = vst [vmem:[#allocation10 + $0x180] sm:$0xff] %v4555_v46  ;;  %4032 = vst [vmem:[#allocation10 + $0x190] sm:$0xff] %v4619_v3  ;;  %v4557_v44 = vadd.f32 %v3501_v5, %v6366_v19  ;;  %v4621_v6 = vadd.f32 %v3887_v13, %v6369_v21  ;;  %v3503_v33 = vpop.f32.mrb[155].mxu0  ;;  %v3889_v0 = vpop.f32.mrb[155].mxu1 }
 0x630   :  { %4031 = vst [vmem:[#allocation10 + $0x188] sm:$0xff] %v4556_v62  ;;  %4033 = vst [vmem:[#allocation10 + $0x198] sm:$0xff] %v4620_v56  ;;  %v4558_v41 = vadd.f32 %v3503_v33, %v6372_v1  ;;  %v4622_v14 = vadd.f32 %v3889_v0, %v6375_v57 }
 0x631   :  { %4034 = vst [vmem:[#allocation10 + $0x1a0] sm:$0xff] %v4557_v44  ;;  %4036 = vst [vmem:[#allocation10 + $0x1b0] sm:$0xff] %v4621_v6 }
 0x632   :  { %4035 = vst [vmem:[#allocation10 + $0x1a8] sm:$0xff] %v4558_v41  ;;  %4037 = vst [vmem:[#allocation10 + $0x1b8] sm:$0xff] %v4622_v14 }
 0x634   :  { %v3507_v50 = vpop.f32.mrb[156].mxu0  ;;  %v3893_v7 = vpop.f32.mrb[156].mxu1 }
 0x635   :  { %v4559_v16 = vadd.f32 %v3507_v50, %v6366_v19  ;;  %v4623_v61 = vadd.f32 %v3893_v7, %v6369_v21  ;;  %v3509_v20 = vpop.f32.mrb[157].mxu0  ;;  %v3895_v58 = vpop.f32.mrb[157].mxu1 }
 0x636   :  { %v4560_v55 = vadd.f32 %v3509_v20, %v6372_v1  ;;  %v4624_v37 = vadd.f32 %v3895_v58, %v6375_v57  ;;  %v3511_v45 = vpop.f32.mrb[158].mxu0  ;;  %v3897_v9 = vpop.f32.mrb[158].mxu1 }
 0x637   :  { %4038 = vst [vmem:[#allocation10 + $0x1c0] sm:$0xff] %v4559_v16  ;;  %4040 = vst [vmem:[#allocation10 + $0x1d0] sm:$0xff] %v4623_v61  ;;  %v4561_v63 = vadd.f32 %v3511_v45, %v6366_v19  ;;  %v4625_v2 = vadd.f32 %v3897_v9, %v6369_v21  ;;  %v3513_v38 = vpop.f32.mrb[159].mxu0  ;;  %v3899_v52 = vpop.f32.mrb[159].mxu1 }
 0x638   :  { %4039 = vst [vmem:[#allocation10 + $0x1c8] sm:$0xff] %v4560_v55  ;;  %4041 = vst [vmem:[#allocation10 + $0x1d8] sm:$0xff] %v4624_v37  ;;  %v4562_v60 = vadd.f32 %v3513_v38, %v6372_v1  ;;  %v4626_v15 = vadd.f32 %v3899_v52, %v6375_v57 }
 0x639   :  { %4042 = vst [vmem:[#allocation10 + $0x1e0] sm:$0xff] %v4561_v63  ;;  %4044 = vst [vmem:[#allocation10 + $0x1f0] sm:$0xff] %v4625_v2 }
 0x63a   :  { %4043 = vst [vmem:[#allocation10 + $0x1e8] sm:$0xff] %v4562_v60  ;;  %4045 = vst [vmem:[#allocation10 + $0x1f8] sm:$0xff] %v4626_v15 }
 0x63c   :  { %v3517_v43 = vpop.f32.mrb[160].mxu0  ;;  %v3903_v26 = vpop.f32.mrb[160].mxu1 }
 0x63d   :  { %v4563_v36 = vadd.f32 %v3517_v43, %v6366_v19  ;;  %v4627_v12 = vadd.f32 %v3903_v26, %v6369_v21  ;;  %v3519_v48 = vpop.f32.mrb[161].mxu0  ;;  %v3905_v47 = vpop.f32.mrb[161].mxu1 }
 0x63e   :  { %v4564_v11 = vadd.f32 %v3519_v48, %v6372_v1  ;;  %v4628_v39 = vadd.f32 %v3905_v47, %v6375_v57  ;;  %v3521_v8 = vpop.f32.mrb[162].mxu0  ;;  %v3907_v54 = vpop.f32.mrb[162].mxu1 }
 0x63f   :  { %4046 = vst [vmem:[#allocation10 + $0x200] sm:$0xff] %v4563_v36  ;;  %4048 = vst [vmem:[#allocation10 + $0x210] sm:$0xff] %v4627_v12  ;;  %v4565_v25 = vadd.f32 %v3521_v8, %v6366_v19  ;;  %v4629_v53 = vadd.f32 %v3907_v54, %v6369_v21  ;;  %v3523_v32 = vpop.f32.mrb[163].mxu0  ;;  %v3909_v40 = vpop.f32.mrb[163].mxu1 }
 0x640   :  { %4047 = vst [vmem:[#allocation10 + $0x208] sm:$0xff] %v4564_v11  ;;  %4049 = vst [vmem:[#allocation10 + $0x218] sm:$0xff] %v4628_v39  ;;  %v4566_v31 = vadd.f32 %v3523_v32, %v6372_v1  ;;  %v4630_v22 = vadd.f32 %v3909_v40, %v6375_v57 }
 0x641   :  { %4050 = vst [vmem:[#allocation10 + $0x220] sm:$0xff] %v4565_v25  ;;  %4052 = vst [vmem:[#allocation10 + $0x230] sm:$0xff] %v4629_v53 }
 0x642   :  { %4051 = vst [vmem:[#allocation10 + $0x228] sm:$0xff] %v4566_v31  ;;  %4053 = vst [vmem:[#allocation10 + $0x238] sm:$0xff] %v4630_v22 }
 0x644   :  { %v3527_v59 = vpop.f32.mrb[164].mxu0  ;;  %v3913_v10 = vpop.f32.mrb[164].mxu1 }
 0x645   :  { %v4567_v27 = vadd.f32 %v3527_v59, %v6366_v19  ;;  %v4631_v17 = vadd.f32 %v3913_v10, %v6369_v21  ;;  %v3529_v18 = vpop.f32.mrb[165].mxu0  ;;  %v3915_v34 = vpop.f32.mrb[165].mxu1 }
 0x646   :  { %v4568_v35 = vadd.f32 %v3529_v18, %v6372_v1  ;;  %v4632_v42 = vadd.f32 %v3915_v34, %v6375_v57  ;;  %v3531_v24 = vpop.f32.mrb[166].mxu0  ;;  %v3917_v29 = vpop.f32.mrb[166].mxu1 }
 0x647   :  { %4054 = vst [vmem:[#allocation10 + $0x240] sm:$0xff] %v4567_v27  ;;  %4056 = vst [vmem:[#allocation10 + $0x250] sm:$0xff] %v4631_v17  ;;  %v4569_v23 = vadd.f32 %v3531_v24, %v6366_v19  ;;  %v4633_v4 = vadd.f32 %v3917_v29, %v6369_v21  ;;  %v3533_v49 = vpop.f32.mrb[167].mxu0  ;;  %v3919_v28 = vpop.f32.mrb[167].mxu1 }
 0x648   :  { %4055 = vst [vmem:[#allocation10 + $0x248] sm:$0xff] %v4568_v35  ;;  %4057 = vst [vmem:[#allocation10 + $0x258] sm:$0xff] %v4632_v42  ;;  %v4570_v46 = vadd.f32 %v3533_v49, %v6372_v1  ;;  %v4634_v3 = vadd.f32 %v3919_v28, %v6375_v57 }
 0x649   :  { %4058 = vst [vmem:[#allocation10 + $0x260] sm:$0xff] %v4569_v23  ;;  %4060 = vst [vmem:[#allocation10 + $0x270] sm:$0xff] %v4633_v4 }
 0x64a   :  { %4059 = vst [vmem:[#allocation10 + $0x268] sm:$0xff] %v4570_v46  ;;  %4061 = vst [vmem:[#allocation10 + $0x278] sm:$0xff] %v4634_v3 }
 0x64c   :  { %v3537_v51 = vpop.f32.mrb[168].mxu0  ;;  %v3923_v30 = vpop.f32.mrb[168].mxu1 }
 0x64d   :  { %v4571_v62 = vadd.f32 %v3537_v51, %v6366_v19  ;;  %v4635_v56 = vadd.f32 %v3923_v30, %v6369_v21  ;;  %v3539_v5 = vpop.f32.mrb[169].mxu0  ;;  %v3925_v13 = vpop.f32.mrb[169].mxu1 }
 0x64e   :  { %v4572_v44 = vadd.f32 %v3539_v5, %v6372_v1  ;;  %v4636_v6 = vadd.f32 %v3925_v13, %v6375_v57  ;;  %v3541_v33 = vpop.f32.mrb[170].mxu0  ;;  %v3927_v0 = vpop.f32.mrb[170].mxu1 }
 0x64f   :  { %4062 = vst [vmem:[#allocation10 + $0x280] sm:$0xff] %v4571_v62  ;;  %4064 = vst [vmem:[#allocation10 + $0x290] sm:$0xff] %v4635_v56  ;;  %v4573_v41 = vadd.f32 %v3541_v33, %v6366_v19  ;;  %v4637_v14 = vadd.f32 %v3927_v0, %v6369_v21  ;;  %v3543_v50 = vpop.f32.mrb[171].mxu0  ;;  %v3929_v7 = vpop.f32.mrb[171].mxu1 }
 0x650   :  { %4063 = vst [vmem:[#allocation10 + $0x288] sm:$0xff] %v4572_v44  ;;  %4065 = vst [vmem:[#allocation10 + $0x298] sm:$0xff] %v4636_v6  ;;  %v4574_v16 = vadd.f32 %v3543_v50, %v6372_v1  ;;  %v4638_v61 = vadd.f32 %v3929_v7, %v6375_v57 }
 0x651   :  { %4066 = vst [vmem:[#allocation10 + $0x2a0] sm:$0xff] %v4573_v41  ;;  %4068 = vst [vmem:[#allocation10 + $0x2b0] sm:$0xff] %v4637_v14 }
 0x652   :  { %4067 = vst [vmem:[#allocation10 + $0x2a8] sm:$0xff] %v4574_v16  ;;  %4069 = vst [vmem:[#allocation10 + $0x2b8] sm:$0xff] %v4638_v61 }
 0x654   :  { %v3547_v20 = vpop.f32.mrb[172].mxu0  ;;  %v3933_v58 = vpop.f32.mrb[172].mxu1 }
 0x655   :  { %v4575_v55 = vadd.f32 %v3547_v20, %v6366_v19  ;;  %v4639_v37 = vadd.f32 %v3933_v58, %v6369_v21  ;;  %v3549_v45 = vpop.f32.mrb[173].mxu0  ;;  %v3935_v9 = vpop.f32.mrb[173].mxu1 }
 0x656   :  { %v4576_v63 = vadd.f32 %v3549_v45, %v6372_v1  ;;  %v4640_v2 = vadd.f32 %v3935_v9, %v6375_v57  ;;  %v3551_v38 = vpop.f32.mrb[174].mxu0  ;;  %v3937_v52 = vpop.f32.mrb[174].mxu1 }
 0x657   :  { %4070 = vst [vmem:[#allocation10 + $0x2c0] sm:$0xff] %v4575_v55  ;;  %4072 = vst [vmem:[#allocation10 + $0x2d0] sm:$0xff] %v4639_v37  ;;  %v4577_v60 = vadd.f32 %v3551_v38, %v6366_v19  ;;  %v4641_v15 = vadd.f32 %v3937_v52, %v6369_v21  ;;  %v3553_v43 = vpop.f32.mrb[175].mxu0  ;;  %v3939_v26 = vpop.f32.mrb[175].mxu1 }
 0x658   :  { %4071 = vst [vmem:[#allocation10 + $0x2c8] sm:$0xff] %v4576_v63  ;;  %4073 = vst [vmem:[#allocation10 + $0x2d8] sm:$0xff] %v4640_v2  ;;  %v4578_v36 = vadd.f32 %v3553_v43, %v6372_v1  ;;  %v4642_v12 = vadd.f32 %v3939_v26, %v6375_v57 }
 0x659   :  { %4074 = vst [vmem:[#allocation10 + $0x2e0] sm:$0xff] %v4577_v60  ;;  %4076 = vst [vmem:[#allocation10 + $0x2f0] sm:$0xff] %v4641_v15 }
 0x65a   :  { %4075 = vst [vmem:[#allocation10 + $0x2e8] sm:$0xff] %v4578_v36  ;;  %4077 = vst [vmem:[#allocation10 + $0x2f8] sm:$0xff] %v4642_v12 }
 0x65c   :  { %v3557_v48 = vpop.f32.mrb[176].mxu0  ;;  %v3943_v47 = vpop.f32.mrb[176].mxu1 }
 0x65d   :  { %v4579_v11 = vadd.f32 %v3557_v48, %v6366_v19  ;;  %v4643_v39 = vadd.f32 %v3943_v47, %v6369_v21  ;;  %v3559_v8 = vpop.f32.mrb[177].mxu0  ;;  %v3945_v54 = vpop.f32.mrb[177].mxu1 }
 0x65e   :  { %v4580_v25 = vadd.f32 %v3559_v8, %v6372_v1  ;;  %v4644_v53 = vadd.f32 %v3945_v54, %v6375_v57  ;;  %v3561_v32 = vpop.f32.mrb[178].mxu0  ;;  %v3947_v40 = vpop.f32.mrb[178].mxu1 }
 0x65f   :  { %4078 = vst [vmem:[#allocation10 + $0x300] sm:$0xff] %v4579_v11  ;;  %4080 = vst [vmem:[#allocation10 + $0x310] sm:$0xff] %v4643_v39  ;;  %v4581_v31 = vadd.f32 %v3561_v32, %v6366_v19  ;;  %v4645_v22 = vadd.f32 %v3947_v40, %v6369_v21  ;;  %v3563_v59 = vpop.f32.mrb[179].mxu0  ;;  %v3949_v10 = vpop.f32.mrb[179].mxu1 }
 0x660   :  { %4079 = vst [vmem:[#allocation10 + $0x308] sm:$0xff] %v4580_v25  ;;  %4081 = vst [vmem:[#allocation10 + $0x318] sm:$0xff] %v4644_v53  ;;  %v4582_v27 = vadd.f32 %v3563_v59, %v6372_v1  ;;  %v4646_v17 = vadd.f32 %v3949_v10, %v6375_v57 }
 0x661   :  { %4082 = vst [vmem:[#allocation10 + $0x320] sm:$0xff] %v4581_v31  ;;  %4084 = vst [vmem:[#allocation10 + $0x330] sm:$0xff] %v4645_v22 }
 0x662   :  { %4083 = vst [vmem:[#allocation10 + $0x328] sm:$0xff] %v4582_v27  ;;  %4085 = vst [vmem:[#allocation10 + $0x338] sm:$0xff] %v4646_v17 }
 0x664   :  { %v3567_v18 = vpop.f32.mrb[180].mxu0  ;;  %v3953_v34 = vpop.f32.mrb[180].mxu1 }
 0x665   :  { %v4583_v35 = vadd.f32 %v3567_v18, %v6366_v19  ;;  %v4647_v42 = vadd.f32 %v3953_v34, %v6369_v21  ;;  %v3569_v24 = vpop.f32.mrb[181].mxu0  ;;  %v3955_v29 = vpop.f32.mrb[181].mxu1 }
 0x666   :  { %v4584_v23 = vadd.f32 %v3569_v24, %v6372_v1  ;;  %v4648_v4 = vadd.f32 %v3955_v29, %v6375_v57  ;;  %v3571_v49 = vpop.f32.mrb[182].mxu0  ;;  %v3957_v28 = vpop.f32.mrb[182].mxu1 }
 0x667   :  { %4086 = vst [vmem:[#allocation10 + $0x340] sm:$0xff] %v4583_v35  ;;  %4088 = vst [vmem:[#allocation10 + $0x350] sm:$0xff] %v4647_v42  ;;  %v4585_v46 = vadd.f32 %v3571_v49, %v6366_v19  ;;  %v4649_v3 = vadd.f32 %v3957_v28, %v6369_v21  ;;  %v3573_v51 = vpop.f32.mrb[183].mxu0  ;;  %v3959_v30 = vpop.f32.mrb[183].mxu1 }
 0x668   :  { %4087 = vst [vmem:[#allocation10 + $0x348] sm:$0xff] %v4584_v23  ;;  %4089 = vst [vmem:[#allocation10 + $0x358] sm:$0xff] %v4648_v4  ;;  %v4586_v62 = vadd.f32 %v3573_v51, %v6372_v1  ;;  %v4650_v56 = vadd.f32 %v3959_v30, %v6375_v57 }
 0x669   :  { %4090 = vst [vmem:[#allocation10 + $0x360] sm:$0xff] %v4585_v46  ;;  %4092 = vst [vmem:[#allocation10 + $0x370] sm:$0xff] %v4649_v3 }
 0x66a   :  { %4091 = vst [vmem:[#allocation10 + $0x368] sm:$0xff] %v4586_v62  ;;  %4093 = vst [vmem:[#allocation10 + $0x378] sm:$0xff] %v4650_v56 }
 0x66c   :  { %v3577_v5 = vpop.f32.mrb[184].mxu0  ;;  %v3963_v13 = vpop.f32.mrb[184].mxu1 }
 0x66d   :  { %v4587_v44 = vadd.f32 %v3577_v5, %v6366_v19  ;;  %v4651_v6 = vadd.f32 %v3963_v13, %v6369_v21  ;;  %v3579_v33 = vpop.f32.mrb[185].mxu0  ;;  %v3965_v0 = vpop.f32.mrb[185].mxu1 }
 0x66e   :  { %v4588_v41 = vadd.f32 %v3579_v33, %v6372_v1  ;;  %v4652_v14 = vadd.f32 %v3965_v0, %v6375_v57  ;;  %v3581_v50 = vpop.f32.mrb[186].mxu0  ;;  %v3967_v7 = vpop.f32.mrb[186].mxu1 }
 0x66f   :  { %4094 = vst [vmem:[#allocation10 + $0x380] sm:$0xff] %v4587_v44  ;;  %4096 = vst [vmem:[#allocation10 + $0x390] sm:$0xff] %v4651_v6  ;;  %v4589_v16 = vadd.f32 %v3581_v50, %v6366_v19  ;;  %v4653_v61 = vadd.f32 %v3967_v7, %v6369_v21  ;;  %v3583_v20 = vpop.f32.mrb[187].mxu0  ;;  %v3969_v58 = vpop.f32.mrb[187].mxu1 }
 0x670   :  { %4095 = vst [vmem:[#allocation10 + $0x388] sm:$0xff] %v4588_v41  ;;  %4097 = vst [vmem:[#allocation10 + $0x398] sm:$0xff] %v4652_v14  ;;  %v4590_v55 = vadd.f32 %v3583_v20, %v6372_v1  ;;  %v4654_v37 = vadd.f32 %v3969_v58, %v6375_v57 }
 0x671   :  { %4098 = vst [vmem:[#allocation10 + $0x3a0] sm:$0xff] %v4589_v16  ;;  %4100 = vst [vmem:[#allocation10 + $0x3b0] sm:$0xff] %v4653_v61 }
 0x672   :  { %4099 = vst [vmem:[#allocation10 + $0x3a8] sm:$0xff] %v4590_v55  ;;  %4101 = vst [vmem:[#allocation10 + $0x3b8] sm:$0xff] %v4654_v37 }
 0x674   :  { %v3587_v45 = vpop.f32.mrb[188].mxu0  ;;  %v3973_v9 = vpop.f32.mrb[188].mxu1 }
 0x675   :  { %v4591_v63 = vadd.f32 %v3587_v45, %v6366_v19  ;;  %v4655_v2 = vadd.f32 %v3973_v9, %v6369_v21  ;;  %v3589_v38 = vpop.f32.mrb[189].mxu0  ;;  %v3975_v52 = vpop.f32.mrb[189].mxu1 }
 0x676   :  { %v4592_v60 = vadd.f32 %v3589_v38, %v6372_v1  ;;  %v4656_v15 = vadd.f32 %v3975_v52, %v6375_v57  ;;  %v3591_v43 = vpop.f32.mrb[190].mxu0  ;;  %v3977_v26 = vpop.f32.mrb[190].mxu1 }
 0x677   :  { %4102 = vst [vmem:[#allocation10 + $0x3c0] sm:$0xff] %v4591_v63  ;;  %4104 = vst [vmem:[#allocation10 + $0x3d0] sm:$0xff] %v4655_v2  ;;  %v4593_v36 = vadd.f32 %v3591_v43, %v6366_v19  ;;  %v4657_v12 = vadd.f32 %v3977_v26, %v6369_v21  ;;  %v3593_v48 = vpop.f32.mrb[191].mxu0  ;;  %v3979_v47 = vpop.f32.mrb[191].mxu1 }
 0x678   :  { %4103 = vst [vmem:[#allocation10 + $0x3c8] sm:$0xff] %v4592_v60  ;;  %4105 = vst [vmem:[#allocation10 + $0x3d8] sm:$0xff] %v4656_v15  ;;  %v4594_v11 = vadd.f32 %v3593_v48, %v6372_v1  ;;  %v4658_v39 = vadd.f32 %v3979_v47, %v6375_v57 }
 0x679   :  { %4106 = vst [vmem:[#allocation10 + $0x3e0] sm:$0xff] %v4593_v36  ;;  %4108 = vst [vmem:[#allocation10 + $0x3f0] sm:$0xff] %v4657_v12 }
 0x67a   :  { %4107 = vst [vmem:[#allocation10 + $0x3e8] sm:$0xff] %v4594_v11  ;;  %4109 = vst [vmem:[#allocation10 + $0x3f8] sm:$0xff] %v4658_v39 }
 0x67b   :  { %5308 = shalt.err (!%p5305_p6)
}
 0x67c   :  { %s5309_s30 = scalar_lea.hbm %s6527_s7, 16384 }
 0x67d   :  { %p5310_p7 = scmp.ne.s32.totalorder %s6527_s7, %s5309_s30  ;;  %p5313_p8 = scmp.lt.u32.totalorder %s5309_s30, %s6527_s7 }
 0x67f   :  { %p5315_p9 = pnand %p5313_p8, %p5310_p7 }
 0x681   :  { %5318 = shalt.err (!%p5315_p9)
}
 0x682   :  { %4121 = dma.vmem_to_hbm [thread:$0]  %s4116_s26, 16384, %s6527_s7, [#allocation7], %s5330_s11, %s5330_s11, %s5331_s12  }
 0x683   :  { %5327 = dma.done.wait [#allocation7], 16384  }
 0x684   :  { %5328 = vsyncadd [#allocation7], 4294950912 }
 0x685   :  { %4125 = vsyncpa [#allocation6], 1 }
 0x686   :  { %4126 = vsyncpa [#allocation9], 1 }
 0x687   :  { %4127 = vsyncpa [#allocation7], 1 }
 0x688   :  { %4128 = vsyncmov [#allocation4] }
 0x68b   :  { %s4129_s15 = vpop.sfrf %4128 }
 0x68c   :  { %p4273_p10 = scmp.ne.s32.totalorder %s4129_s15, 0 }
 0x68e   :  { %4133 = shalt.err (%p4273_p10)  }
 0x68f   :  { %4135 = vsyncmov [#allocation4 + $0x1] }
 0x692   :  { %s4136_s16 = vpop.sfrf %4135 }
 0x693   :  { %p4274_p11 = scmp.ne.s32.totalorder %s4136_s16, 0 }
 0x695   :  { %4140 = shalt.err (%p4274_p11)  }

// kernel: toy_model_forward.1
= control target key start
LH: loop header
LB: loop body
LE: loop exit
PB: predicated region body
PF: predicated region fallthrough
CT: control target
= control target key end

     0   :  { %12 = vsyncpa [#allocation6], 0  ;;  %s6520_s0 = inlined_call_operand.hbm [shape: f32[256,512], index: 0, kind: input, shape index: {}]   ;;  %s6521_s1 = inlined_call_operand.hbm [shape: bf16[512,512], index: 1, kind: input, shape index: {}]   ;;  %s6522_s2 = inlined_call_operand.vmem [shape: f32[1,512], index: 2, kind: input, shape index: {}]   ;;  %s6523_s3 = inlined_call_operand.hbm [shape: bf16[512,512], index: 3, kind: input, shape index: {}]   ;;  %s6524_s4 = inlined_call_operand.vmem [shape: f32[1,512], index: 4, kind: input, shape index: {}]   ;;  %s6525_s5 = inlined_call_operand.hbm [shape: bf16[512,512], index: 5, kind: input, shape index: {}]   ;;  %s6526_s6 = inlined_call_operand.vmem [shape: f32[1,512], index: 6, kind: input, shape index: {}]   ;;  %s6527_s7 = inlined_call_operand.hbm [shape: f32[256,512], index: 7, kind: output, shape index: {}]  }
   0x1   :  { %13 = vsyncpa [#allocation9], 0 }
   0x2   :  { %14 = vsyncpa [#allocation7], 0  ;;  %s5329_s24 = smov [#allocation5]   ;;  %s5253_s28 = scalar_lea.hbm %s6520_s0, 16384 }
   0x3   :  { %s20_s25 = sshll.u32 %s5329_s24, 4  ;;  %p5254_p0 = scmp.ne.s32.totalorder %s6520_s0, %s5253_s28  ;;  %s21_s25 = int_to_ptr.vmem [resolvable:$true] %s20_s25 }
   0x4   :  { %p5257_p1 = scmp.lt.u32.totalorder %s5253_s28, %s6520_s0 }
   0x6   :  { %p5259_p2 = pnand %p5257_p1, %p5254_p0 }
   0x8   :  { %5262 = shalt.err (!%p5259_p2)
}
   0x9   :  { %s5263_s10 = scalar_lea.vmem %s21_s25, 16384  ;;  %p5268_p4 = scmp.lt.s32.totalorder %s21_s25, %s21_s25 }
   0xa   :  { %p5264_p3 = scmp.ne.s32.totalorder %s21_s25, %s5263_s10  ;;  %p5269_p5 = scmp.lt.s32.totalorder %s5263_s10, %s5263_s10 }
   0xc   :  { %p5270_p6 = por %p5269_p5, %p5268_p4 }
   0xe   :  { %p5271_p7 = pnand %p5270_p6, %p5264_p3 }
  0x10   :  { %5274 = shalt.err (!%p5271_p7)
}
  0x11   :  { %s5330_s11 = smov 512   ;;  %s5331_s12 = smov 32  }
  0x12   :  { %26 = dma.hbm_to_vmem [thread:$0]  %s6520_s0, 16384, %s21_s25, [#allocation6], %s5330_s11, %s5330_s11, %s5331_s12  }
  0x13   :  { %s5332_s15 = smov [#allocation8]   ;;  %s5275_s19 = scalar_lea.hbm %s6521_s1, 16384 }
  0x14   :  { %s32_s16 = sshll.u32 %s5332_s15, 4  ;;  %p5276_p8 = scmp.ne.s32.totalorder %s6521_s1, %s5275_s19  ;;  %s33_s16 = int_to_ptr.vmem [resolvable:$true] %s32_s16 }
  0x15   :  { %p5279_p9 = scmp.lt.u32.totalorder %s5275_s19, %s6521_s1 }
  0x17   :  { %p5281_p10 = pnand %p5279_p9, %p5276_p8 }
  0x19   :  { %5284 = shalt.err (!%p5281_p10)
}
  0x1a   :  { %s5285_s24 = scalar_lea.vmem %s33_s16, 16384  ;;  %p5290_p12 = scmp.lt.s32.totalorder %s33_s16, %s33_s16 }
  0x1b   :  { %p5286_p11 = scmp.ne.s32.totalorder %s33_s16, %s5285_s24  ;;  %p5291_p13 = scmp.lt.s32.totalorder %s5285_s24, %s5285_s24 }
  0x1d   :  { %p5292_p0 = por %p5291_p13, %p5290_p12 }
  0x1f   :  { %p5293_p1 = pnand %p5292_p0, %p5286_p11 }
  0x21   :  { %5296 = shalt.err (!%p5293_p1)
}
  0x22   :  { %s5333_s0 = smov 256   ;;  %s5334_s25 = smov 16  }
  0x23   :  { %38 = dma.hbm_to_vmem [thread:$0]  %s6521_s1, 16384, %s33_s16, [#allocation9], %s5333_s0, %s5333_s0, %s5334_s25  }
  0x24   :  { %5319 = dma.done.wait [#allocation6], 16384  }
  0x25   :  { %5320 = vsyncadd [#allocation6], 4294950912 }
  0x26   :  { %5321 = dma.done.wait [#allocation9], 16384  }
  0x27   :  { %5322 = vsyncadd [#allocation9], 4294950912  ;;  %s56_s28 = sld [smem:[#allocation0]]   ;;  %68 = sst [smem:[#allocation12]] %s5330_s11 }
  0x28   :  { %70 = sst [smem:[#allocation12 + $0x1]] %s5330_s11  ;;  %s5335_s29 = smov [#allocation2]  }
  0x29   :  { %s64_s30 = sshll.u32 %s5335_s29, 4  ;;  %80 = sst [smem:[#allocation12 + $0x6]] %s5333_s0  ;;  %s65_s30 = int_to_ptr.vmem [resolvable:$true] %s64_s30 }
  0x2a   :  { %s5336_s8 = smov 4   ;;  %s5337_s9 = smov 64  }
  0x2b   :  { %72 = sst [smem:[#allocation12 + $0x2]] %s5336_s8  ;;  %s5338_s10 = smov 128  }
  0x2c   :  { %74 = sst [smem:[#allocation12 + $0x3]] %s5337_s9  ;;  %s5339_s13 = smov 2  }
  0x2d   :  { %76 = sst [smem:[#allocation12 + $0x4]] %s5338_s10  ;;  %s4141_s1 = sshll.u32 %s56_s28, 26 }
  0x2e   :  { %78 = sst [smem:[#allocation12 + $0x5]] %s5339_s13  ;;  %s4142_s14 = sadd.s32 134217728, %s4141_s1 }
  0x2f   :  { %82 = sst [smem:[#allocation12 + $0x7]] %s5337_s9  ;;  %s5340_s15 = smov [#allocation4]  }
  0x30   :  { %84 = sst [smem:[#allocation12 + $0x8]] %s5336_s8  ;;  %s5341_s16 = smov [#allocation11]  }
  0x31   :  { %86 = dma.general %s6523_s3, 16384, %s65_s30, %s5340_s15, %s5341_s16, [#allocation12], %s4142_s14, 0  }
  0x32   :  { %103 = sst [smem:[#allocation14]] %s5330_s11  ;;  %s5342_s19 = smov [#allocation3]  }
  0x33   :  { %105 = sst [smem:[#allocation14 + $0x1]] %s5330_s11  ;;  %s99_s20 = sshll.u32 %s5342_s19, 4  ;;  %s100_s20 = int_to_ptr.vmem [resolvable:$true] %s99_s20 }
  0x34   :  { %107 = sst [smem:[#allocation14 + $0x2]] %s5336_s8  ;;  %s5343_s21 = smov [#allocation4 + $0x1]  }
  0x35   :  { %109 = sst [smem:[#allocation14 + $0x3]] %s5337_s9  ;;  %s5344_s22 = smov [#allocation13]  }
  0x36   :  { %111 = sst [smem:[#allocation14 + $0x4]] %s5338_s10 }
  0x37   :  { %113 = sst [smem:[#allocation14 + $0x5]] %s5339_s13 }
  0x38   :  { %115 = sst [smem:[#allocation14 + $0x6]] %s5333_s0 }
  0x39   :  { %117 = sst [smem:[#allocation14 + $0x7]] %s5337_s9 }
  0x3a   :  { %119 = sst [smem:[#allocation14 + $0x8]] %s5336_s8 }
  0x3b   :  { %121 = dma.general %s6525_s5, 16384, %s100_s20, %s5343_s21, %s5344_s22, [#allocation14], %s4142_s14, 0  }
  0x3c   :  { %v5061_v0 = vld [vmem:[#allocation8 + $0x4] ss:$16 sps:$4 sm:$0xff]   ;;  %v5063_v1 = vld [vmem:[#allocation8 + $0xc] ss:$16 sps:$4 sm:$0xff]   ;;  %v5065_v2 = vld [vmem:[#allocation8] ss:$16 sps:$4 sm:$0xff]  }
  0x3d   :  { %1104 = vmatprep.subr.bf16.mxu0 %v5061_v0  ;;  %v5066_v3 = vld [vmem:[#allocation8 + $0x8] ss:$16 sps:$4 sm:$0xff]   ;;  %1490 = vmatprep.subr.bf16.mxu1 %v5063_v1  ;;  %v5067_v4 = vld [vmem:[#allocation8 + $0x24] ss:$16 sps:$4 sm:$0xff]   ;;  %v5069_v5 = vld [vmem:[#allocation8 + $0x2c] ss:$16 sps:$4 sm:$0xff]  }
  0x3e   :  { %1105 = vmatpush1.bf16.msra.mxu0 %v5065_v2  ;;  %1491 = vmatpush1.bf16.msra.mxu1 %v5066_v3  ;;  %v5071_v6 = vld [vmem:[#allocation8 + $0x20] ss:$16 sps:$4 sm:$0xff]   ;;  %v5072_v7 = vld [vmem:[#allocation8 + $0x28] ss:$16 sps:$4 sm:$0xff]   ;;  %v5073_v8 = vld [vmem:[#allocation8 + $0x44] ss:$16 sps:$4 sm:$0xff]  }
  0x3f   :  { %1106 = vmatprep.subr.bf16.mxu0 %v5067_v4  ;;  %1492 = vmatprep.subr.bf16.mxu1 %v5069_v5  ;;  %v5075_v9 = vld [vmem:[#allocation8 + $0x4c] ss:$16 sps:$4 sm:$0xff]   ;;  %v5077_v10 = vld [vmem:[#allocation8 + $0x40] ss:$16 sps:$4 sm:$0xff]   ;;  %v5078_v11 = vld [vmem:[#allocation8 + $0x48] ss:$16 sps:$4 sm:$0xff]  }
  0x40   :  { %v5079_v12 = vld [vmem:[#allocation8 + $0x64] ss:$16 sps:$4 sm:$0xff]   ;;  %v5081_v13 = vld [vmem:[#allocation8 + $0x6c] ss:$16 sps:$4 sm:$0xff]   ;;  %v5083_v14 = vld [vmem:[#allocation8 + $0x60] ss:$16 sps:$4 sm:$0xff]  }
  0x41   :  { %v5084_v15 = vld [vmem:[#allocation8 + $0x68] ss:$16 sps:$4 sm:$0xff]   ;;  %v5085_v16 = vld [vmem:[#allocation8 + $0x84] ss:$16 sps:$4 sm:$0xff]   ;;  %v5087_v17 = vld [vmem:[#allocation8 + $0x8c] ss:$16 sps:$4 sm:$0xff]  }
  0x42   :  { %1107 = vmatpush1.bf16.msra.mxu0 %v5071_v6  ;;  %1493 = vmatpush1.bf16.msra.mxu1 %v5072_v7  ;;  %v5089_v18 = vld [vmem:[#allocation8 + $0x80] ss:$16 sps:$4 sm:$0xff]   ;;  %v5090_v19 = vld [vmem:[#allocation8 + $0x88] ss:$16 sps:$4 sm:$0xff]   ;;  %v5091_v20 = vld [vmem:[#allocation8 + $0xa4] ss:$16 sps:$4 sm:$0xff]  }
  0x43   :  { %1108 = vmatprep.subr.bf16.mxu0 %v5073_v8  ;;  %1494 = vmatprep.subr.bf16.mxu1 %v5075_v9  ;;  %v5093_v21 = vld [vmem:[#allocation8 + $0xac] ss:$16 sps:$4 sm:$0xff]   ;;  %v5095_v22 = vld [vmem:[#allocation8 + $0xa0] ss:$16 sps:$4 sm:$0xff]   ;;  %v5096_v23 = vld [vmem:[#allocation8 + $0xa8] ss:$16 sps:$4 sm:$0xff]  }
  0x44   :  { %v5097_v24 = vld [vmem:[#allocation8 + $0xc4] ss:$16 sps:$4 sm:$0xff]   ;;  %v5099_v25 = vld [vmem:[#allocation8 + $0xcc] ss:$16 sps:$4 sm:$0xff]   ;;  %v5101_v26 = vld [vmem:[#allocation8 + $0xc0] ss:$16 sps:$4 sm:$0xff]  }
  0x45   :  { %v5102_v27 = vld [vmem:[#allocation8 + $0xc8] ss:$16 sps:$4 sm:$0xff]   ;;  %v5103_v28 = vld [vmem:[#allocation8 + $0xe4] ss:$16 sps:$4 sm:$0xff]   ;;  %v5105_v29 = vld [vmem:[#allocation8 + $0xec] ss:$16 sps:$4 sm:$0xff]  }
  0x46   :  { %1109 = vmatpush1.bf16.msra.mxu0 %v5077_v10  ;;  %1495 = vmatpush1.bf16.msra.mxu1 %v5078_v11  ;;  %v5107_v30 = vld [vmem:[#allocation8 + $0xe0] ss:$16 sps:$4 sm:$0xff]   ;;  %v5108_v31 = vld [vmem:[#allocation8 + $0xe8] ss:$16 sps:$4 sm:$0xff]   ;;  %v5109_v32 = vld [vmem:[#allocation8 + $0x104] ss:$16 sps:$4 sm:$0xff]  }
  0x47   :  { %1110 = vmatprep.subr.bf16.mxu0 %v5079_v12  ;;  %1496 = vmatprep.subr.bf16.mxu1 %v5081_v13  ;;  %v5111_v33 = vld [vmem:[#allocation8 + $0x10c] ss:$16 sps:$4 sm:$0xff]   ;;  %v5113_v34 = vld [vmem:[#allocation8 + $0x100] ss:$16 sps:$4 sm:$0xff]   ;;  %v5114_v35 = vld [vmem:[#allocation8 + $0x108] ss:$16 sps:$4 sm:$0xff]  }
  0x48   :  { %v5115_v36 = vld [vmem:[#allocation8 + $0x124] ss:$16 sps:$4 sm:$0xff]   ;;  %v5117_v37 = vld [vmem:[#allocation8 + $0x12c] ss:$16 sps:$4 sm:$0xff]   ;;  %v5119_v38 = vld [vmem:[#allocation8 + $0x120] ss:$16 sps:$4 sm:$0xff]  }
  0x49   :  { %v5120_v39 = vld [vmem:[#allocation8 + $0x128] ss:$16 sps:$4 sm:$0xff]   ;;  %v5121_v40 = vld [vmem:[#allocation8 + $0x144] ss:$16 sps:$4 sm:$0xff]   ;;  %v5123_v41 = vld [vmem:[#allocation8 + $0x14c] ss:$16 sps:$4 sm:$0xff]  }
  0x4a   :  { %1111 = vmatpush1.bf16.msra.mxu0 %v5083_v14  ;;  %1497 = vmatpush1.bf16.msra.mxu1 %v5084_v15  ;;  %v5125_v42 = vld [vmem:[#allocation8 + $0x140] ss:$16 sps:$4 sm:$0xff]   ;;  %v5126_v43 = vld [vmem:[#allocation8 + $0x148] ss:$16 sps:$4 sm:$0xff]   ;;  %v5127_v44 = vld [vmem:[#allocation8 + $0x164] ss:$16 sps:$4 sm:$0xff]  }
  0x4b   :  { %1112 = vmatprep.subr.bf16.mxu0 %v5085_v16  ;;  %1498 = vmatprep.subr.bf16.mxu1 %v5087_v17  ;;  %v5129_v45 = vld [vmem:[#allocation8 + $0x16c] ss:$16 sps:$4 sm:$0xff]   ;;  %v5131_v47 = vld [vmem:[#allocation8 + $0x160] ss:$16 sps:$4 sm:$0xff]   ;;  %v5132_v48 = vld [vmem:[#allocation8 + $0x168] ss:$16 sps:$4 sm:$0xff]  }
  0x4c   :  { %v123_v46 = vld [vmem:[#allocation5 + $0x8] sm:$0xff]  ;;  %v5133_v50 = vld [vmem:[#allocation8 + $0x184] ss:$16 sps:$4 sm:$0xff]   ;;  %v5137_v53 = vld [vmem:[#allocation8 + $0x180] ss:$16 sps:$4 sm:$0xff]  }
  0x4d   :  { %v127_v49 = vld [vmem:[#allocation5 + $0x28] sm:$0xff]  ;;  %v5139_v55 = vld [vmem:[#allocation8 + $0x1a4] ss:$16 sps:$4 sm:$0xff]   ;;  %v5143_v57 = vld [vmem:[#allocation8 + $0x1a0] ss:$16 sps:$4 sm:$0xff]  }
  0x4e   :  { %1113 = vmatpush1.bf16.msra.mxu0 %v5089_v18  ;;  %1499 = vmatpush1.bf16.msra.mxu1 %v5090_v19  ;;  %v251_v51 = vpack.c.bf16 %v127_v49, %v123_v46  ;;  %v5135_v52 = vld [vmem:[#allocation8 + $0x18c] ss:$16 sps:$4 sm:$0xff]   ;;  %v5138_v54 = vld [vmem:[#allocation8 + $0x188] ss:$16 sps:$4 sm:$0xff]   ;;  %v5145_v59 = vld [vmem:[#allocation8 + $0x1c4] ss:$16 sps:$4 sm:$0xff]  }
  0x4f   :  { %1114 = vmatprep.subr.bf16.mxu0 %v5091_v20  ;;  %1500 = vmatprep.subr.bf16.mxu1 %v5093_v21  ;;  %v5141_v56 = vld [vmem:[#allocation8 + $0x1ac] ss:$16 sps:$4 sm:$0xff]   ;;  %v5144_v58 = vld [vmem:[#allocation8 + $0x1a8] ss:$16 sps:$4 sm:$0xff]   ;;  %v5149_v61 = vld [vmem:[#allocation8 + $0x1c0] ss:$16 sps:$4 sm:$0xff]  }
  0x50   :  { %1136 = vmatprep.mubr.bf16.mxu0 %v251_v51  ;;  %1522 = vmatprep.mubr.bf16.mxu1 %v251_v51  ;;  %v5147_v60 = vld [vmem:[#allocation8 + $0x1cc] ss:$16 sps:$4 sm:$0xff]   ;;  %v5150_v62 = vld [vmem:[#allocation8 + $0x1c8] ss:$16 sps:$4 sm:$0xff]   ;;  %v5151_v63 = vld [vmem:[#allocation8 + $0x1e4] ss:$16 sps:$4 sm:$0xff]  }
  0x51   :  { %v5153_v0 = vld [vmem:[#allocation8 + $0x1ec] ss:$16 sps:$4 sm:$0xff]   ;;  %v5155_v1 = vld [vmem:[#allocation8 + $0x1e0] ss:$16 sps:$4 sm:$0xff]   ;;  %v5156_v2 = vld [vmem:[#allocation8 + $0x1e8] ss:$16 sps:$4 sm:$0xff]  }
  0x52   :  { %1115 = vmatpush1.bf16.msra.mxu0 %v5095_v22  ;;  %1501 = vmatpush1.bf16.msra.mxu1 %v5096_v23  ;;  %v122_v3 = vld [vmem:[#allocation5] sm:$0xff]  ;;  %v5162_v6 = vld [vmem:[#allocation8 + $0x20c] ss:$16 sps:$4 sm:$0xff]   ;;  %v5160_v11 = vld [vmem:[#allocation8 + $0x208] ss:$16 sps:$4 sm:$0xff]  }
  0x53   :  { %1116 = vmatprep.subr.bf16.mxu0 %v5097_v24  ;;  %1502 = vmatprep.subr.bf16.mxu1 %v5099_v25  ;;  %v126_v4 = vld [vmem:[#allocation5 + $0x20] sm:$0xff]  ;;  %v131_v7 = vld [vmem:[#allocation5 + $0x48] sm:$0xff] }
  0x54   :  { %v5159_v5 = vld [vmem:[#allocation8 + $0x204] ss:$16 sps:$4 sm:$0xff]   ;;  %v135_v8 = vld [vmem:[#allocation5 + $0x68] sm:$0xff]  ;;  %v250_v9 = vpack.c.bf16 %v126_v4, %v122_v3  ;;  %v5157_v10 = vld [vmem:[#allocation8 + $0x200] ss:$16 sps:$4 sm:$0xff]  }
  0x55   :  { %v255_v12 = vpack.c.bf16 %v135_v8, %v131_v7  ;;  %v130_v13 = vld [vmem:[#allocation5 + $0x40] sm:$0xff]  ;;  %v5168_v17 = vld [vmem:[#allocation8 + $0x22c] ss:$16 sps:$4 sm:$0xff]   ;;  %v5166_v18 = vld [vmem:[#allocation8 + $0x228] ss:$16 sps:$4 sm:$0xff]  }
  0x56   :  { %1117 = vmatpush1.bf16.msra.mxu0 %v5101_v26  ;;  %1503 = vmatpush1.bf16.msra.mxu1 %v5102_v27  ;;  %v134_v14 = vld [vmem:[#allocation5 + $0x60] sm:$0xff]  ;;  %v139_v19 = vld [vmem:[#allocation5 + $0x88] sm:$0xff] }
  0x57   :  { %1118 = vmatprep.subr.bf16.mxu0 %v5103_v28  ;;  %1504 = vmatprep.subr.bf16.mxu1 %v5105_v29  ;;  %v5163_v15 = vld [vmem:[#allocation8 + $0x220] ss:$16 sps:$4 sm:$0xff]   ;;  %v5165_v16 = vld [vmem:[#allocation8 + $0x224] ss:$16 sps:$4 sm:$0xff]   ;;  %v143_v20 = vld [vmem:[#allocation5 + $0xa8] sm:$0xff]  ;;  %v254_v23 = vpack.c.bf16 %v134_v14, %v130_v13 }
  0x58   :  { %v5171_v21 = vld [vmem:[#allocation8 + $0x244] ss:$16 sps:$4 sm:$0xff]   ;;  %v5174_v22 = vld [vmem:[#allocation8 + $0x24c] ss:$16 sps:$4 sm:$0xff]   ;;  %v259_v24 = vpack.c.bf16 %v143_v20, %v139_v19  ;;  %v5169_v25 = vld [vmem:[#allocation8 + $0x240] ss:$16 sps:$4 sm:$0xff]  }
  0x59   :  { %v5172_v26 = vld [vmem:[#allocation8 + $0x248] ss:$16 sps:$4 sm:$0xff]   ;;  %v138_v27 = vld [vmem:[#allocation5 + $0x80] sm:$0xff]  ;;  %v5180_v29 = vld [vmem:[#allocation8 + $0x26c] ss:$16 sps:$4 sm:$0xff]  }
  0x5a   :  { %1119 = vmatpush1.bf16.msra.mxu0 %v5107_v30  ;;  %1505 = vmatpush1.bf16.msra.mxu1 %v5108_v31  ;;  %v5177_v28 = vld [vmem:[#allocation8 + $0x264] ss:$16 sps:$4 sm:$0xff]   ;;  %v147_v31 = vld [vmem:[#allocation5 + $0xc8] sm:$0xff]  ;;  %v5205_v3 = vld [vmem:[#allocation8 + $0x300] ss:$16 sps:$4 sm:$0xff]  }
  0x5b   :  { %1120 = vmatprep.subr.bf16.mxu0 %v5109_v32  ;;  %1506 = vmatprep.subr.bf16.mxu1 %v5111_v33  ;;  %v142_v30 = vld [vmem:[#allocation5 + $0xa0] sm:$0xff]  ;;  %v151_v32 = vld [vmem:[#allocation5 + $0xe8] sm:$0xff] }
  0x5c   :  { %v5175_v33 = vld [vmem:[#allocation8 + $0x260] ss:$16 sps:$4 sm:$0xff]   ;;  %v159_v46 = vld [vmem:[#allocation5 + $0x128] sm:$0xff]  ;;  %v5195_v49 = vld [vmem:[#allocation8 + $0x2c4] ss:$16 sps:$4 sm:$0xff]  }
  0x5d   :  { %v5208_v4 = vld [vmem:[#allocation8 + $0x308] ss:$16 sps:$4 sm:$0xff]   ;;  %v5216_v7 = vld [vmem:[#allocation8 + $0x32c] ss:$16 sps:$4 sm:$0xff]   ;;  %v166_v8 = vld [vmem:[#allocation5 + $0x160] sm:$0xff] }
  0x5e   :  { %1121 = vmatpush1.bf16.msra.mxu0 %v5113_v34  ;;  %1507 = vmatpush1.bf16.msra.mxu1 %v5114_v35  ;;  %v5178_v34 = vld [vmem:[#allocation8 + $0x268] ss:$16 sps:$4 sm:$0xff]   ;;  %v5183_v35 = vld [vmem:[#allocation8 + $0x284] ss:$16 sps:$4 sm:$0xff]   ;;  %v5222_v14 = vld [vmem:[#allocation8 + $0x34c] ss:$16 sps:$4 sm:$0xff]  }
  0x5f   :  { %1122 = vmatprep.subr.bf16.mxu0 %v5115_v36  ;;  %1508 = vmatprep.subr.bf16.mxu1 %v5117_v37  ;;  %v5186_v36 = vld [vmem:[#allocation8 + $0x28c] ss:$16 sps:$4 sm:$0xff]   ;;  %v258_v37 = vpack.c.bf16 %v142_v30, %v138_v27  ;;  %v5219_v13 = vld [vmem:[#allocation8 + $0x344] ss:$16 sps:$4 sm:$0xff]  }
  0x60   :  { %v5225_v19 = vld [vmem:[#allocation8 + $0x364] ss:$16 sps:$4 sm:$0xff]   ;;  %v5228_v20 = vld [vmem:[#allocation8 + $0x36c] ss:$16 sps:$4 sm:$0xff]  }
  0x61   :  { %v5231_v27 = vld [vmem:[#allocation8 + $0x384] ss:$16 sps:$4 sm:$0xff]  }
  0x62   :  { %1123 = vmatpush1.bf16.msra.mxu0 %v5119_v38  ;;  %1509 = vmatpush1.bf16.msra.mxu1 %v5120_v39  ;;  %v263_v38 = vpack.c.bf16 %v151_v32, %v147_v31  ;;  %v5181_v39 = vld [vmem:[#allocation8 + $0x280] ss:$16 sps:$4 sm:$0xff]   ;;  %v5232_v32 = vld [vmem:[#allocation8 + $0x388] ss:$16 sps:$4 sm:$0xff]  }
  0x63   :  { %1124 = vmatprep.subr.bf16.mxu0 %v5121_v40  ;;  %1510 = vmatprep.subr.bf16.mxu1 %v5123_v41  ;;  %v5184_v40 = vld [vmem:[#allocation8 + $0x288] ss:$16 sps:$4 sm:$0xff]   ;;  %v146_v41 = vld [vmem:[#allocation5 + $0xc0] sm:$0xff] }
  0x64   :  { %v5229_v31 = vld [vmem:[#allocation8 + $0x380] ss:$16 sps:$4 sm:$0xff]  }
  0x66   :  { %1125 = vmatpush1.bf16.msra.mxu0 %v5125_v42  ;;  %1511 = vmatpush1.bf16.msra.mxu1 %v5126_v43  ;;  %v5189_v42 = vld [vmem:[#allocation8 + $0x2a4] ss:$16 sps:$4 sm:$0xff]   ;;  %v5192_v43 = vld [vmem:[#allocation8 + $0x2ac] ss:$16 sps:$4 sm:$0xff]  }
  0x67   :  { %1126 = vmatprep.subr.bf16.mxu0 %v5127_v44  ;;  %1512 = vmatprep.subr.bf16.mxu1 %v5129_v45  ;;  %v150_v44 = vld [vmem:[#allocation5 + $0xe0] sm:$0xff]  ;;  %v155_v45 = vld [vmem:[#allocation5 + $0x108] sm:$0xff] }
  0x68   :  { %v262_v51 = vpack.c.bf16 %v150_v44, %v146_v41  ;;  %v5243_v41 = vld [vmem:[#allocation8 + $0x3c4] ss:$16 sps:$4 sm:$0xff]  }
  0x6a   :  { %1127 = vmatpush1.bf16.msra.mxu0 %v5131_v47  ;;  %1513 = vmatpush1.bf16.msra.mxu1 %v5132_v48  ;;  %v5187_v47 = vld [vmem:[#allocation8 + $0x2a0] ss:$16 sps:$4 sm:$0xff]   ;;  %v5190_v48 = vld [vmem:[#allocation8 + $0x2a8] ss:$16 sps:$4 sm:$0xff]  }
  0x6b   :  { %1128 = vmatprep.subr.bf16.mxu0 %v5133_v50  ;;  %1514 = vmatprep.subr.bf16.mxu1 %v5135_v52  ;;  %v5198_v50 = vld [vmem:[#allocation8 + $0x2cc] ss:$16 sps:$4 sm:$0xff]   ;;  %v267_v52 = vpack.c.bf16 %v159_v46, %v155_v45  ;;  %v5241_v45 = vld [vmem:[#allocation8 + $0x3c0] ss:$16 sps:$4 sm:$0xff]   ;;  %v5244_v46 = vld [vmem:[#allocation8 + $0x3c8] ss:$16 sps:$4 sm:$0xff]  }
  0x6e   :  { %1129 = vmatpush1.bf16.msra.mxu0 %v5137_v53  ;;  %1515 = vmatpush1.bf16.msra.mxu1 %v5138_v54  ;;  %v5193_v53 = vld [vmem:[#allocation8 + $0x2c0] ss:$16 sps:$4 sm:$0xff]   ;;  %v5196_v54 = vld [vmem:[#allocation8 + $0x2c8] ss:$16 sps:$4 sm:$0xff]  }
  0x6f   :  { %1130 = vmatprep.subr.bf16.mxu0 %v5139_v55  ;;  %1516 = vmatprep.subr.bf16.mxu1 %v5141_v56  ;;  %v154_v55 = vld [vmem:[#allocation5 + $0x100] sm:$0xff] }
  0x70   :  { %v5201_v56 = vld [vmem:[#allocation8 + $0x2e4] ss:$16 sps:$4 sm:$0xff]  }
  0x72   :  { %1131 = vmatpush1.bf16.msra.mxu0 %v5143_v57  ;;  %1517 = vmatpush1.bf16.msra.mxu1 %v5144_v58  ;;  %v5204_v57 = vld [vmem:[#allocation8 + $0x2ec] ss:$16 sps:$4 sm:$0xff]   ;;  %v158_v58 = vld [vmem:[#allocation5 + $0x120] sm:$0xff] }
  0x73   :  { %1132 = vmatprep.subr.bf16.mxu0 %v5145_v59  ;;  %1518 = vmatprep.subr.bf16.mxu1 %v5147_v60  ;;  %v163_v59 = vld [vmem:[#allocation5 + $0x148] sm:$0xff] }
  0x74   :  { %v167_v60 = vld [vmem:[#allocation5 + $0x168] sm:$0xff] }
  0x76   :  { %1133 = vmatpush1.bf16.msra.mxu0 %v5149_v61  ;;  %1519 = vmatpush1.bf16.msra.mxu1 %v5150_v62  ;;  %v5199_v61 = vld [vmem:[#allocation8 + $0x2e0] ss:$16 sps:$4 sm:$0xff]   ;;  %v5202_v62 = vld [vmem:[#allocation8 + $0x2e8] ss:$16 sps:$4 sm:$0xff]  }
  0x77   :  { %1134 = vmatprep.subr.bf16.mxu0 %v5151_v63  ;;  %1520 = vmatprep.subr.bf16.mxu1 %v5153_v0  ;;  %v5207_v63 = vld [vmem:[#allocation8 + $0x304] ss:$16 sps:$4 sm:$0xff]   ;;  %v5210_v0 = vld [vmem:[#allocation8 + $0x30c] ss:$16 sps:$4 sm:$0xff]  }
  0x7a   :  { %1135 = vmatpush1.bf16.msra.mxu0 %v5155_v1  ;;  %1521 = vmatpush1.bf16.msra.mxu1 %v5156_v2  ;;  %v266_v1 = vpack.c.bf16 %v158_v58, %v154_v55  ;;  %v271_v2 = vpack.c.bf16 %v167_v60, %v163_v59  ;;  %v198_v58 = vld [vmem:[#allocation5 + $0x260] sm:$0xff]  ;;  %v203_v59 = vld [vmem:[#allocation5 + $0x288] sm:$0xff] }
  0x7b   :  { %1297 = vmatprep.subr.bf16.mxu0 %v5159_v5  ;;  %1683 = vmatprep.subr.bf16.mxu1 %v5162_v6  ;;  %v162_v5 = vld [vmem:[#allocation5 + $0x140] sm:$0xff]  ;;  %v207_v60 = vld [vmem:[#allocation5 + $0x2a8] sm:$0xff] }
  0x7c   :  { %v5213_v6 = vld [vmem:[#allocation8 + $0x324] ss:$16 sps:$4 sm:$0xff]  }
  0x7d   :  { %1137 = vmatmul.mubr.bf16.vlgmr.msra.gmra.mrb[0].mxu0 %v250_v9  ;;  %1523 = vmatmul.mubr.bf16.vlgmr.msra.gmra.mrb[0].mxu1 %v250_v9  ;;  %v171_v9 = vld [vmem:[#allocation5 + $0x188] sm:$0xff] }
  0x7e   :  { %1298 = vmatpush1.bf16.msra.mxu0 %v5157_v10  ;;  %1684 = vmatpush1.bf16.msra.mxu1 %v5160_v11  ;;  %v175_v10 = vld [vmem:[#allocation5 + $0x1a8] sm:$0xff]  ;;  %v5211_v11 = vld [vmem:[#allocation8 + $0x320] ss:$16 sps:$4 sm:$0xff]  }
  0x7f   :  { %1146 = vmatprep.mubr.bf16.mxu0 %v255_v12  ;;  %1532 = vmatprep.mubr.bf16.mxu1 %v255_v12  ;;  %v5214_v12 = vld [vmem:[#allocation8 + $0x328] ss:$16 sps:$4 sm:$0xff]  }
  0x80   :  { %1299 = vmatprep.subr.bf16.mxu0 %v5165_v16  ;;  %1685 = vmatprep.subr.bf16.mxu1 %v5168_v17  ;;  %v275_v16 = vpack.c.bf16 %v175_v10, %v171_v9  ;;  %v5217_v17 = vld [vmem:[#allocation8 + $0x340] ss:$16 sps:$4 sm:$0xff]  }
  0x82   :  { %1300 = vmatpush1.bf16.msra.mxu0 %v5163_v15  ;;  %1686 = vmatpush1.bf16.msra.mxu1 %v5166_v18  ;;  %v270_v15 = vpack.c.bf16 %v166_v8, %v162_v5  ;;  %v5220_v18 = vld [vmem:[#allocation8 + $0x348] ss:$16 sps:$4 sm:$0xff]   ;;  %v210_v5 = vld [vmem:[#allocation5 + $0x2c0] sm:$0xff] }
  0x83   :  { %1301 = vmatprep.subr.bf16.mxu0 %v5171_v21  ;;  %1687 = vmatprep.subr.bf16.mxu1 %v5174_v22  ;;  %v170_v21 = vld [vmem:[#allocation5 + $0x180] sm:$0xff]  ;;  %v223_v8 = vld [vmem:[#allocation5 + $0x328] sm:$0xff] }
  0x84   :  { %v174_v22 = vld [vmem:[#allocation5 + $0x1a0] sm:$0xff] }
  0x85   :  { %1147 = vmatmul.mubr.bf16.gmra.mrb[4].mxu0 %v254_v23  ;;  %1533 = vmatmul.mubr.bf16.gmra.mrb[4].mxu1 %v254_v23  ;;  %v179_v23 = vld [vmem:[#allocation5 + $0x1c8] sm:$0xff] }
  0x86   :  { %1156 = vmatprep.mubr.bf16.mxu0 %v259_v24  ;;  %1542 = vmatprep.mubr.bf16.mxu1 %v259_v24  ;;  %v183_v24 = vld [vmem:[#allocation5 + $0x1e8] sm:$0xff] }
  0x87   :  { %1302 = vmatpush1.bf16.msra.mxu0 %v5169_v25  ;;  %1688 = vmatpush1.bf16.msra.mxu1 %v5172_v26  ;;  %v5223_v25 = vld [vmem:[#allocation8 + $0x360] ss:$16 sps:$4 sm:$0xff]   ;;  %v5226_v26 = vld [vmem:[#allocation8 + $0x368] ss:$16 sps:$4 sm:$0xff]   ;;  %v279_v30 = vpack.c.bf16 %v183_v24, %v179_v23 }
  0x88   :  { %1303 = vmatprep.subr.bf16.mxu0 %v5177_v28  ;;  %1689 = vmatprep.subr.bf16.mxu1 %v5180_v29  ;;  %v5234_v28 = vld [vmem:[#allocation8 + $0x38c] ss:$16 sps:$4 sm:$0xff]   ;;  %v274_v29 = vpack.c.bf16 %v174_v22, %v170_v21  ;;  %v234_v23 = vld [vmem:[#allocation5 + $0x380] sm:$0xff] }
  0x89   :  { %v238_v24 = vld [vmem:[#allocation5 + $0x3a0] sm:$0xff] }
  0x8b   :  { %1304 = vmatpush1.bf16.msra.mxu0 %v5175_v33  ;;  %1690 = vmatpush1.bf16.msra.mxu1 %v5178_v34  ;;  %v5237_v33 = vld [vmem:[#allocation8 + $0x3a4] ss:$16 sps:$4 sm:$0xff]   ;;  %v5240_v34 = vld [vmem:[#allocation8 + $0x3ac] ss:$16 sps:$4 sm:$0xff]  }
  0x8c   :  { %1305 = vmatprep.subr.bf16.mxu0 %v5183_v35  ;;  %1691 = vmatprep.subr.bf16.mxu1 %v5186_v36  ;;  %v178_v35 = vld [vmem:[#allocation5 + $0x1c0] sm:$0xff] }
  0x8d   :  { %1157 = vmatmul.mubr.bf16.gmra.mrb[8].mxu0 %v258_v37  ;;  %1543 = vmatmul.mubr.bf16.gmra.mrb[8].mxu1 %v258_v37  ;;  %v182_v36 = vld [vmem:[#allocation5 + $0x1e0] sm:$0xff]  ;;  %v187_v37 = vld [vmem:[#allocation5 + $0x208] sm:$0xff] }
  0x8e   :  { %1166 = vmatprep.mubr.bf16.mxu0 %v263_v38  ;;  %1552 = vmatprep.mubr.bf16.mxu1 %v263_v38  ;;  %v191_v38 = vld [vmem:[#allocation5 + $0x228] sm:$0xff] }
  0x8f   :  { %1306 = vmatpush1.bf16.msra.mxu0 %v5181_v39  ;;  %1692 = vmatpush1.bf16.msra.mxu1 %v5184_v40  ;;  %v5235_v39 = vld [vmem:[#allocation8 + $0x3a0] ss:$16 sps:$4 sm:$0xff]   ;;  %v5238_v40 = vld [vmem:[#allocation8 + $0x3a8] ss:$16 sps:$4 sm:$0xff]   ;;  %v283_v44 = vpack.c.bf16 %v191_v38, %v187_v37 }
  0x90   :  { %1307 = vmatprep.subr.bf16.mxu0 %v5189_v42  ;;  %1693 = vmatprep.subr.bf16.mxu1 %v5192_v43  ;;  %v5246_v42 = vld [vmem:[#allocation8 + $0x3cc] ss:$16 sps:$4 sm:$0xff]   ;;  %v278_v43 = vpack.c.bf16 %v182_v36, %v178_v35  ;;  %v124_v35 = vld [vmem:[#allocation5 + $0x10] sm:$0xff] }
  0x91   :  { %v128_v36 = vld [vmem:[#allocation5 + $0x30] sm:$0xff]  ;;  %v133_v37 = vld [vmem:[#allocation5 + $0x58] sm:$0xff] }
  0x92   :  { %v137_v38 = vld [vmem:[#allocation5 + $0x78] sm:$0xff] }
  0x93   :  { %1308 = vmatpush1.bf16.msra.mxu0 %v5187_v47  ;;  %1694 = vmatpush1.bf16.msra.mxu1 %v5190_v48  ;;  %v5249_v47 = vld [vmem:[#allocation8 + $0x3e4] ss:$16 sps:$4 sm:$0xff]   ;;  %v5252_v48 = vld [vmem:[#allocation8 + $0x3ec] ss:$16 sps:$4 sm:$0xff]  }
  0x94   :  { %1309 = vmatprep.subr.bf16.mxu0 %v5195_v49  ;;  %1695 = vmatprep.subr.bf16.mxu1 %v5198_v50  ;;  %v186_v49 = vld [vmem:[#allocation5 + $0x200] sm:$0xff] }
  0x95   :  { %1167 = vmatmul.mubr.bf16.gmra.mrb[12].mxu0 %v262_v51  ;;  %1553 = vmatmul.mubr.bf16.gmra.mrb[12].mxu1 %v262_v51  ;;  %v190_v50 = vld [vmem:[#allocation5 + $0x220] sm:$0xff]  ;;  %v195_v51 = vld [vmem:[#allocation5 + $0x248] sm:$0xff] }
  0x96   :  { %1176 = vmatprep.mubr.bf16.mxu0 %v267_v52  ;;  %1562 = vmatprep.mubr.bf16.mxu1 %v267_v52  ;;  %v199_v52 = vld [vmem:[#allocation5 + $0x268] sm:$0xff]  ;;  %v282_v55 = vpack.c.bf16 %v190_v50, %v186_v49  ;;  %v149_v49 = vld [vmem:[#allocation5 + $0xd8] sm:$0xff] }
  0x97   :  { %1310 = vmatpush1.bf16.msra.mxu0 %v5193_v53  ;;  %1696 = vmatpush1.bf16.msra.mxu1 %v5196_v54  ;;  %v5247_v53 = vld [vmem:[#allocation8 + $0x3e0] ss:$16 sps:$4 sm:$0xff]   ;;  %v5250_v54 = vld [vmem:[#allocation8 + $0x3e8] ss:$16 sps:$4 sm:$0xff]  }
  0x98   :  { %1311 = vmatprep.subr.bf16.mxu0 %v5201_v56  ;;  %1697 = vmatprep.subr.bf16.mxu1 %v5204_v57  ;;  %v287_v56 = vpack.c.bf16 %v199_v52, %v195_v51  ;;  %v194_v57 = vld [vmem:[#allocation5 + $0x240] sm:$0xff]  ;;  %v153_v50 = vld [vmem:[#allocation5 + $0xf8] sm:$0xff] }
  0x99   :  { %v265_v52 = vpack.c.bf16 %v153_v50, %v149_v49  ;;  %v228_v49 = vld [vmem:[#allocation5 + $0x350] sm:$0xff] }
  0x9a   :  { %v232_v50 = vld [vmem:[#allocation5 + $0x370] sm:$0xff] }
  0x9b   :  { %1312 = vmatpush1.bf16.msra.mxu0 %v5199_v61  ;;  %1698 = vmatpush1.bf16.msra.mxu1 %v5202_v62  ;;  %v286_v61 = vpack.c.bf16 %v198_v58, %v194_v57  ;;  %v291_v62 = vpack.c.bf16 %v207_v60, %v203_v59  ;;  %v156_v59 = vld [vmem:[#allocation5 + $0x110] sm:$0xff] }
  0x9c   :  { %1313 = vmatprep.subr.bf16.mxu0 %v5207_v63  ;;  %1699 = vmatprep.subr.bf16.mxu1 %v5210_v0  ;;  %v202_v63 = vld [vmem:[#allocation5 + $0x280] sm:$0xff]  ;;  %v160_v60 = vld [vmem:[#allocation5 + $0x130] sm:$0xff] }
  0x9d   :  { %1177 = vmatmul.mubr.bf16.gmra.mrb[16].mxu0 %v266_v1  ;;  %1563 = vmatmul.mubr.bf16.gmra.mrb[16].mxu1 %v266_v1  ;;  %v206_v0 = vld [vmem:[#allocation5 + $0x2a0] sm:$0xff]  ;;  %v211_v1 = vld [vmem:[#allocation5 + $0x2c8] sm:$0xff] }
  0x9e   :  { %1186 = vmatprep.mubr.bf16.mxu0 %v271_v2  ;;  %1572 = vmatprep.mubr.bf16.mxu1 %v271_v2  ;;  %v215_v2 = vld [vmem:[#allocation5 + $0x2e8] sm:$0xff] }
  0x9f   :  { %1314 = vmatpush1.bf16.msra.mxu0 %v5205_v3  ;;  %1700 = vmatpush1.bf16.msra.mxu1 %v5208_v4  ;;  %v290_v3 = vpack.c.bf16 %v206_v0, %v202_v63  ;;  %v295_v4 = vpack.c.bf16 %v215_v2, %v211_v1  ;;  %v268_v63 = vpack.c.bf16 %v160_v60, %v156_v59  ;;  %v164_v1 = vld [vmem:[#allocation5 + $0x150] sm:$0xff] }
  0xa0   :  { %1315 = vmatprep.subr.bf16.mxu0 %v5213_v6  ;;  %1701 = vmatprep.subr.bf16.mxu1 %v5216_v7  ;;  %v214_v6 = vld [vmem:[#allocation5 + $0x2e0] sm:$0xff]  ;;  %v219_v7 = vld [vmem:[#allocation5 + $0x308] sm:$0xff]  ;;  %v168_v2 = vld [vmem:[#allocation5 + $0x170] sm:$0xff] }
  0xa1   :  { %v294_v9 = vpack.c.bf16 %v214_v6, %v210_v5  ;;  %v299_v10 = vpack.c.bf16 %v223_v8, %v219_v7  ;;  %v272_v5 = vpack.c.bf16 %v168_v2, %v164_v1  ;;  %v172_v7 = vld [vmem:[#allocation5 + $0x190] sm:$0xff] }
  0xa2   :  { %v176_v8 = vld [vmem:[#allocation5 + $0x1b0] sm:$0xff] }
  0xa3   :  { %1316 = vmatpush1.bf16.msra.mxu0 %v5211_v11  ;;  %1702 = vmatpush1.bf16.msra.mxu1 %v5214_v12  ;;  %v218_v11 = vld [vmem:[#allocation5 + $0x300] sm:$0xff] }
  0xa4   :  { %1317 = vmatprep.subr.bf16.mxu0 %v5219_v13  ;;  %1703 = vmatprep.subr.bf16.mxu1 %v5222_v14  ;;  %v222_v12 = vld [vmem:[#allocation5 + $0x320] sm:$0xff]  ;;  %v227_v13 = vld [vmem:[#allocation5 + $0x348] sm:$0xff] }
  0xa5   :  { %1187 = vmatmul.mubr.bf16.gmra.mrb[20].mxu0 %v270_v15  ;;  %1573 = vmatmul.mubr.bf16.gmra.mrb[20].mxu1 %v270_v15  ;;  %v231_v14 = vld [vmem:[#allocation5 + $0x368] sm:$0xff]  ;;  %v298_v15 = vpack.c.bf16 %v222_v12, %v218_v11  ;;  %v276_v11 = vpack.c.bf16 %v176_v8, %v172_v7 }
  0xa6   :  { %1196 = vmatprep.mubr.bf16.mxu0 %v275_v16  ;;  %1582 = vmatprep.mubr.bf16.mxu1 %v275_v16  ;;  %v303_v16 = vpack.c.bf16 %v231_v14, %v227_v13  ;;  %v180_v13 = vld [vmem:[#allocation5 + $0x1d0] sm:$0xff] }
  0xa7   :  { %1318 = vmatpush1.bf16.msra.mxu0 %v5217_v17  ;;  %1704 = vmatpush1.bf16.msra.mxu1 %v5220_v18  ;;  %v226_v17 = vld [vmem:[#allocation5 + $0x340] sm:$0xff]  ;;  %v184_v14 = vld [vmem:[#allocation5 + $0x1f0] sm:$0xff] }
  0xa8   :  { %1319 = vmatprep.subr.bf16.mxu0 %v5225_v19  ;;  %1705 = vmatprep.subr.bf16.mxu1 %v5228_v20  ;;  %v230_v18 = vld [vmem:[#allocation5 + $0x360] sm:$0xff]  ;;  %v235_v19 = vld [vmem:[#allocation5 + $0x388] sm:$0xff] }
  0xa9   :  { %v239_v20 = vld [vmem:[#allocation5 + $0x3a8] sm:$0xff]  ;;  %v302_v21 = vpack.c.bf16 %v230_v18, %v226_v17  ;;  %v280_v17 = vpack.c.bf16 %v184_v14, %v180_v13 }
  0xaa   :  { %v307_v22 = vpack.c.bf16 %v239_v20, %v235_v19  ;;  %v188_v19 = vld [vmem:[#allocation5 + $0x210] sm:$0xff] }
  0xab   :  { %1320 = vmatpush1.bf16.msra.mxu0 %v5223_v25  ;;  %1706 = vmatpush1.bf16.msra.mxu1 %v5226_v26  ;;  %v243_v25 = vld [vmem:[#allocation5 + $0x3c8] sm:$0xff]  ;;  %v192_v20 = vld [vmem:[#allocation5 + $0x230] sm:$0xff] }
  0xac   :  { %1321 = vmatprep.subr.bf16.mxu0 %v5231_v27  ;;  %1707 = vmatprep.subr.bf16.mxu1 %v5234_v28  ;;  %v247_v26 = vld [vmem:[#allocation5 + $0x3e8] sm:$0xff]  ;;  %v306_v27 = vpack.c.bf16 %v238_v24, %v234_v23  ;;  %v284_v23 = vpack.c.bf16 %v192_v20, %v188_v19 }
  0xad   :  { %1197 = vmatmul.mubr.bf16.gmra.mrb[24].mxu0 %v274_v29  ;;  %1583 = vmatmul.mubr.bf16.gmra.mrb[24].mxu1 %v274_v29  ;;  %v311_v28 = vpack.c.bf16 %v247_v26, %v243_v25  ;;  %v242_v29 = vld [vmem:[#allocation5 + $0x3c0] sm:$0xff]  ;;  %v196_v25 = vld [vmem:[#allocation5 + $0x250] sm:$0xff] }
  0xae   :  { %1206 = vmatprep.mubr.bf16.mxu0 %v279_v30  ;;  %1592 = vmatprep.mubr.bf16.mxu1 %v279_v30  ;;  %v246_v30 = vld [vmem:[#allocation5 + $0x3e0] sm:$0xff]  ;;  %v200_v26 = vld [vmem:[#allocation5 + $0x270] sm:$0xff] }
  0xaf   :  { %1322 = vmatpush1.bf16.msra.mxu0 %v5229_v31  ;;  %1708 = vmatpush1.bf16.msra.mxu1 %v5232_v32  ;;  %v125_v31 = vld [vmem:[#allocation5 + $0x18] sm:$0xff] }
  0xb0   :  { %1323 = vmatprep.subr.bf16.mxu0 %v5237_v33  ;;  %1709 = vmatprep.subr.bf16.mxu1 %v5240_v34  ;;  %v129_v32 = vld [vmem:[#allocation5 + $0x38] sm:$0xff]  ;;  %v310_v33 = vpack.c.bf16 %v246_v30, %v242_v29  ;;  %v288_v29 = vpack.c.bf16 %v200_v26, %v196_v25 }
  0xb1   :  { %v253_v34 = vpack.c.bf16 %v129_v32, %v125_v31  ;;  %v204_v31 = vld [vmem:[#allocation5 + $0x290] sm:$0xff] }
  0xb2   :  { %v208_v32 = vld [vmem:[#allocation5 + $0x2b0] sm:$0xff] }
  0xb3   :  { %1324 = vmatpush1.bf16.msra.mxu0 %v5235_v39  ;;  %1710 = vmatpush1.bf16.msra.mxu1 %v5238_v40  ;;  %v252_v39 = vpack.c.bf16 %v128_v36, %v124_v35  ;;  %v257_v40 = vpack.c.bf16 %v137_v38, %v133_v37  ;;  %v292_v35 = vpack.c.bf16 %v208_v32, %v204_v31  ;;  %v212_v37 = vld [vmem:[#allocation5 + $0x2d0] sm:$0xff]  ;;  %v6530_v31 = vmov 0  }
  0xb4   :  { %1325 = vmatprep.subr.bf16.mxu0 %v5243_v41  ;;  %1711 = vmatprep.subr.bf16.mxu1 %v5246_v42  ;;  %v132_v41 = vld [vmem:[#allocation5 + $0x50] sm:$0xff] }
  0xb5   :  { %1207 = vmatmul.mubr.bf16.gmra.mrb[28].mxu0 %v278_v43  ;;  %1593 = vmatmul.mubr.bf16.gmra.mrb[28].mxu1 %v278_v43  ;;  %v136_v42 = vld [vmem:[#allocation5 + $0x70] sm:$0xff]  ;;  %v141_v43 = vld [vmem:[#allocation5 + $0x98] sm:$0xff] }
  0xb6   :  { %1216 = vmatprep.mubr.bf16.mxu0 %v283_v44  ;;  %1602 = vmatprep.mubr.bf16.mxu1 %v283_v44  ;;  %v145_v44 = vld [vmem:[#allocation5 + $0xb8] sm:$0xff]  ;;  %v216_v38 = vld [vmem:[#allocation5 + $0x2f0] sm:$0xff] }
  0xb7   :  { %1326 = vmatpush1.bf16.msra.mxu0 %v5241_v45  ;;  %1712 = vmatpush1.bf16.msra.mxu1 %v5244_v46  ;;  %v256_v45 = vpack.c.bf16 %v136_v42, %v132_v41  ;;  %v261_v46 = vpack.c.bf16 %v145_v44, %v141_v43  ;;  %v296_v41 = vpack.c.bf16 %v216_v38, %v212_v37  ;;  %v220_v43 = vld [vmem:[#allocation5 + $0x310] sm:$0xff] }
  0xb8   :  { %1327 = vmatprep.subr.bf16.mxu0 %v5249_v47  ;;  %1713 = vmatprep.subr.bf16.mxu1 %v5252_v48  ;;  %v140_v47 = vld [vmem:[#allocation5 + $0x90] sm:$0xff] }
  0xb9   :  { %v144_v48 = vld [vmem:[#allocation5 + $0xb0] sm:$0xff] }
  0xba   :  { %v260_v51 = vpack.c.bf16 %v144_v48, %v140_v47  ;;  %v224_v44 = vld [vmem:[#allocation5 + $0x330] sm:$0xff] }
  0xbb   :  { %1328 = vmatpush1.bf16.msra.mxu0 %v5247_v53  ;;  %1714 = vmatpush1.bf16.msra.mxu1 %v5250_v54  ;;  %v148_v53 = vld [vmem:[#allocation5 + $0xd0] sm:$0xff]  ;;  %v300_v47 = vpack.c.bf16 %v224_v44, %v220_v43 }
  0xbc   :  { %v152_v54 = vld [vmem:[#allocation5 + $0xf0] sm:$0xff] }
  0xbd   :  { %1217 = vmatmul.mubr.bf16.gmra.mrb[32].mxu0 %v282_v55  ;;  %1603 = vmatmul.mubr.bf16.gmra.mrb[32].mxu1 %v282_v55  ;;  %v157_v55 = vld [vmem:[#allocation5 + $0x118] sm:$0xff]  ;;  %v264_v57 = vpack.c.bf16 %v152_v54, %v148_v53  ;;  %v304_v53 = vpack.c.bf16 %v232_v50, %v228_v49 }
  0xbe   :  { %1226 = vmatprep.mubr.bf16.mxu0 %v287_v56  ;;  %1612 = vmatprep.mubr.bf16.mxu1 %v287_v56  ;;  %v161_v56 = vld [vmem:[#allocation5 + $0x138] sm:$0xff] }
  0xbf   :  { %v269_v58 = vpack.c.bf16 %v161_v56, %v157_v55  ;;  %v236_v55 = vld [vmem:[#allocation5 + $0x390] sm:$0xff] }
  0xc0   :  { %v240_v56 = vld [vmem:[#allocation5 + $0x3b0] sm:$0xff] }
  0xc1   :  { %v308_v59 = vpack.c.bf16 %v240_v56, %v236_v55 }
  0xc5   :  { %1227 = vmatmul.mubr.bf16.gmra.mrb[36].mxu0 %v286_v61  ;;  %1613 = vmatmul.mubr.bf16.gmra.mrb[36].mxu1 %v286_v61  ;;  %v165_v61 = vld [vmem:[#allocation5 + $0x158] sm:$0xff] }
  0xc6   :  { %1236 = vmatprep.mubr.bf16.mxu0 %v291_v62  ;;  %1622 = vmatprep.mubr.bf16.mxu1 %v291_v62  ;;  %v169_v62 = vld [vmem:[#allocation5 + $0x178] sm:$0xff] }
  0xc7   :  { %v273_v0 = vpack.c.bf16 %v169_v62, %v165_v61  ;;  %v244_v61 = vld [vmem:[#allocation5 + $0x3d0] sm:$0xff] }
  0xc8   :  { %v248_v62 = vld [vmem:[#allocation5 + $0x3f0] sm:$0xff] }
  0xcd   :  { %1237 = vmatmul.mubr.bf16.gmra.mrb[40].mxu0 %v290_v3  ;;  %1623 = vmatmul.mubr.bf16.gmra.mrb[40].mxu1 %v290_v3  ;;  %v173_v3 = vld [vmem:[#allocation5 + $0x198] sm:$0xff] }
  0xce   :  { %1246 = vmatprep.mubr.bf16.mxu0 %v295_v4  ;;  %1632 = vmatprep.mubr.bf16.mxu1 %v295_v4  ;;  %v177_v4 = vld [vmem:[#allocation5 + $0x1b8] sm:$0xff] }
  0xcf   :  { %v277_v6 = vpack.c.bf16 %v177_v4, %v173_v3  ;;  %v442_v4 = vld [vmem:[%s6522_s2] sm:$0xf] }
  0xd5   :  { %1247 = vmatmul.mubr.bf16.gmra.mrb[44].mxu0 %v294_v9  ;;  %1633 = vmatmul.mubr.bf16.gmra.mrb[44].mxu1 %v294_v9  ;;  %v181_v9 = vld [vmem:[#allocation5 + $0x1d8] sm:$0xff] }
  0xd6   :  { %1256 = vmatprep.mubr.bf16.mxu0 %v299_v10  ;;  %1642 = vmatprep.mubr.bf16.mxu1 %v299_v10  ;;  %v185_v10 = vld [vmem:[#allocation5 + $0x1f8] sm:$0xff] }
  0xd7   :  { %v281_v12 = vpack.c.bf16 %v185_v10, %v181_v9 }
  0xdd   :  { %1257 = vmatmul.mubr.bf16.gmra.mrb[48].mxu0 %v298_v15  ;;  %1643 = vmatmul.mubr.bf16.gmra.mrb[48].mxu1 %v298_v15  ;;  %v189_v15 = vld [vmem:[#allocation5 + $0x218] sm:$0xff] }
  0xde   :  { %1266 = vmatprep.mubr.bf16.mxu0 %v303_v16  ;;  %1652 = vmatprep.mubr.bf16.mxu1 %v303_v16  ;;  %v193_v16 = vld [vmem:[#allocation5 + $0x238] sm:$0xff] }
  0xdf   :  { %v285_v18 = vpack.c.bf16 %v193_v16, %v189_v15 }
  0xe5   :  { %1267 = vmatmul.mubr.bf16.gmra.mrb[52].mxu0 %v302_v21  ;;  %1653 = vmatmul.mubr.bf16.gmra.mrb[52].mxu1 %v302_v21  ;;  %v197_v21 = vld [vmem:[#allocation5 + $0x258] sm:$0xff] }
  0xe6   :  { %1276 = vmatprep.mubr.bf16.mxu0 %v307_v22  ;;  %1662 = vmatprep.mubr.bf16.mxu1 %v307_v22  ;;  %v201_v22 = vld [vmem:[#allocation5 + $0x278] sm:$0xff] }
  0xe7   :  { %v289_v24 = vpack.c.bf16 %v201_v22, %v197_v21 }
  0xed   :  { %1277 = vmatmul.mubr.bf16.gmra.mrb[56].mxu0 %v306_v27  ;;  %1663 = vmatmul.mubr.bf16.gmra.mrb[56].mxu1 %v306_v27  ;;  %v205_v27 = vld [vmem:[#allocation5 + $0x298] sm:$0xff] }
  0xee   :  { %1286 = vmatprep.mubr.bf16.mxu0 %v311_v28  ;;  %1672 = vmatprep.mubr.bf16.mxu1 %v311_v28  ;;  %v209_v28 = vld [vmem:[#allocation5 + $0x2b8] sm:$0xff] }
  0xef   :  { %v293_v30 = vpack.c.bf16 %v209_v28, %v205_v27 }
  0xf5   :  { %1287 = vmatmul.mubr.bf16.gmra.mrb[60].mxu0 %v310_v33  ;;  %1673 = vmatmul.mubr.bf16.gmra.mrb[60].mxu1 %v310_v33  ;;  %v213_v33 = vld [vmem:[#allocation5 + $0x2d8] sm:$0xff] }
  0xf6   :  { %1329 = vmatprep.mubr.bf16.mxu0 %v253_v34  ;;  %1715 = vmatprep.mubr.bf16.mxu1 %v253_v34  ;;  %v217_v34 = vld [vmem:[#allocation5 + $0x2f8] sm:$0xff] }
  0xf7   :  { %v297_v36 = vpack.c.bf16 %v217_v34, %v213_v33 }
  0xfd   :  { %1330 = vmatmul.mubr.bf16.vlgmr.msra.gmra.mrb[0].mxu0 %v252_v39  ;;  %1716 = vmatmul.mubr.bf16.vlgmr.msra.gmra.mrb[0].mxu1 %v252_v39  ;;  %v221_v39 = vld [vmem:[#allocation5 + $0x318] sm:$0xff] }
  0xfe   :  { %1339 = vmatprep.mubr.bf16.mxu0 %v257_v40  ;;  %1725 = vmatprep.mubr.bf16.mxu1 %v257_v40  ;;  %v225_v40 = vld [vmem:[#allocation5 + $0x338] sm:$0xff] }
  0xff   :  { %v301_v42 = vpack.c.bf16 %v225_v40, %v221_v39 }
 0x105   :  { %1340 = vmatmul.mubr.bf16.gmra.mrb[4].mxu0 %v256_v45  ;;  %1726 = vmatmul.mubr.bf16.gmra.mrb[4].mxu1 %v256_v45  ;;  %v229_v45 = vld [vmem:[#allocation5 + $0x358] sm:$0xff] }
 0x106   :  { %1349 = vmatprep.mubr.bf16.mxu0 %v261_v46  ;;  %1735 = vmatprep.mubr.bf16.mxu1 %v261_v46  ;;  %v233_v46 = vld [vmem:[#allocation5 + $0x378] sm:$0xff] }
 0x107   :  { %v305_v48 = vpack.c.bf16 %v233_v46, %v229_v45 }
 0x10d   :  { %1350 = vmatmul.mubr.bf16.gmra.mrb[8].mxu0 %v260_v51  ;;  %1736 = vmatmul.mubr.bf16.gmra.mrb[8].mxu1 %v260_v51  ;;  %v237_v51 = vld [vmem:[#allocation5 + $0x398] sm:$0xff] }
 0x10e   :  { %1359 = vmatprep.mubr.bf16.mxu0 %v265_v52  ;;  %1745 = vmatprep.mubr.bf16.mxu1 %v265_v52  ;;  %v241_v52 = vld [vmem:[#allocation5 + $0x3b8] sm:$0xff] }
 0x10f   :  { %v309_v54 = vpack.c.bf16 %v241_v52, %v237_v51 }
 0x115   :  { %1360 = vmatmul.mubr.bf16.gmra.mrb[12].mxu0 %v264_v57  ;;  %1746 = vmatmul.mubr.bf16.gmra.mrb[12].mxu1 %v264_v57  ;;  %v245_v57 = vld [vmem:[#allocation5 + $0x3d8] sm:$0xff] }
 0x116   :  { %1369 = vmatprep.mubr.bf16.mxu0 %v269_v58  ;;  %1755 = vmatprep.mubr.bf16.mxu1 %v269_v58  ;;  %v249_v58 = vld [vmem:[#allocation5 + $0x3f8] sm:$0xff] }
 0x117   :  { %v313_v60 = vpack.c.bf16 %v249_v58, %v245_v57 }
 0x11d   :  { %1370 = vmatmul.mubr.bf16.gmra.mrb[16].mxu0 %v268_v63  ;;  %1756 = vmatmul.mubr.bf16.gmra.mrb[16].mxu1 %v268_v63  ;;  %v312_v63 = vpack.c.bf16 %v248_v62, %v244_v61 }
 0x11e   :  { %1379 = vmatprep.mubr.bf16.mxu0 %v273_v0  ;;  %1765 = vmatprep.mubr.bf16.mxu1 %v273_v0  ;;  %v444_v0 = vlaneseq }
 0x120   :  { %v445_v1 = vshrl.u32 %v444_v0, 7 }
 0x122   :  { %v5428_v2 = vsub.s32 0, %v445_v1  ;;  %v5430_v3 = vsub.s32 2, %v445_v1 }
 0x124   :  { %6578 = vst [vmem:[#allocation20_spill] sm:$0xff] %v5428_v2  ;;  %6579 = vst [vmem:[#allocation21_spill] sm:$0xff] %v5430_v3  ;;  %v5440_v7 = vrot.slane %v442_v4, %v5428_v2  ;;  %v5443_v8 = vrot.slane %v442_v4, %v5430_v3  ;;  %v6592_v2 = vmov 0  }
 0x125   :  { %1380 = vmatmul.mubr.bf16.gmra.mrb[20].mxu0 %v272_v5  ;;  %1766 = vmatmul.mubr.bf16.gmra.mrb[20].mxu1 %v272_v5  ;;  %v5435_v5 = vsub.s32 1, %v445_v1 }
 0x126   :  { %1389 = vmatprep.mubr.bf16.mxu0 %v277_v6  ;;  %1775 = vmatprep.mubr.bf16.mxu1 %v277_v6  ;;  %v5437_v6 = vsub.s32 3, %v445_v1 }
 0x127   :  { %6580 = vst [vmem:[#allocation22_spill] sm:$0xff] %v5435_v5 }
 0x128   :  { %6581 = vst [vmem:[#allocation23_spill] sm:$0xff] %v5437_v6 }
 0x12d   :  { %1390 = vmatmul.mubr.bf16.gmra.mrb[24].mxu0 %v276_v11  ;;  %1776 = vmatmul.mubr.bf16.gmra.mrb[24].mxu1 %v276_v11  ;;  %v5446_v11 = vrot.slane %v442_v4, %v5435_v5 }
 0x12e   :  { %1399 = vmatprep.mubr.bf16.mxu0 %v281_v12  ;;  %1785 = vmatprep.mubr.bf16.mxu1 %v281_v12  ;;  %v5449_v12 = vrot.slane %v442_v4, %v5437_v6 }
 0x135   :  { %1400 = vmatmul.mubr.bf16.gmra.mrb[28].mxu0 %v280_v17  ;;  %1786 = vmatmul.mubr.bf16.gmra.mrb[28].mxu1 %v280_v17 }
 0x136   :  { %1409 = vmatprep.mubr.bf16.mxu0 %v285_v18  ;;  %1795 = vmatprep.mubr.bf16.mxu1 %v285_v18 }
 0x13d   :  { %1410 = vmatmul.mubr.bf16.gmra.mrb[32].mxu0 %v284_v23  ;;  %1796 = vmatmul.mubr.bf16.gmra.mrb[32].mxu1 %v284_v23 }
 0x13e   :  { %1419 = vmatprep.mubr.bf16.mxu0 %v289_v24  ;;  %1805 = vmatprep.mubr.bf16.mxu1 %v289_v24 }
 0x145   :  { %1420 = vmatmul.mubr.bf16.gmra.mrb[36].mxu0 %v288_v29  ;;  %1806 = vmatmul.mubr.bf16.gmra.mrb[36].mxu1 %v288_v29 }
 0x146   :  { %1429 = vmatprep.mubr.bf16.mxu0 %v293_v30  ;;  %1815 = vmatprep.mubr.bf16.mxu1 %v293_v30 }
 0x14d   :  { %1430 = vmatmul.mubr.bf16.gmra.mrb[40].mxu0 %v292_v35  ;;  %1816 = vmatmul.mubr.bf16.gmra.mrb[40].mxu1 %v292_v35 }
 0x14e   :  { %1439 = vmatprep.mubr.bf16.mxu0 %v297_v36  ;;  %1825 = vmatprep.mubr.bf16.mxu1 %v297_v36 }
 0x155   :  { %1440 = vmatmul.mubr.bf16.gmra.mrb[44].mxu0 %v296_v41  ;;  %1826 = vmatmul.mubr.bf16.gmra.mrb[44].mxu1 %v296_v41 }
 0x156   :  { %1449 = vmatprep.mubr.bf16.mxu0 %v301_v42  ;;  %1835 = vmatprep.mubr.bf16.mxu1 %v301_v42 }
 0x15d   :  { %1450 = vmatmul.mubr.bf16.gmra.mrb[48].mxu0 %v300_v47  ;;  %1836 = vmatmul.mubr.bf16.gmra.mrb[48].mxu1 %v300_v47 }
 0x15e   :  { %1459 = vmatprep.mubr.bf16.mxu0 %v305_v48  ;;  %1845 = vmatprep.mubr.bf16.mxu1 %v305_v48 }
 0x165   :  { %1460 = vmatmul.mubr.bf16.gmra.mrb[52].mxu0 %v304_v53  ;;  %1846 = vmatmul.mubr.bf16.gmra.mrb[52].mxu1 %v304_v53 }
 0x166   :  { %1469 = vmatprep.mubr.bf16.mxu0 %v309_v54  ;;  %1855 = vmatprep.mubr.bf16.mxu1 %v309_v54 }
 0x16d   :  { %1470 = vmatmul.mubr.bf16.gmra.mrb[56].mxu0 %v308_v59  ;;  %1856 = vmatmul.mubr.bf16.gmra.mrb[56].mxu1 %v308_v59 }
 0x16e   :  { %1479 = vmatprep.mubr.bf16.mxu0 %v313_v60  ;;  %1865 = vmatprep.mubr.bf16.mxu1 %v313_v60 }
 0x175   :  { %1480 = vmatmul.mubr.bf16.gmra.mrb[60].mxu0 %v312_v63  ;;  %1866 = vmatmul.mubr.bf16.gmra.mrb[60].mxu1 %v312_v63 }
 0x1d0   :  { %v1331_v9 = vpop.f32.mrb[0].mxu0  ;;  %v1717_v10 = vpop.f32.mrb[0].mxu1 }
 0x1d1   :  { %v1333_v13 = vpop.f32.mrb[1].mxu0  ;;  %v1719_v14 = vpop.f32.mrb[1].mxu1  ;;  %v4275_v17 = vadd.f32 %v1331_v9, %v5440_v7  ;;  %v4339_v18 = vadd.f32 %v1717_v10, %v5443_v8 }
 0x1d2   :  { %v1335_v15 = vpop.f32.mrb[2].mxu0  ;;  %v1721_v16 = vpop.f32.mrb[2].mxu1  ;;  %v4276_v23 = vadd.f32 %v1333_v13, %v5446_v11  ;;  %v4340_v24 = vadd.f32 %v1719_v14, %v5449_v12 }
 0x1d3   :  { %v4277_v19 = vadd.f32 %v1335_v15, %v5440_v7  ;;  %v4341_v20 = vadd.f32 %v1721_v16, %v5443_v8  ;;  %v1337_v21 = vpop.f32.mrb[3].mxu0  ;;  %v1723_v22 = vpop.f32.mrb[3].mxu1 }
 0x1d4   :  { %v4278_v25 = vadd.f32 %v1337_v21, %v5446_v11  ;;  %v4342_v26 = vadd.f32 %v1723_v22, %v5449_v12 }
 0x1d5   :  { %v1876_v27 = vpack.c.bf16 %v4277_v19, %v4275_v17  ;;  %v1878_v28 = vpack.c.bf16 %v4341_v20, %v4339_v18 }
 0x1d6   :  { %v1877_v29 = vpack.c.bf16 %v4278_v25, %v4276_v23  ;;  %v1879_v30 = vpack.c.bf16 %v4342_v26, %v4340_v24 }
 0x1d7   :  { %v5460_v32 = vmax.bf16 %v6530_v31, %v1876_v27  ;;  %v5463_v33 = vmax.bf16 %v6530_v31, %v1878_v28 }
 0x1d8   :  { %v5466_v34 = vmax.bf16 %v6530_v31, %v1877_v29  ;;  %v5469_v35 = vmax.bf16 %v6530_v31, %v1879_v30  ;;  %v1341_v36 = vpop.f32.mrb[4].mxu0  ;;  %v1727_v37 = vpop.f32.mrb[4].mxu1 }
 0x1d9   :  { %v1343_v38 = vpop.f32.mrb[5].mxu0  ;;  %v1729_v39 = vpop.f32.mrb[5].mxu1  ;;  %v4279_v42 = vadd.f32 %v1341_v36, %v5440_v7  ;;  %v4343_v43 = vadd.f32 %v1727_v37, %v5443_v8 }
 0x1da   :  { %v1345_v40 = vpop.f32.mrb[6].mxu0  ;;  %v1731_v41 = vpop.f32.mrb[6].mxu1  ;;  %v4280_v48 = vadd.f32 %v1343_v38, %v5446_v11  ;;  %v4344_v49 = vadd.f32 %v1729_v39, %v5449_v12 }
 0x1db   :  { %v4281_v44 = vadd.f32 %v1345_v40, %v5440_v7  ;;  %v4345_v45 = vadd.f32 %v1731_v41, %v5443_v8  ;;  %v1347_v46 = vpop.f32.mrb[7].mxu0  ;;  %v1733_v47 = vpop.f32.mrb[7].mxu1 }
 0x1dc   :  { %v4282_v50 = vadd.f32 %v1347_v46, %v5446_v11  ;;  %v4346_v51 = vadd.f32 %v1733_v47, %v5449_v12 }
 0x1dd   :  { %v1880_v52 = vpack.c.bf16 %v4281_v44, %v4279_v42  ;;  %v1882_v53 = vpack.c.bf16 %v4345_v45, %v4343_v43 }
 0x1de   :  { %v1881_v54 = vpack.c.bf16 %v4282_v50, %v4280_v48  ;;  %v1883_v55 = vpack.c.bf16 %v4346_v51, %v4344_v49 }
 0x1df   :  { %v5480_v56 = vmax.bf16 %v6530_v31, %v1880_v52  ;;  %v5483_v57 = vmax.bf16 %v6530_v31, %v1882_v53 }
 0x1e0   :  { %v5486_v58 = vmax.bf16 %v6530_v31, %v1881_v54  ;;  %v5489_v59 = vmax.bf16 %v6530_v31, %v1883_v55  ;;  %v1351_v60 = vpop.f32.mrb[8].mxu0  ;;  %v1737_v61 = vpop.f32.mrb[8].mxu1 }
 0x1e1   :  { %v1353_v62 = vpop.f32.mrb[9].mxu0  ;;  %v1739_v63 = vpop.f32.mrb[9].mxu1  ;;  %v4283_v4 = vadd.f32 %v1351_v60, %v5440_v7  ;;  %v4347_v9 = vadd.f32 %v1737_v61, %v5443_v8 }
 0x1e2   :  { %v1355_v0 = vpop.f32.mrb[10].mxu0  ;;  %v1741_v1 = vpop.f32.mrb[10].mxu1  ;;  %v4284_v16 = vadd.f32 %v1353_v62, %v5446_v11  ;;  %v4348_v17 = vadd.f32 %v1739_v63, %v5449_v12 }
 0x1e3   :  { %v4285_v10 = vadd.f32 %v1355_v0, %v5440_v7  ;;  %v4349_v13 = vadd.f32 %v1741_v1, %v5443_v8  ;;  %v1357_v14 = vpop.f32.mrb[11].mxu0  ;;  %v1743_v15 = vpop.f32.mrb[11].mxu1 }
 0x1e4   :  { %v4286_v18 = vadd.f32 %v1357_v14, %v5446_v11  ;;  %v4350_v19 = vadd.f32 %v1743_v15, %v5449_v12 }
 0x1e5   :  { %v1884_v20 = vpack.c.bf16 %v4285_v10, %v4283_v4  ;;  %v1886_v21 = vpack.c.bf16 %v4349_v13, %v4347_v9 }
 0x1e6   :  { %v1885_v22 = vpack.c.bf16 %v4286_v18, %v4284_v16  ;;  %v1887_v23 = vpack.c.bf16 %v4350_v19, %v4348_v17 }
 0x1e7   :  { %v5500_v24 = vmax.bf16 %v6530_v31, %v1884_v20  ;;  %v5503_v25 = vmax.bf16 %v6530_v31, %v1886_v21 }
 0x1e8   :  { %v5506_v26 = vmax.bf16 %v6530_v31, %v1885_v22  ;;  %v5509_v27 = vmax.bf16 %v6530_v31, %v1887_v23  ;;  %v1361_v28 = vpop.f32.mrb[12].mxu0  ;;  %v1747_v29 = vpop.f32.mrb[12].mxu1 }
 0x1e9   :  { %v1363_v30 = vpop.f32.mrb[13].mxu0  ;;  %v1749_v36 = vpop.f32.mrb[13].mxu1  ;;  %v4287_v39 = vadd.f32 %v1361_v28, %v5440_v7  ;;  %v4351_v40 = vadd.f32 %v1747_v29, %v5443_v8 }
 0x1ea   :  { %v1365_v37 = vpop.f32.mrb[14].mxu0  ;;  %v1751_v38 = vpop.f32.mrb[14].mxu1  ;;  %v4288_v45 = vadd.f32 %v1363_v30, %v5446_v11  ;;  %v4352_v46 = vadd.f32 %v1749_v36, %v5449_v12 }
 0x1eb   :  { %v4289_v41 = vadd.f32 %v1365_v37, %v5440_v7  ;;  %v4353_v42 = vadd.f32 %v1751_v38, %v5443_v8  ;;  %v1367_v43 = vpop.f32.mrb[15].mxu0  ;;  %v1753_v44 = vpop.f32.mrb[15].mxu1 }
 0x1ec   :  { %v4290_v47 = vadd.f32 %v1367_v43, %v5446_v11  ;;  %v4354_v48 = vadd.f32 %v1753_v44, %v5449_v12 }
 0x1ed   :  { %v1888_v49 = vpack.c.bf16 %v4289_v41, %v4287_v39  ;;  %v1890_v50 = vpack.c.bf16 %v4353_v42, %v4351_v40 }
 0x1ee   :  { %v1889_v51 = vpack.c.bf16 %v4290_v47, %v4288_v45  ;;  %v1891_v52 = vpack.c.bf16 %v4354_v48, %v4352_v46 }
 0x1ef   :  { %v5520_v53 = vmax.bf16 %v6530_v31, %v1888_v49  ;;  %v5523_v54 = vmax.bf16 %v6530_v31, %v1890_v50 }
 0x1f0   :  { %v5526_v55 = vmax.bf16 %v6530_v31, %v1889_v51  ;;  %v5529_v60 = vmax.bf16 %v6530_v31, %v1891_v52  ;;  %v1371_v61 = vpop.f32.mrb[16].mxu0  ;;  %v1757_v62 = vpop.f32.mrb[16].mxu1 }
 0x1f1   :  { %v1373_v63 = vpop.f32.mrb[17].mxu0  ;;  %v1759_v0 = vpop.f32.mrb[17].mxu1  ;;  %v4291_v9 = vadd.f32 %v1371_v61, %v5440_v7  ;;  %v4355_v10 = vadd.f32 %v1757_v62, %v5443_v8 }
 0x1f2   :  { %v1375_v1 = vpop.f32.mrb[18].mxu0  ;;  %v1761_v4 = vpop.f32.mrb[18].mxu1  ;;  %v4292_v17 = vadd.f32 %v1373_v63, %v5446_v11  ;;  %v4356_v18 = vadd.f32 %v1759_v0, %v5449_v12 }
 0x1f3   :  { %v4293_v13 = vadd.f32 %v1375_v1, %v5440_v7  ;;  %v4357_v14 = vadd.f32 %v1761_v4, %v5443_v8  ;;  %v1377_v15 = vpop.f32.mrb[19].mxu0  ;;  %v1763_v16 = vpop.f32.mrb[19].mxu1 }
 0x1f4   :  { %v4294_v19 = vadd.f32 %v1377_v15, %v5446_v11  ;;  %v4358_v20 = vadd.f32 %v1763_v16, %v5449_v12 }
 0x1f5   :  { %v1892_v21 = vpack.c.bf16 %v4293_v13, %v4291_v9  ;;  %v1894_v22 = vpack.c.bf16 %v4357_v14, %v4355_v10 }
 0x1f6   :  { %v1893_v23 = vpack.c.bf16 %v4294_v19, %v4292_v17  ;;  %v1895_v28 = vpack.c.bf16 %v4358_v20, %v4356_v18 }
 0x1f7   :  { %v5540_v29 = vmax.bf16 %v6530_v31, %v1892_v21  ;;  %v5543_v30 = vmax.bf16 %v6530_v31, %v1894_v22 }
 0x1f8   :  { %v5546_v36 = vmax.bf16 %v6530_v31, %v1893_v23  ;;  %v5549_v37 = vmax.bf16 %v6530_v31, %v1895_v28  ;;  %v1381_v38 = vpop.f32.mrb[20].mxu0  ;;  %v1767_v39 = vpop.f32.mrb[20].mxu1 }
 0x1f9   :  { %v1383_v40 = vpop.f32.mrb[21].mxu0  ;;  %v1769_v41 = vpop.f32.mrb[21].mxu1  ;;  %v4295_v44 = vadd.f32 %v1381_v38, %v5440_v7  ;;  %v4359_v45 = vadd.f32 %v1767_v39, %v5443_v8 }
 0x1fa   :  { %v1385_v42 = vpop.f32.mrb[22].mxu0  ;;  %v1771_v43 = vpop.f32.mrb[22].mxu1  ;;  %v4296_v50 = vadd.f32 %v1383_v40, %v5446_v11  ;;  %v4360_v51 = vadd.f32 %v1769_v41, %v5449_v12 }
 0x1fb   :  { %v4297_v46 = vadd.f32 %v1385_v42, %v5440_v7  ;;  %v4361_v47 = vadd.f32 %v1771_v43, %v5443_v8  ;;  %v1387_v48 = vpop.f32.mrb[23].mxu0  ;;  %v1773_v49 = vpop.f32.mrb[23].mxu1 }
 0x1fc   :  { %v4298_v52 = vadd.f32 %v1387_v48, %v5446_v11  ;;  %v4362_v61 = vadd.f32 %v1773_v49, %v5449_v12 }
 0x1fd   :  { %v1896_v62 = vpack.c.bf16 %v4297_v46, %v4295_v44  ;;  %v1898_v63 = vpack.c.bf16 %v4361_v47, %v4359_v45 }
 0x1fe   :  { %v1897_v0 = vpack.c.bf16 %v4298_v52, %v4296_v50  ;;  %v1899_v1 = vpack.c.bf16 %v4362_v61, %v4360_v51 }
 0x1ff   :  { %v5560_v4 = vmax.bf16 %v6530_v31, %v1896_v62  ;;  %v5563_v9 = vmax.bf16 %v6530_v31, %v1898_v63 }
 0x200   :  { %v5566_v10 = vmax.bf16 %v6530_v31, %v1897_v0  ;;  %v5569_v13 = vmax.bf16 %v6530_v31, %v1899_v1  ;;  %v1391_v14 = vpop.f32.mrb[24].mxu0  ;;  %v1777_v15 = vpop.f32.mrb[24].mxu1 }
 0x201   :  { %6582 = vst [vmem:[#allocation24_spill] sm:$0xff] %v5563_v9  ;;  %v1393_v16 = vpop.f32.mrb[25].mxu0  ;;  %v1779_v17 = vpop.f32.mrb[25].mxu1  ;;  %v4299_v20 = vadd.f32 %v1391_v14, %v5440_v7  ;;  %v4363_v21 = vadd.f32 %v1777_v15, %v5443_v8 }
 0x202   :  { %6583 = vst [vmem:[#allocation25_spill] sm:$0xff] %v5569_v13  ;;  %v1395_v18 = vpop.f32.mrb[26].mxu0  ;;  %v1781_v19 = vpop.f32.mrb[26].mxu1  ;;  %v4300_v39 = vadd.f32 %v1393_v16, %v5446_v11  ;;  %v4364_v40 = vadd.f32 %v1779_v17, %v5449_v12 }
 0x203   :  { %v4301_v22 = vadd.f32 %v1395_v18, %v5440_v7  ;;  %v4365_v23 = vadd.f32 %v1781_v19, %v5443_v8  ;;  %v1397_v28 = vpop.f32.mrb[27].mxu0  ;;  %v1783_v38 = vpop.f32.mrb[27].mxu1 }
 0x204   :  { %v4302_v41 = vadd.f32 %v1397_v28, %v5446_v11  ;;  %v4366_v42 = vadd.f32 %v1783_v38, %v5449_v12 }
 0x205   :  { %v1900_v43 = vpack.c.bf16 %v4301_v22, %v4299_v20  ;;  %v1902_v44 = vpack.c.bf16 %v4365_v23, %v4363_v21 }
 0x206   :  { %v1901_v45 = vpack.c.bf16 %v4302_v41, %v4300_v39  ;;  %v1903_v46 = vpack.c.bf16 %v4366_v42, %v4364_v40 }
 0x207   :  { %v5580_v47 = vmax.bf16 %v6530_v31, %v1900_v43  ;;  %v5583_v48 = vmax.bf16 %v6530_v31, %v1902_v44 }
 0x208   :  { %v5586_v49 = vmax.bf16 %v6530_v31, %v1901_v45  ;;  %v5589_v50 = vmax.bf16 %v6530_v31, %v1903_v46  ;;  %v1401_v51 = vpop.f32.mrb[28].mxu0  ;;  %v1787_v52 = vpop.f32.mrb[28].mxu1 }
 0x209   :  { %6584 = vst [vmem:[#allocation26_spill] sm:$0xff] %v5583_v48  ;;  %v1403_v61 = vpop.f32.mrb[29].mxu0  ;;  %v1789_v62 = vpop.f32.mrb[29].mxu1  ;;  %v4303_v1 = vadd.f32 %v1401_v51, %v5440_v7  ;;  %v4367_v14 = vadd.f32 %v1787_v52, %v5443_v8 }
 0x20a   :  { %6585 = vst [vmem:[#allocation27_spill] sm:$0xff] %v5589_v50  ;;  %v1405_v63 = vpop.f32.mrb[30].mxu0  ;;  %v1791_v0 = vpop.f32.mrb[30].mxu1  ;;  %v4304_v19 = vadd.f32 %v1403_v61, %v5446_v11  ;;  %v4368_v20 = vadd.f32 %v1789_v62, %v5449_v12 }
 0x20b   :  { %v4305_v15 = vadd.f32 %v1405_v63, %v5440_v7  ;;  %v4369_v16 = vadd.f32 %v1791_v0, %v5443_v8  ;;  %v1407_v17 = vpop.f32.mrb[31].mxu0  ;;  %v1793_v18 = vpop.f32.mrb[31].mxu1 }
 0x20c   :  { %v4306_v21 = vadd.f32 %v1407_v17, %v5446_v11  ;;  %v4370_v22 = vadd.f32 %v1793_v18, %v5449_v12 }
 0x20d   :  { %v1904_v23 = vpack.c.bf16 %v4305_v15, %v4303_v1  ;;  %v1906_v28 = vpack.c.bf16 %v4369_v16, %v4367_v14 }
 0x20e   :  { %v1905_v38 = vpack.c.bf16 %v4306_v21, %v4304_v19  ;;  %v1907_v39 = vpack.c.bf16 %v4370_v22, %v4368_v20 }
 0x20f   :  { %v5600_v40 = vmax.bf16 %v6530_v31, %v1904_v23  ;;  %v5603_v41 = vmax.bf16 %v6530_v31, %v1906_v28 }
 0x210   :  { %v5606_v42 = vmax.bf16 %v6530_v31, %v1905_v38  ;;  %v5609_v43 = vmax.bf16 %v6530_v31, %v1907_v39  ;;  %v1411_v44 = vpop.f32.mrb[32].mxu0  ;;  %v1797_v45 = vpop.f32.mrb[32].mxu1 }
 0x211   :  { %6586 = vst [vmem:[#allocation28_spill] sm:$0xff] %v5603_v41  ;;  %v1413_v46 = vpop.f32.mrb[33].mxu0  ;;  %v1799_v51 = vpop.f32.mrb[33].mxu1  ;;  %v4307_v62 = vadd.f32 %v1411_v44, %v5440_v7  ;;  %v4371_v63 = vadd.f32 %v1797_v45, %v5443_v8 }
 0x212   :  { %6587 = vst [vmem:[#allocation29_spill] sm:$0xff] %v5609_v43  ;;  %v1415_v52 = vpop.f32.mrb[34].mxu0  ;;  %v1801_v61 = vpop.f32.mrb[34].mxu1  ;;  %v4308_v16 = vadd.f32 %v1413_v46, %v5446_v11  ;;  %v4372_v17 = vadd.f32 %v1799_v51, %v5449_v12 }
 0x213   :  { %v4309_v0 = vadd.f32 %v1415_v52, %v5440_v7  ;;  %v4373_v1 = vadd.f32 %v1801_v61, %v5443_v8  ;;  %v1417_v14 = vpop.f32.mrb[35].mxu0  ;;  %v1803_v15 = vpop.f32.mrb[35].mxu1 }
 0x214   :  { %v4310_v18 = vadd.f32 %v1417_v14, %v5446_v11  ;;  %v4374_v19 = vadd.f32 %v1803_v15, %v5449_v12 }
 0x215   :  { %v1908_v20 = vpack.c.bf16 %v4309_v0, %v4307_v62  ;;  %v1910_v21 = vpack.c.bf16 %v4373_v1, %v4371_v63 }
 0x216   :  { %v1909_v22 = vpack.c.bf16 %v4310_v18, %v4308_v16  ;;  %v1911_v23 = vpack.c.bf16 %v4374_v19, %v4372_v17 }
 0x217   :  { %v5620_v28 = vmax.bf16 %v6530_v31, %v1908_v20  ;;  %v5623_v38 = vmax.bf16 %v6530_v31, %v1910_v21 }
 0x218   :  { %v5626_v39 = vmax.bf16 %v6530_v31, %v1909_v22  ;;  %v5629_v44 = vmax.bf16 %v6530_v31, %v1911_v23  ;;  %v1421_v45 = vpop.f32.mrb[36].mxu0  ;;  %v1807_v46 = vpop.f32.mrb[36].mxu1 }
 0x219   :  { %6588 = vst [vmem:[#allocation30_spill] sm:$0xff] %v5623_v38  ;;  %v1423_v51 = vpop.f32.mrb[37].mxu0  ;;  %v1809_v52 = vpop.f32.mrb[37].mxu1  ;;  %v4311_v63 = vadd.f32 %v1421_v45, %v5440_v7  ;;  %v4375_v0 = vadd.f32 %v1807_v46, %v5443_v8 }
 0x21a   :  { %6589 = vst [vmem:[#allocation31_spill] sm:$0xff] %v5629_v44  ;;  %v1425_v61 = vpop.f32.mrb[38].mxu0  ;;  %v1811_v62 = vpop.f32.mrb[38].mxu1  ;;  %v4312_v17 = vadd.f32 %v1423_v51, %v5446_v11  ;;  %v4376_v18 = vadd.f32 %v1809_v52, %v5449_v12 }
 0x21b   :  { %v4313_v1 = vadd.f32 %v1425_v61, %v5440_v7  ;;  %v4377_v14 = vadd.f32 %v1811_v62, %v5443_v8  ;;  %v1427_v15 = vpop.f32.mrb[39].mxu0  ;;  %v1813_v16 = vpop.f32.mrb[39].mxu1 }
 0x21c   :  { %v4314_v19 = vadd.f32 %v1427_v15, %v5446_v11  ;;  %v4378_v20 = vadd.f32 %v1813_v16, %v5449_v12 }
 0x21d   :  { %v1912_v21 = vpack.c.bf16 %v4313_v1, %v4311_v63  ;;  %v1914_v22 = vpack.c.bf16 %v4377_v14, %v4375_v0 }
 0x21e   :  { %v1913_v23 = vpack.c.bf16 %v4314_v19, %v4312_v17  ;;  %v1915_v45 = vpack.c.bf16 %v4378_v20, %v4376_v18 }
 0x21f   :  { %v5640_v46 = vmax.bf16 %v6530_v31, %v1912_v21  ;;  %v5643_v61 = vmax.bf16 %v6530_v31, %v1914_v22 }
 0x220   :  { %v5646_v62 = vmax.bf16 %v6530_v31, %v1913_v23  ;;  %v5649_v51 = vmax.bf16 %v6530_v31, %v1915_v45  ;;  %v1431_v52 = vpop.f32.mrb[40].mxu0  ;;  %v1817_v15 = vpop.f32.mrb[40].mxu1 }
 0x221   :  { %6590 = vst [vmem:[#allocation32_spill] sm:$0xff] %v5643_v61  ;;  %v1433_v6 = vpop.f32.mrb[41].mxu0  ;;  %v1819_v16 = vpop.f32.mrb[41].mxu1  ;;  %v4315_v1 = vadd.f32 %v1431_v52, %v5440_v7  ;;  %v4379_v14 = vadd.f32 %v1817_v15, %v5443_v8 }
 0x222   :  { %6591 = vst [vmem:[#allocation33_spill] sm:$0xff] %v5649_v51  ;;  %v1435_v63 = vpop.f32.mrb[42].mxu0  ;;  %v1821_v0 = vpop.f32.mrb[42].mxu1  ;;  %v4316_v21 = vadd.f32 %v1433_v6, %v5446_v11  ;;  %v4380_v22 = vadd.f32 %v1819_v16, %v5449_v12 }
 0x223   :  { %v4317_v17 = vadd.f32 %v1435_v63, %v5440_v7  ;;  %v4381_v18 = vadd.f32 %v1821_v0, %v5443_v8  ;;  %v1437_v19 = vpop.f32.mrb[43].mxu0  ;;  %v1823_v20 = vpop.f32.mrb[43].mxu1 }
 0x224   :  { %v4318_v23 = vadd.f32 %v1437_v19, %v5446_v11  ;;  %v4382_v45 = vadd.f32 %v1823_v20, %v5449_v12 }
 0x225   :  { %v1916_v31 = vpack.c.bf16 %v4317_v17, %v4315_v1  ;;  %v1918_v5 = vpack.c.bf16 %v4381_v18, %v4379_v14 }
 0x226   :  { %v1917_v3 = vpack.c.bf16 %v4318_v23, %v4316_v21  ;;  %v1919_v52 = vpack.c.bf16 %v4382_v45, %v4380_v22 }
 0x227   :  { %v5660_v15 = vmax.bf16 %v6592_v2, %v1916_v31  ;;  %v5663_v63 = vmax.bf16 %v6592_v2, %v1918_v5 }
 0x228   :  { %v5666_v0 = vmax.bf16 %v6592_v2, %v1917_v3  ;;  %v5669_v6 = vmax.bf16 %v6592_v2, %v1919_v52  ;;  %v1441_v16 = vpop.f32.mrb[44].mxu0  ;;  %v1827_v19 = vpop.f32.mrb[44].mxu1 }
 0x229   :  { %6593 = vst [vmem:[#allocation34_spill] sm:$0xff] %v5663_v63  ;;  %v1443_v61 = vpop.f32.mrb[45].mxu0  ;;  %v1829_v20 = vpop.f32.mrb[45].mxu1  ;;  %v4319_v17 = vadd.f32 %v1441_v16, %v5440_v7  ;;  %v4383_v31 = vadd.f32 %v1827_v19, %v5443_v8 }
 0x22a   :  { %6594 = vst [vmem:[#allocation35_spill] sm:$0xff] %v5669_v6  ;;  %v1445_v1 = vpop.f32.mrb[46].mxu0  ;;  %v1831_v14 = vpop.f32.mrb[46].mxu1  ;;  %v4320_v22 = vadd.f32 %v1443_v61, %v5446_v11  ;;  %v4384_v23 = vadd.f32 %v1829_v20, %v5449_v12 }
 0x22b   :  { %v4321_v18 = vadd.f32 %v1445_v1, %v5440_v7  ;;  %v4385_v5 = vadd.f32 %v1831_v14, %v5443_v8  ;;  %v1447_v21 = vpop.f32.mrb[47].mxu0  ;;  %v1833_v3 = vpop.f32.mrb[47].mxu1 }
 0x22c   :  { %v4322_v45 = vadd.f32 %v1447_v21, %v5446_v11  ;;  %v4386_v52 = vadd.f32 %v1833_v3, %v5449_v12 }
 0x22d   :  { %v1920_v63 = vpack.c.bf16 %v4321_v18, %v4319_v17  ;;  %v1922_v6 = vpack.c.bf16 %v4385_v5, %v4383_v31 }
 0x22e   :  { %v1921_v51 = vpack.c.bf16 %v4322_v45, %v4320_v22  ;;  %v1923_v16 = vpack.c.bf16 %v4386_v52, %v4384_v23 }
 0x22f   :  { %v5680_v19 = vmax.bf16 %v6592_v2, %v1920_v63  ;;  %v5683_v1 = vmax.bf16 %v6592_v2, %v1922_v6 }
 0x230   :  { %v5686_v14 = vmax.bf16 %v6592_v2, %v1921_v51  ;;  %v5689_v61 = vmax.bf16 %v6592_v2, %v1923_v16  ;;  %v1451_v20 = vpop.f32.mrb[48].mxu0  ;;  %v1837_v21 = vpop.f32.mrb[48].mxu1 }
 0x231   :  { %6595 = vst [vmem:[#allocation36_spill] sm:$0xff] %v5683_v1  ;;  %v1453_v38 = vpop.f32.mrb[49].mxu0  ;;  %v1839_v3 = vpop.f32.mrb[49].mxu1  ;;  %v4323_v18 = vadd.f32 %v1451_v20, %v5440_v7  ;;  %v4387_v63 = vadd.f32 %v1837_v21, %v5443_v8 }
 0x232   :  { %6596 = vst [vmem:[#allocation37_spill] sm:$0xff] %v5689_v61  ;;  %v1455_v17 = vpop.f32.mrb[50].mxu0  ;;  %v1841_v31 = vpop.f32.mrb[50].mxu1  ;;  %v4324_v23 = vadd.f32 %v1453_v38, %v5446_v11  ;;  %v4388_v45 = vadd.f32 %v1839_v3, %v5449_v12 }
 0x233   :  { %v4325_v5 = vadd.f32 %v1455_v17, %v5440_v7  ;;  %v4389_v6 = vadd.f32 %v1841_v31, %v5443_v8  ;;  %v1457_v22 = vpop.f32.mrb[51].mxu0  ;;  %v1843_v51 = vpop.f32.mrb[51].mxu1 }
 0x234   :  { %v4326_v52 = vadd.f32 %v1457_v22, %v5446_v11  ;;  %v4390_v16 = vadd.f32 %v1843_v51, %v5449_v12 }
 0x235   :  { %v1924_v1 = vpack.c.bf16 %v4325_v5, %v4323_v18  ;;  %v1926_v61 = vpack.c.bf16 %v4389_v6, %v4387_v63 }
 0x236   :  { %v1925_v44 = vpack.c.bf16 %v4326_v52, %v4324_v23  ;;  %v1927_v20 = vpack.c.bf16 %v4390_v16, %v4388_v45 }
 0x237   :  { %v5700_v21 = vmax.bf16 %v6592_v2, %v1924_v1  ;;  %v5703_v17 = vmax.bf16 %v6592_v2, %v1926_v61 }
 0x238   :  { %v5706_v31 = vmax.bf16 %v6592_v2, %v1925_v44  ;;  %v5709_v38 = vmax.bf16 %v6592_v2, %v1927_v20  ;;  %v1461_v3 = vpop.f32.mrb[52].mxu0  ;;  %v1847_v22 = vpop.f32.mrb[52].mxu1 }
 0x239   :  { %6597 = vst [vmem:[#allocation38_spill] sm:$0xff] %v5703_v17  ;;  %v1463_v41 = vpop.f32.mrb[53].mxu0  ;;  %v1849_v51 = vpop.f32.mrb[53].mxu1  ;;  %v4327_v5 = vadd.f32 %v1461_v3, %v5440_v7  ;;  %v4391_v1 = vadd.f32 %v1847_v22, %v5443_v8 }
 0x23a   :  { %6598 = vst [vmem:[#allocation39_spill] sm:$0xff] %v5709_v38  ;;  %v1465_v18 = vpop.f32.mrb[54].mxu0  ;;  %v1851_v63 = vpop.f32.mrb[54].mxu1  ;;  %v4328_v45 = vadd.f32 %v1463_v41, %v5446_v11  ;;  %v4392_v52 = vadd.f32 %v1849_v51, %v5449_v12 }
 0x23b   :  { %v4329_v6 = vadd.f32 %v1465_v18, %v5440_v7  ;;  %v4393_v61 = vadd.f32 %v1851_v63, %v5443_v8  ;;  %v1467_v23 = vpop.f32.mrb[55].mxu0  ;;  %v1853_v44 = vpop.f32.mrb[55].mxu1 }
 0x23c   :  { %v4330_v16 = vadd.f32 %v1467_v23, %v5446_v11  ;;  %v4394_v20 = vadd.f32 %v1853_v44, %v5449_v12 }
 0x23d   :  { %v1928_v17 = vpack.c.bf16 %v4329_v6, %v4327_v5  ;;  %v1930_v38 = vpack.c.bf16 %v4393_v61, %v4391_v1 }
 0x23e   :  { %v1929_v43 = vpack.c.bf16 %v4330_v16, %v4328_v45  ;;  %v1931_v3 = vpack.c.bf16 %v4394_v20, %v4392_v52 }
 0x23f   :  { %v5720_v22 = vmax.bf16 %v6592_v2, %v1928_v17  ;;  %v5723_v18 = vmax.bf16 %v6592_v2, %v1930_v38 }
 0x240   :  { %v5726_v63 = vmax.bf16 %v6592_v2, %v1929_v43  ;;  %v5729_v41 = vmax.bf16 %v6592_v2, %v1931_v3  ;;  %v1471_v51 = vpop.f32.mrb[56].mxu0  ;;  %v1857_v23 = vpop.f32.mrb[56].mxu1 }
 0x241   :  { %6599 = vst [vmem:[#allocation40_spill] sm:$0xff] %v5723_v18  ;;  %v1473_v48 = vpop.f32.mrb[57].mxu0  ;;  %v1859_v44 = vpop.f32.mrb[57].mxu1  ;;  %v4331_v6 = vadd.f32 %v1471_v51, %v5440_v7  ;;  %v4395_v17 = vadd.f32 %v1857_v23, %v5443_v8 }
 0x242   :  { %6600 = vst [vmem:[#allocation41_spill] sm:$0xff] %v5729_v41  ;;  %v1475_v5 = vpop.f32.mrb[58].mxu0  ;;  %v1861_v1 = vpop.f32.mrb[58].mxu1  ;;  %v4332_v52 = vadd.f32 %v1473_v48, %v5446_v11  ;;  %v4396_v16 = vadd.f32 %v1859_v44, %v5449_v12 }
 0x243   :  { %v4333_v61 = vadd.f32 %v1475_v5, %v5440_v7  ;;  %v4397_v38 = vadd.f32 %v1861_v1, %v5443_v8  ;;  %v1477_v45 = vpop.f32.mrb[59].mxu0  ;;  %v1863_v43 = vpop.f32.mrb[59].mxu1 }
 0x244   :  { %v4334_v20 = vadd.f32 %v1477_v45, %v5446_v11  ;;  %v4398_v3 = vadd.f32 %v1863_v43, %v5449_v12 }
 0x245   :  { %v1932_v18 = vpack.c.bf16 %v4333_v61, %v4331_v6  ;;  %v1934_v41 = vpack.c.bf16 %v4397_v38, %v4395_v17 }
 0x246   :  { %v1933_v50 = vpack.c.bf16 %v4334_v20, %v4332_v52  ;;  %v1935_v51 = vpack.c.bf16 %v4398_v3, %v4396_v16 }
 0x247   :  { %v5740_v23 = vmax.bf16 %v6592_v2, %v1932_v18  ;;  %v5743_v5 = vmax.bf16 %v6592_v2, %v1934_v41 }
 0x248   :  { %v5746_v1 = vmax.bf16 %v6592_v2, %v1933_v50  ;;  %v5749_v48 = vmax.bf16 %v6592_v2, %v1935_v51  ;;  %v1481_v44 = vpop.f32.mrb[60].mxu0  ;;  %v1867_v45 = vpop.f32.mrb[60].mxu1 }
 0x249   :  { %6601 = vst [vmem:[#allocation42_spill] sm:$0xff] %v5743_v5  ;;  %v1483_v9 = vpop.f32.mrb[61].mxu0  ;;  %v1869_v43 = vpop.f32.mrb[61].mxu1  ;;  %v4335_v61 = vadd.f32 %v1481_v44, %v5440_v7  ;;  %v4399_v18 = vadd.f32 %v1867_v45, %v5443_v8 }
 0x24a   :  { %6602 = vst [vmem:[#allocation43_spill] sm:$0xff] %v5749_v48  ;;  %v1485_v6 = vpop.f32.mrb[62].mxu0  ;;  %v1871_v17 = vpop.f32.mrb[62].mxu1  ;;  %v4336_v16 = vadd.f32 %v1483_v9, %v5446_v11  ;;  %v4400_v20 = vadd.f32 %v1869_v43, %v5449_v12 }
 0x24b   :  { %v4337_v38 = vadd.f32 %v1485_v6, %v5440_v7  ;;  %v4401_v41 = vadd.f32 %v1871_v17, %v5443_v8  ;;  %v1487_v52 = vpop.f32.mrb[63].mxu0  ;;  %v1873_v50 = vpop.f32.mrb[63].mxu1 }
 0x24c   :  { %v4338_v3 = vadd.f32 %v1487_v52, %v5446_v11  ;;  %v4402_v51 = vadd.f32 %v1873_v50, %v5449_v12 }
 0x24d   :  { %v1936_v5 = vpack.c.bf16 %v4337_v38, %v4335_v61  ;;  %v1938_v48 = vpack.c.bf16 %v4401_v41, %v4399_v18 }
 0x24e   :  { %v1937_v13 = vpack.c.bf16 %v4338_v3, %v4336_v16  ;;  %v1939_v44 = vpack.c.bf16 %v4402_v51, %v4400_v20 }
 0x24f   :  { %v5760_v45 = vmax.bf16 %v6592_v2, %v1936_v5  ;;  %v5763_v7 = vmax.bf16 %v6592_v2, %v1938_v48 }
 0x250   :  { %v5766_v8 = vmax.bf16 %v6592_v2, %v1937_v13  ;;  %v5769_v9 = vmax.bf16 %v6592_v2, %v1939_v44 }
 0x251   :  { %5323 = dma.done.wait [#allocation4], 16384 }
 0x252   :  { %5324 = vsyncadd [#allocation4], 4294950912  ;;  %2190 = vmatprep.mubr.bf16.mxu0 %v5466_v34  ;;  %2576 = vmatprep.mubr.bf16.mxu1 %v5466_v34  ;;  %v2009_v11 = vld [vmem:[#allocation2 + $0x8] sm:$0xff]  ;;  %v2011_v12 = vld [vmem:[#allocation2 + $0x18] sm:$0xff] }
 0x253   :  { %v2008_v43 = vld [vmem:[#allocation2] sm:$0xff]  ;;  %2158 = vmatprep.subr.bf16.mxu0 %v2009_v11  ;;  %2544 = vmatprep.subr.bf16.mxu1 %v2011_v12  ;;  %v2010_v5 = vld [vmem:[#allocation2 + $0x10] sm:$0xff]  ;;  %v2013_v48 = vld [vmem:[#allocation2 + $0x28] sm:$0xff] }
 0x254   :  { %v2015_v6 = vld [vmem:[#allocation2 + $0x38] sm:$0xff]  ;;  %2159 = vmatpush1.bf16.msra.mxu0 %v2008_v43  ;;  %2545 = vmatpush1.bf16.msra.mxu1 %v2010_v5  ;;  %v2012_v13 = vld [vmem:[#allocation2 + $0x20] sm:$0xff]  ;;  %v2014_v17 = vld [vmem:[#allocation2 + $0x30] sm:$0xff] }
 0x255   :  { %2160 = vmatprep.subr.bf16.mxu0 %v2013_v48  ;;  %2546 = vmatprep.subr.bf16.mxu1 %v2015_v6  ;;  %v2017_v61 = vld [vmem:[#allocation2 + $0x48] sm:$0xff]  ;;  %v2019_v18 = vld [vmem:[#allocation2 + $0x58] sm:$0xff]  ;;  %v2016_v34 = vld [vmem:[#allocation2 + $0x40] sm:$0xff] }
 0x256   :  { %v2018_v38 = vld [vmem:[#allocation2 + $0x50] sm:$0xff]  ;;  %v2021_v41 = vld [vmem:[#allocation2 + $0x68] sm:$0xff]  ;;  %v2023_v52 = vld [vmem:[#allocation2 + $0x78] sm:$0xff] }
 0x257   :  { %v2020_v50 = vld [vmem:[#allocation2 + $0x60] sm:$0xff]  ;;  %v2022_v16 = vld [vmem:[#allocation2 + $0x70] sm:$0xff]  ;;  %v2025_v20 = vld [vmem:[#allocation2 + $0x88] sm:$0xff] }
 0x258   :  { %2161 = vmatpush1.bf16.msra.mxu0 %v2012_v13  ;;  %2547 = vmatpush1.bf16.msra.mxu1 %v2014_v17  ;;  %v2027_v3 = vld [vmem:[#allocation2 + $0x98] sm:$0xff]  ;;  %v2024_v51 = vld [vmem:[#allocation2 + $0x80] sm:$0xff]  ;;  %v2026_v44 = vld [vmem:[#allocation2 + $0x90] sm:$0xff] }
 0x259   :  { %2162 = vmatprep.subr.bf16.mxu0 %v2017_v61  ;;  %2548 = vmatprep.subr.bf16.mxu1 %v2019_v18  ;;  %v2029_v11 = vld [vmem:[#allocation2 + $0xa8] sm:$0xff]  ;;  %v2031_v12 = vld [vmem:[#allocation2 + $0xb8] sm:$0xff]  ;;  %v2028_v43 = vld [vmem:[#allocation2 + $0xa0] sm:$0xff] }
 0x25a   :  { %v2030_v5 = vld [vmem:[#allocation2 + $0xb0] sm:$0xff]  ;;  %v2033_v48 = vld [vmem:[#allocation2 + $0xc8] sm:$0xff]  ;;  %v2035_v6 = vld [vmem:[#allocation2 + $0xd8] sm:$0xff] }
 0x25b   :  { %v2032_v13 = vld [vmem:[#allocation2 + $0xc0] sm:$0xff]  ;;  %v2034_v17 = vld [vmem:[#allocation2 + $0xd0] sm:$0xff]  ;;  %v2037_v61 = vld [vmem:[#allocation2 + $0xe8] sm:$0xff] }
 0x25c   :  { %2163 = vmatpush1.bf16.msra.mxu0 %v2016_v34  ;;  %2549 = vmatpush1.bf16.msra.mxu1 %v2018_v38  ;;  %v2039_v18 = vld [vmem:[#allocation2 + $0xf8] sm:$0xff]  ;;  %v2036_v34 = vld [vmem:[#allocation2 + $0xe0] sm:$0xff]  ;;  %v2038_v38 = vld [vmem:[#allocation2 + $0xf0] sm:$0xff] }
 0x25d   :  { %2164 = vmatprep.subr.bf16.mxu0 %v2021_v41  ;;  %2550 = vmatprep.subr.bf16.mxu1 %v2023_v52  ;;  %v2041_v41 = vld [vmem:[#allocation2 + $0x108] sm:$0xff]  ;;  %v2043_v52 = vld [vmem:[#allocation2 + $0x118] sm:$0xff] }
 0x260   :  { %2165 = vmatpush1.bf16.msra.mxu0 %v2020_v50  ;;  %2551 = vmatpush1.bf16.msra.mxu1 %v2022_v16  ;;  %v2040_v50 = vld [vmem:[#allocation2 + $0x100] sm:$0xff]  ;;  %v2042_v16 = vld [vmem:[#allocation2 + $0x110] sm:$0xff] }
 0x261   :  { %2166 = vmatprep.subr.bf16.mxu0 %v2025_v20  ;;  %2552 = vmatprep.subr.bf16.mxu1 %v2027_v3  ;;  %v2045_v20 = vld [vmem:[#allocation2 + $0x128] sm:$0xff]  ;;  %v2047_v3 = vld [vmem:[#allocation2 + $0x138] sm:$0xff] }
 0x264   :  { %2167 = vmatpush1.bf16.msra.mxu0 %v2024_v51  ;;  %2553 = vmatpush1.bf16.msra.mxu1 %v2026_v44  ;;  %v2044_v51 = vld [vmem:[#allocation2 + $0x120] sm:$0xff]  ;;  %v2046_v44 = vld [vmem:[#allocation2 + $0x130] sm:$0xff] }
 0x265   :  { %2168 = vmatprep.subr.bf16.mxu0 %v2029_v11  ;;  %2554 = vmatprep.subr.bf16.mxu1 %v2031_v12  ;;  %v2049_v11 = vld [vmem:[#allocation2 + $0x148] sm:$0xff]  ;;  %v2051_v12 = vld [vmem:[#allocation2 + $0x158] sm:$0xff] }
 0x268   :  { %2169 = vmatpush1.bf16.msra.mxu0 %v2028_v43  ;;  %2555 = vmatpush1.bf16.msra.mxu1 %v2030_v5  ;;  %v2048_v43 = vld [vmem:[#allocation2 + $0x140] sm:$0xff]  ;;  %v2050_v5 = vld [vmem:[#allocation2 + $0x150] sm:$0xff] }
 0x269   :  { %2170 = vmatprep.subr.bf16.mxu0 %v2033_v48  ;;  %2556 = vmatprep.subr.bf16.mxu1 %v2035_v6  ;;  %v2053_v48 = vld [vmem:[#allocation2 + $0x168] sm:$0xff]  ;;  %v2055_v6 = vld [vmem:[#allocation2 + $0x178] sm:$0xff] }
 0x26c   :  { %2171 = vmatpush1.bf16.msra.mxu0 %v2032_v13  ;;  %2557 = vmatpush1.bf16.msra.mxu1 %v2034_v17  ;;  %v2052_v13 = vld [vmem:[#allocation2 + $0x160] sm:$0xff]  ;;  %v2054_v17 = vld [vmem:[#allocation2 + $0x170] sm:$0xff] }
 0x26d   :  { %2172 = vmatprep.subr.bf16.mxu0 %v2037_v61  ;;  %2558 = vmatprep.subr.bf16.mxu1 %v2039_v18  ;;  %v2057_v61 = vld [vmem:[#allocation2 + $0x188] sm:$0xff]  ;;  %v2059_v18 = vld [vmem:[#allocation2 + $0x198] sm:$0xff] }
 0x270   :  { %2173 = vmatpush1.bf16.msra.mxu0 %v2036_v34  ;;  %2559 = vmatpush1.bf16.msra.mxu1 %v2038_v38  ;;  %v2056_v34 = vld [vmem:[#allocation2 + $0x180] sm:$0xff]  ;;  %v2058_v38 = vld [vmem:[#allocation2 + $0x190] sm:$0xff] }
 0x271   :  { %2174 = vmatprep.subr.bf16.mxu0 %v2041_v41  ;;  %2560 = vmatprep.subr.bf16.mxu1 %v2043_v52  ;;  %v2061_v41 = vld [vmem:[#allocation2 + $0x1a8] sm:$0xff]  ;;  %v2063_v52 = vld [vmem:[#allocation2 + $0x1b8] sm:$0xff] }
 0x274   :  { %2175 = vmatpush1.bf16.msra.mxu0 %v2040_v50  ;;  %2561 = vmatpush1.bf16.msra.mxu1 %v2042_v16  ;;  %v2060_v50 = vld [vmem:[#allocation2 + $0x1a0] sm:$0xff]  ;;  %v2062_v16 = vld [vmem:[#allocation2 + $0x1b0] sm:$0xff] }
 0x275   :  { %2176 = vmatprep.subr.bf16.mxu0 %v2045_v20  ;;  %2562 = vmatprep.subr.bf16.mxu1 %v2047_v3  ;;  %v2065_v20 = vld [vmem:[#allocation2 + $0x1c8] sm:$0xff]  ;;  %v2067_v3 = vld [vmem:[#allocation2 + $0x1d8] sm:$0xff] }
 0x278   :  { %2177 = vmatpush1.bf16.msra.mxu0 %v2044_v51  ;;  %2563 = vmatpush1.bf16.msra.mxu1 %v2046_v44  ;;  %v2064_v51 = vld [vmem:[#allocation2 + $0x1c0] sm:$0xff]  ;;  %v2066_v44 = vld [vmem:[#allocation2 + $0x1d0] sm:$0xff] }
 0x279   :  { %2178 = vmatprep.subr.bf16.mxu0 %v2049_v11  ;;  %2564 = vmatprep.subr.bf16.mxu1 %v2051_v12  ;;  %v2069_v11 = vld [vmem:[#allocation2 + $0x1e8] sm:$0xff]  ;;  %v2071_v12 = vld [vmem:[#allocation2 + $0x1f8] sm:$0xff] }
 0x27c   :  { %2179 = vmatpush1.bf16.msra.mxu0 %v2048_v43  ;;  %2565 = vmatpush1.bf16.msra.mxu1 %v2050_v5  ;;  %v2068_v43 = vld [vmem:[#allocation2 + $0x1e0] sm:$0xff]  ;;  %v2070_v5 = vld [vmem:[#allocation2 + $0x1f0] sm:$0xff] }
 0x27d   :  { %2180 = vmatprep.subr.bf16.mxu0 %v2053_v48  ;;  %2566 = vmatprep.subr.bf16.mxu1 %v2055_v6  ;;  %v2073_v48 = vld [vmem:[#allocation2 + $0x208] sm:$0xff]  ;;  %v2075_v6 = vld [vmem:[#allocation2 + $0x218] sm:$0xff] }
 0x280   :  { %2181 = vmatpush1.bf16.msra.mxu0 %v2052_v13  ;;  %2567 = vmatpush1.bf16.msra.mxu1 %v2054_v17  ;;  %v2072_v13 = vld [vmem:[#allocation2 + $0x200] sm:$0xff]  ;;  %v2074_v17 = vld [vmem:[#allocation2 + $0x210] sm:$0xff] }
 0x281   :  { %2182 = vmatprep.subr.bf16.mxu0 %v2057_v61  ;;  %2568 = vmatprep.subr.bf16.mxu1 %v2059_v18  ;;  %v2077_v61 = vld [vmem:[#allocation2 + $0x228] sm:$0xff]  ;;  %v2079_v18 = vld [vmem:[#allocation2 + $0x238] sm:$0xff] }
 0x284   :  { %2183 = vmatpush1.bf16.msra.mxu0 %v2056_v34  ;;  %2569 = vmatpush1.bf16.msra.mxu1 %v2058_v38  ;;  %v2076_v34 = vld [vmem:[#allocation2 + $0x220] sm:$0xff]  ;;  %v2078_v38 = vld [vmem:[#allocation2 + $0x230] sm:$0xff] }
 0x285   :  { %2184 = vmatprep.subr.bf16.mxu0 %v2061_v41  ;;  %2570 = vmatprep.subr.bf16.mxu1 %v2063_v52  ;;  %v2081_v41 = vld [vmem:[#allocation2 + $0x248] sm:$0xff]  ;;  %v2083_v52 = vld [vmem:[#allocation2 + $0x258] sm:$0xff] }
 0x288   :  { %2185 = vmatpush1.bf16.msra.mxu0 %v2060_v50  ;;  %2571 = vmatpush1.bf16.msra.mxu1 %v2062_v16  ;;  %v2080_v50 = vld [vmem:[#allocation2 + $0x240] sm:$0xff]  ;;  %v2085_v16 = vld [vmem:[#allocation2 + $0x268] sm:$0xff] }
 0x289   :  { %2186 = vmatprep.subr.bf16.mxu0 %v2065_v20  ;;  %2572 = vmatprep.subr.bf16.mxu1 %v2067_v3  ;;  %v2087_v20 = vld [vmem:[#allocation2 + $0x278] sm:$0xff]  ;;  %v2086_v3 = vld [vmem:[#allocation2 + $0x270] sm:$0xff] }
 0x28c   :  { %2187 = vmatpush1.bf16.msra.mxu0 %v2064_v51  ;;  %2573 = vmatpush1.bf16.msra.mxu1 %v2066_v44  ;;  %v2089_v51 = vld [vmem:[#allocation2 + $0x288] sm:$0xff]  ;;  %v2091_v44 = vld [vmem:[#allocation2 + $0x298] sm:$0xff] }
 0x28d   :  { %2188 = vmatprep.subr.bf16.mxu0 %v2069_v11  ;;  %2574 = vmatprep.subr.bf16.mxu1 %v2071_v12  ;;  %v2088_v11 = vld [vmem:[#allocation2 + $0x280] sm:$0xff]  ;;  %v2093_v12 = vld [vmem:[#allocation2 + $0x2a8] sm:$0xff] }
 0x290   :  { %2189 = vmatpush1.bf16.msra.mxu0 %v2068_v43  ;;  %2575 = vmatpush1.bf16.msra.mxu1 %v2070_v5  ;;  %v2092_v43 = vld [vmem:[#allocation2 + $0x2a0] sm:$0xff]  ;;  %v2094_v5 = vld [vmem:[#allocation2 + $0x2b0] sm:$0xff] }
 0x291   :  { %2351 = vmatprep.subr.bf16.mxu0 %v2073_v48  ;;  %2737 = vmatprep.subr.bf16.mxu1 %v2075_v6  ;;  %v2097_v48 = vld [vmem:[#allocation2 + $0x2c8] sm:$0xff]  ;;  %v2099_v6 = vld [vmem:[#allocation2 + $0x2d8] sm:$0xff] }
 0x293   :  { %2191 = vmatmul.mubr.bf16.vlgmr.msra.gmra.mrb[64].mxu0 %v5460_v32  ;;  %2577 = vmatmul.mubr.bf16.vlgmr.msra.gmra.mrb[64].mxu1 %v5460_v32  ;;  %v2082_v32 = vld [vmem:[#allocation2 + $0x250] sm:$0xff] }
 0x294   :  { %2352 = vmatpush1.bf16.msra.mxu0 %v2072_v13  ;;  %2738 = vmatpush1.bf16.msra.mxu1 %v2074_v17  ;;  %v2096_v13 = vld [vmem:[#allocation2 + $0x2c0] sm:$0xff]  ;;  %v2101_v17 = vld [vmem:[#allocation2 + $0x2e8] sm:$0xff] }
 0x295   :  { %2200 = vmatprep.mubr.bf16.mxu0 %v5486_v58  ;;  %2586 = vmatprep.mubr.bf16.mxu1 %v5486_v58  ;;  %v2084_v58 = vld [vmem:[#allocation2 + $0x260] sm:$0xff] }
 0x296   :  { %2353 = vmatprep.subr.bf16.mxu0 %v2077_v61  ;;  %2739 = vmatprep.subr.bf16.mxu1 %v2079_v18  ;;  %v2100_v61 = vld [vmem:[#allocation2 + $0x2e0] sm:$0xff]  ;;  %v2102_v18 = vld [vmem:[#allocation2 + $0x2f0] sm:$0xff] }
 0x298   :  { %2354 = vmatpush1.bf16.msra.mxu0 %v2076_v34  ;;  %2740 = vmatpush1.bf16.msra.mxu1 %v2078_v38  ;;  %v2105_v34 = vld [vmem:[#allocation2 + $0x308] sm:$0xff]  ;;  %v2107_v38 = vld [vmem:[#allocation2 + $0x318] sm:$0xff] }
 0x299   :  { %2355 = vmatprep.subr.bf16.mxu0 %v2081_v41  ;;  %2741 = vmatprep.subr.bf16.mxu1 %v2083_v52  ;;  %v2104_v41 = vld [vmem:[#allocation2 + $0x300] sm:$0xff]  ;;  %v2109_v52 = vld [vmem:[#allocation2 + $0x328] sm:$0xff] }
 0x29b   :  { %2201 = vmatmul.mubr.bf16.gmra.mrb[68].mxu0 %v5480_v56  ;;  %2587 = vmatmul.mubr.bf16.gmra.mrb[68].mxu1 %v5480_v56  ;;  %v2090_v56 = vld [vmem:[#allocation2 + $0x290] sm:$0xff] }
 0x29c   :  { %2210 = vmatprep.mubr.bf16.mxu0 %v5506_v26  ;;  %2596 = vmatprep.mubr.bf16.mxu1 %v5506_v26  ;;  %v2095_v26 = vld [vmem:[#allocation2 + $0x2b8] sm:$0xff] }
 0x29d   :  { %2356 = vmatpush1.bf16.msra.mxu0 %v2080_v50  ;;  %2742 = vmatpush1.bf16.msra.mxu1 %v2082_v32  ;;  %v2108_v50 = vld [vmem:[#allocation2 + $0x320] sm:$0xff]  ;;  %v2110_v32 = vld [vmem:[#allocation2 + $0x330] sm:$0xff] }
 0x29e   :  { %2357 = vmatprep.subr.bf16.mxu0 %v2085_v16  ;;  %2743 = vmatprep.subr.bf16.mxu1 %v2087_v20  ;;  %v2113_v16 = vld [vmem:[#allocation2 + $0x348] sm:$0xff]  ;;  %v2115_v20 = vld [vmem:[#allocation2 + $0x358] sm:$0xff] }
 0x2a1   :  { %2358 = vmatpush1.bf16.msra.mxu0 %v2084_v58  ;;  %2744 = vmatpush1.bf16.msra.mxu1 %v2086_v3  ;;  %v2112_v58 = vld [vmem:[#allocation2 + $0x340] sm:$0xff]  ;;  %v2117_v3 = vld [vmem:[#allocation2 + $0x368] sm:$0xff] }
 0x2a2   :  { %2359 = vmatprep.subr.bf16.mxu0 %v2089_v51  ;;  %2745 = vmatprep.subr.bf16.mxu1 %v2091_v44  ;;  %v2116_v51 = vld [vmem:[#allocation2 + $0x360] sm:$0xff]  ;;  %v2118_v44 = vld [vmem:[#allocation2 + $0x370] sm:$0xff] }
 0x2a3   :  { %2211 = vmatmul.mubr.bf16.gmra.mrb[72].mxu0 %v5500_v24  ;;  %2597 = vmatmul.mubr.bf16.gmra.mrb[72].mxu1 %v5500_v24  ;;  %v2098_v24 = vld [vmem:[#allocation2 + $0x2d0] sm:$0xff] }
 0x2a4   :  { %2220 = vmatprep.mubr.bf16.mxu0 %v5526_v55  ;;  %2606 = vmatprep.mubr.bf16.mxu1 %v5526_v55  ;;  %v2103_v55 = vld [vmem:[#allocation2 + $0x2f8] sm:$0xff] }
 0x2a5   :  { %2360 = vmatpush1.bf16.msra.mxu0 %v2088_v11  ;;  %2746 = vmatpush1.bf16.msra.mxu1 %v2090_v56  ;;  %v2121_v11 = vld [vmem:[#allocation2 + $0x388] sm:$0xff]  ;;  %v2123_v56 = vld [vmem:[#allocation2 + $0x398] sm:$0xff] }
 0x2a6   :  { %2361 = vmatprep.subr.bf16.mxu0 %v2093_v12  ;;  %2747 = vmatprep.subr.bf16.mxu1 %v2095_v26  ;;  %v2120_v12 = vld [vmem:[#allocation2 + $0x380] sm:$0xff]  ;;  %v2125_v26 = vld [vmem:[#allocation2 + $0x3a8] sm:$0xff] }
 0x2a9   :  { %2362 = vmatpush1.bf16.msra.mxu0 %v2092_v43  ;;  %2748 = vmatpush1.bf16.msra.mxu1 %v2094_v5  ;;  %v2124_v43 = vld [vmem:[#allocation2 + $0x3a0] sm:$0xff]  ;;  %v2126_v5 = vld [vmem:[#allocation2 + $0x3b0] sm:$0xff] }
 0x2aa   :  { %2363 = vmatprep.subr.bf16.mxu0 %v2097_v48  ;;  %2749 = vmatprep.subr.bf16.mxu1 %v2099_v6  ;;  %v2129_v48 = vld [vmem:[#allocation2 + $0x3c8] sm:$0xff]  ;;  %v2131_v6 = vld [vmem:[#allocation2 + $0x3d8] sm:$0xff] }
 0x2ab   :  { %2221 = vmatmul.mubr.bf16.gmra.mrb[76].mxu0 %v5520_v53  ;;  %2607 = vmatmul.mubr.bf16.gmra.mrb[76].mxu1 %v5520_v53  ;;  %v2106_v53 = vld [vmem:[#allocation2 + $0x310] sm:$0xff] }
 0x2ac   :  { %2230 = vmatprep.mubr.bf16.mxu0 %v5546_v36  ;;  %2616 = vmatprep.mubr.bf16.mxu1 %v5546_v36  ;;  %v2111_v36 = vld [vmem:[#allocation2 + $0x338] sm:$0xff] }
 0x2ad   :  { %2364 = vmatpush1.bf16.msra.mxu0 %v2096_v13  ;;  %2750 = vmatpush1.bf16.msra.mxu1 %v2098_v24  ;;  %v2128_v13 = vld [vmem:[#allocation2 + $0x3c0] sm:$0xff]  ;;  %v2133_v24 = vld [vmem:[#allocation2 + $0x3e8] sm:$0xff] }
 0x2ae   :  { %2365 = vmatprep.subr.bf16.mxu0 %v2101_v17  ;;  %2751 = vmatprep.subr.bf16.mxu1 %v2103_v55  ;;  %v2132_v17 = vld [vmem:[#allocation2 + $0x3e0] sm:$0xff]  ;;  %v2134_v55 = vld [vmem:[#allocation2 + $0x3f0] sm:$0xff] }
 0x2b1   :  { %2366 = vmatpush1.bf16.msra.mxu0 %v2100_v61  ;;  %2752 = vmatpush1.bf16.msra.mxu1 %v2102_v18  ;;  %v6625_v61 = vld [vmem:[#allocation22_spill] sm:$0xff] }
 0x2b2   :  { %2367 = vmatprep.subr.bf16.mxu0 %v2105_v34  ;;  %2753 = vmatprep.subr.bf16.mxu1 %v2107_v38 }
 0x2b3   :  { %2231 = vmatmul.mubr.bf16.gmra.mrb[80].mxu0 %v5540_v29  ;;  %2617 = vmatmul.mubr.bf16.gmra.mrb[80].mxu1 %v5540_v29  ;;  %v2114_v29 = vld [vmem:[#allocation2 + $0x350] sm:$0xff] }
 0x2b4   :  { %2240 = vmatprep.mubr.bf16.mxu0 %v5566_v10  ;;  %2626 = vmatprep.mubr.bf16.mxu1 %v5566_v10  ;;  %v2119_v10 = vld [vmem:[#allocation2 + $0x378] sm:$0xff] }
 0x2b5   :  { %2368 = vmatpush1.bf16.msra.mxu0 %v2104_v41  ;;  %2754 = vmatpush1.bf16.msra.mxu1 %v2106_v53 }
 0x2b6   :  { %2369 = vmatprep.subr.bf16.mxu0 %v2109_v52  ;;  %2755 = vmatprep.subr.bf16.mxu1 %v2111_v36 }
 0x2b9   :  { %2370 = vmatpush1.bf16.msra.mxu0 %v2108_v50  ;;  %2756 = vmatpush1.bf16.msra.mxu1 %v2110_v32 }
 0x2ba   :  { %2371 = vmatprep.subr.bf16.mxu0 %v2113_v16  ;;  %2757 = vmatprep.subr.bf16.mxu1 %v2115_v20 }
 0x2bb   :  { %2241 = vmatmul.mubr.bf16.gmra.mrb[84].mxu0 %v5560_v4  ;;  %2627 = vmatmul.mubr.bf16.gmra.mrb[84].mxu1 %v5560_v4  ;;  %v2122_v4 = vld [vmem:[#allocation2 + $0x390] sm:$0xff] }
 0x2bc   :  { %2250 = vmatprep.mubr.bf16.mxu0 %v5586_v49  ;;  %2636 = vmatprep.mubr.bf16.mxu1 %v5586_v49  ;;  %v2127_v49 = vld [vmem:[#allocation2 + $0x3b8] sm:$0xff] }
 0x2bd   :  { %2372 = vmatpush1.bf16.msra.mxu0 %v2112_v58  ;;  %2758 = vmatpush1.bf16.msra.mxu1 %v2114_v29 }
 0x2be   :  { %2373 = vmatprep.subr.bf16.mxu0 %v2117_v3  ;;  %2759 = vmatprep.subr.bf16.mxu1 %v2119_v10 }
 0x2c1   :  { %2374 = vmatpush1.bf16.msra.mxu0 %v2116_v51  ;;  %2760 = vmatpush1.bf16.msra.mxu1 %v2118_v44 }
 0x2c2   :  { %2375 = vmatprep.subr.bf16.mxu0 %v2121_v11  ;;  %2761 = vmatprep.subr.bf16.mxu1 %v2123_v56 }
 0x2c3   :  { %2251 = vmatmul.mubr.bf16.gmra.mrb[88].mxu0 %v5580_v47  ;;  %2637 = vmatmul.mubr.bf16.gmra.mrb[88].mxu1 %v5580_v47  ;;  %v2130_v47 = vld [vmem:[#allocation2 + $0x3d0] sm:$0xff] }
 0x2c4   :  { %2260 = vmatprep.mubr.bf16.mxu0 %v5606_v42  ;;  %2646 = vmatprep.mubr.bf16.mxu1 %v5606_v42  ;;  %v2135_v42 = vld [vmem:[#allocation2 + $0x3f8] sm:$0xff] }
 0x2c5   :  { %2376 = vmatpush1.bf16.msra.mxu0 %v2120_v12  ;;  %2762 = vmatpush1.bf16.msra.mxu1 %v2122_v4 }
 0x2c6   :  { %2377 = vmatprep.subr.bf16.mxu0 %v2125_v26  ;;  %2763 = vmatprep.subr.bf16.mxu1 %v2127_v49 }
 0x2c9   :  { %2378 = vmatpush1.bf16.msra.mxu0 %v2124_v43  ;;  %2764 = vmatpush1.bf16.msra.mxu1 %v2126_v5 }
 0x2ca   :  { %2379 = vmatprep.subr.bf16.mxu0 %v2129_v48  ;;  %2765 = vmatprep.subr.bf16.mxu1 %v2131_v6 }
 0x2cb   :  { %2261 = vmatmul.mubr.bf16.gmra.mrb[92].mxu0 %v5600_v40  ;;  %2647 = vmatmul.mubr.bf16.gmra.mrb[92].mxu1 %v5600_v40  ;;  %v6613_v40 = vld [vmem:[#allocation35_spill] sm:$0xff] }
 0x2cc   :  { %2270 = vmatprep.mubr.bf16.mxu0 %v5626_v39  ;;  %2656 = vmatprep.mubr.bf16.mxu1 %v5626_v39  ;;  %v6615_v39 = vld [vmem:[#allocation37_spill] sm:$0xff] }
 0x2cd   :  { %2380 = vmatpush1.bf16.msra.mxu0 %v2128_v13  ;;  %2766 = vmatpush1.bf16.msra.mxu1 %v2130_v47 }
 0x2ce   :  { %2381 = vmatprep.subr.bf16.mxu0 %v2133_v24  ;;  %2767 = vmatprep.subr.bf16.mxu1 %v2135_v42 }
 0x2d1   :  { %2382 = vmatpush1.bf16.msra.mxu0 %v2132_v17  ;;  %2768 = vmatpush1.bf16.msra.mxu1 %v2134_v55 }
 0x2d3   :  { %2271 = vmatmul.mubr.bf16.gmra.mrb[96].mxu0 %v5620_v28  ;;  %2657 = vmatmul.mubr.bf16.gmra.mrb[96].mxu1 %v5620_v28  ;;  %v6614_v28 = vld [vmem:[#allocation34_spill] sm:$0xff] }
 0x2d4   :  { %2280 = vmatprep.mubr.bf16.mxu0 %v5646_v62  ;;  %2666 = vmatprep.mubr.bf16.mxu1 %v5646_v62  ;;  %v6617_v62 = vld [vmem:[#allocation39_spill] sm:$0xff] }
 0x2db   :  { %2281 = vmatmul.mubr.bf16.gmra.mrb[100].mxu0 %v5640_v46  ;;  %2667 = vmatmul.mubr.bf16.gmra.mrb[100].mxu1 %v5640_v46  ;;  %v6616_v46 = vld [vmem:[#allocation36_spill] sm:$0xff] }
 0x2dc   :  { %2290 = vmatprep.mubr.bf16.mxu0 %v5666_v0  ;;  %2676 = vmatprep.mubr.bf16.mxu1 %v5666_v0  ;;  %v6619_v0 = vld [vmem:[#allocation41_spill] sm:$0xff] }
 0x2e3   :  { %2291 = vmatmul.mubr.bf16.gmra.mrb[104].mxu0 %v5660_v15  ;;  %2677 = vmatmul.mubr.bf16.gmra.mrb[104].mxu1 %v5660_v15  ;;  %v6618_v15 = vld [vmem:[#allocation38_spill] sm:$0xff] }
 0x2e4   :  { %2300 = vmatprep.mubr.bf16.mxu0 %v5686_v14  ;;  %2686 = vmatprep.mubr.bf16.mxu1 %v5686_v14  ;;  %v6621_v14 = vld [vmem:[#allocation43_spill] sm:$0xff] }
 0x2eb   :  { %2301 = vmatmul.mubr.bf16.gmra.mrb[108].mxu0 %v5680_v19  ;;  %2687 = vmatmul.mubr.bf16.gmra.mrb[108].mxu1 %v5680_v19  ;;  %v6620_v19 = vld [vmem:[#allocation40_spill] sm:$0xff] }
 0x2ec   :  { %2310 = vmatprep.mubr.bf16.mxu0 %v5706_v31  ;;  %2696 = vmatprep.mubr.bf16.mxu1 %v5706_v31  ;;  %v2136_v31 = vld [vmem:[%s6524_s4] sm:$0xf] }
 0x2ed   :  { %v5909_v18 = vrot.slane %v2136_v31, %v6625_v61 }
 0x2f3   :  { %2311 = vmatmul.mubr.bf16.gmra.mrb[112].mxu0 %v5700_v21  ;;  %2697 = vmatmul.mubr.bf16.gmra.mrb[112].mxu1 %v5700_v21  ;;  %v6622_v21 = vld [vmem:[#allocation42_spill] sm:$0xff] }
 0x2f4   :  { %2320 = vmatprep.mubr.bf16.mxu0 %v5726_v63  ;;  %2706 = vmatprep.mubr.bf16.mxu1 %v5726_v63 }
 0x2fb   :  { %2321 = vmatmul.mubr.bf16.gmra.mrb[116].mxu0 %v5720_v22  ;;  %2707 = vmatmul.mubr.bf16.gmra.mrb[116].mxu1 %v5720_v22  ;;  %v6623_v22 = vld [vmem:[#allocation20_spill] sm:$0xff] }
 0x2fc   :  { %2330 = vmatprep.mubr.bf16.mxu0 %v5746_v1  ;;  %2716 = vmatprep.mubr.bf16.mxu1 %v5746_v1  ;;  %v5903_v63 = vrot.slane %v2136_v31, %v6623_v22 }
 0x303   :  { %2331 = vmatmul.mubr.bf16.gmra.mrb[120].mxu0 %v5740_v23  ;;  %2717 = vmatmul.mubr.bf16.gmra.mrb[120].mxu1 %v5740_v23  ;;  %v6624_v23 = vld [vmem:[#allocation21_spill] sm:$0xff] }
 0x304   :  { %2340 = vmatprep.mubr.bf16.mxu0 %v5766_v8  ;;  %2726 = vmatprep.mubr.bf16.mxu1 %v5766_v8  ;;  %v5906_v1 = vrot.slane %v2136_v31, %v6624_v23 }
 0x30b   :  { %2341 = vmatmul.mubr.bf16.gmra.mrb[124].mxu0 %v5760_v45  ;;  %2727 = vmatmul.mubr.bf16.gmra.mrb[124].mxu1 %v5760_v45 }
 0x30c   :  { %2383 = vmatprep.mubr.bf16.mxu0 %v5469_v35  ;;  %2769 = vmatprep.mubr.bf16.mxu1 %v5469_v35  ;;  %v6604_v35 = vld [vmem:[#allocation24_spill] sm:$0xff] }
 0x313   :  { %2384 = vmatmul.mubr.bf16.vlgmr.msra.gmra.mrb[64].mxu0 %v5463_v33  ;;  %2770 = vmatmul.mubr.bf16.vlgmr.msra.gmra.mrb[64].mxu1 %v5463_v33  ;;  %v6603_v33 = vld [vmem:[#allocation25_spill] sm:$0xff] }
 0x314   :  { %2393 = vmatprep.mubr.bf16.mxu0 %v5489_v59  ;;  %2779 = vmatprep.mubr.bf16.mxu1 %v5489_v59  ;;  %v6606_v59 = vld [vmem:[#allocation26_spill] sm:$0xff] }
 0x31b   :  { %2394 = vmatmul.mubr.bf16.gmra.mrb[68].mxu0 %v5483_v57  ;;  %2780 = vmatmul.mubr.bf16.gmra.mrb[68].mxu1 %v5483_v57  ;;  %v6605_v57 = vld [vmem:[#allocation27_spill] sm:$0xff] }
 0x31c   :  { %2403 = vmatprep.mubr.bf16.mxu0 %v5509_v27  ;;  %2789 = vmatprep.mubr.bf16.mxu1 %v5509_v27  ;;  %v6608_v27 = vld [vmem:[#allocation28_spill] sm:$0xff] }
 0x323   :  { %2404 = vmatmul.mubr.bf16.gmra.mrb[72].mxu0 %v5503_v25  ;;  %2790 = vmatmul.mubr.bf16.gmra.mrb[72].mxu1 %v5503_v25  ;;  %v6607_v25 = vld [vmem:[#allocation29_spill] sm:$0xff] }
 0x324   :  { %2413 = vmatprep.mubr.bf16.mxu0 %v5529_v60  ;;  %2799 = vmatprep.mubr.bf16.mxu1 %v5529_v60  ;;  %v6610_v60 = vld [vmem:[#allocation30_spill] sm:$0xff] }
 0x32b   :  { %2414 = vmatmul.mubr.bf16.gmra.mrb[76].mxu0 %v5523_v54  ;;  %2800 = vmatmul.mubr.bf16.gmra.mrb[76].mxu1 %v5523_v54  ;;  %v6609_v54 = vld [vmem:[#allocation31_spill] sm:$0xff] }
 0x32c   :  { %2423 = vmatprep.mubr.bf16.mxu0 %v5549_v37  ;;  %2809 = vmatprep.mubr.bf16.mxu1 %v5549_v37  ;;  %v6612_v37 = vld [vmem:[#allocation32_spill] sm:$0xff] }
 0x333   :  { %2424 = vmatmul.mubr.bf16.gmra.mrb[80].mxu0 %v5543_v30  ;;  %2810 = vmatmul.mubr.bf16.gmra.mrb[80].mxu1 %v5543_v30  ;;  %v6611_v30 = vld [vmem:[#allocation33_spill] sm:$0xff] }
 0x334   :  { %2433 = vmatprep.mubr.bf16.mxu0 %v6603_v33  ;;  %2819 = vmatprep.mubr.bf16.mxu1 %v6603_v33 }
 0x33b   :  { %2434 = vmatmul.mubr.bf16.gmra.mrb[84].mxu0 %v6604_v35  ;;  %2820 = vmatmul.mubr.bf16.gmra.mrb[84].mxu1 %v6604_v35 }
 0x33c   :  { %2443 = vmatprep.mubr.bf16.mxu0 %v6605_v57  ;;  %2829 = vmatprep.mubr.bf16.mxu1 %v6605_v57 }
 0x343   :  { %2444 = vmatmul.mubr.bf16.gmra.mrb[88].mxu0 %v6606_v59  ;;  %2830 = vmatmul.mubr.bf16.gmra.mrb[88].mxu1 %v6606_v59 }
 0x344   :  { %2453 = vmatprep.mubr.bf16.mxu0 %v6607_v25  ;;  %2839 = vmatprep.mubr.bf16.mxu1 %v6607_v25 }
 0x34b   :  { %2454 = vmatmul.mubr.bf16.gmra.mrb[92].mxu0 %v6608_v27  ;;  %2840 = vmatmul.mubr.bf16.gmra.mrb[92].mxu1 %v6608_v27 }
 0x34c   :  { %2463 = vmatprep.mubr.bf16.mxu0 %v6609_v54  ;;  %2849 = vmatprep.mubr.bf16.mxu1 %v6609_v54 }
 0x353   :  { %2464 = vmatmul.mubr.bf16.gmra.mrb[96].mxu0 %v6610_v60  ;;  %2850 = vmatmul.mubr.bf16.gmra.mrb[96].mxu1 %v6610_v60 }
 0x354   :  { %2473 = vmatprep.mubr.bf16.mxu0 %v6611_v30  ;;  %2859 = vmatprep.mubr.bf16.mxu1 %v6611_v30 }
 0x35b   :  { %2474 = vmatmul.mubr.bf16.gmra.mrb[100].mxu0 %v6612_v37  ;;  %2860 = vmatmul.mubr.bf16.gmra.mrb[100].mxu1 %v6612_v37 }
 0x35c   :  { %2483 = vmatprep.mubr.bf16.mxu0 %v6613_v40  ;;  %2869 = vmatprep.mubr.bf16.mxu1 %v6613_v40 }
 0x363   :  { %2484 = vmatmul.mubr.bf16.gmra.mrb[104].mxu0 %v6614_v28  ;;  %2870 = vmatmul.mubr.bf16.gmra.mrb[104].mxu1 %v6614_v28 }
 0x364   :  { %2493 = vmatprep.mubr.bf16.mxu0 %v6615_v39  ;;  %2879 = vmatprep.mubr.bf16.mxu1 %v6615_v39 }
 0x36b   :  { %2494 = vmatmul.mubr.bf16.gmra.mrb[108].mxu0 %v6616_v46  ;;  %2880 = vmatmul.mubr.bf16.gmra.mrb[108].mxu1 %v6616_v46 }
 0x36c   :  { %2503 = vmatprep.mubr.bf16.mxu0 %v6617_v62  ;;  %2889 = vmatprep.mubr.bf16.mxu1 %v6617_v62 }
 0x373   :  { %2504 = vmatmul.mubr.bf16.gmra.mrb[112].mxu0 %v6618_v15  ;;  %2890 = vmatmul.mubr.bf16.gmra.mrb[112].mxu1 %v6618_v15 }
 0x374   :  { %2513 = vmatprep.mubr.bf16.mxu0 %v6619_v0  ;;  %2899 = vmatprep.mubr.bf16.mxu1 %v6619_v0 }
 0x37b   :  { %2514 = vmatmul.mubr.bf16.gmra.mrb[116].mxu0 %v6620_v19  ;;  %2900 = vmatmul.mubr.bf16.gmra.mrb[116].mxu1 %v6620_v19 }
 0x37c   :  { %2523 = vmatprep.mubr.bf16.mxu0 %v6621_v14  ;;  %2909 = vmatprep.mubr.bf16.mxu1 %v6621_v14 }
 0x383   :  { %2524 = vmatmul.mubr.bf16.gmra.mrb[120].mxu0 %v6622_v21  ;;  %2910 = vmatmul.mubr.bf16.gmra.mrb[120].mxu1 %v6622_v21 }
 0x384   :  { %2533 = vmatprep.mubr.bf16.mxu0 %v5769_v9  ;;  %2919 = vmatprep.mubr.bf16.mxu1 %v5769_v9  ;;  %v6626_v9 = vld [vmem:[#allocation23_spill] sm:$0xff] }
 0x385   :  { %v5912_v34 = vrot.slane %v2136_v31, %v6626_v9 }
 0x38b   :  { %2534 = vmatmul.mubr.bf16.gmra.mrb[124].mxu0 %v5763_v7  ;;  %2920 = vmatmul.mubr.bf16.gmra.mrb[124].mxu1 %v5763_v7 }
 0x3e6   :  { %v2385_v45 = vpop.f32.mrb[64].mxu0  ;;  %v2771_v8 = vpop.f32.mrb[64].mxu1 }
 0x3e7   :  { %v2387_v38 = vpop.f32.mrb[65].mxu0  ;;  %v2773_v7 = vpop.f32.mrb[65].mxu1  ;;  %v4403_v52 = vadd.f32 %v2385_v45, %v5903_v63  ;;  %v4467_v36 = vadd.f32 %v2771_v8, %v5906_v1 }
 0x3e8   :  { %v2389_v41 = vpop.f32.mrb[66].mxu0  ;;  %v2775_v53 = vpop.f32.mrb[66].mxu1  ;;  %v4404_v58 = vadd.f32 %v2387_v38, %v5909_v18  ;;  %v4468_v29 = vadd.f32 %v2773_v7, %v5912_v34 }
 0x3e9   :  { %v4405_v50 = vadd.f32 %v2389_v41, %v5903_v63  ;;  %v4469_v32 = vadd.f32 %v2775_v53, %v5906_v1  ;;  %v2391_v16 = vpop.f32.mrb[67].mxu0  ;;  %v2777_v20 = vpop.f32.mrb[67].mxu1 }
 0x3ea   :  { %v4406_v3 = vadd.f32 %v2391_v16, %v5909_v18  ;;  %v4470_v10 = vadd.f32 %v2777_v20, %v5912_v34 }
 0x3eb   :  { %v2930_v51 = vpack.c.bf16 %v4405_v50, %v4403_v52  ;;  %v2932_v44 = vpack.c.bf16 %v4469_v32, %v4467_v36 }
 0x3ec   :  { %v2931_v11 = vpack.c.bf16 %v4406_v3, %v4404_v58  ;;  %v2933_v56 = vpack.c.bf16 %v4470_v10, %v4468_v29 }
 0x3ed   :  { %v5923_v12 = vmax.bf16 %v6592_v2, %v2930_v51  ;;  %v5926_v4 = vmax.bf16 %v6592_v2, %v2932_v44 }
 0x3ee   :  { %v5929_v26 = vmax.bf16 %v6592_v2, %v2931_v11  ;;  %v5932_v49 = vmax.bf16 %v6592_v2, %v2933_v56  ;;  %v2395_v43 = vpop.f32.mrb[68].mxu0  ;;  %v2781_v5 = vpop.f32.mrb[68].mxu1 }
 0x3ef   :  { %v2397_v48 = vpop.f32.mrb[69].mxu0  ;;  %v2783_v6 = vpop.f32.mrb[69].mxu1  ;;  %v4407_v24 = vadd.f32 %v2395_v43, %v5903_v63  ;;  %v4471_v42 = vadd.f32 %v2781_v5, %v5906_v1 }
 0x3f0   :  { %v2399_v13 = vpop.f32.mrb[70].mxu0  ;;  %v2785_v47 = vpop.f32.mrb[70].mxu1  ;;  %v4408_v57 = vadd.f32 %v2397_v48, %v5909_v18  ;;  %v4472_v59 = vadd.f32 %v2783_v6, %v5912_v34 }
 0x3f1   :  { %v4409_v17 = vadd.f32 %v2399_v13, %v5903_v63  ;;  %v4473_v55 = vadd.f32 %v2785_v47, %v5906_v1  ;;  %v2401_v33 = vpop.f32.mrb[71].mxu0  ;;  %v2787_v35 = vpop.f32.mrb[71].mxu1 }
 0x3f2   :  { %v4410_v25 = vadd.f32 %v2401_v33, %v5909_v18  ;;  %v4474_v27 = vadd.f32 %v2787_v35, %v5912_v34 }
 0x3f3   :  { %v2934_v54 = vpack.c.bf16 %v4409_v17, %v4407_v24  ;;  %v2936_v60 = vpack.c.bf16 %v4473_v55, %v4471_v42 }
 0x3f4   :  { %v2935_v30 = vpack.c.bf16 %v4410_v25, %v4408_v57  ;;  %v2937_v37 = vpack.c.bf16 %v4474_v27, %v4472_v59 }
 0x3f5   :  { %v5943_v40 = vmax.bf16 %v6592_v2, %v2934_v54  ;;  %v5946_v28 = vmax.bf16 %v6592_v2, %v2936_v60 }
 0x3f6   :  { %v5949_v39 = vmax.bf16 %v6592_v2, %v2935_v30  ;;  %v5952_v46 = vmax.bf16 %v6592_v2, %v2937_v37  ;;  %v2405_v62 = vpop.f32.mrb[72].mxu0  ;;  %v2791_v15 = vpop.f32.mrb[72].mxu1 }
 0x3f7   :  { %v2407_v0 = vpop.f32.mrb[73].mxu0  ;;  %v2793_v19 = vpop.f32.mrb[73].mxu1  ;;  %v4411_v31 = vadd.f32 %v2405_v62, %v5903_v63  ;;  %v4475_v45 = vadd.f32 %v2791_v15, %v5906_v1 }
 0x3f8   :  { %v2409_v14 = vpop.f32.mrb[74].mxu0  ;;  %v2795_v21 = vpop.f32.mrb[74].mxu1  ;;  %v4412_v53 = vadd.f32 %v2407_v0, %v5909_v18  ;;  %v4476_v52 = vadd.f32 %v2793_v19, %v5912_v34 }
 0x3f9   :  { %v4413_v8 = vadd.f32 %v2409_v14, %v5903_v63  ;;  %v4477_v38 = vadd.f32 %v2795_v21, %v5906_v1  ;;  %v2411_v7 = vpop.f32.mrb[75].mxu0  ;;  %v2797_v41 = vpop.f32.mrb[75].mxu1 }
 0x3fa   :  { %v4414_v36 = vadd.f32 %v2411_v7, %v5909_v18  ;;  %v4478_v50 = vadd.f32 %v2797_v41, %v5912_v34 }
 0x3fb   :  { %v2938_v32 = vpack.c.bf16 %v4413_v8, %v4411_v31  ;;  %v2940_v16 = vpack.c.bf16 %v4477_v38, %v4475_v45 }
 0x3fc   :  { %v2939_v20 = vpack.c.bf16 %v4414_v36, %v4412_v53  ;;  %v2941_v58 = vpack.c.bf16 %v4478_v50, %v4476_v52 }
 0x3fd   :  { %v5963_v29 = vmax.bf16 %v6592_v2, %v2938_v32  ;;  %v5966_v3 = vmax.bf16 %v6592_v2, %v2940_v16 }
 0x3fe   :  { %v5969_v10 = vmax.bf16 %v6592_v2, %v2939_v20  ;;  %v5972_v51 = vmax.bf16 %v6592_v2, %v2941_v58  ;;  %v2415_v44 = vpop.f32.mrb[76].mxu0  ;;  %v2801_v11 = vpop.f32.mrb[76].mxu1 }
 0x3ff   :  { %v2417_v56 = vpop.f32.mrb[77].mxu0  ;;  %v2803_v43 = vpop.f32.mrb[77].mxu1  ;;  %v4415_v6 = vadd.f32 %v2415_v44, %v5903_v63  ;;  %v4479_v13 = vadd.f32 %v2801_v11, %v5906_v1 }
 0x400   :  { %v2419_v5 = vpop.f32.mrb[78].mxu0  ;;  %v2805_v48 = vpop.f32.mrb[78].mxu1  ;;  %v4416_v55 = vadd.f32 %v2417_v56, %v5909_v18  ;;  %v4480_v33 = vadd.f32 %v2803_v43, %v5912_v34 }
 0x401   :  { %v4417_v47 = vadd.f32 %v2419_v5, %v5903_v63  ;;  %v4481_v24 = vadd.f32 %v2805_v48, %v5906_v1  ;;  %v2421_v42 = vpop.f32.mrb[79].mxu0  ;;  %v2807_v17 = vpop.f32.mrb[79].mxu1 }
 0x402   :  { %v4418_v35 = vadd.f32 %v2421_v42, %v5909_v18  ;;  %v4482_v57 = vadd.f32 %v2807_v17, %v5912_v34 }
 0x403   :  { %v2942_v59 = vpack.c.bf16 %v4417_v47, %v4415_v6  ;;  %v2944_v25 = vpack.c.bf16 %v4481_v24, %v4479_v13 }
 0x404   :  { %v2943_v27 = vpack.c.bf16 %v4418_v35, %v4416_v55  ;;  %v2945_v54 = vpack.c.bf16 %v4482_v57, %v4480_v33 }
 0x405   :  { %v5983_v60 = vmax.bf16 %v6592_v2, %v2942_v59  ;;  %v5986_v30 = vmax.bf16 %v6592_v2, %v2944_v25 }
 0x406   :  { %v5989_v37 = vmax.bf16 %v6592_v2, %v2943_v27  ;;  %v5992_v62 = vmax.bf16 %v6592_v2, %v2945_v54  ;;  %v2425_v15 = vpop.f32.mrb[80].mxu0  ;;  %v2811_v0 = vpop.f32.mrb[80].mxu1 }
 0x407   :  { %v2427_v19 = vpop.f32.mrb[81].mxu0  ;;  %v2813_v14 = vpop.f32.mrb[81].mxu1  ;;  %v4419_v45 = vadd.f32 %v2425_v15, %v5903_v63  ;;  %v4483_v8 = vadd.f32 %v2811_v0, %v5906_v1 }
 0x408   :  { %v2429_v21 = vpop.f32.mrb[82].mxu0  ;;  %v2815_v31 = vpop.f32.mrb[82].mxu1  ;;  %v4420_v52 = vadd.f32 %v2427_v19, %v5909_v18  ;;  %v4484_v36 = vadd.f32 %v2813_v14, %v5912_v34 }
 0x409   :  { %v4421_v38 = vadd.f32 %v2429_v21, %v5903_v63  ;;  %v4485_v7 = vadd.f32 %v2815_v31, %v5906_v1  ;;  %v2431_v41 = vpop.f32.mrb[83].mxu0  ;;  %v2817_v53 = vpop.f32.mrb[83].mxu1 }
 0x40a   :  { %v4422_v50 = vadd.f32 %v2431_v41, %v5909_v18  ;;  %v4486_v32 = vadd.f32 %v2817_v53, %v5912_v34 }
 0x40b   :  { %v2946_v16 = vpack.c.bf16 %v4421_v38, %v4419_v45  ;;  %v2948_v20 = vpack.c.bf16 %v4485_v7, %v4483_v8 }
 0x40c   :  { %v2947_v58 = vpack.c.bf16 %v4422_v50, %v4420_v52  ;;  %v2949_v44 = vpack.c.bf16 %v4486_v32, %v4484_v36 }
 0x40d   :  { %v6003_v11 = vmax.bf16 %v6592_v2, %v2946_v16  ;;  %v6006_v56 = vmax.bf16 %v6592_v2, %v2948_v20 }
 0x40e   :  { %v6009_v43 = vmax.bf16 %v6592_v2, %v2947_v58  ;;  %v6012_v5 = vmax.bf16 %v6592_v2, %v2949_v44  ;;  %v2435_v48 = vpop.f32.mrb[84].mxu0  ;;  %v2821_v6 = vpop.f32.mrb[84].mxu1 }
 0x40f   :  { %v2437_v13 = vpop.f32.mrb[85].mxu0  ;;  %v2823_v47 = vpop.f32.mrb[85].mxu1  ;;  %v4423_v17 = vadd.f32 %v2435_v48, %v5903_v63  ;;  %v4487_v55 = vadd.f32 %v2821_v6, %v5906_v1 }
 0x410   :  { %v2439_v24 = vpop.f32.mrb[86].mxu0  ;;  %v2825_v42 = vpop.f32.mrb[86].mxu1  ;;  %v4424_v25 = vadd.f32 %v2437_v13, %v5909_v18  ;;  %v4488_v27 = vadd.f32 %v2823_v47, %v5912_v34 }
 0x411   :  { %v4425_v33 = vadd.f32 %v2439_v24, %v5903_v63  ;;  %v4489_v35 = vadd.f32 %v2825_v42, %v5906_v1  ;;  %v2441_v57 = vpop.f32.mrb[87].mxu0  ;;  %v2827_v59 = vpop.f32.mrb[87].mxu1 }
 0x412   :  { %v4426_v54 = vadd.f32 %v2441_v57, %v5909_v18  ;;  %v4490_v15 = vadd.f32 %v2827_v59, %v5912_v34 }
 0x413   :  { %v2950_v0 = vpack.c.bf16 %v4425_v33, %v4423_v17  ;;  %v2952_v19 = vpack.c.bf16 %v4489_v35, %v4487_v55 }
 0x414   :  { %v2951_v14 = vpack.c.bf16 %v4426_v54, %v4424_v25  ;;  %v2953_v21 = vpack.c.bf16 %v4490_v15, %v4488_v27 }
 0x415   :  { %v6023_v31 = vmax.bf16 %v6592_v2, %v2950_v0  ;;  %v6026_v45 = vmax.bf16 %v6592_v2, %v2952_v19 }
 0x416   :  { %v6029_v8 = vmax.bf16 %v6592_v2, %v2951_v14  ;;  %v6032_v38 = vmax.bf16 %v6592_v2, %v2953_v21  ;;  %v2445_v7 = vpop.f32.mrb[88].mxu0  ;;  %v2831_v41 = vpop.f32.mrb[88].mxu1 }
 0x417   :  { %6627 = vst [vmem:[#allocation25_spill] sm:$0xff] %v6026_v45  ;;  %v2447_v53 = vpop.f32.mrb[89].mxu0  ;;  %v2833_v52 = vpop.f32.mrb[89].mxu1  ;;  %v4427_v32 = vadd.f32 %v2445_v7, %v5903_v63  ;;  %v4491_v16 = vadd.f32 %v2831_v41, %v5906_v1 }
 0x418   :  { %6628 = vst [vmem:[#allocation24_spill] sm:$0xff] %v6032_v38  ;;  %v2449_v36 = vpop.f32.mrb[90].mxu0  ;;  %v2835_v50 = vpop.f32.mrb[90].mxu1  ;;  %v4428_v6 = vadd.f32 %v2447_v53, %v5909_v18  ;;  %v4492_v13 = vadd.f32 %v2833_v52, %v5912_v34 }
 0x419   :  { %v4429_v20 = vadd.f32 %v2449_v36, %v5903_v63  ;;  %v4493_v58 = vadd.f32 %v2835_v50, %v5906_v1  ;;  %v2451_v44 = vpop.f32.mrb[91].mxu0  ;;  %v2837_v48 = vpop.f32.mrb[91].mxu1 }
 0x41a   :  { %v4430_v47 = vadd.f32 %v2451_v44, %v5909_v18  ;;  %v4494_v24 = vadd.f32 %v2837_v48, %v5912_v34 }
 0x41b   :  { %v2954_v42 = vpack.c.bf16 %v4429_v20, %v4427_v32  ;;  %v2956_v17 = vpack.c.bf16 %v4493_v58, %v4491_v16 }
 0x41c   :  { %v2955_v55 = vpack.c.bf16 %v4430_v47, %v4428_v6  ;;  %v2957_v33 = vpack.c.bf16 %v4494_v24, %v4492_v13 }
 0x41d   :  { %v6043_v35 = vmax.bf16 %v6592_v2, %v2954_v42  ;;  %v6046_v57 = vmax.bf16 %v6592_v2, %v2956_v17 }
 0x41e   :  { %v6049_v59 = vmax.bf16 %v6592_v2, %v2955_v55  ;;  %v6052_v25 = vmax.bf16 %v6592_v2, %v2957_v33  ;;  %v2455_v27 = vpop.f32.mrb[92].mxu0  ;;  %v2841_v54 = vpop.f32.mrb[92].mxu1 }
 0x41f   :  { %6629 = vst [vmem:[#allocation27_spill] sm:$0xff] %v6046_v57  ;;  %v2457_v15 = vpop.f32.mrb[93].mxu0  ;;  %v2843_v0 = vpop.f32.mrb[93].mxu1  ;;  %v4431_v21 = vadd.f32 %v2455_v27, %v5903_v63  ;;  %v4495_v7 = vadd.f32 %v2841_v54, %v5906_v1 }
 0x420   :  { %6630 = vst [vmem:[#allocation26_spill] sm:$0xff] %v6052_v25  ;;  %v2459_v19 = vpop.f32.mrb[94].mxu0  ;;  %v2845_v14 = vpop.f32.mrb[94].mxu1  ;;  %v4432_v50 = vadd.f32 %v2457_v15, %v5909_v18  ;;  %v4496_v32 = vadd.f32 %v2843_v0, %v5912_v34 }
 0x421   :  { %v4433_v41 = vadd.f32 %v2459_v19, %v5903_v63  ;;  %v4497_v53 = vadd.f32 %v2845_v14, %v5906_v1  ;;  %v2461_v52 = vpop.f32.mrb[95].mxu0  ;;  %v2847_v36 = vpop.f32.mrb[95].mxu1 }
 0x422   :  { %v4434_v16 = vadd.f32 %v2461_v52, %v5909_v18  ;;  %v4498_v20 = vadd.f32 %v2847_v36, %v5912_v34 }
 0x423   :  { %v2958_v58 = vpack.c.bf16 %v4433_v41, %v4431_v21  ;;  %v2960_v44 = vpack.c.bf16 %v4497_v53, %v4495_v7 }
 0x424   :  { %v2959_v48 = vpack.c.bf16 %v4434_v16, %v4432_v50  ;;  %v2961_v6 = vpack.c.bf16 %v4498_v20, %v4496_v32 }
 0x425   :  { %v6063_v13 = vmax.bf16 %v6592_v2, %v2958_v58  ;;  %v6066_v47 = vmax.bf16 %v6592_v2, %v2960_v44 }
 0x426   :  { %v6069_v24 = vmax.bf16 %v6592_v2, %v2959_v48  ;;  %v6072_v42 = vmax.bf16 %v6592_v2, %v2961_v6  ;;  %v2465_v17 = vpop.f32.mrb[96].mxu0  ;;  %v2851_v55 = vpop.f32.mrb[96].mxu1 }
 0x427   :  { %6631 = vst [vmem:[#allocation29_spill] sm:$0xff] %v6066_v47  ;;  %v2467_v33 = vpop.f32.mrb[97].mxu0  ;;  %v2853_v27 = vpop.f32.mrb[97].mxu1  ;;  %v4435_v0 = vadd.f32 %v2465_v17, %v5903_v63  ;;  %v4499_v19 = vadd.f32 %v2851_v55, %v5906_v1 }
 0x428   :  { %6632 = vst [vmem:[#allocation28_spill] sm:$0xff] %v6072_v42  ;;  %v2469_v54 = vpop.f32.mrb[98].mxu0  ;;  %v2855_v15 = vpop.f32.mrb[98].mxu1  ;;  %v4436_v53 = vadd.f32 %v2467_v33, %v5909_v18  ;;  %v4500_v52 = vadd.f32 %v2853_v27, %v5912_v34 }
 0x429   :  { %v4437_v14 = vadd.f32 %v2469_v54, %v5903_v63  ;;  %v4501_v21 = vadd.f32 %v2855_v15, %v5906_v1  ;;  %v2471_v7 = vpop.f32.mrb[99].mxu0  ;;  %v2857_v41 = vpop.f32.mrb[99].mxu1 }
 0x42a   :  { %v4438_v36 = vadd.f32 %v2471_v7, %v5909_v18  ;;  %v4502_v50 = vadd.f32 %v2857_v41, %v5912_v34 }
 0x42b   :  { %v2962_v32 = vpack.c.bf16 %v4437_v14, %v4435_v0  ;;  %v2964_v16 = vpack.c.bf16 %v4501_v21, %v4499_v19 }
 0x42c   :  { %v2963_v20 = vpack.c.bf16 %v4438_v36, %v4436_v53  ;;  %v2965_v58 = vpack.c.bf16 %v4502_v50, %v4500_v52 }
 0x42d   :  { %v6083_v44 = vmax.bf16 %v6592_v2, %v2962_v32  ;;  %v6086_v48 = vmax.bf16 %v6592_v2, %v2964_v16 }
 0x42e   :  { %v6089_v6 = vmax.bf16 %v6592_v2, %v2963_v20  ;;  %v6092_v17 = vmax.bf16 %v6592_v2, %v2965_v58  ;;  %v2475_v55 = vpop.f32.mrb[100].mxu0  ;;  %v2861_v33 = vpop.f32.mrb[100].mxu1 }
 0x42f   :  { %6633 = vst [vmem:[#allocation31_spill] sm:$0xff] %v6086_v48  ;;  %v2477_v27 = vpop.f32.mrb[101].mxu0  ;;  %v2863_v54 = vpop.f32.mrb[101].mxu1  ;;  %v4439_v19 = vadd.f32 %v2475_v55, %v5903_v63  ;;  %v4503_v14 = vadd.f32 %v2861_v33, %v5906_v1 }
 0x430   :  { %6634 = vst [vmem:[#allocation30_spill] sm:$0xff] %v6092_v17  ;;  %v2479_v15 = vpop.f32.mrb[102].mxu0  ;;  %v2865_v0 = vpop.f32.mrb[102].mxu1  ;;  %v4440_v52 = vadd.f32 %v2477_v27, %v5909_v18  ;;  %v4504_v36 = vadd.f32 %v2863_v54, %v5912_v34 }
 0x431   :  { %v4441_v21 = vadd.f32 %v2479_v15, %v5903_v63  ;;  %v4505_v7 = vadd.f32 %v2865_v0, %v5906_v1  ;;  %v2481_v41 = vpop.f32.mrb[103].mxu0  ;;  %v2867_v53 = vpop.f32.mrb[103].mxu1 }
 0x432   :  { %v4442_v50 = vadd.f32 %v2481_v41, %v5909_v18  ;;  %v4506_v32 = vadd.f32 %v2867_v53, %v5912_v34 }
 0x433   :  { %v2966_v16 = vpack.c.bf16 %v4441_v21, %v4439_v19  ;;  %v2968_v20 = vpack.c.bf16 %v4505_v7, %v4503_v14 }
 0x434   :  { %v2967_v58 = vpack.c.bf16 %v4442_v50, %v4440_v52  ;;  %v2969_v55 = vpack.c.bf16 %v4506_v32, %v4504_v36 }
 0x435   :  { %v6103_v33 = vmax.bf16 %v6592_v2, %v2966_v16  ;;  %v6106_v15 = vmax.bf16 %v6592_v2, %v2968_v20 }
 0x436   :  { %v6109_v0 = vmax.bf16 %v6592_v2, %v2967_v58  ;;  %v6112_v27 = vmax.bf16 %v6592_v2, %v2969_v55  ;;  %v2485_v54 = vpop.f32.mrb[104].mxu0  ;;  %v2871_v41 = vpop.f32.mrb[104].mxu1 }
 0x437   :  { %6635 = vst [vmem:[#allocation33_spill] sm:$0xff] %v6106_v15  ;;  %v2487_v9 = vpop.f32.mrb[105].mxu0  ;;  %v2873_v53 = vpop.f32.mrb[105].mxu1  ;;  %v4443_v21 = vadd.f32 %v2485_v54, %v5903_v63  ;;  %v4507_v7 = vadd.f32 %v2871_v41, %v5906_v1 }
 0x438   :  { %6636 = vst [vmem:[#allocation32_spill] sm:$0xff] %v6112_v27  ;;  %v2489_v19 = vpop.f32.mrb[106].mxu0  ;;  %v2875_v14 = vpop.f32.mrb[106].mxu1  ;;  %v4444_v16 = vadd.f32 %v2487_v9, %v5909_v18  ;;  %v4508_v20 = vadd.f32 %v2873_v53, %v5912_v34 }
 0x439   :  { %v4445_v52 = vadd.f32 %v2489_v19, %v5903_v63  ;;  %v4509_v36 = vadd.f32 %v2875_v14, %v5906_v1  ;;  %v2491_v50 = vpop.f32.mrb[107].mxu0  ;;  %v2877_v32 = vpop.f32.mrb[107].mxu1 }
 0x43a   :  { %v4446_v58 = vadd.f32 %v2491_v50, %v5909_v18  ;;  %v4510_v55 = vadd.f32 %v2877_v32, %v5912_v34 }
 0x43b   :  { %v2970_v61 = vpack.c.bf16 %v4445_v52, %v4443_v21  ;;  %v2972_v23 = vpack.c.bf16 %v4509_v36, %v4507_v7 }
 0x43c   :  { %v2971_v22 = vpack.c.bf16 %v4446_v58, %v4444_v16  ;;  %v2973_v54 = vpack.c.bf16 %v4510_v55, %v4508_v20 }
 0x43d   :  { %v6123_v41 = vmax.bf16 %v6592_v2, %v2970_v61  ;;  %v6126_v19 = vmax.bf16 %v6592_v2, %v2972_v23 }
 0x43e   :  { %v6129_v14 = vmax.bf16 %v6592_v2, %v2971_v22  ;;  %v6132_v9 = vmax.bf16 %v6592_v2, %v2973_v54  ;;  %v2495_v53 = vpop.f32.mrb[108].mxu0  ;;  %v2881_v50 = vpop.f32.mrb[108].mxu1 }
 0x43f   :  { %6637 = vst [vmem:[#allocation35_spill] sm:$0xff] %v6126_v19  ;;  %v2497_v15 = vpop.f32.mrb[109].mxu0  ;;  %v2883_v32 = vpop.f32.mrb[109].mxu1  ;;  %v4447_v52 = vadd.f32 %v2495_v53, %v5903_v63  ;;  %v4511_v61 = vadd.f32 %v2881_v50, %v5906_v1 }
 0x440   :  { %6638 = vst [vmem:[#allocation34_spill] sm:$0xff] %v6132_v9  ;;  %v2499_v21 = vpop.f32.mrb[110].mxu0  ;;  %v2885_v7 = vpop.f32.mrb[110].mxu1  ;;  %v4448_v20 = vadd.f32 %v2497_v15, %v5909_v18  ;;  %v4512_v58 = vadd.f32 %v2883_v32, %v5912_v34 }
 0x441   :  { %v4449_v36 = vadd.f32 %v2499_v21, %v5903_v63  ;;  %v4513_v23 = vadd.f32 %v2885_v7, %v5906_v1  ;;  %v2501_v16 = vpop.f32.mrb[111].mxu0  ;;  %v2887_v22 = vpop.f32.mrb[111].mxu1 }
 0x442   :  { %v4450_v55 = vadd.f32 %v2501_v16, %v5909_v18  ;;  %v4514_v54 = vadd.f32 %v2887_v22, %v5912_v34 }
 0x443   :  { %v2974_v19 = vpack.c.bf16 %v4449_v36, %v4447_v52  ;;  %v2976_v9 = vpack.c.bf16 %v4513_v23, %v4511_v61 }
 0x444   :  { %v2975_v27 = vpack.c.bf16 %v4450_v55, %v4448_v20  ;;  %v2977_v53 = vpack.c.bf16 %v4514_v54, %v4512_v58 }
 0x445   :  { %v6143_v50 = vmax.bf16 %v6592_v2, %v2974_v19  ;;  %v6146_v21 = vmax.bf16 %v6592_v2, %v2976_v9 }
 0x446   :  { %v6149_v7 = vmax.bf16 %v6592_v2, %v2975_v27  ;;  %v6152_v15 = vmax.bf16 %v6592_v2, %v2977_v53  ;;  %v2505_v32 = vpop.f32.mrb[112].mxu0  ;;  %v2891_v16 = vpop.f32.mrb[112].mxu1 }
 0x447   :  { %6639 = vst [vmem:[#allocation37_spill] sm:$0xff] %v6146_v21  ;;  %v2507_v48 = vpop.f32.mrb[113].mxu0  ;;  %v2893_v22 = vpop.f32.mrb[113].mxu1  ;;  %v4451_v36 = vadd.f32 %v2505_v32, %v5903_v63  ;;  %v4515_v19 = vadd.f32 %v2891_v16, %v5906_v1 }
 0x448   :  { %6640 = vst [vmem:[#allocation36_spill] sm:$0xff] %v6152_v15  ;;  %v2509_v52 = vpop.f32.mrb[114].mxu0  ;;  %v2895_v61 = vpop.f32.mrb[114].mxu1  ;;  %v4452_v58 = vadd.f32 %v2507_v48, %v5909_v18  ;;  %v4516_v55 = vadd.f32 %v2893_v22, %v5912_v34 }
 0x449   :  { %v4453_v23 = vadd.f32 %v2509_v52, %v5903_v63  ;;  %v4517_v9 = vadd.f32 %v2895_v61, %v5906_v1  ;;  %v2511_v20 = vpop.f32.mrb[115].mxu0  ;;  %v2897_v27 = vpop.f32.mrb[115].mxu1 }
 0x44a   :  { %v4454_v54 = vadd.f32 %v2511_v20, %v5909_v18  ;;  %v4518_v53 = vadd.f32 %v2897_v27, %v5912_v34 }
 0x44b   :  { %v2978_v21 = vpack.c.bf16 %v4453_v23, %v4451_v36  ;;  %v2980_v15 = vpack.c.bf16 %v4517_v9, %v4515_v19 }
 0x44c   :  { %v2979_v17 = vpack.c.bf16 %v4454_v54, %v4452_v58  ;;  %v2981_v32 = vpack.c.bf16 %v4518_v53, %v4516_v55 }
 0x44d   :  { %v6163_v16 = vmax.bf16 %v6592_v2, %v2978_v21  ;;  %v6166_v52 = vmax.bf16 %v6592_v2, %v2980_v15 }
 0x44e   :  { %v6169_v61 = vmax.bf16 %v6592_v2, %v2979_v17  ;;  %v6172_v48 = vmax.bf16 %v6592_v2, %v2981_v32  ;;  %v2515_v22 = vpop.f32.mrb[116].mxu0  ;;  %v2901_v20 = vpop.f32.mrb[116].mxu1 }
 0x44f   :  { %6641 = vst [vmem:[#allocation39_spill] sm:$0xff] %v6166_v52  ;;  %v2517_v47 = vpop.f32.mrb[117].mxu0  ;;  %v2903_v27 = vpop.f32.mrb[117].mxu1  ;;  %v4455_v23 = vadd.f32 %v2515_v22, %v5903_v63  ;;  %v4519_v21 = vadd.f32 %v2901_v20, %v5906_v1 }
 0x450   :  { %6642 = vst [vmem:[#allocation38_spill] sm:$0xff] %v6172_v48  ;;  %v2519_v36 = vpop.f32.mrb[118].mxu0  ;;  %v2905_v19 = vpop.f32.mrb[118].mxu1  ;;  %v4456_v55 = vadd.f32 %v2517_v47, %v5909_v18  ;;  %v4520_v54 = vadd.f32 %v2903_v27, %v5912_v34 }
 0x451   :  { %v4457_v9 = vadd.f32 %v2519_v36, %v5903_v63  ;;  %v4521_v15 = vadd.f32 %v2905_v19, %v5906_v1  ;;  %v2521_v58 = vpop.f32.mrb[119].mxu0  ;;  %v2907_v17 = vpop.f32.mrb[119].mxu1 }
 0x452   :  { %v4458_v53 = vadd.f32 %v2521_v58, %v5909_v18  ;;  %v4522_v32 = vadd.f32 %v2907_v17, %v5912_v34 }
 0x453   :  { %v2982_v52 = vpack.c.bf16 %v4457_v9, %v4455_v23  ;;  %v2984_v48 = vpack.c.bf16 %v4521_v15, %v4519_v21 }
 0x454   :  { %v2983_v42 = vpack.c.bf16 %v4458_v53, %v4456_v55  ;;  %v2985_v22 = vpack.c.bf16 %v4522_v32, %v4520_v54 }
 0x455   :  { %v6183_v20 = vmax.bf16 %v6592_v2, %v2982_v52  ;;  %v6186_v36 = vmax.bf16 %v6592_v2, %v2984_v48 }
 0x456   :  { %v6189_v19 = vmax.bf16 %v6592_v2, %v2983_v42  ;;  %v6192_v47 = vmax.bf16 %v6592_v2, %v2985_v22  ;;  %v2525_v27 = vpop.f32.mrb[120].mxu0  ;;  %v2911_v58 = vpop.f32.mrb[120].mxu1 }
 0x457   :  { %6643 = vst [vmem:[#allocation41_spill] sm:$0xff] %v6186_v36  ;;  %v2527_v57 = vpop.f32.mrb[121].mxu0  ;;  %v2913_v17 = vpop.f32.mrb[121].mxu1  ;;  %v4459_v9 = vadd.f32 %v2525_v27, %v5903_v63  ;;  %v4523_v52 = vadd.f32 %v2911_v58, %v5906_v1 }
 0x458   :  { %6644 = vst [vmem:[#allocation40_spill] sm:$0xff] %v6192_v47  ;;  %v2529_v23 = vpop.f32.mrb[122].mxu0  ;;  %v2915_v21 = vpop.f32.mrb[122].mxu1  ;;  %v4460_v54 = vadd.f32 %v2527_v57, %v5909_v18  ;;  %v4524_v53 = vadd.f32 %v2913_v17, %v5912_v34 }
 0x459   :  { %v4461_v15 = vadd.f32 %v2529_v23, %v5903_v63  ;;  %v4525_v48 = vadd.f32 %v2915_v21, %v5906_v1  ;;  %v2531_v55 = vpop.f32.mrb[123].mxu0  ;;  %v2917_v42 = vpop.f32.mrb[123].mxu1 }
 0x45a   :  { %v4462_v32 = vadd.f32 %v2531_v55, %v5909_v18  ;;  %v4526_v22 = vadd.f32 %v2917_v42, %v5912_v34 }
 0x45b   :  { %v2986_v36 = vpack.c.bf16 %v4461_v15, %v4459_v9  ;;  %v2988_v47 = vpack.c.bf16 %v4525_v48, %v4523_v52 }
 0x45c   :  { %v2987_v25 = vpack.c.bf16 %v4462_v32, %v4460_v54  ;;  %v2989_v27 = vpack.c.bf16 %v4526_v22, %v4524_v53 }
 0x45d   :  { %v6203_v58 = vmax.bf16 %v6592_v2, %v2986_v36  ;;  %v6206_v23 = vmax.bf16 %v6592_v2, %v2988_v47 }
 0x45e   :  { %v6209_v21 = vmax.bf16 %v6592_v2, %v2987_v25  ;;  %v6212_v57 = vmax.bf16 %v6592_v2, %v2989_v27  ;;  %v2535_v17 = vpop.f32.mrb[124].mxu0  ;;  %v2921_v55 = vpop.f32.mrb[124].mxu1 }
 0x45f   :  { %6645 = vst [vmem:[#allocation43_spill] sm:$0xff] %v6206_v23  ;;  %v2537_v45 = vpop.f32.mrb[125].mxu0  ;;  %v2923_v42 = vpop.f32.mrb[125].mxu1  ;;  %v4463_v15 = vadd.f32 %v2535_v17, %v5903_v63  ;;  %v4527_v36 = vadd.f32 %v2921_v55, %v5906_v1 }
 0x460   :  { %6646 = vst [vmem:[#allocation42_spill] sm:$0xff] %v6212_v57  ;;  %v2539_v9 = vpop.f32.mrb[126].mxu0  ;;  %v2925_v52 = vpop.f32.mrb[126].mxu1  ;;  %v4464_v53 = vadd.f32 %v2537_v45, %v5909_v18  ;;  %v4528_v32 = vadd.f32 %v2923_v42, %v5912_v34 }
 0x461   :  { %v4465_v48 = vadd.f32 %v2539_v9, %v5903_v63  ;;  %v4529_v47 = vadd.f32 %v2925_v52, %v5906_v1  ;;  %v2541_v54 = vpop.f32.mrb[127].mxu0  ;;  %v2927_v25 = vpop.f32.mrb[127].mxu1 }
 0x462   :  { %v4466_v22 = vadd.f32 %v2541_v54, %v5909_v18  ;;  %v4530_v27 = vadd.f32 %v2927_v25, %v5912_v34 }
 0x463   :  { %v2990_v23 = vpack.c.bf16 %v4465_v48, %v4463_v15  ;;  %v2992_v57 = vpack.c.bf16 %v4529_v47, %v4527_v36 }
 0x464   :  { %v2991_v38 = vpack.c.bf16 %v4466_v22, %v4464_v53  ;;  %v2993_v17 = vpack.c.bf16 %v4530_v27, %v4528_v32 }
 0x465   :  { %v6223_v55 = vmax.bf16 %v6592_v2, %v2990_v23  ;;  %v6226_v63 = vmax.bf16 %v6592_v2, %v2992_v57 }
 0x466   :  { %v6229_v1 = vmax.bf16 %v6592_v2, %v2991_v38  ;;  %v6232_v45 = vmax.bf16 %v6592_v2, %v2993_v17 }
 0x467   :  { %5325 = dma.done.wait [#allocation4 + $0x1], 16384 }
 0x468   :  { %5326 = vsyncadd [#allocation4 + $0x1], 4294950912  ;;  %3242 = vmatprep.mubr.bf16.mxu0 %v5929_v26  ;;  %3628 = vmatprep.mubr.bf16.mxu1 %v5929_v26  ;;  %v3061_v18 = vld [vmem:[#allocation3 + $0x8] sm:$0xff]  ;;  %v3063_v34 = vld [vmem:[#allocation3 + $0x18] sm:$0xff] }
 0x469   :  { %v3060_v42 = vld [vmem:[#allocation3] sm:$0xff]  ;;  %3210 = vmatprep.subr.bf16.mxu0 %v3061_v18  ;;  %3596 = vmatprep.subr.bf16.mxu1 %v3063_v34  ;;  %v3062_v23 = vld [vmem:[#allocation3 + $0x10] sm:$0xff]  ;;  %v3065_v57 = vld [vmem:[#allocation3 + $0x28] sm:$0xff] }
 0x46a   :  { %v3067_v9 = vld [vmem:[#allocation3 + $0x38] sm:$0xff]  ;;  %3211 = vmatpush1.bf16.msra.mxu0 %v3060_v42  ;;  %3597 = vmatpush1.bf16.msra.mxu1 %v3062_v23  ;;  %v3064_v2 = vld [vmem:[#allocation3 + $0x20] sm:$0xff]  ;;  %v3066_v38 = vld [vmem:[#allocation3 + $0x30] sm:$0xff] }
 0x46b   :  { %3212 = vmatprep.subr.bf16.mxu0 %v3065_v57  ;;  %3598 = vmatprep.subr.bf16.mxu1 %v3067_v9  ;;  %v3069_v52 = vld [vmem:[#allocation3 + $0x48] sm:$0xff]  ;;  %v3071_v15 = vld [vmem:[#allocation3 + $0x58] sm:$0xff]  ;;  %v3068_v26 = vld [vmem:[#allocation3 + $0x40] sm:$0xff] }
 0x46c   :  { %v3070_v36 = vld [vmem:[#allocation3 + $0x50] sm:$0xff]  ;;  %v3073_v48 = vld [vmem:[#allocation3 + $0x68] sm:$0xff]  ;;  %v3075_v47 = vld [vmem:[#allocation3 + $0x78] sm:$0xff] }
 0x46d   :  { %v3072_v54 = vld [vmem:[#allocation3 + $0x60] sm:$0xff]  ;;  %v3074_v25 = vld [vmem:[#allocation3 + $0x70] sm:$0xff]  ;;  %v3077_v53 = vld [vmem:[#allocation3 + $0x88] sm:$0xff] }
 0x46e   :  { %3213 = vmatpush1.bf16.msra.mxu0 %v3064_v2  ;;  %3599 = vmatpush1.bf16.msra.mxu1 %v3066_v38  ;;  %v3079_v32 = vld [vmem:[#allocation3 + $0x98] sm:$0xff]  ;;  %v3076_v22 = vld [vmem:[#allocation3 + $0x80] sm:$0xff]  ;;  %v3078_v27 = vld [vmem:[#allocation3 + $0x90] sm:$0xff] }
 0x46f   :  { %3214 = vmatprep.subr.bf16.mxu0 %v3069_v52  ;;  %3600 = vmatprep.subr.bf16.mxu1 %v3071_v15  ;;  %v3081_v17 = vld [vmem:[#allocation3 + $0xa8] sm:$0xff]  ;;  %v3083_v18 = vld [vmem:[#allocation3 + $0xb8] sm:$0xff]  ;;  %v3080_v34 = vld [vmem:[#allocation3 + $0xa0] sm:$0xff] }
 0x470   :  { %v3082_v42 = vld [vmem:[#allocation3 + $0xb0] sm:$0xff]  ;;  %v3085_v23 = vld [vmem:[#allocation3 + $0xc8] sm:$0xff]  ;;  %v3087_v57 = vld [vmem:[#allocation3 + $0xd8] sm:$0xff] }
 0x471   :  { %v3084_v9 = vld [vmem:[#allocation3 + $0xc0] sm:$0xff]  ;;  %v3086_v2 = vld [vmem:[#allocation3 + $0xd0] sm:$0xff]  ;;  %v3089_v38 = vld [vmem:[#allocation3 + $0xe8] sm:$0xff] }
 0x472   :  { %3215 = vmatpush1.bf16.msra.mxu0 %v3068_v26  ;;  %3601 = vmatpush1.bf16.msra.mxu1 %v3070_v36  ;;  %v3091_v52 = vld [vmem:[#allocation3 + $0xf8] sm:$0xff]  ;;  %v3088_v15 = vld [vmem:[#allocation3 + $0xe0] sm:$0xff]  ;;  %v3090_v26 = vld [vmem:[#allocation3 + $0xf0] sm:$0xff] }
 0x473   :  { %3216 = vmatprep.subr.bf16.mxu0 %v3073_v48  ;;  %3602 = vmatprep.subr.bf16.mxu1 %v3075_v47  ;;  %v3093_v36 = vld [vmem:[#allocation3 + $0x108] sm:$0xff]  ;;  %v3095_v48 = vld [vmem:[#allocation3 + $0x118] sm:$0xff]  ;;  %v3092_v47 = vld [vmem:[#allocation3 + $0x100] sm:$0xff] }
 0x476   :  { %3217 = vmatpush1.bf16.msra.mxu0 %v3072_v54  ;;  %3603 = vmatpush1.bf16.msra.mxu1 %v3074_v25  ;;  %v3094_v54 = vld [vmem:[#allocation3 + $0x110] sm:$0xff]  ;;  %v3097_v25 = vld [vmem:[#allocation3 + $0x128] sm:$0xff] }
 0x477   :  { %3218 = vmatprep.subr.bf16.mxu0 %v3077_v53  ;;  %3604 = vmatprep.subr.bf16.mxu1 %v3079_v32  ;;  %v3099_v53 = vld [vmem:[#allocation3 + $0x138] sm:$0xff]  ;;  %v3096_v32 = vld [vmem:[#allocation3 + $0x120] sm:$0xff] }
 0x47a   :  { %3219 = vmatpush1.bf16.msra.mxu0 %v3076_v22  ;;  %3605 = vmatpush1.bf16.msra.mxu1 %v3078_v27  ;;  %v3098_v22 = vld [vmem:[#allocation3 + $0x130] sm:$0xff]  ;;  %v3101_v27 = vld [vmem:[#allocation3 + $0x148] sm:$0xff] }
 0x47b   :  { %3220 = vmatprep.subr.bf16.mxu0 %v3081_v17  ;;  %3606 = vmatprep.subr.bf16.mxu1 %v3083_v18  ;;  %v3103_v17 = vld [vmem:[#allocation3 + $0x158] sm:$0xff]  ;;  %v3100_v18 = vld [vmem:[#allocation3 + $0x140] sm:$0xff] }
 0x47e   :  { %3221 = vmatpush1.bf16.msra.mxu0 %v3080_v34  ;;  %3607 = vmatpush1.bf16.msra.mxu1 %v3082_v42  ;;  %v3102_v34 = vld [vmem:[#allocation3 + $0x150] sm:$0xff]  ;;  %v3105_v42 = vld [vmem:[#allocation3 + $0x168] sm:$0xff] }
 0x47f   :  { %3222 = vmatprep.subr.bf16.mxu0 %v3085_v23  ;;  %3608 = vmatprep.subr.bf16.mxu1 %v3087_v57  ;;  %v3107_v23 = vld [vmem:[#allocation3 + $0x178] sm:$0xff]  ;;  %v3104_v57 = vld [vmem:[#allocation3 + $0x160] sm:$0xff] }
 0x482   :  { %3223 = vmatpush1.bf16.msra.mxu0 %v3084_v9  ;;  %3609 = vmatpush1.bf16.msra.mxu1 %v3086_v2  ;;  %v3106_v9 = vld [vmem:[#allocation3 + $0x170] sm:$0xff]  ;;  %v3109_v2 = vld [vmem:[#allocation3 + $0x188] sm:$0xff] }
 0x483   :  { %3224 = vmatprep.subr.bf16.mxu0 %v3089_v38  ;;  %3610 = vmatprep.subr.bf16.mxu1 %v3091_v52  ;;  %v3111_v38 = vld [vmem:[#allocation3 + $0x198] sm:$0xff]  ;;  %v3108_v52 = vld [vmem:[#allocation3 + $0x180] sm:$0xff] }
 0x486   :  { %3225 = vmatpush1.bf16.msra.mxu0 %v3088_v15  ;;  %3611 = vmatpush1.bf16.msra.mxu1 %v3090_v26  ;;  %v3110_v15 = vld [vmem:[#allocation3 + $0x190] sm:$0xff]  ;;  %v3113_v26 = vld [vmem:[#allocation3 + $0x1a8] sm:$0xff] }
 0x487   :  { %3226 = vmatprep.subr.bf16.mxu0 %v3093_v36  ;;  %3612 = vmatprep.subr.bf16.mxu1 %v3095_v48  ;;  %v3115_v36 = vld [vmem:[#allocation3 + $0x1b8] sm:$0xff]  ;;  %v3112_v48 = vld [vmem:[#allocation3 + $0x1a0] sm:$0xff] }
 0x48a   :  { %3227 = vmatpush1.bf16.msra.mxu0 %v3092_v47  ;;  %3613 = vmatpush1.bf16.msra.mxu1 %v3094_v54  ;;  %v3114_v47 = vld [vmem:[#allocation3 + $0x1b0] sm:$0xff]  ;;  %v3117_v54 = vld [vmem:[#allocation3 + $0x1c8] sm:$0xff] }
 0x48b   :  { %3228 = vmatprep.subr.bf16.mxu0 %v3097_v25  ;;  %3614 = vmatprep.subr.bf16.mxu1 %v3099_v53  ;;  %v3119_v25 = vld [vmem:[#allocation3 + $0x1d8] sm:$0xff]  ;;  %v3116_v53 = vld [vmem:[#allocation3 + $0x1c0] sm:$0xff] }
 0x48e   :  { %3229 = vmatpush1.bf16.msra.mxu0 %v3096_v32  ;;  %3615 = vmatpush1.bf16.msra.mxu1 %v3098_v22  ;;  %v3118_v32 = vld [vmem:[#allocation3 + $0x1d0] sm:$0xff]  ;;  %v3121_v22 = vld [vmem:[#allocation3 + $0x1e8] sm:$0xff] }
 0x48f   :  { %3230 = vmatprep.subr.bf16.mxu0 %v3101_v27  ;;  %3616 = vmatprep.subr.bf16.mxu1 %v3103_v17  ;;  %v3123_v27 = vld [vmem:[#allocation3 + $0x1f8] sm:$0xff]  ;;  %v3120_v17 = vld [vmem:[#allocation3 + $0x1e0] sm:$0xff] }
 0x492   :  { %3231 = vmatpush1.bf16.msra.mxu0 %v3100_v18  ;;  %3617 = vmatpush1.bf16.msra.mxu1 %v3102_v34  ;;  %v3122_v18 = vld [vmem:[#allocation3 + $0x1f0] sm:$0xff]  ;;  %v3125_v34 = vld [vmem:[#allocation3 + $0x208] sm:$0xff] }
 0x493   :  { %3232 = vmatprep.subr.bf16.mxu0 %v3105_v42  ;;  %3618 = vmatprep.subr.bf16.mxu1 %v3107_v23  ;;  %v3127_v42 = vld [vmem:[#allocation3 + $0x218] sm:$0xff]  ;;  %v3124_v23 = vld [vmem:[#allocation3 + $0x200] sm:$0xff] }
 0x496   :  { %3233 = vmatpush1.bf16.msra.mxu0 %v3104_v57  ;;  %3619 = vmatpush1.bf16.msra.mxu1 %v3106_v9  ;;  %v3126_v57 = vld [vmem:[#allocation3 + $0x210] sm:$0xff]  ;;  %v3129_v9 = vld [vmem:[#allocation3 + $0x228] sm:$0xff] }
 0x497   :  { %3234 = vmatprep.subr.bf16.mxu0 %v3109_v2  ;;  %3620 = vmatprep.subr.bf16.mxu1 %v3111_v38  ;;  %v3131_v2 = vld [vmem:[#allocation3 + $0x238] sm:$0xff]  ;;  %v3128_v38 = vld [vmem:[#allocation3 + $0x220] sm:$0xff] }
 0x49a   :  { %3235 = vmatpush1.bf16.msra.mxu0 %v3108_v52  ;;  %3621 = vmatpush1.bf16.msra.mxu1 %v3110_v15  ;;  %v3130_v52 = vld [vmem:[#allocation3 + $0x230] sm:$0xff]  ;;  %v3133_v15 = vld [vmem:[#allocation3 + $0x248] sm:$0xff] }
 0x49b   :  { %3236 = vmatprep.subr.bf16.mxu0 %v3113_v26  ;;  %3622 = vmatprep.subr.bf16.mxu1 %v3115_v36  ;;  %v3135_v26 = vld [vmem:[#allocation3 + $0x258] sm:$0xff]  ;;  %v3132_v36 = vld [vmem:[#allocation3 + $0x240] sm:$0xff] }
 0x49e   :  { %3237 = vmatpush1.bf16.msra.mxu0 %v3112_v48  ;;  %3623 = vmatpush1.bf16.msra.mxu1 %v3114_v47  ;;  %v3137_v48 = vld [vmem:[#allocation3 + $0x268] sm:$0xff]  ;;  %v3139_v47 = vld [vmem:[#allocation3 + $0x278] sm:$0xff] }
 0x49f   :  { %3238 = vmatprep.subr.bf16.mxu0 %v3117_v54  ;;  %3624 = vmatprep.subr.bf16.mxu1 %v3119_v25  ;;  %v3138_v54 = vld [vmem:[#allocation3 + $0x270] sm:$0xff]  ;;  %v3141_v25 = vld [vmem:[#allocation3 + $0x288] sm:$0xff] }
 0x4a2   :  { %3239 = vmatpush1.bf16.msra.mxu0 %v3116_v53  ;;  %3625 = vmatpush1.bf16.msra.mxu1 %v3118_v32  ;;  %v3143_v53 = vld [vmem:[#allocation3 + $0x298] sm:$0xff]  ;;  %v3140_v32 = vld [vmem:[#allocation3 + $0x280] sm:$0xff] }
 0x4a3   :  { %3240 = vmatprep.subr.bf16.mxu0 %v3121_v22  ;;  %3626 = vmatprep.subr.bf16.mxu1 %v3123_v27  ;;  %v3145_v22 = vld [vmem:[#allocation3 + $0x2a8] sm:$0xff]  ;;  %v3144_v27 = vld [vmem:[#allocation3 + $0x2a0] sm:$0xff] }
 0x4a6   :  { %3241 = vmatpush1.bf16.msra.mxu0 %v3120_v17  ;;  %3627 = vmatpush1.bf16.msra.mxu1 %v3122_v18  ;;  %v3146_v17 = vld [vmem:[#allocation3 + $0x2b0] sm:$0xff]  ;;  %v3149_v18 = vld [vmem:[#allocation3 + $0x2c8] sm:$0xff] }
 0x4a7   :  { %3403 = vmatprep.subr.bf16.mxu0 %v3125_v34  ;;  %3789 = vmatprep.subr.bf16.mxu1 %v3127_v42  ;;  %v3151_v34 = vld [vmem:[#allocation3 + $0x2d8] sm:$0xff]  ;;  %v3148_v42 = vld [vmem:[#allocation3 + $0x2c0] sm:$0xff] }
 0x4a9   :  { %3243 = vmatmul.mubr.bf16.vlgmr.msra.gmra.mrb[128].mxu0 %v5923_v12  ;;  %3629 = vmatmul.mubr.bf16.vlgmr.msra.gmra.mrb[128].mxu1 %v5923_v12  ;;  %v3134_v12 = vld [vmem:[#allocation3 + $0x250] sm:$0xff] }
 0x4aa   :  { %3404 = vmatpush1.bf16.msra.mxu0 %v3124_v23  ;;  %3790 = vmatpush1.bf16.msra.mxu1 %v3126_v57  ;;  %v3153_v23 = vld [vmem:[#allocation3 + $0x2e8] sm:$0xff]  ;;  %v3152_v57 = vld [vmem:[#allocation3 + $0x2e0] sm:$0xff] }
 0x4ab   :  { %3252 = vmatprep.mubr.bf16.mxu0 %v5949_v39  ;;  %3638 = vmatprep.mubr.bf16.mxu1 %v5949_v39  ;;  %v3136_v39 = vld [vmem:[#allocation3 + $0x260] sm:$0xff] }
 0x4ac   :  { %3405 = vmatprep.subr.bf16.mxu0 %v3129_v9  ;;  %3791 = vmatprep.subr.bf16.mxu1 %v3131_v2  ;;  %v3154_v9 = vld [vmem:[#allocation3 + $0x2f0] sm:$0xff]  ;;  %v3157_v2 = vld [vmem:[#allocation3 + $0x308] sm:$0xff] }
 0x4ae   :  { %3406 = vmatpush1.bf16.msra.mxu0 %v3128_v38  ;;  %3792 = vmatpush1.bf16.msra.mxu1 %v3130_v52  ;;  %v3159_v38 = vld [vmem:[#allocation3 + $0x318] sm:$0xff]  ;;  %v3156_v52 = vld [vmem:[#allocation3 + $0x300] sm:$0xff] }
 0x4af   :  { %3407 = vmatprep.subr.bf16.mxu0 %v3133_v15  ;;  %3793 = vmatprep.subr.bf16.mxu1 %v3135_v26  ;;  %v3161_v15 = vld [vmem:[#allocation3 + $0x328] sm:$0xff]  ;;  %v3160_v26 = vld [vmem:[#allocation3 + $0x320] sm:$0xff] }
 0x4b1   :  { %3253 = vmatmul.mubr.bf16.gmra.mrb[132].mxu0 %v5943_v40  ;;  %3639 = vmatmul.mubr.bf16.gmra.mrb[132].mxu1 %v5943_v40  ;;  %v3142_v40 = vld [vmem:[#allocation3 + $0x290] sm:$0xff] }
 0x4b2   :  { %3262 = vmatprep.mubr.bf16.mxu0 %v5969_v10  ;;  %3648 = vmatprep.mubr.bf16.mxu1 %v5969_v10  ;;  %v3147_v10 = vld [vmem:[#allocation3 + $0x2b8] sm:$0xff] }
 0x4b3   :  { %3408 = vmatpush1.bf16.msra.mxu0 %v3132_v36  ;;  %3794 = vmatpush1.bf16.msra.mxu1 %v3134_v12  ;;  %v3162_v36 = vld [vmem:[#allocation3 + $0x330] sm:$0xff]  ;;  %v3165_v12 = vld [vmem:[#allocation3 + $0x348] sm:$0xff] }
 0x4b4   :  { %3409 = vmatprep.subr.bf16.mxu0 %v3137_v48  ;;  %3795 = vmatprep.subr.bf16.mxu1 %v3139_v47  ;;  %v3167_v48 = vld [vmem:[#allocation3 + $0x358] sm:$0xff]  ;;  %v3164_v47 = vld [vmem:[#allocation3 + $0x340] sm:$0xff] }
 0x4b7   :  { %3410 = vmatpush1.bf16.msra.mxu0 %v3136_v39  ;;  %3796 = vmatpush1.bf16.msra.mxu1 %v3138_v54  ;;  %v3169_v39 = vld [vmem:[#allocation3 + $0x368] sm:$0xff]  ;;  %v3168_v54 = vld [vmem:[#allocation3 + $0x360] sm:$0xff] }
 0x4b8   :  { %3411 = vmatprep.subr.bf16.mxu0 %v3141_v25  ;;  %3797 = vmatprep.subr.bf16.mxu1 %v3143_v53  ;;  %v3170_v25 = vld [vmem:[#allocation3 + $0x370] sm:$0xff]  ;;  %v3173_v53 = vld [vmem:[#allocation3 + $0x388] sm:$0xff] }
 0x4b9   :  { %3263 = vmatmul.mubr.bf16.gmra.mrb[136].mxu0 %v5963_v29  ;;  %3649 = vmatmul.mubr.bf16.gmra.mrb[136].mxu1 %v5963_v29  ;;  %v3150_v29 = vld [vmem:[#allocation3 + $0x2d0] sm:$0xff] }
 0x4ba   :  { %3272 = vmatprep.mubr.bf16.mxu0 %v5989_v37  ;;  %3658 = vmatprep.mubr.bf16.mxu1 %v5989_v37  ;;  %v3155_v37 = vld [vmem:[#allocation3 + $0x2f8] sm:$0xff] }
 0x4bb   :  { %3412 = vmatpush1.bf16.msra.mxu0 %v3140_v32  ;;  %3798 = vmatpush1.bf16.msra.mxu1 %v3142_v40  ;;  %v3175_v32 = vld [vmem:[#allocation3 + $0x398] sm:$0xff]  ;;  %v3172_v40 = vld [vmem:[#allocation3 + $0x380] sm:$0xff] }
 0x4bc   :  { %3413 = vmatprep.subr.bf16.mxu0 %v3145_v22  ;;  %3799 = vmatprep.subr.bf16.mxu1 %v3147_v10  ;;  %v3177_v22 = vld [vmem:[#allocation3 + $0x3a8] sm:$0xff]  ;;  %v3176_v10 = vld [vmem:[#allocation3 + $0x3a0] sm:$0xff] }
 0x4bf   :  { %3414 = vmatpush1.bf16.msra.mxu0 %v3144_v27  ;;  %3800 = vmatpush1.bf16.msra.mxu1 %v3146_v17  ;;  %v3178_v27 = vld [vmem:[#allocation3 + $0x3b0] sm:$0xff]  ;;  %v3181_v17 = vld [vmem:[#allocation3 + $0x3c8] sm:$0xff] }
 0x4c0   :  { %3415 = vmatprep.subr.bf16.mxu0 %v3149_v18  ;;  %3801 = vmatprep.subr.bf16.mxu1 %v3151_v34  ;;  %v3183_v18 = vld [vmem:[#allocation3 + $0x3d8] sm:$0xff]  ;;  %v3180_v34 = vld [vmem:[#allocation3 + $0x3c0] sm:$0xff] }
 0x4c1   :  { %3273 = vmatmul.mubr.bf16.gmra.mrb[140].mxu0 %v5983_v60  ;;  %3659 = vmatmul.mubr.bf16.gmra.mrb[140].mxu1 %v5983_v60  ;;  %v3158_v60 = vld [vmem:[#allocation3 + $0x310] sm:$0xff] }
 0x4c2   :  { %3282 = vmatprep.mubr.bf16.mxu0 %v6009_v43  ;;  %3668 = vmatprep.mubr.bf16.mxu1 %v6009_v43  ;;  %v3163_v43 = vld [vmem:[#allocation3 + $0x338] sm:$0xff] }
 0x4c3   :  { %3416 = vmatpush1.bf16.msra.mxu0 %v3148_v42  ;;  %3802 = vmatpush1.bf16.msra.mxu1 %v3150_v29  ;;  %v3185_v42 = vld [vmem:[#allocation3 + $0x3e8] sm:$0xff]  ;;  %v3184_v29 = vld [vmem:[#allocation3 + $0x3e0] sm:$0xff] }
 0x4c4   :  { %3417 = vmatprep.subr.bf16.mxu0 %v3153_v23  ;;  %3803 = vmatprep.subr.bf16.mxu1 %v3155_v37  ;;  %v3186_v23 = vld [vmem:[#allocation3 + $0x3f0] sm:$0xff]  ;;  %v6670_v37 = vld [vmem:[#allocation23_spill] sm:$0xff] }
 0x4c7   :  { %3418 = vmatpush1.bf16.msra.mxu0 %v3152_v57  ;;  %3804 = vmatpush1.bf16.msra.mxu1 %v3154_v9 }
 0x4c8   :  { %3419 = vmatprep.subr.bf16.mxu0 %v3157_v2  ;;  %3805 = vmatprep.subr.bf16.mxu1 %v3159_v38 }
 0x4c9   :  { %3283 = vmatmul.mubr.bf16.gmra.mrb[144].mxu0 %v6003_v11  ;;  %3669 = vmatmul.mubr.bf16.gmra.mrb[144].mxu1 %v6003_v11  ;;  %v3166_v11 = vld [vmem:[#allocation3 + $0x350] sm:$0xff] }
 0x4ca   :  { %3292 = vmatprep.mubr.bf16.mxu0 %v6029_v8  ;;  %3678 = vmatprep.mubr.bf16.mxu1 %v6029_v8  ;;  %v3171_v8 = vld [vmem:[#allocation3 + $0x378] sm:$0xff] }
 0x4cb   :  { %3420 = vmatpush1.bf16.msra.mxu0 %v3156_v52  ;;  %3806 = vmatpush1.bf16.msra.mxu1 %v3158_v60 }
 0x4cc   :  { %3421 = vmatprep.subr.bf16.mxu0 %v3161_v15  ;;  %3807 = vmatprep.subr.bf16.mxu1 %v3163_v43 }
 0x4cf   :  { %3422 = vmatpush1.bf16.msra.mxu0 %v3160_v26  ;;  %3808 = vmatpush1.bf16.msra.mxu1 %v3162_v36 }
 0x4d0   :  { %3423 = vmatprep.subr.bf16.mxu0 %v3165_v12  ;;  %3809 = vmatprep.subr.bf16.mxu1 %v3167_v48 }
 0x4d1   :  { %3293 = vmatmul.mubr.bf16.gmra.mrb[148].mxu0 %v6023_v31  ;;  %3679 = vmatmul.mubr.bf16.gmra.mrb[148].mxu1 %v6023_v31  ;;  %v3174_v31 = vld [vmem:[#allocation3 + $0x390] sm:$0xff] }
 0x4d2   :  { %3302 = vmatprep.mubr.bf16.mxu0 %v6049_v59  ;;  %3688 = vmatprep.mubr.bf16.mxu1 %v6049_v59  ;;  %v3179_v59 = vld [vmem:[#allocation3 + $0x3b8] sm:$0xff] }
 0x4d3   :  { %3424 = vmatpush1.bf16.msra.mxu0 %v3164_v47  ;;  %3810 = vmatpush1.bf16.msra.mxu1 %v3166_v11 }
 0x4d4   :  { %3425 = vmatprep.subr.bf16.mxu0 %v3169_v39  ;;  %3811 = vmatprep.subr.bf16.mxu1 %v3171_v8 }
 0x4d7   :  { %3426 = vmatpush1.bf16.msra.mxu0 %v3168_v54  ;;  %3812 = vmatpush1.bf16.msra.mxu1 %v3170_v25 }
 0x4d8   :  { %3427 = vmatprep.subr.bf16.mxu0 %v3173_v53  ;;  %3813 = vmatprep.subr.bf16.mxu1 %v3175_v32 }
 0x4d9   :  { %3303 = vmatmul.mubr.bf16.gmra.mrb[152].mxu0 %v6043_v35  ;;  %3689 = vmatmul.mubr.bf16.gmra.mrb[152].mxu1 %v6043_v35  ;;  %v3182_v35 = vld [vmem:[#allocation3 + $0x3d0] sm:$0xff] }
 0x4da   :  { %3312 = vmatprep.mubr.bf16.mxu0 %v6069_v24  ;;  %3698 = vmatprep.mubr.bf16.mxu1 %v6069_v24  ;;  %v3187_v24 = vld [vmem:[#allocation3 + $0x3f8] sm:$0xff] }
 0x4db   :  { %3428 = vmatpush1.bf16.msra.mxu0 %v3172_v40  ;;  %3814 = vmatpush1.bf16.msra.mxu1 %v3174_v31 }
 0x4dc   :  { %3429 = vmatprep.subr.bf16.mxu0 %v3177_v22  ;;  %3815 = vmatprep.subr.bf16.mxu1 %v3179_v59 }
 0x4df   :  { %3430 = vmatpush1.bf16.msra.mxu0 %v3176_v10  ;;  %3816 = vmatpush1.bf16.msra.mxu1 %v3178_v27 }
 0x4e0   :  { %3431 = vmatprep.subr.bf16.mxu0 %v3181_v17  ;;  %3817 = vmatprep.subr.bf16.mxu1 %v3183_v18 }
 0x4e1   :  { %3313 = vmatmul.mubr.bf16.gmra.mrb[156].mxu0 %v6063_v13  ;;  %3699 = vmatmul.mubr.bf16.gmra.mrb[156].mxu1 %v6063_v13  ;;  %v6657_v13 = vld [vmem:[#allocation34_spill] sm:$0xff] }
 0x4e2   :  { %3322 = vmatprep.mubr.bf16.mxu0 %v6089_v6  ;;  %3708 = vmatprep.mubr.bf16.mxu1 %v6089_v6  ;;  %v6659_v6 = vld [vmem:[#allocation36_spill] sm:$0xff] }
 0x4e3   :  { %3432 = vmatpush1.bf16.msra.mxu0 %v3180_v34  ;;  %3818 = vmatpush1.bf16.msra.mxu1 %v3182_v35 }
 0x4e4   :  { %3433 = vmatprep.subr.bf16.mxu0 %v3185_v42  ;;  %3819 = vmatprep.subr.bf16.mxu1 %v3187_v24 }
 0x4e7   :  { %3434 = vmatpush1.bf16.msra.mxu0 %v3184_v29  ;;  %3820 = vmatpush1.bf16.msra.mxu1 %v3186_v23 }
 0x4e9   :  { %3323 = vmatmul.mubr.bf16.gmra.mrb[160].mxu0 %v6083_v44  ;;  %3709 = vmatmul.mubr.bf16.gmra.mrb[160].mxu1 %v6083_v44  ;;  %v6658_v44 = vld [vmem:[#allocation35_spill] sm:$0xff] }
 0x4ea   :  { %3332 = vmatprep.mubr.bf16.mxu0 %v6109_v0  ;;  %3718 = vmatprep.mubr.bf16.mxu1 %v6109_v0  ;;  %v6661_v0 = vld [vmem:[#allocation38_spill] sm:$0xff] }
 0x4f1   :  { %3333 = vmatmul.mubr.bf16.gmra.mrb[164].mxu0 %v6103_v33  ;;  %3719 = vmatmul.mubr.bf16.gmra.mrb[164].mxu1 %v6103_v33  ;;  %v6660_v33 = vld [vmem:[#allocation37_spill] sm:$0xff] }
 0x4f2   :  { %3342 = vmatprep.mubr.bf16.mxu0 %v6129_v14  ;;  %3728 = vmatprep.mubr.bf16.mxu1 %v6129_v14  ;;  %v6663_v14 = vld [vmem:[#allocation40_spill] sm:$0xff] }
 0x4f9   :  { %3343 = vmatmul.mubr.bf16.gmra.mrb[168].mxu0 %v6123_v41  ;;  %3729 = vmatmul.mubr.bf16.gmra.mrb[168].mxu1 %v6123_v41  ;;  %v6662_v41 = vld [vmem:[#allocation39_spill] sm:$0xff] }
 0x4fa   :  { %3352 = vmatprep.mubr.bf16.mxu0 %v6149_v7  ;;  %3738 = vmatprep.mubr.bf16.mxu1 %v6149_v7  ;;  %v6665_v7 = vld [vmem:[#allocation42_spill] sm:$0xff] }
 0x501   :  { %3353 = vmatmul.mubr.bf16.gmra.mrb[172].mxu0 %v6143_v50  ;;  %3739 = vmatmul.mubr.bf16.gmra.mrb[172].mxu1 %v6143_v50  ;;  %v6664_v50 = vld [vmem:[#allocation41_spill] sm:$0xff] }
 0x502   :  { %3362 = vmatprep.mubr.bf16.mxu0 %v6169_v61  ;;  %3748 = vmatprep.mubr.bf16.mxu1 %v6169_v61  ;;  %v3188_v61 = vld [vmem:[%s6526_s6] sm:$0xf]  ;;  %s5346_s6 = smov [#allocation10]  }
 0x503   :  { %v6375_v57 = vrot.slane %v3188_v61, %v6670_v37  ;;  %s4115_s26 = sshll.u32 %s5346_s6, 4  ;;  %s4116_s26 = int_to_ptr.vmem [resolvable:$true] %s4115_s26 }
 0x504   :  { %s5297_s27 = scalar_lea.vmem %s4116_s26, 16384  ;;  %p5302_p3 = scmp.lt.s32.totalorder %s4116_s26, %s4116_s26 }
 0x505   :  { %p5298_p2 = scmp.ne.s32.totalorder %s4116_s26, %s5297_s27  ;;  %p5303_p4 = scmp.lt.s32.totalorder %s5297_s27, %s5297_s27 }
 0x507   :  { %p5304_p5 = por %p5303_p4, %p5302_p3 }
 0x509   :  { %3363 = vmatmul.mubr.bf16.gmra.mrb[176].mxu0 %v6163_v16  ;;  %3749 = vmatmul.mubr.bf16.gmra.mrb[176].mxu1 %v6163_v16  ;;  %v6666_v16 = vld [vmem:[#allocation43_spill] sm:$0xff]  ;;  %p5305_p6 = pnand %p5304_p5, %p5298_p2 }
 0x50a   :  { %3372 = vmatprep.mubr.bf16.mxu0 %v6189_v19  ;;  %3758 = vmatprep.mubr.bf16.mxu1 %v6189_v19 }
 0x511   :  { %3373 = vmatmul.mubr.bf16.gmra.mrb[180].mxu0 %v6183_v20  ;;  %3759 = vmatmul.mubr.bf16.gmra.mrb[180].mxu1 %v6183_v20  ;;  %v6667_v20 = vld [vmem:[#allocation20_spill] sm:$0xff] }
 0x512   :  { %3382 = vmatprep.mubr.bf16.mxu0 %v6209_v21  ;;  %3768 = vmatprep.mubr.bf16.mxu1 %v6209_v21  ;;  %v6366_v19 = vrot.slane %v3188_v61, %v6667_v20 }
 0x519   :  { %3383 = vmatmul.mubr.bf16.gmra.mrb[184].mxu0 %v6203_v58  ;;  %3769 = vmatmul.mubr.bf16.gmra.mrb[184].mxu1 %v6203_v58  ;;  %v6668_v58 = vld [vmem:[#allocation21_spill] sm:$0xff] }
 0x51a   :  { %3392 = vmatprep.mubr.bf16.mxu0 %v6229_v1  ;;  %3778 = vmatprep.mubr.bf16.mxu1 %v6229_v1  ;;  %v6369_v21 = vrot.slane %v3188_v61, %v6668_v58 }
 0x521   :  { %3393 = vmatmul.mubr.bf16.gmra.mrb[188].mxu0 %v6223_v55  ;;  %3779 = vmatmul.mubr.bf16.gmra.mrb[188].mxu1 %v6223_v55  ;;  %v6669_v55 = vld [vmem:[#allocation22_spill] sm:$0xff] }
 0x522   :  { %3435 = vmatprep.mubr.bf16.mxu0 %v5932_v49  ;;  %3821 = vmatprep.mubr.bf16.mxu1 %v5932_v49  ;;  %v6648_v49 = vld [vmem:[#allocation25_spill] sm:$0xff]  ;;  %v6372_v1 = vrot.slane %v3188_v61, %v6669_v55 }
 0x529   :  { %3436 = vmatmul.mubr.bf16.vlgmr.msra.gmra.mrb[128].mxu0 %v5926_v4  ;;  %3822 = vmatmul.mubr.bf16.vlgmr.msra.gmra.mrb[128].mxu1 %v5926_v4  ;;  %v6647_v4 = vld [vmem:[#allocation24_spill] sm:$0xff] }
 0x52a   :  { %3445 = vmatprep.mubr.bf16.mxu0 %v5952_v46  ;;  %3831 = vmatprep.mubr.bf16.mxu1 %v5952_v46  ;;  %v6650_v46 = vld [vmem:[#allocation27_spill] sm:$0xff] }
 0x531   :  { %3446 = vmatmul.mubr.bf16.gmra.mrb[132].mxu0 %v5946_v28  ;;  %3832 = vmatmul.mubr.bf16.gmra.mrb[132].mxu1 %v5946_v28  ;;  %v6649_v28 = vld [vmem:[#allocation26_spill] sm:$0xff] }
 0x532   :  { %3455 = vmatprep.mubr.bf16.mxu0 %v5972_v51  ;;  %3841 = vmatprep.mubr.bf16.mxu1 %v5972_v51  ;;  %v6652_v51 = vld [vmem:[#allocation29_spill] sm:$0xff] }
 0x539   :  { %3456 = vmatmul.mubr.bf16.gmra.mrb[136].mxu0 %v5966_v3  ;;  %3842 = vmatmul.mubr.bf16.gmra.mrb[136].mxu1 %v5966_v3  ;;  %v6651_v3 = vld [vmem:[#allocation28_spill] sm:$0xff] }
 0x53a   :  { %3465 = vmatprep.mubr.bf16.mxu0 %v5992_v62  ;;  %3851 = vmatprep.mubr.bf16.mxu1 %v5992_v62  ;;  %v6654_v62 = vld [vmem:[#allocation31_spill] sm:$0xff] }
 0x541   :  { %3466 = vmatmul.mubr.bf16.gmra.mrb[140].mxu0 %v5986_v30  ;;  %3852 = vmatmul.mubr.bf16.gmra.mrb[140].mxu1 %v5986_v30  ;;  %v6653_v30 = vld [vmem:[#allocation30_spill] sm:$0xff] }
 0x542   :  { %3475 = vmatprep.mubr.bf16.mxu0 %v6012_v5  ;;  %3861 = vmatprep.mubr.bf16.mxu1 %v6012_v5  ;;  %v6656_v5 = vld [vmem:[#allocation33_spill] sm:$0xff] }
 0x549   :  { %3476 = vmatmul.mubr.bf16.gmra.mrb[144].mxu0 %v6006_v56  ;;  %3862 = vmatmul.mubr.bf16.gmra.mrb[144].mxu1 %v6006_v56  ;;  %v6655_v56 = vld [vmem:[#allocation32_spill] sm:$0xff] }
 0x54a   :  { %3485 = vmatprep.mubr.bf16.mxu0 %v6647_v4  ;;  %3871 = vmatprep.mubr.bf16.mxu1 %v6647_v4 }
 0x551   :  { %3486 = vmatmul.mubr.bf16.gmra.mrb[148].mxu0 %v6648_v49  ;;  %3872 = vmatmul.mubr.bf16.gmra.mrb[148].mxu1 %v6648_v49 }
 0x552   :  { %3495 = vmatprep.mubr.bf16.mxu0 %v6649_v28  ;;  %3881 = vmatprep.mubr.bf16.mxu1 %v6649_v28 }
 0x559   :  { %3496 = vmatmul.mubr.bf16.gmra.mrb[152].mxu0 %v6650_v46  ;;  %3882 = vmatmul.mubr.bf16.gmra.mrb[152].mxu1 %v6650_v46 }
 0x55a   :  { %3505 = vmatprep.mubr.bf16.mxu0 %v6651_v3  ;;  %3891 = vmatprep.mubr.bf16.mxu1 %v6651_v3 }
 0x561   :  { %3506 = vmatmul.mubr.bf16.gmra.mrb[156].mxu0 %v6652_v51  ;;  %3892 = vmatmul.mubr.bf16.gmra.mrb[156].mxu1 %v6652_v51 }
 0x562   :  { %3515 = vmatprep.mubr.bf16.mxu0 %v6653_v30  ;;  %3901 = vmatprep.mubr.bf16.mxu1 %v6653_v30 }
 0x569   :  { %3516 = vmatmul.mubr.bf16.gmra.mrb[160].mxu0 %v6654_v62  ;;  %3902 = vmatmul.mubr.bf16.gmra.mrb[160].mxu1 %v6654_v62 }
 0x56a   :  { %3525 = vmatprep.mubr.bf16.mxu0 %v6655_v56  ;;  %3911 = vmatprep.mubr.bf16.mxu1 %v6655_v56 }
 0x571   :  { %3526 = vmatmul.mubr.bf16.gmra.mrb[164].mxu0 %v6656_v5  ;;  %3912 = vmatmul.mubr.bf16.gmra.mrb[164].mxu1 %v6656_v5 }
 0x572   :  { %3535 = vmatprep.mubr.bf16.mxu0 %v6657_v13  ;;  %3921 = vmatprep.mubr.bf16.mxu1 %v6657_v13 }
 0x579   :  { %3536 = vmatmul.mubr.bf16.gmra.mrb[168].mxu0 %v6658_v44  ;;  %3922 = vmatmul.mubr.bf16.gmra.mrb[168].mxu1 %v6658_v44 }
 0x57a   :  { %3545 = vmatprep.mubr.bf16.mxu0 %v6659_v6  ;;  %3931 = vmatprep.mubr.bf16.mxu1 %v6659_v6 }
 0x581   :  { %3546 = vmatmul.mubr.bf16.gmra.mrb[172].mxu0 %v6660_v33  ;;  %3932 = vmatmul.mubr.bf16.gmra.mrb[172].mxu1 %v6660_v33 }
 0x582   :  { %3555 = vmatprep.mubr.bf16.mxu0 %v6661_v0  ;;  %3941 = vmatprep.mubr.bf16.mxu1 %v6661_v0 }
 0x589   :  { %3556 = vmatmul.mubr.bf16.gmra.mrb[176].mxu0 %v6662_v41  ;;  %3942 = vmatmul.mubr.bf16.gmra.mrb[176].mxu1 %v6662_v41 }
 0x58a   :  { %3565 = vmatprep.mubr.bf16.mxu0 %v6663_v14  ;;  %3951 = vmatprep.mubr.bf16.mxu1 %v6663_v14 }
 0x591   :  { %3566 = vmatmul.mubr.bf16.gmra.mrb[180].mxu0 %v6664_v50  ;;  %3952 = vmatmul.mubr.bf16.gmra.mrb[180].mxu1 %v6664_v50 }
 0x592   :  { %3575 = vmatprep.mubr.bf16.mxu0 %v6665_v7  ;;  %3961 = vmatprep.mubr.bf16.mxu1 %v6665_v7 }
 0x599   :  { %3576 = vmatmul.mubr.bf16.gmra.mrb[184].mxu0 %v6666_v16  ;;  %3962 = vmatmul.mubr.bf16.gmra.mrb[184].mxu1 %v6666_v16 }
 0x59a   :  { %3585 = vmatprep.mubr.bf16.mxu0 %v6232_v45  ;;  %3971 = vmatprep.mubr.bf16.mxu1 %v6232_v45 }
 0x5a1   :  { %3586 = vmatmul.mubr.bf16.gmra.mrb[188].mxu0 %v6226_v63  ;;  %3972 = vmatmul.mubr.bf16.gmra.mrb[188].mxu1 %v6226_v63 }
 0x5fc   :  { %v3437_v45 = vpop.f32.mrb[128].mxu0  ;;  %v3823_v9 = vpop.f32.mrb[128].mxu1 }
 0x5fd   :  { %v4531_v63 = vadd.f32 %v3437_v45, %v6366_v19  ;;  %v4595_v2 = vadd.f32 %v3823_v9, %v6369_v21  ;;  %v3439_v38 = vpop.f32.mrb[129].mxu0  ;;  %v3825_v52 = vpop.f32.mrb[129].mxu1 }
 0x5fe   :  { %v4532_v60 = vadd.f32 %v3439_v38, %v6372_v1  ;;  %v4596_v15 = vadd.f32 %v3825_v52, %v6375_v57  ;;  %v3441_v43 = vpop.f32.mrb[130].mxu0  ;;  %v3827_v26 = vpop.f32.mrb[130].mxu1 }
 0x5ff   :  { %3982 = vst [vmem:[#allocation10] sm:$0xff] %v4531_v63  ;;  %3984 = vst [vmem:[#allocation10 + $0x10] sm:$0xff] %v4595_v2  ;;  %v4533_v36 = vadd.f32 %v3441_v43, %v6366_v19  ;;  %v4597_v12 = vadd.f32 %v3827_v26, %v6369_v21  ;;  %v3443_v48 = vpop.f32.mrb[131].mxu0  ;;  %v3829_v47 = vpop.f32.mrb[131].mxu1 }
 0x600   :  { %3983 = vst [vmem:[#allocation10 + $0x8] sm:$0xff] %v4532_v60  ;;  %3985 = vst [vmem:[#allocation10 + $0x18] sm:$0xff] %v4596_v15  ;;  %v4534_v11 = vadd.f32 %v3443_v48, %v6372_v1  ;;  %v4598_v39 = vadd.f32 %v3829_v47, %v6375_v57 }
 0x601   :  { %3986 = vst [vmem:[#allocation10 + $0x20] sm:$0xff] %v4533_v36  ;;  %3988 = vst [vmem:[#allocation10 + $0x30] sm:$0xff] %v4597_v12 }
 0x602   :  { %3987 = vst [vmem:[#allocation10 + $0x28] sm:$0xff] %v4534_v11  ;;  %3989 = vst [vmem:[#allocation10 + $0x38] sm:$0xff] %v4598_v39 }
 0x604   :  { %v3447_v8 = vpop.f32.mrb[132].mxu0  ;;  %v3833_v54 = vpop.f32.mrb[132].mxu1 }
 0x605   :  { %v4535_v25 = vadd.f32 %v3447_v8, %v6366_v19  ;;  %v4599_v53 = vadd.f32 %v3833_v54, %v6369_v21  ;;  %v3449_v32 = vpop.f32.mrb[133].mxu0  ;;  %v3835_v40 = vpop.f32.mrb[133].mxu1 }
 0x606   :  { %v4536_v31 = vadd.f32 %v3449_v32, %v6372_v1  ;;  %v4600_v22 = vadd.f32 %v3835_v40, %v6375_v57  ;;  %v3451_v59 = vpop.f32.mrb[134].mxu0  ;;  %v3837_v10 = vpop.f32.mrb[134].mxu1 }
 0x607   :  { %3990 = vst [vmem:[#allocation10 + $0x40] sm:$0xff] %v4535_v25  ;;  %3992 = vst [vmem:[#allocation10 + $0x50] sm:$0xff] %v4599_v53  ;;  %v4537_v27 = vadd.f32 %v3451_v59, %v6366_v19  ;;  %v4601_v17 = vadd.f32 %v3837_v10, %v6369_v21  ;;  %v3453_v18 = vpop.f32.mrb[135].mxu0  ;;  %v3839_v34 = vpop.f32.mrb[135].mxu1 }
 0x608   :  { %3991 = vst [vmem:[#allocation10 + $0x48] sm:$0xff] %v4536_v31  ;;  %3993 = vst [vmem:[#allocation10 + $0x58] sm:$0xff] %v4600_v22  ;;  %v4538_v35 = vadd.f32 %v3453_v18, %v6372_v1  ;;  %v4602_v42 = vadd.f32 %v3839_v34, %v6375_v57 }
 0x609   :  { %3994 = vst [vmem:[#allocation10 + $0x60] sm:$0xff] %v4537_v27  ;;  %3996 = vst [vmem:[#allocation10 + $0x70] sm:$0xff] %v4601_v17 }
 0x60a   :  { %3995 = vst [vmem:[#allocation10 + $0x68] sm:$0xff] %v4538_v35  ;;  %3997 = vst [vmem:[#allocation10 + $0x78] sm:$0xff] %v4602_v42 }
 0x60c   :  { %v3457_v24 = vpop.f32.mrb[136].mxu0  ;;  %v3843_v29 = vpop.f32.mrb[136].mxu1 }
 0x60d   :  { %v4539_v23 = vadd.f32 %v3457_v24, %v6366_v19  ;;  %v4603_v4 = vadd.f32 %v3843_v29, %v6369_v21  ;;  %v3459_v49 = vpop.f32.mrb[137].mxu0  ;;  %v3845_v28 = vpop.f32.mrb[137].mxu1 }
 0x60e   :  { %v4540_v46 = vadd.f32 %v3459_v49, %v6372_v1  ;;  %v4604_v3 = vadd.f32 %v3845_v28, %v6375_v57  ;;  %v3461_v51 = vpop.f32.mrb[138].mxu0  ;;  %v3847_v30 = vpop.f32.mrb[138].mxu1 }
 0x60f   :  { %3998 = vst [vmem:[#allocation10 + $0x80] sm:$0xff] %v4539_v23  ;;  %4000 = vst [vmem:[#allocation10 + $0x90] sm:$0xff] %v4603_v4  ;;  %v4541_v62 = vadd.f32 %v3461_v51, %v6366_v19  ;;  %v4605_v56 = vadd.f32 %v3847_v30, %v6369_v21  ;;  %v3463_v5 = vpop.f32.mrb[139].mxu0  ;;  %v3849_v13 = vpop.f32.mrb[139].mxu1 }
 0x610   :  { %3999 = vst [vmem:[#allocation10 + $0x88] sm:$0xff] %v4540_v46  ;;  %4001 = vst [vmem:[#allocation10 + $0x98] sm:$0xff] %v4604_v3  ;;  %v4542_v44 = vadd.f32 %v3463_v5, %v6372_v1  ;;  %v4606_v6 = vadd.f32 %v3849_v13, %v6375_v57 }
 0x611   :  { %4002 = vst [vmem:[#allocation10 + $0xa0] sm:$0xff] %v4541_v62  ;;  %4004 = vst [vmem:[#allocation10 + $0xb0] sm:$0xff] %v4605_v56 }
 0x612   :  { %4003 = vst [vmem:[#allocation10 + $0xa8] sm:$0xff] %v4542_v44  ;;  %4005 = vst [vmem:[#allocation10 + $0xb8] sm:$0xff] %v4606_v6 }
 0x614   :  { %v3467_v33 = vpop.f32.mrb[140].mxu0  ;;  %v3853_v0 = vpop.f32.mrb[140].mxu1 }
 0x615   :  { %v4543_v41 = vadd.f32 %v3467_v33, %v6366_v19  ;;  %v4607_v14 = vadd.f32 %v3853_v0, %v6369_v21  ;;  %v3469_v50 = vpop.f32.mrb[141].mxu0  ;;  %v3855_v7 = vpop.f32.mrb[141].mxu1 }
 0x616   :  { %v4544_v16 = vadd.f32 %v3469_v50, %v6372_v1  ;;  %v4608_v61 = vadd.f32 %v3855_v7, %v6375_v57  ;;  %v3471_v20 = vpop.f32.mrb[142].mxu0  ;;  %v3857_v58 = vpop.f32.mrb[142].mxu1 }
 0x617   :  { %4006 = vst [vmem:[#allocation10 + $0xc0] sm:$0xff] %v4543_v41  ;;  %4008 = vst [vmem:[#allocation10 + $0xd0] sm:$0xff] %v4607_v14  ;;  %v4545_v55 = vadd.f32 %v3471_v20, %v6366_v19  ;;  %v4609_v37 = vadd.f32 %v3857_v58, %v6369_v21  ;;  %v3473_v45 = vpop.f32.mrb[143].mxu0  ;;  %v3859_v9 = vpop.f32.mrb[143].mxu1 }
 0x618   :  { %4007 = vst [vmem:[#allocation10 + $0xc8] sm:$0xff] %v4544_v16  ;;  %4009 = vst [vmem:[#allocation10 + $0xd8] sm:$0xff] %v4608_v61  ;;  %v4546_v63 = vadd.f32 %v3473_v45, %v6372_v1  ;;  %v4610_v2 = vadd.f32 %v3859_v9, %v6375_v57 }
 0x619   :  { %4010 = vst [vmem:[#allocation10 + $0xe0] sm:$0xff] %v4545_v55  ;;  %4012 = vst [vmem:[#allocation10 + $0xf0] sm:$0xff] %v4609_v37 }
 0x61a   :  { %4011 = vst [vmem:[#allocation10 + $0xe8] sm:$0xff] %v4546_v63  ;;  %4013 = vst [vmem:[#allocation10 + $0xf8] sm:$0xff] %v4610_v2 }
 0x61c   :  { %v3477_v38 = vpop.f32.mrb[144].mxu0  ;;  %v3863_v52 = vpop.f32.mrb[144].mxu1 }
 0x61d   :  { %v4547_v60 = vadd.f32 %v3477_v38, %v6366_v19  ;;  %v4611_v15 = vadd.f32 %v3863_v52, %v6369_v21  ;;  %v3479_v43 = vpop.f32.mrb[145].mxu0  ;;  %v3865_v26 = vpop.f32.mrb[145].mxu1 }
 0x61e   :  { %v4548_v36 = vadd.f32 %v3479_v43, %v6372_v1  ;;  %v4612_v12 = vadd.f32 %v3865_v26, %v6375_v57  ;;  %v3481_v48 = vpop.f32.mrb[146].mxu0  ;;  %v3867_v47 = vpop.f32.mrb[146].mxu1 }
 0x61f   :  { %4014 = vst [vmem:[#allocation10 + $0x100] sm:$0xff] %v4547_v60  ;;  %4016 = vst [vmem:[#allocation10 + $0x110] sm:$0xff] %v4611_v15  ;;  %v4549_v11 = vadd.f32 %v3481_v48, %v6366_v19  ;;  %v4613_v39 = vadd.f32 %v3867_v47, %v6369_v21  ;;  %v3483_v8 = vpop.f32.mrb[147].mxu0  ;;  %v3869_v54 = vpop.f32.mrb[147].mxu1 }
 0x620   :  { %4015 = vst [vmem:[#allocation10 + $0x108] sm:$0xff] %v4548_v36  ;;  %4017 = vst [vmem:[#allocation10 + $0x118] sm:$0xff] %v4612_v12  ;;  %v4550_v25 = vadd.f32 %v3483_v8, %v6372_v1  ;;  %v4614_v53 = vadd.f32 %v3869_v54, %v6375_v57 }
 0x621   :  { %4018 = vst [vmem:[#allocation10 + $0x120] sm:$0xff] %v4549_v11  ;;  %4020 = vst [vmem:[#allocation10 + $0x130] sm:$0xff] %v4613_v39 }
 0x622   :  { %4019 = vst [vmem:[#allocation10 + $0x128] sm:$0xff] %v4550_v25  ;;  %4021 = vst [vmem:[#allocation10 + $0x138] sm:$0xff] %v4614_v53 }
 0x624   :  { %v3487_v32 = vpop.f32.mrb[148].mxu0  ;;  %v3873_v40 = vpop.f32.mrb[148].mxu1 }
 0x625   :  { %v4551_v31 = vadd.f32 %v3487_v32, %v6366_v19  ;;  %v4615_v22 = vadd.f32 %v3873_v40, %v6369_v21  ;;  %v3489_v59 = vpop.f32.mrb[149].mxu0  ;;  %v3875_v10 = vpop.f32.mrb[149].mxu1 }
 0x626   :  { %v4552_v27 = vadd.f32 %v3489_v59, %v6372_v1  ;;  %v4616_v17 = vadd.f32 %v3875_v10, %v6375_v57  ;;  %v3491_v18 = vpop.f32.mrb[150].mxu0  ;;  %v3877_v34 = vpop.f32.mrb[150].mxu1 }
 0x627   :  { %4022 = vst [vmem:[#allocation10 + $0x140] sm:$0xff] %v4551_v31  ;;  %4024 = vst [vmem:[#allocation10 + $0x150] sm:$0xff] %v4615_v22  ;;  %v4553_v35 = vadd.f32 %v3491_v18, %v6366_v19  ;;  %v4617_v42 = vadd.f32 %v3877_v34, %v6369_v21  ;;  %v3493_v24 = vpop.f32.mrb[151].mxu0  ;;  %v3879_v29 = vpop.f32.mrb[151].mxu1 }
 0x628   :  { %4023 = vst [vmem:[#allocation10 + $0x148] sm:$0xff] %v4552_v27  ;;  %4025 = vst [vmem:[#allocation10 + $0x158] sm:$0xff] %v4616_v17  ;;  %v4554_v23 = vadd.f32 %v3493_v24, %v6372_v1  ;;  %v4618_v4 = vadd.f32 %v3879_v29, %v6375_v57 }
 0x629   :  { %4026 = vst [vmem:[#allocation10 + $0x160] sm:$0xff] %v4553_v35  ;;  %4028 = vst [vmem:[#allocation10 + $0x170] sm:$0xff] %v4617_v42 }
 0x62a   :  { %4027 = vst [vmem:[#allocation10 + $0x168] sm:$0xff] %v4554_v23  ;;  %4029 = vst [vmem:[#allocation10 + $0x178] sm:$0xff] %v4618_v4 }
 0x62c   :  { %v3497_v49 = vpop.f32.mrb[152].mxu0  ;;  %v3883_v28 = vpop.f32.mrb[152].mxu1 }
 0x62d   :  { %v4555_v46 = vadd.f32 %v3497_v49, %v6366_v19  ;;  %v4619_v3 = vadd.f32 %v3883_v28, %v6369_v21  ;;  %v3499_v51 = vpop.f32.mrb[153].mxu0  ;;  %v3885_v30 = vpop.f32.mrb[153].mxu1 }
 0x62e   :  { %v4556_v62 = vadd.f32 %v3499_v51, %v6372_v1  ;;  %v4620_v56 = vadd.f32 %v3885_v30, %v6375_v57  ;;  %v3501_v5 = vpop.f32.mrb[154].mxu0  ;;  %v3887_v13 = vpop.f32.mrb[154].mxu1 }
 0x62f   :  { %4030 = vst [vmem:[#allocation10 + $0x180] sm:$0xff] %v4555_v46  ;;  %4032 = vst [vmem:[#allocation10 + $0x190] sm:$0xff] %v4619_v3  ;;  %v4557_v44 = vadd.f32 %v3501_v5, %v6366_v19  ;;  %v4621_v6 = vadd.f32 %v3887_v13, %v6369_v21  ;;  %v3503_v33 = vpop.f32.mrb[155].mxu0  ;;  %v3889_v0 = vpop.f32.mrb[155].mxu1 }
 0x630   :  { %4031 = vst [vmem:[#allocation10 + $0x188] sm:$0xff] %v4556_v62  ;;  %4033 = vst [vmem:[#allocation10 + $0x198] sm:$0xff] %v4620_v56  ;;  %v4558_v41 = vadd.f32 %v3503_v33, %v6372_v1  ;;  %v4622_v14 = vadd.f32 %v3889_v0, %v6375_v57 }
 0x631   :  { %4034 = vst [vmem:[#allocation10 + $0x1a0] sm:$0xff] %v4557_v44  ;;  %4036 = vst [vmem:[#allocation10 + $0x1b0] sm:$0xff] %v4621_v6 }
 0x632   :  { %4035 = vst [vmem:[#allocation10 + $0x1a8] sm:$0xff] %v4558_v41  ;;  %4037 = vst [vmem:[#allocation10 + $0x1b8] sm:$0xff] %v4622_v14 }
 0x634   :  { %v3507_v50 = vpop.f32.mrb[156].mxu0  ;;  %v3893_v7 = vpop.f32.mrb[156].mxu1 }
 0x635   :  { %v4559_v16 = vadd.f32 %v3507_v50, %v6366_v19  ;;  %v4623_v61 = vadd.f32 %v3893_v7, %v6369_v21  ;;  %v3509_v20 = vpop.f32.mrb[157].mxu0  ;;  %v3895_v58 = vpop.f32.mrb[157].mxu1 }
 0x636   :  { %v4560_v55 = vadd.f32 %v3509_v20, %v6372_v1  ;;  %v4624_v37 = vadd.f32 %v3895_v58, %v6375_v57  ;;  %v3511_v45 = vpop.f32.mrb[158].mxu0  ;;  %v3897_v9 = vpop.f32.mrb[158].mxu1 }
 0x637   :  { %4038 = vst [vmem:[#allocation10 + $0x1c0] sm:$0xff] %v4559_v16  ;;  %4040 = vst [vmem:[#allocation10 + $0x1d0] sm:$0xff] %v4623_v61  ;;  %v4561_v63 = vadd.f32 %v3511_v45, %v6366_v19  ;;  %v4625_v2 = vadd.f32 %v3897_v9, %v6369_v21  ;;  %v3513_v38 = vpop.f32.mrb[159].mxu0  ;;  %v3899_v52 = vpop.f32.mrb[159].mxu1 }
 0x638   :  { %4039 = vst [vmem:[#allocation10 + $0x1c8] sm:$0xff] %v4560_v55  ;;  %4041 = vst [vmem:[#allocation10 + $0x1d8] sm:$0xff] %v4624_v37  ;;  %v4562_v60 = vadd.f32 %v3513_v38, %v6372_v1  ;;  %v4626_v15 = vadd.f32 %v3899_v52, %v6375_v57 }
 0x639   :  { %4042 = vst [vmem:[#allocation10 + $0x1e0] sm:$0xff] %v4561_v63  ;;  %4044 = vst [vmem:[#allocation10 + $0x1f0] sm:$0xff] %v4625_v2 }
 0x63a   :  { %4043 = vst [vmem:[#allocation10 + $0x1e8] sm:$0xff] %v4562_v60  ;;  %4045 = vst [vmem:[#allocation10 + $0x1f8] sm:$0xff] %v4626_v15 }
 0x63c   :  { %v3517_v43 = vpop.f32.mrb[160].mxu0  ;;  %v3903_v26 = vpop.f32.mrb[160].mxu1 }
 0x63d   :  { %v4563_v36 = vadd.f32 %v3517_v43, %v6366_v19  ;;  %v4627_v12 = vadd.f32 %v3903_v26, %v6369_v21  ;;  %v3519_v48 = vpop.f32.mrb[161].mxu0  ;;  %v3905_v47 = vpop.f32.mrb[161].mxu1 }
 0x63e   :  { %v4564_v11 = vadd.f32 %v3519_v48, %v6372_v1  ;;  %v4628_v39 = vadd.f32 %v3905_v47, %v6375_v57  ;;  %v3521_v8 = vpop.f32.mrb[162].mxu0  ;;  %v3907_v54 = vpop.f32.mrb[162].mxu1 }
 0x63f   :  { %4046 = vst [vmem:[#allocation10 + $0x200] sm:$0xff] %v4563_v36  ;;  %4048 = vst [vmem:[#allocation10 + $0x210] sm:$0xff] %v4627_v12  ;;  %v4565_v25 = vadd.f32 %v3521_v8, %v6366_v19  ;;  %v4629_v53 = vadd.f32 %v3907_v54, %v6369_v21  ;;  %v3523_v32 = vpop.f32.mrb[163].mxu0  ;;  %v3909_v40 = vpop.f32.mrb[163].mxu1 }
 0x640   :  { %4047 = vst [vmem:[#allocation10 + $0x208] sm:$0xff] %v4564_v11  ;;  %4049 = vst [vmem:[#allocation10 + $0x218] sm:$0xff] %v4628_v39  ;;  %v4566_v31 = vadd.f32 %v3523_v32, %v6372_v1  ;;  %v4630_v22 = vadd.f32 %v3909_v40, %v6375_v57 }
 0x641   :  { %4050 = vst [vmem:[#allocation10 + $0x220] sm:$0xff] %v4565_v25  ;;  %4052 = vst [vmem:[#allocation10 + $0x230] sm:$0xff] %v4629_v53 }
 0x642   :  { %4051 = vst [vmem:[#allocation10 + $0x228] sm:$0xff] %v4566_v31  ;;  %4053 = vst [vmem:[#allocation10 + $0x238] sm:$0xff] %v4630_v22 }
 0x644   :  { %v3527_v59 = vpop.f32.mrb[164].mxu0  ;;  %v3913_v10 = vpop.f32.mrb[164].mxu1 }
 0x645   :  { %v4567_v27 = vadd.f32 %v3527_v59, %v6366_v19  ;;  %v4631_v17 = vadd.f32 %v3913_v10, %v6369_v21  ;;  %v3529_v18 = vpop.f32.mrb[165].mxu0  ;;  %v3915_v34 = vpop.f32.mrb[165].mxu1 }
 0x646   :  { %v4568_v35 = vadd.f32 %v3529_v18, %v6372_v1  ;;  %v4632_v42 = vadd.f32 %v3915_v34, %v6375_v57  ;;  %v3531_v24 = vpop.f32.mrb[166].mxu0  ;;  %v3917_v29 = vpop.f32.mrb[166].mxu1 }
 0x647   :  { %4054 = vst [vmem:[#allocation10 + $0x240] sm:$0xff] %v4567_v27  ;;  %4056 = vst [vmem:[#allocation10 + $0x250] sm:$0xff] %v4631_v17  ;;  %v4569_v23 = vadd.f32 %v3531_v24, %v6366_v19  ;;  %v4633_v4 = vadd.f32 %v3917_v29, %v6369_v21  ;;  %v3533_v49 = vpop.f32.mrb[167].mxu0  ;;  %v3919_v28 = vpop.f32.mrb[167].mxu1 }
 0x648   :  { %4055 = vst [vmem:[#allocation10 + $0x248] sm:$0xff] %v4568_v35  ;;  %4057 = vst [vmem:[#allocation10 + $0x258] sm:$0xff] %v4632_v42  ;;  %v4570_v46 = vadd.f32 %v3533_v49, %v6372_v1  ;;  %v4634_v3 = vadd.f32 %v3919_v28, %v6375_v57 }
 0x649   :  { %4058 = vst [vmem:[#allocation10 + $0x260] sm:$0xff] %v4569_v23  ;;  %4060 = vst [vmem:[#allocation10 + $0x270] sm:$0xff] %v4633_v4 }
 0x64a   :  { %4059 = vst [vmem:[#allocation10 + $0x268] sm:$0xff] %v4570_v46  ;;  %4061 = vst [vmem:[#allocation10 + $0x278] sm:$0xff] %v4634_v3 }
 0x64c   :  { %v3537_v51 = vpop.f32.mrb[168].mxu0  ;;  %v3923_v30 = vpop.f32.mrb[168].mxu1 }
 0x64d   :  { %v4571_v62 = vadd.f32 %v3537_v51, %v6366_v19  ;;  %v4635_v56 = vadd.f32 %v3923_v30, %v6369_v21  ;;  %v3539_v5 = vpop.f32.mrb[169].mxu0  ;;  %v3925_v13 = vpop.f32.mrb[169].mxu1 }
 0x64e   :  { %v4572_v44 = vadd.f32 %v3539_v5, %v6372_v1  ;;  %v4636_v6 = vadd.f32 %v3925_v13, %v6375_v57  ;;  %v3541_v33 = vpop.f32.mrb[170].mxu0  ;;  %v3927_v0 = vpop.f32.mrb[170].mxu1 }
 0x64f   :  { %4062 = vst [vmem:[#allocation10 + $0x280] sm:$0xff] %v4571_v62  ;;  %4064 = vst [vmem:[#allocation10 + $0x290] sm:$0xff] %v4635_v56  ;;  %v4573_v41 = vadd.f32 %v3541_v33, %v6366_v19  ;;  %v4637_v14 = vadd.f32 %v3927_v0, %v6369_v21  ;;  %v3543_v50 = vpop.f32.mrb[171].mxu0  ;;  %v3929_v7 = vpop.f32.mrb[171].mxu1 }
 0x650   :  { %4063 = vst [vmem:[#allocation10 + $0x288] sm:$0xff] %v4572_v44  ;;  %4065 = vst [vmem:[#allocation10 + $0x298] sm:$0xff] %v4636_v6  ;;  %v4574_v16 = vadd.f32 %v3543_v50, %v6372_v1  ;;  %v4638_v61 = vadd.f32 %v3929_v7, %v6375_v57 }
 0x651   :  { %4066 = vst [vmem:[#allocation10 + $0x2a0] sm:$0xff] %v4573_v41  ;;  %4068 = vst [vmem:[#allocation10 + $0x2b0] sm:$0xff] %v4637_v14 }
 0x652   :  { %4067 = vst [vmem:[#allocation10 + $0x2a8] sm:$0xff] %v4574_v16  ;;  %4069 = vst [vmem:[#allocation10 + $0x2b8] sm:$0xff] %v4638_v61 }
 0x654   :  { %v3547_v20 = vpop.f32.mrb[172].mxu0  ;;  %v3933_v58 = vpop.f32.mrb[172].mxu1 }
 0x655   :  { %v4575_v55 = vadd.f32 %v3547_v20, %v6366_v19  ;;  %v4639_v37 = vadd.f32 %v3933_v58, %v6369_v21  ;;  %v3549_v45 = vpop.f32.mrb[173].mxu0  ;;  %v3935_v9 = vpop.f32.mrb[173].mxu1 }
 0x656   :  { %v4576_v63 = vadd.f32 %v3549_v45, %v6372_v1  ;;  %v4640_v2 = vadd.f32 %v3935_v9, %v6375_v57  ;;  %v3551_v38 = vpop.f32.mrb[174].mxu0  ;;  %v3937_v52 = vpop.f32.mrb[174].mxu1 }
 0x657   :  { %4070 = vst [vmem:[#allocation10 + $0x2c0] sm:$0xff] %v4575_v55  ;;  %4072 = vst [vmem:[#allocation10 + $0x2d0] sm:$0xff] %v4639_v37  ;;  %v4577_v60 = vadd.f32 %v3551_v38, %v6366_v19  ;;  %v4641_v15 = vadd.f32 %v3937_v52, %v6369_v21  ;;  %v3553_v43 = vpop.f32.mrb[175].mxu0  ;;  %v3939_v26 = vpop.f32.mrb[175].mxu1 }
 0x658   :  { %4071 = vst [vmem:[#allocation10 + $0x2c8] sm:$0xff] %v4576_v63  ;;  %4073 = vst [vmem:[#allocation10 + $0x2d8] sm:$0xff] %v4640_v2  ;;  %v4578_v36 = vadd.f32 %v3553_v43, %v6372_v1  ;;  %v4642_v12 = vadd.f32 %v3939_v26, %v6375_v57 }
 0x659   :  { %4074 = vst [vmem:[#allocation10 + $0x2e0] sm:$0xff] %v4577_v60  ;;  %4076 = vst [vmem:[#allocation10 + $0x2f0] sm:$0xff] %v4641_v15 }
 0x65a   :  { %4075 = vst [vmem:[#allocation10 + $0x2e8] sm:$0xff] %v4578_v36  ;;  %4077 = vst [vmem:[#allocation10 + $0x2f8] sm:$0xff] %v4642_v12 }
 0x65c   :  { %v3557_v48 = vpop.f32.mrb[176].mxu0  ;;  %v3943_v47 = vpop.f32.mrb[176].mxu1 }
 0x65d   :  { %v4579_v11 = vadd.f32 %v3557_v48, %v6366_v19  ;;  %v4643_v39 = vadd.f32 %v3943_v47, %v6369_v21  ;;  %v3559_v8 = vpop.f32.mrb[177].mxu0  ;;  %v3945_v54 = vpop.f32.mrb[177].mxu1 }
 0x65e   :  { %v4580_v25 = vadd.f32 %v3559_v8, %v6372_v1  ;;  %v4644_v53 = vadd.f32 %v3945_v54, %v6375_v57  ;;  %v3561_v32 = vpop.f32.mrb[178].mxu0  ;;  %v3947_v40 = vpop.f32.mrb[178].mxu1 }
 0x65f   :  { %4078 = vst [vmem:[#allocation10 + $0x300] sm:$0xff] %v4579_v11  ;;  %4080 = vst [vmem:[#allocation10 + $0x310] sm:$0xff] %v4643_v39  ;;  %v4581_v31 = vadd.f32 %v3561_v32, %v6366_v19  ;;  %v4645_v22 = vadd.f32 %v3947_v40, %v6369_v21  ;;  %v3563_v59 = vpop.f32.mrb[179].mxu0  ;;  %v3949_v10 = vpop.f32.mrb[179].mxu1 }
 0x660   :  { %4079 = vst [vmem:[#allocation10 + $0x308] sm:$0xff] %v4580_v25  ;;  %4081 = vst [vmem:[#allocation10 + $0x318] sm:$0xff] %v4644_v53  ;;  %v4582_v27 = vadd.f32 %v3563_v59, %v6372_v1  ;;  %v4646_v17 = vadd.f32 %v3949_v10, %v6375_v57 }
 0x661   :  { %4082 = vst [vmem:[#allocation10 + $0x320] sm:$0xff] %v4581_v31  ;;  %4084 = vst [vmem:[#allocation10 + $0x330] sm:$0xff] %v4645_v22 }
 0x662   :  { %4083 = vst [vmem:[#allocation10 + $0x328] sm:$0xff] %v4582_v27  ;;  %4085 = vst [vmem:[#allocation10 + $0x338] sm:$0xff] %v4646_v17 }
 0x664   :  { %v3567_v18 = vpop.f32.mrb[180].mxu0  ;;  %v3953_v34 = vpop.f32.mrb[180].mxu1 }
 0x665   :  { %v4583_v35 = vadd.f32 %v3567_v18, %v6366_v19  ;;  %v4647_v42 = vadd.f32 %v3953_v34, %v6369_v21  ;;  %v3569_v24 = vpop.f32.mrb[181].mxu0  ;;  %v3955_v29 = vpop.f32.mrb[181].mxu1 }
 0x666   :  { %v4584_v23 = vadd.f32 %v3569_v24, %v6372_v1  ;;  %v4648_v4 = vadd.f32 %v3955_v29, %v6375_v57  ;;  %v3571_v49 = vpop.f32.mrb[182].mxu0  ;;  %v3957_v28 = vpop.f32.mrb[182].mxu1 }
 0x667   :  { %4086 = vst [vmem:[#allocation10 + $0x340] sm:$0xff] %v4583_v35  ;;  %4088 = vst [vmem:[#allocation10 + $0x350] sm:$0xff] %v4647_v42  ;;  %v4585_v46 = vadd.f32 %v3571_v49, %v6366_v19  ;;  %v4649_v3 = vadd.f32 %v3957_v28, %v6369_v21  ;;  %v3573_v51 = vpop.f32.mrb[183].mxu0  ;;  %v3959_v30 = vpop.f32.mrb[183].mxu1 }
 0x668   :  { %4087 = vst [vmem:[#allocation10 + $0x348] sm:$0xff] %v4584_v23  ;;  %4089 = vst [vmem:[#allocation10 + $0x358] sm:$0xff] %v4648_v4  ;;  %v4586_v62 = vadd.f32 %v3573_v51, %v6372_v1  ;;  %v4650_v56 = vadd.f32 %v3959_v30, %v6375_v57 }
 0x669   :  { %4090 = vst [vmem:[#allocation10 + $0x360] sm:$0xff] %v4585_v46  ;;  %4092 = vst [vmem:[#allocation10 + $0x370] sm:$0xff] %v4649_v3 }
 0x66a   :  { %4091 = vst [vmem:[#allocation10 + $0x368] sm:$0xff] %v4586_v62  ;;  %4093 = vst [vmem:[#allocation10 + $0x378] sm:$0xff] %v4650_v56 }
 0x66c   :  { %v3577_v5 = vpop.f32.mrb[184].mxu0  ;;  %v3963_v13 = vpop.f32.mrb[184].mxu1 }
 0x66d   :  { %v4587_v44 = vadd.f32 %v3577_v5, %v6366_v19  ;;  %v4651_v6 = vadd.f32 %v3963_v13, %v6369_v21  ;;  %v3579_v33 = vpop.f32.mrb[185].mxu0  ;;  %v3965_v0 = vpop.f32.mrb[185].mxu1 }
 0x66e   :  { %v4588_v41 = vadd.f32 %v3579_v33, %v6372_v1  ;;  %v4652_v14 = vadd.f32 %v3965_v0, %v6375_v57  ;;  %v3581_v50 = vpop.f32.mrb[186].mxu0  ;;  %v3967_v7 = vpop.f32.mrb[186].mxu1 }
 0x66f   :  { %4094 = vst [vmem:[#allocation10 + $0x380] sm:$0xff] %v4587_v44  ;;  %4096 = vst [vmem:[#allocation10 + $0x390] sm:$0xff] %v4651_v6  ;;  %v4589_v16 = vadd.f32 %v3581_v50, %v6366_v19  ;;  %v4653_v61 = vadd.f32 %v3967_v7, %v6369_v21  ;;  %v3583_v20 = vpop.f32.mrb[187].mxu0  ;;  %v3969_v58 = vpop.f32.mrb[187].mxu1 }
 0x670   :  { %4095 = vst [vmem:[#allocation10 + $0x388] sm:$0xff] %v4588_v41  ;;  %4097 = vst [vmem:[#allocation10 + $0x398] sm:$0xff] %v4652_v14  ;;  %v4590_v55 = vadd.f32 %v3583_v20, %v6372_v1  ;;  %v4654_v37 = vadd.f32 %v3969_v58, %v6375_v57 }
 0x671   :  { %4098 = vst [vmem:[#allocation10 + $0x3a0] sm:$0xff] %v4589_v16  ;;  %4100 = vst [vmem:[#allocation10 + $0x3b0] sm:$0xff] %v4653_v61 }
 0x672   :  { %4099 = vst [vmem:[#allocation10 + $0x3a8] sm:$0xff] %v4590_v55  ;;  %4101 = vst [vmem:[#allocation10 + $0x3b8] sm:$0xff] %v4654_v37 }
 0x674   :  { %v3587_v45 = vpop.f32.mrb[188].mxu0  ;;  %v3973_v9 = vpop.f32.mrb[188].mxu1 }
 0x675   :  { %v4591_v63 = vadd.f32 %v3587_v45, %v6366_v19  ;;  %v4655_v2 = vadd.f32 %v3973_v9, %v6369_v21  ;;  %v3589_v38 = vpop.f32.mrb[189].mxu0  ;;  %v3975_v52 = vpop.f32.mrb[189].mxu1 }
 0x676   :  { %v4592_v60 = vadd.f32 %v3589_v38, %v6372_v1  ;;  %v4656_v15 = vadd.f32 %v3975_v52, %v6375_v57  ;;  %v3591_v43 = vpop.f32.mrb[190].mxu0  ;;  %v3977_v26 = vpop.f32.mrb[190].mxu1 }
 0x677   :  { %4102 = vst [vmem:[#allocation10 + $0x3c0] sm:$0xff] %v4591_v63  ;;  %4104 = vst [vmem:[#allocation10 + $0x3d0] sm:$0xff] %v4655_v2  ;;  %v4593_v36 = vadd.f32 %v3591_v43, %v6366_v19  ;;  %v4657_v12 = vadd.f32 %v3977_v26, %v6369_v21  ;;  %v3593_v48 = vpop.f32.mrb[191].mxu0  ;;  %v3979_v47 = vpop.f32.mrb[191].mxu1 }
 0x678   :  { %4103 = vst [vmem:[#allocation10 + $0x3c8] sm:$0xff] %v4592_v60  ;;  %4105 = vst [vmem:[#allocation10 + $0x3d8] sm:$0xff] %v4656_v15  ;;  %v4594_v11 = vadd.f32 %v3593_v48, %v6372_v1  ;;  %v4658_v39 = vadd.f32 %v3979_v47, %v6375_v57 }
 0x679   :  { %4106 = vst [vmem:[#allocation10 + $0x3e0] sm:$0xff] %v4593_v36  ;;  %4108 = vst [vmem:[#allocation10 + $0x3f0] sm:$0xff] %v4657_v12 }
 0x67a   :  { %4107 = vst [vmem:[#allocation10 + $0x3e8] sm:$0xff] %v4594_v11  ;;  %4109 = vst [vmem:[#allocation10 + $0x3f8] sm:$0xff] %v4658_v39 }
 0x67b   :  { %5308 = shalt.err (!%p5305_p6)
}
 0x67c   :  { %s5309_s30 = scalar_lea.hbm %s6527_s7, 16384 }
 0x67d   :  { %p5310_p7 = scmp.ne.s32.totalorder %s6527_s7, %s5309_s30  ;;  %p5313_p8 = scmp.lt.u32.totalorder %s5309_s30, %s6527_s7 }
 0x67f   :  { %p5315_p9 = pnand %p5313_p8, %p5310_p7 }
 0x681   :  { %5318 = shalt.err (!%p5315_p9)
}
 0x682   :  { %4121 = dma.vmem_to_hbm [thread:$0]  %s4116_s26, 16384, %s6527_s7, [#allocation7], %s5330_s11, %s5330_s11, %s5331_s12  }
 0x683   :  { %5327 = dma.done.wait [#allocation7], 16384  }
 0x684   :  { %5328 = vsyncadd [#allocation7], 4294950912 }
 0x685   :  { %4125 = vsyncpa [#allocation6], 1 }
 0x686   :  { %4126 = vsyncpa [#allocation9], 1 }
 0x687   :  { %4127 = vsyncpa [#allocation7], 1 }
 0x688   :  { %4128 = vsyncmov [#allocation4] }
 0x68b   :  { %s4129_s15 = vpop.sfrf %4128 }
 0x68c   :  { %p4273_p10 = scmp.ne.s32.totalorder %s4129_s15, 0 }
 0x68e   :  { %4133 = shalt.err (%p4273_p10)  }
 0x68f   :  { %4135 = vsyncmov [#allocation4 + $0x1] }
 0x692   :  { %s4136_s16 = vpop.sfrf %4135 }
 0x693   :  { %p4274_p11 = scmp.ne.s32.totalorder %s4136_s16, 0 }
 0x695   :  { %4140 = shalt.err (%p4274_p11)  }

</bundles_post_ra>
